<compile_context>
chip_gen: v6e
topology: v6e:2x2x1
jax: 0.10.0
libtpu: 0.0.40
codegen_flags: <defaults>
</compile_context>

<pallas_src>
import functools

import jax
import jax.numpy as jnp
from jax import lax
from jax.experimental import pallas as pl
from jax.experimental.pallas import tpu as pltpu

HIDDEN = 128            # self.hidden_dim (== packed per-layer hidden width)
H_DIR = HIDDEN // 2     # per-direction LSTM hidden size (64)
GATES = 4 * HIDDEN      # packed gate width (512)


# ----------------------------------------------------------------------------
# Fused Pallas kernel: fc_in -> biLSTM1 -> biLSTM2 -> fc_out
# ----------------------------------------------------------------------------
def _tec_lstm_kernel(x_ref, fc_in_w_ref, fc_in_b_ref,
                     w_ih1_ref, w_hh1_ref, b1_ref,
                     w_ih2_ref, w_hh2_ref, b2_ref,
                     fc_out_w_ref, fc_out_b_ref,
                     y_ref, *, T, B):
    H, G = HIDDEN, GATES
    f32 = jnp.float32

    # Lane masks selecting the forward-direction half of the packed layouts.
    fwd_g = (lax.broadcasted_iota(jnp.int32, (B, G), 1) % H) < H_DIR   # (B, 512)
    fwd_h = lax.broadcasted_iota(jnp.int32, (B, H), 1) < H_DIR         # (B, 128)

    def cell(gx, h, c, w_hh_ref):
        """One packed bi-directional LSTM step (PyTorch gate order i,f,g,o)."""
        g = gx + jnp.dot(h, w_hh_ref[...], preferred_element_type=f32)
        i = jax.nn.sigmoid(g[:, 0 * H:1 * H])      # [i_f | i_b]
        f = jax.nn.sigmoid(g[:, 1 * H:2 * H])      # [f_f | f_b]
        gg = jnp.tanh(g[:, 2 * H:3 * H])           # [g_f | g_b]
        o = jax.nn.sigmoid(g[:, 3 * H:4 * H])      # [o_f | o_b]
        c_new = f * c + i * gg
        h_new = o * jnp.tanh(c_new)
        return h_new, c_new

    def run_layer(gx, w_hh_ref, h, c):
        """Fully unrolled packed recurrence.

        gx[t] is the (B, 512) x-projection of the layer input at *time* t.
        Step s consumes time s on the fwd lanes and time T-1-s on the bwd
        lanes; outs[s] = [h_fwd(time s) | h_bwd(time T-1-s)].
        """
        outs = []
        for s in range(T):
            gx_s = jnp.where(fwd_g, gx[s], gx[T - 1 - s])
            h, c = cell(gx_s, h, c, w_hh_ref)
            outs.append(h)
        return outs, h, c

    def time_major(outs):
        """Bidirectional output at each time t: [h_fwd(t) | h_bwd(t)]."""
        return [jnp.where(fwd_h, outs[t], outs[T - 1 - t]) for t in range(T)]

    # ---- fc_input + ReLU and layer-1 input projection (dropout == identity) --
    g1 = []
    for t in range(T):
        x_t = x_ref[t]                                                   # (B, in_dim)
        x1_t = jnp.maximum(
            jnp.dot(x_t, fc_in_w_ref[...], preferred_element_type=f32)
            + fc_in_b_ref[...], 0.0)                                     # (B, 128)
        g1.append(jnp.dot(x1_t, w_ih1_ref[...], preferred_element_type=f32)
                  + b1_ref[...])                                         # (B, 512)

    # ---- lstm1: packed bidirectional recurrence, zero initial state ---------
    h = jnp.zeros((B, H), f32)
    c = jnp.zeros((B, H), f32)
    outs1, h, c = run_layer(g1, w_hh1_ref, h, c)

    # ---- lstm2: seeded with (hn1, cn1) == packed final (h, c) of lstm1 ------
    # ReLU applies to lstm1's *output* sequence only, not the carried state.
    g2 = []
    for o1_t in time_major(outs1):
        x2_t = jnp.maximum(o1_t, 0.0)                                    # (B, 128)
        g2.append(jnp.dot(x2_t, w_ih2_ref[...], preferred_element_type=f32)
                  + b2_ref[...])                                         # (B, 512)
    outs2, _, _ = run_layer(g2, w_hh2_ref, h, c)

    # ---- ReLU + fc_output, written time-major -------------------------------
    for t, o2_t in enumerate(time_major(outs2)):
        x3_t = jnp.maximum(o2_t, 0.0)
        y_t = (jnp.dot(x3_t, fc_out_w_ref[...], preferred_element_type=f32)
               + fc_out_b_ref[...])
        y_ref[t] = y_t.astype(y_ref.dtype)


# ----------------------------------------------------------------------------
# Wrapper: one pallas_call for the full forward pass
# ----------------------------------------------------------------------------
def tec_lstm_forward(tec, packed):
    """tec: (B, T, in_dim), batch_first like the PyTorch module."""
    B, T, in_dim = tec.shape
    out_dim = packed['fc_out_w'].shape[1]
    x_tm = jnp.transpose(tec, (1, 0, 2))                  # (T, B, in_dim)

    def full(shape):
        return pl.BlockSpec(shape, lambda: (0,) * len(shape))

    y_tm = pl.pallas_call(
        functools.partial(_tec_lstm_kernel, T=T, B=B),
        out_shape=jax.ShapeDtypeStruct((T, B, out_dim), jnp.float32),
        in_specs=[
            full((T, B, in_dim)),
            full((in_dim, HIDDEN)), full((1, HIDDEN)),
            full((HIDDEN, GATES)), full((HIDDEN, GATES)), full((1, GATES)),
            full((HIDDEN, GATES)), full((HIDDEN, GATES)), full((1, GATES)),
            full((HIDDEN, out_dim)), full((1, out_dim)),
        ],
        out_specs=full((T, B, out_dim)),
        compiler_params=pltpu.CompilerParams(vmem_limit_bytes=32 * 1024 * 1024),
    )(x_tm,
      packed['fc_in_w'], packed['fc_in_b'],
      packed['w_ih1'], packed['w_hh1'], packed['b1'],
      packed['w_ih2'], packed['w_hh2'], packed['b2'],
      packed['fc_out_w'], packed['fc_out_b'])
    return jnp.transpose(y_tm, (1, 0, 2))                 # (B, T, out_dim)


# ----------------------------------------------------------------------------
# Parameter handling: raw per-direction params -> lane-packed kernel params
# ----------------------------------------------------------------------------
def _interleave_gates(a_fwd, a_bwd):
    """Interleave the [i,f,g,o] gate blocks (each H_DIR wide) of two directions
    along the last axis into [i_f,i_b, f_f,f_b, g_f,g_b, o_f,o_b]."""
    parts = []
    for g in range(4):
        parts.append(a_fwd[..., g * H_DIR:(g + 1) * H_DIR])
        parts.append(a_bwd[..., g * H_DIR:(g + 1) * H_DIR])
    return jnp.concatenate(parts, axis=-1)


def pack_params(raw):
    def pack_lstm(p):
        w_ih = _interleave_gates(p['w_ih_f'], p['w_ih_b'])               # (128, 512)
        z = jnp.zeros_like(p['w_hh_f'])                                  # (64, 256)
        w_hh = jnp.concatenate(
            [_interleave_gates(p['w_hh_f'], z),                          # rows fed by h_fwd
             _interleave_gates(z, p['w_hh_b'])], axis=0)                 # rows fed by h_bwd
        b = _interleave_gates(p['b_f'], p['b_b']).reshape(1, GATES)      # (1, 512)
        return w_ih, w_hh, b

    w_ih1, w_hh1, b1 = pack_lstm(raw['lstm1'])
    w_ih2, w_hh2, b2 = pack_lstm(raw['lstm2'])
    return {
        'fc_in_w': raw['fc_in_w'],
        'fc_in_b': raw['fc_in_b'].reshape(1, HIDDEN),
        'fc_out_w': raw['fc_out_w'],
        'fc_out_b': raw['fc_out_b'].reshape(1, -1),
        'w_ih1': w_ih1, 'w_hh1': w_hh1, 'b1': b1,
        'w_ih2': w_ih2, 'w_hh2': w_hh2, 'b2': b2,
    }


def init_params(key, in_dim, out_dim):
    """Raw per-direction parameters (PyTorch shapes, stored transposed for x@W,
    gate column order i,f,g,o, the two LSTM biases pre-summed)."""
    keys = jax.random.split(key, 16)

    def u(k, shape, scale):
        return jax.random.uniform(k, shape, jnp.float32, -scale, scale)

    s_in = 1.0 / (in_dim ** 0.5)
    s_hid = 1.0 / (HIDDEN ** 0.5)
    s_h = 1.0 / (H_DIR ** 0.5)

    def lstm_p(ks):
        return {
            'w_ih_f': u(ks[0], (HIDDEN, 4 * H_DIR), s_h),
            'w_hh_f': u(ks[1], (H_DIR, 4 * H_DIR), s_h),
            'b_f':    u(ks[2], (4 * H_DIR,), s_h),
            'w_ih_b': u(ks[3], (HIDDEN, 4 * H_DIR), s_h),
            'w_hh_b': u(ks[4], (H_DIR, 4 * H_DIR), s_h),
            'b_b':    u(ks[5], (4 * H_DIR,), s_h),
        }

    return {
        'fc_in_w': u(keys[0], (in_dim, HIDDEN), s_in),
        'fc_in_b': u(keys[1], (HIDDEN,), s_in),
        'fc_out_w': u(keys[2], (HIDDEN, out_dim), s_hid),
        'fc_out_b': u(keys[3], (out_dim,), s_hid),
        'lstm1': lstm_p(keys[4:10]),
        'lstm2': lstm_p(keys[10:16]),
    }


# ----------------------------------------------------------------------------
# Plain-JAX (non-Pallas) reference of the PyTorch forward, for validation
# ----------------------------------------------------------------------------
def _lstm_dir_ref(xs, w_ih, w_hh, b, h, c):
    P = lax.Precision.HIGHEST
    Hd = w_hh.shape[0]
    outs = []
    for t in range(xs.shape[0]):
        g = jnp.dot(xs[t], w_ih, precision=P) + b + jnp.dot(h, w_hh, precision=P)
        i = jax.nn.sigmoid(g[:, 0 * Hd:1 * Hd])
        f = jax.nn.sigmoid(g[:, 1 * Hd:2 * Hd])
        gg = jnp.tanh(g[:, 2 * Hd:3 * Hd])
        o = jax.nn.sigmoid(g[:, 3 * Hd:4 * Hd])
        c = f * c + i * gg
        h = o * jnp.tanh(c)
        outs.append(h)
    return jnp.stack(outs, 0), h, c


def _bilstm_ref(x_btd, p, h0, c0):
    xt = jnp.transpose(x_btd, (1, 0, 2))
    of, hf, cf = _lstm_dir_ref(xt, p['w_ih_f'], p['w_hh_f'], p['b_f'], h0[0], c0[0])
    ob, hb, cb = _lstm_dir_ref(xt[::-1], p['w_ih_b'], p['w_hh_b'], p['b_b'], h0[1], c0[1])
    out = jnp.concatenate([of, ob[::-1]], axis=-1)
    return (jnp.transpose(out, (1, 0, 2)),
            jnp.stack([hf, hb], 0), jnp.stack([cf, cb], 0))


def reference_forward(tec, raw):
    P = lax.Precision.HIGHEST
    B = tec.shape[0]
    x = jax.nn.relu(jnp.dot(tec, raw['fc_in_w'], precision=P) + raw['fc_in_b'])
    h0 = jnp.zeros((2, B, H_DIR), jnp.float32)
    c0 = jnp.zeros((2, B, H_DIR), jnp.float32)
    o1, hn, cn = _bilstm_ref(x, raw['lstm1'], h0, c0)
    o2, _, _ = _bilstm_ref(jax.nn.relu(o1), raw['lstm2'], hn, cn)
    return jnp.dot(jax.nn.relu(o2), raw['fc_out_w'], precision=P) + raw['fc_out_b']


# ----------------------------------------------------------------------------
if __name__ == "__main__":
    B, T, IN_DIM, OUT_DIM = 2, 8, 4, 2
    key = jax.random.PRNGKey(0)
    kx, kp = jax.random.split(key)
    tec = jax.random.normal(kx, (B, T, IN_DIM), dtype=jnp.float32)
    raw = init_params(kp, IN_DIM, OUT_DIM)
    packed = pack_params(raw)

    fwd = jax.jit(tec_lstm_forward)
    out = fwd(tec, packed)
    jax.block_until_ready(out)

    assert out.shape == (B, T, OUT_DIM), out.shape
    assert bool(jnp.all(jnp.isfinite(out)))

    # Validate the fused lane-packed kernel against the plain-JAX reference.
    ref = reference_forward(tec, raw)
    max_err = float(jnp.max(jnp.abs(out - ref)))
    assert max_err < 1e-2, f"max abs error vs reference: {max_err}"

    print("KERNEL_OK")
</pallas_src>

<mosaic_0001>
module attributes {stable_mosaic.version = 11 : i64} {
  func.func @_tec_lstm_kernel(%arg0: memref<8x2x4xf32, #tpu.memory_space<vmem>>, %arg1: memref<4x128xf32, #tpu.memory_space<vmem>>, %arg2: memref<1x128xf32, #tpu.memory_space<vmem>>, %arg3: memref<128x512xf32, #tpu.memory_space<vmem>>, %arg4: memref<128x512xf32, #tpu.memory_space<vmem>>, %arg5: memref<1x512xf32, #tpu.memory_space<vmem>>, %arg6: memref<128x512xf32, #tpu.memory_space<vmem>>, %arg7: memref<128x512xf32, #tpu.memory_space<vmem>>, %arg8: memref<1x512xf32, #tpu.memory_space<vmem>>, %arg9: memref<128x2xf32, #tpu.memory_space<vmem>>, %arg10: memref<1x2xf32, #tpu.memory_space<vmem>>, %arg11: memref<8x2x2xf32, #tpu.memory_space<vmem>>) attributes {dimension_semantics = [], scalar_prefetch = 0 : i64, scratch_operands = 0 : i64, tpu.core_type = #tpu.core_type<tc>} {
    %0 = tpu.iota {dimensions = array<i32: 1>} : vector<2x512xi32>
    %c128_i32 = arith.constant 128 : i32
    %c0_i32 = arith.constant 0 : i32
    %1 = arith.cmpi eq, %c128_i32, %c0_i32 : i32
    %c1_i32 = arith.constant 1 : i32
    %2 = arith.select %1, %c1_i32, %c128_i32 : i32
    %3 = vector.broadcast %2 : i32 to vector<2x512xi32>
    %4 = arith.remsi %0, %3 : vector<2x512xi32>
    %c0_i32_0 = arith.constant 0 : i32
    %5 = vector.broadcast %c0_i32_0 : i32 to vector<2x512xi32>
    %6 = arith.cmpi ne, %4, %5 : vector<2x512xi32>
    %c0_i32_1 = arith.constant 0 : i32
    %7 = vector.broadcast %c0_i32_1 : i32 to vector<2x512xi32>
    %8 = arith.cmpi slt, %4, %7 : vector<2x512xi32>
    %c0_i32_2 = arith.constant 0 : i32
    %9 = arith.cmpi slt, %2, %c0_i32_2 : i32
    %10 = vector.broadcast %9 : i1 to vector<2x512xi1>
    %11 = vector.broadcast %10 : vector<2x512xi1> to vector<2x512xi1>
    %12 = arith.xori %8, %11 : vector<2x512xi1>
    %13 = arith.andi %12, %6 : vector<2x512xi1>
    %14 = vector.broadcast %2 : i32 to vector<2x512xi32>
    %15 = arith.addi %4, %14 : vector<2x512xi32>
    %16 = arith.select %13, %15, %4 : vector<2x512xi1>, vector<2x512xi32>
    %c64_i32 = arith.constant 64 : i32
    %17 = vector.broadcast %c64_i32 : i32 to vector<2x512xi32>
    %18 = arith.cmpi slt, %16, %17 : vector<2x512xi32>
    %19 = tpu.iota {dimensions = array<i32: 1>} : vector<2x128xi32>
    %c64_i32_3 = arith.constant 64 : i32
    %20 = vector.broadcast %c64_i32_3 : i32 to vector<2x128xi32>
    %21 = arith.cmpi slt, %19, %20 : vector<2x128xi32>
    %c0 = arith.constant 0 : index
    %c0_4 = arith.constant 0 : index
    %c0_5 = arith.constant 0 : index
    %22 = vector.load %arg0[%c0, %c0_4, %c0_5] : memref<8x2x4xf32, #tpu.memory_space<vmem>>, vector<1x2x4xf32>
    %23 = vector.shape_cast %22 : vector<1x2x4xf32> to vector<2x4xf32>
    %c0_6 = arith.constant 0 : index
    %c0_7 = arith.constant 0 : index
    %24 = vector.load %arg1[%c0_6, %c0_7] : memref<4x128xf32, #tpu.memory_space<vmem>>, vector<4x128xf32>
    %cst = arith.constant dense<0.000000e+00> : vector<2x128xf32>
    %25 = tpu.matmul %23, %24, %cst {dimension_numbers = #tpu.dot_dimension_numbers<[1], [0], [0], [1], [0, 0, 1, 1], [], []>} : vector<2x4xf32>, vector<4x128xf32>, vector<2x128xf32> -> vector<2x128xf32>
    %c0_8 = arith.constant 0 : index
    %c0_9 = arith.constant 0 : index
    %26 = vector.load %arg2[%c0_8, %c0_9] : memref<1x128xf32, #tpu.memory_space<vmem>>, vector<1x128xf32>
    %27 = vector.broadcast %26 : vector<1x128xf32> to vector<2x128xf32>
    %28 = arith.addf %25, %27 : vector<2x128xf32>
    %cst_10 = arith.constant 0.000000e+00 : f32
    %29 = vector.broadcast %cst_10 : f32 to vector<2x128xf32>
    %30 = arith.maximumf %28, %29 : vector<2x128xf32>
    %c0_11 = arith.constant 0 : index
    %c0_12 = arith.constant 0 : index
    %31 = vector.load %arg3[%c0_11, %c0_12] : memref<128x512xf32, #tpu.memory_space<vmem>>, vector<128x512xf32>
    %cst_13 = arith.constant dense<0.000000e+00> : vector<2x512xf32>
    %32 = tpu.matmul %30, %31, %cst_13 {dimension_numbers = #tpu.dot_dimension_numbers<[1], [0], [0], [1], [0, 0, 1, 1], [], []>} : vector<2x128xf32>, vector<128x512xf32>, vector<2x512xf32> -> vector<2x512xf32>
    %c0_14 = arith.constant 0 : index
    %c0_15 = arith.constant 0 : index
    %33 = vector.load %arg5[%c0_14, %c0_15] : memref<1x512xf32, #tpu.memory_space<vmem>>, vector<1x512xf32>
    %34 = vector.broadcast %33 : vector<1x512xf32> to vector<2x512xf32>
    %35 = arith.addf %32, %34 : vector<2x512xf32>
    %c1 = arith.constant 1 : index
    %c0_16 = arith.constant 0 : index
    %c0_17 = arith.constant 0 : index
    %36 = vector.load %arg0[%c1, %c0_16, %c0_17] : memref<8x2x4xf32, #tpu.memory_space<vmem>>, vector<1x2x4xf32>
    %37 = vector.shape_cast %36 : vector<1x2x4xf32> to vector<2x4xf32>
    %c0_18 = arith.constant 0 : index
    %c0_19 = arith.constant 0 : index
    %38 = vector.load %arg1[%c0_18, %c0_19] : memref<4x128xf32, #tpu.memory_space<vmem>>, vector<4x128xf32>
    %cst_20 = arith.constant dense<0.000000e+00> : vector<2x128xf32>
    %39 = tpu.matmul %37, %38, %cst_20 {dimension_numbers = #tpu.dot_dimension_numbers<[1], [0], [0], [1], [0, 0, 1, 1], [], []>} : vector<2x4xf32>, vector<4x128xf32>, vector<2x128xf32> -> vector<2x128xf32>
    %c0_21 = arith.constant 0 : index
    %c0_22 = arith.constant 0 : index
    %40 = vector.load %arg2[%c0_21, %c0_22] : memref<1x128xf32, #tpu.memory_space<vmem>>, vector<1x128xf32>
    %41 = vector.broadcast %40 : vector<1x128xf32> to vector<2x128xf32>
    %42 = arith.addf %39, %41 : vector<2x128xf32>
    %cst_23 = arith.constant 0.000000e+00 : f32
    %43 = vector.broadcast %cst_23 : f32 to vector<2x128xf32>
    %44 = arith.maximumf %42, %43 : vector<2x128xf32>
    %c0_24 = arith.constant 0 : index
    %c0_25 = arith.constant 0 : index
    %45 = vector.load %arg3[%c0_24, %c0_25] : memref<128x512xf32, #tpu.memory_space<vmem>>, vector<128x512xf32>
    %cst_26 = arith.constant dense<0.000000e+00> : vector<2x512xf32>
    %46 = tpu.matmul %44, %45, %cst_26 {dimension_numbers = #tpu.dot_dimension_numbers<[1], [0], [0], [1], [0, 0, 1, 1], [], []>} : vector<2x128xf32>, vector<128x512xf32>, vector<2x512xf32> -> vector<2x512xf32>
    %c0_27 = arith.constant 0 : index
    %c0_28 = arith.constant 0 : index
    %47 = vector.load %arg5[%c0_27, %c0_28] : memref<1x512xf32, #tpu.memory_space<vmem>>, vector<1x512xf32>
    %48 = vector.broadcast %47 : vector<1x512xf32> to vector<2x512xf32>
    %49 = arith.addf %46, %48 : vector<2x512xf32>
    %c2 = arith.constant 2 : index
    %c0_29 = arith.constant 0 : index
    %c0_30 = arith.constant 0 : index
    %50 = vector.load %arg0[%c2, %c0_29, %c0_30] : memref<8x2x4xf32, #tpu.memory_space<vmem>>, vector<1x2x4xf32>
    %51 = vector.shape_cast %50 : vector<1x2x4xf32> to vector<2x4xf32>
    %c0_31 = arith.constant 0 : index
    %c0_32 = arith.constant 0 : index
    %52 = vector.load %arg1[%c0_31, %c0_32] : memref<4x128xf32, #tpu.memory_space<vmem>>, vector<4x128xf32>
    %cst_33 = arith.constant dense<0.000000e+00> : vector<2x128xf32>
    %53 = tpu.matmul %51, %52, %cst_33 {dimension_numbers = #tpu.dot_dimension_numbers<[1], [0], [0], [1], [0, 0, 1, 1], [], []>} : vector<2x4xf32>, vector<4x128xf32>, vector<2x128xf32> -> vector<2x128xf32>
    %c0_34 = arith.constant 0 : index
    %c0_35 = arith.constant 0 : index
    %54 = vector.load %arg2[%c0_34, %c0_35] : memref<1x128xf32, #tpu.memory_space<vmem>>, vector<1x128xf32>
    %55 = vector.broadcast %54 : vector<1x128xf32> to vector<2x128xf32>
    %56 = arith.addf %53, %55 : vector<2x128xf32>
    %cst_36 = arith.constant 0.000000e+00 : f32
    %57 = vector.broadcast %cst_36 : f32 to vector<2x128xf32>
    %58 = arith.maximumf %56, %57 : vector<2x128xf32>
    %c0_37 = arith.constant 0 : index
    %c0_38 = arith.constant 0 : index
    %59 = vector.load %arg3[%c0_37, %c0_38] : memref<128x512xf32, #tpu.memory_space<vmem>>, vector<128x512xf32>
    %cst_39 = arith.constant dense<0.000000e+00> : vector<2x512xf32>
    %60 = tpu.matmul %58, %59, %cst_39 {dimension_numbers = #tpu.dot_dimension_numbers<[1], [0], [0], [1], [0, 0, 1, 1], [], []>} : vector<2x128xf32>, vector<128x512xf32>, vector<2x512xf32> -> vector<2x512xf32>
    %c0_40 = arith.constant 0 : index
    %c0_41 = arith.constant 0 : index
    %61 = vector.load %arg5[%c0_40, %c0_41] : memref<1x512xf32, #tpu.memory_space<vmem>>, vector<1x512xf32>
    %62 = vector.broadcast %61 : vector<1x512xf32> to vector<2x512xf32>
    %63 = arith.addf %60, %62 : vector<2x512xf32>
    %c3 = arith.constant 3 : index
    %c0_42 = arith.constant 0 : index
    %c0_43 = arith.constant 0 : index
    %64 = vector.load %arg0[%c3, %c0_42, %c0_43] : memref<8x2x4xf32, #tpu.memory_space<vmem>>, vector<1x2x4xf32>
    %65 = vector.shape_cast %64 : vector<1x2x4xf32> to vector<2x4xf32>
    %c0_44 = arith.constant 0 : index
    %c0_45 = arith.constant 0 : index
    %66 = vector.load %arg1[%c0_44, %c0_45] : memref<4x128xf32, #tpu.memory_space<vmem>>, vector<4x128xf32>
    %cst_46 = arith.constant dense<0.000000e+00> : vector<2x128xf32>
    %67 = tpu.matmul %65, %66, %cst_46 {dimension_numbers = #tpu.dot_dimension_numbers<[1], [0], [0], [1], [0, 0, 1, 1], [], []>} : vector<2x4xf32>, vector<4x128xf32>, vector<2x128xf32> -> vector<2x128xf32>
    %c0_47 = arith.constant 0 : index
    %c0_48 = arith.constant 0 : index
    %68 = vector.load %arg2[%c0_47, %c0_48] : memref<1x128xf32, #tpu.memory_space<vmem>>, vector<1x128xf32>
    %69 = vector.broadcast %68 : vector<1x128xf32> to vector<2x128xf32>
    %70 = arith.addf %67, %69 : vector<2x128xf32>
    %cst_49 = arith.constant 0.000000e+00 : f32
    %71 = vector.broadcast %cst_49 : f32 to vector<2x128xf32>
    %72 = arith.maximumf %70, %71 : vector<2x128xf32>
    %c0_50 = arith.constant 0 : index
    %c0_51 = arith.constant 0 : index
    %73 = vector.load %arg3[%c0_50, %c0_51] : memref<128x512xf32, #tpu.memory_space<vmem>>, vector<128x512xf32>
    %cst_52 = arith.constant dense<0.000000e+00> : vector<2x512xf32>
    %74 = tpu.matmul %72, %73, %cst_52 {dimension_numbers = #tpu.dot_dimension_numbers<[1], [0], [0], [1], [0, 0, 1, 1], [], []>} : vector<2x128xf32>, vector<128x512xf32>, vector<2x512xf32> -> vector<2x512xf32>
    %c0_53 = arith.constant 0 : index
    %c0_54 = arith.constant 0 : index
    %75 = vector.load %arg5[%c0_53, %c0_54] : memref<1x512xf32, #tpu.memory_space<vmem>>, vector<1x512xf32>
    %76 = vector.broadcast %75 : vector<1x512xf32> to vector<2x512xf32>
    %77 = arith.addf %74, %76 : vector<2x512xf32>
    %c4 = arith.constant 4 : index
    %c0_55 = arith.constant 0 : index
    %c0_56 = arith.constant 0 : index
    %78 = vector.load %arg0[%c4, %c0_55, %c0_56] : memref<8x2x4xf32, #tpu.memory_space<vmem>>, vector<1x2x4xf32>
    %79 = vector.shape_cast %78 : vector<1x2x4xf32> to vector<2x4xf32>
    %c0_57 = arith.constant 0 : index
    %c0_58 = arith.constant 0 : index
    %80 = vector.load %arg1[%c0_57, %c0_58] : memref<4x128xf32, #tpu.memory_space<vmem>>, vector<4x128xf32>
    %cst_59 = arith.constant dense<0.000000e+00> : vector<2x128xf32>
    %81 = tpu.matmul %79, %80, %cst_59 {dimension_numbers = #tpu.dot_dimension_numbers<[1], [0], [0], [1], [0, 0, 1, 1], [], []>} : vector<2x4xf32>, vector<4x128xf32>, vector<2x128xf32> -> vector<2x128xf32>
    %c0_60 = arith.constant 0 : index
    %c0_61 = arith.constant 0 : index
    %82 = vector.load %arg2[%c0_60, %c0_61] : memref<1x128xf32, #tpu.memory_space<vmem>>, vector<1x128xf32>
    %83 = vector.broadcast %82 : vector<1x128xf32> to vector<2x128xf32>
    %84 = arith.addf %81, %83 : vector<2x128xf32>
    %cst_62 = arith.constant 0.000000e+00 : f32
    %85 = vector.broadcast %cst_62 : f32 to vector<2x128xf32>
    %86 = arith.maximumf %84, %85 : vector<2x128xf32>
    %c0_63 = arith.constant 0 : index
    %c0_64 = arith.constant 0 : index
    %87 = vector.load %arg3[%c0_63, %c0_64] : memref<128x512xf32, #tpu.memory_space<vmem>>, vector<128x512xf32>
    %cst_65 = arith.constant dense<0.000000e+00> : vector<2x512xf32>
    %88 = tpu.matmul %86, %87, %cst_65 {dimension_numbers = #tpu.dot_dimension_numbers<[1], [0], [0], [1], [0, 0, 1, 1], [], []>} : vector<2x128xf32>, vector<128x512xf32>, vector<2x512xf32> -> vector<2x512xf32>
    %c0_66 = arith.constant 0 : index
    %c0_67 = arith.constant 0 : index
    %89 = vector.load %arg5[%c0_66, %c0_67] : memref<1x512xf32, #tpu.memory_space<vmem>>, vector<1x512xf32>
    %90 = vector.broadcast %89 : vector<1x512xf32> to vector<2x512xf32>
    %91 = arith.addf %88, %90 : vector<2x512xf32>
    %c5 = arith.constant 5 : index
    %c0_68 = arith.constant 0 : index
    %c0_69 = arith.constant 0 : index
    %92 = vector.load %arg0[%c5, %c0_68, %c0_69] : memref<8x2x4xf32, #tpu.memory_space<vmem>>, vector<1x2x4xf32>
    %93 = vector.shape_cast %92 : vector<1x2x4xf32> to vector<2x4xf32>
    %c0_70 = arith.constant 0 : index
    %c0_71 = arith.constant 0 : index
    %94 = vector.load %arg1[%c0_70, %c0_71] : memref<4x128xf32, #tpu.memory_space<vmem>>, vector<4x128xf32>
    %cst_72 = arith.constant dense<0.000000e+00> : vector<2x128xf32>
    %95 = tpu.matmul %93, %94, %cst_72 {dimension_numbers = #tpu.dot_dimension_numbers<[1], [0], [0], [1], [0, 0, 1, 1], [], []>} : vector<2x4xf32>, vector<4x128xf32>, vector<2x128xf32> -> vector<2x128xf32>
    %c0_73 = arith.constant 0 : index
    %c0_74 = arith.constant 0 : index
    %96 = vector.load %arg2[%c0_73, %c0_74] : memref<1x128xf32, #tpu.memory_space<vmem>>, vector<1x128xf32>
    %97 = vector.broadcast %96 : vector<1x128xf32> to vector<2x128xf32>
    %98 = arith.addf %95, %97 : vector<2x128xf32>
    %cst_75 = arith.constant 0.000000e+00 : f32
    %99 = vector.broadcast %cst_75 : f32 to vector<2x128xf32>
    %100 = arith.maximumf %98, %99 : vector<2x128xf32>
    %c0_76 = arith.constant 0 : index
    %c0_77 = arith.constant 0 : index
    %101 = vector.load %arg3[%c0_76, %c0_77] : memref<128x512xf32, #tpu.memory_space<vmem>>, vector<128x512xf32>
    %cst_78 = arith.constant dense<0.000000e+00> : vector<2x512xf32>
    %102 = tpu.matmul %100, %101, %cst_78 {dimension_numbers = #tpu.dot_dimension_numbers<[1], [0], [0], [1], [0, 0, 1, 1], [], []>} : vector<2x128xf32>, vector<128x512xf32>, vector<2x512xf32> -> vector<2x512xf32>
    %c0_79 = arith.constant 0 : index
    %c0_80 = arith.constant 0 : index
    %103 = vector.load %arg5[%c0_79, %c0_80] : memref<1x512xf32, #tpu.memory_space<vmem>>, vector<1x512xf32>
    %104 = vector.broadcast %103 : vector<1x512xf32> to vector<2x512xf32>
    %105 = arith.addf %102, %104 : vector<2x512xf32>
    %c6 = arith.constant 6 : index
    %c0_81 = arith.constant 0 : index
    %c0_82 = arith.constant 0 : index
    %106 = vector.load %arg0[%c6, %c0_81, %c0_82] : memref<8x2x4xf32, #tpu.memory_space<vmem>>, vector<1x2x4xf32>
    %107 = vector.shape_cast %106 : vector<1x2x4xf32> to vector<2x4xf32>
    %c0_83 = arith.constant 0 : index
    %c0_84 = arith.constant 0 : index
    %108 = vector.load %arg1[%c0_83, %c0_84] : memref<4x128xf32, #tpu.memory_space<vmem>>, vector<4x128xf32>
    %cst_85 = arith.constant dense<0.000000e+00> : vector<2x128xf32>
    %109 = tpu.matmul %107, %108, %cst_85 {dimension_numbers = #tpu.dot_dimension_numbers<[1], [0], [0], [1], [0, 0, 1, 1], [], []>} : vector<2x4xf32>, vector<4x128xf32>, vector<2x128xf32> -> vector<2x128xf32>
    %c0_86 = arith.constant 0 : index
    %c0_87 = arith.constant 0 : index
    %110 = vector.load %arg2[%c0_86, %c0_87] : memref<1x128xf32, #tpu.memory_space<vmem>>, vector<1x128xf32>
    %111 = vector.broadcast %110 : vector<1x128xf32> to vector<2x128xf32>
    %112 = arith.addf %109, %111 : vector<2x128xf32>
    %cst_88 = arith.constant 0.000000e+00 : f32
    %113 = vector.broadcast %cst_88 : f32 to vector<2x128xf32>
    %114 = arith.maximumf %112, %113 : vector<2x128xf32>
    %c0_89 = arith.constant 0 : index
    %c0_90 = arith.constant 0 : index
    %115 = vector.load %arg3[%c0_89, %c0_90] : memref<128x512xf32, #tpu.memory_space<vmem>>, vector<128x512xf32>
    %cst_91 = arith.constant dense<0.000000e+00> : vector<2x512xf32>
    %116 = tpu.matmul %114, %115, %cst_91 {dimension_numbers = #tpu.dot_dimension_numbers<[1], [0], [0], [1], [0, 0, 1, 1], [], []>} : vector<2x128xf32>, vector<128x512xf32>, vector<2x512xf32> -> vector<2x512xf32>
    %c0_92 = arith.constant 0 : index
    %c0_93 = arith.constant 0 : index
    %117 = vector.load %arg5[%c0_92, %c0_93] : memref<1x512xf32, #tpu.memory_space<vmem>>, vector<1x512xf32>
    %118 = vector.broadcast %117 : vector<1x512xf32> to vector<2x512xf32>
    %119 = arith.addf %116, %118 : vector<2x512xf32>
    %c7 = arith.constant 7 : index
    %c0_94 = arith.constant 0 : index
    %c0_95 = arith.constant 0 : index
    %120 = vector.load %arg0[%c7, %c0_94, %c0_95] : memref<8x2x4xf32, #tpu.memory_space<vmem>>, vector<1x2x4xf32>
    %121 = vector.shape_cast %120 : vector<1x2x4xf32> to vector<2x4xf32>
    %c0_96 = arith.constant 0 : index
    %c0_97 = arith.constant 0 : index
    %122 = vector.load %arg1[%c0_96, %c0_97] : memref<4x128xf32, #tpu.memory_space<vmem>>, vector<4x128xf32>
    %cst_98 = arith.constant dense<0.000000e+00> : vector<2x128xf32>
    %123 = tpu.matmul %121, %122, %cst_98 {dimension_numbers = #tpu.dot_dimension_numbers<[1], [0], [0], [1], [0, 0, 1, 1], [], []>} : vector<2x4xf32>, vector<4x128xf32>, vector<2x128xf32> -> vector<2x128xf32>
    %c0_99 = arith.constant 0 : index
    %c0_100 = arith.constant 0 : index
    %124 = vector.load %arg2[%c0_99, %c0_100] : memref<1x128xf32, #tpu.memory_space<vmem>>, vector<1x128xf32>
    %125 = vector.broadcast %124 : vector<1x128xf32> to vector<2x128xf32>
    %126 = arith.addf %123, %125 : vector<2x128xf32>
    %cst_101 = arith.constant 0.000000e+00 : f32
    %127 = vector.broadcast %cst_101 : f32 to vector<2x128xf32>
    %128 = arith.maximumf %126, %127 : vector<2x128xf32>
    %c0_102 = arith.constant 0 : index
    %c0_103 = arith.constant 0 : index
    %129 = vector.load %arg3[%c0_102, %c0_103] : memref<128x512xf32, #tpu.memory_space<vmem>>, vector<128x512xf32>
    %cst_104 = arith.constant dense<0.000000e+00> : vector<2x512xf32>
    %130 = tpu.matmul %128, %129, %cst_104 {dimension_numbers = #tpu.dot_dimension_numbers<[1], [0], [0], [1], [0, 0, 1, 1], [], []>} : vector<2x128xf32>, vector<128x512xf32>, vector<2x512xf32> -> vector<2x512xf32>
    %c0_105 = arith.constant 0 : index
    %c0_106 = arith.constant 0 : index
    %131 = vector.load %arg5[%c0_105, %c0_106] : memref<1x512xf32, #tpu.memory_space<vmem>>, vector<1x512xf32>
    %132 = vector.broadcast %131 : vector<1x512xf32> to vector<2x512xf32>
    %133 = arith.addf %130, %132 : vector<2x512xf32>
    %cst_107 = arith.constant 0.000000e+00 : f32
    %134 = vector.broadcast %cst_107 : f32 to vector<2x128xf32>
    %cst_108 = arith.constant 0.000000e+00 : f32
    %135 = vector.broadcast %cst_108 : f32 to vector<2x128xf32>
    %136 = arith.select %18, %35, %133 : vector<2x512xi1>, vector<2x512xf32>
    %c0_109 = arith.constant 0 : index
    %c0_110 = arith.constant 0 : index
    %137 = vector.load %arg4[%c0_109, %c0_110] : memref<128x512xf32, #tpu.memory_space<vmem>>, vector<128x512xf32>
    %cst_111 = arith.constant dense<0.000000e+00> : vector<2x512xf32>
    %138 = tpu.matmul %134, %137, %cst_111 {dimension_numbers = #tpu.dot_dimension_numbers<[1], [0], [0], [1], [0, 0, 1, 1], [], []>} : vector<2x128xf32>, vector<128x512xf32>, vector<2x512xf32> -> vector<2x512xf32>
    %139 = arith.addf %136, %138 : vector<2x512xf32>
    %140 = vector.extract_strided_slice %139 {offsets = [0, 0], sizes = [2, 128], strides = [1, 1]} : vector<2x512xf32> to vector<2x128xf32>
    %141 = arith.negf %140 : vector<2x128xf32>
    %142 = math.exp %141 : vector<2x128xf32>
    %cst_112 = arith.constant 1.000000e+00 : f32
    %143 = vector.broadcast %cst_112 : f32 to vector<2x128xf32>
    %144 = arith.addf %143, %142 : vector<2x128xf32>
    %145 = arith.divf %143, %144 : vector<2x128xf32>
    %146 = vector.extract_strided_slice %139 {offsets = [0, 128], sizes = [2, 128], strides = [1, 1]} : vector<2x512xf32> to vector<2x128xf32>
    %147 = arith.negf %146 : vector<2x128xf32>
    %148 = math.exp %147 : vector<2x128xf32>
    %cst_113 = arith.constant 1.000000e+00 : f32
    %149 = vector.broadcast %cst_113 : f32 to vector<2x128xf32>
    %150 = arith.addf %149, %148 : vector<2x128xf32>
    %151 = arith.divf %149, %150 : vector<2x128xf32>
    %152 = vector.extract_strided_slice %139 {offsets = [0, 256], sizes = [2, 128], strides = [1, 1]} : vector<2x512xf32> to vector<2x128xf32>
    %153 = math.tanh %152 : vector<2x128xf32>
    %154 = vector.extract_strided_slice %139 {offsets = [0, 384], sizes = [2, 128], strides = [1, 1]} : vector<2x512xf32> to vector<2x128xf32>
    %155 = arith.negf %154 : vector<2x128xf32>
    %156 = math.exp %155 : vector<2x128xf32>
    %cst_114 = arith.constant 1.000000e+00 : f32
    %157 = vector.broadcast %cst_114 : f32 to vector<2x128xf32>
    %158 = arith.addf %157, %156 : vector<2x128xf32>
    %159 = arith.divf %157, %158 : vector<2x128xf32>
    %160 = arith.mulf %151, %135 : vector<2x128xf32>
    %161 = arith.mulf %145, %153 : vector<2x128xf32>
    %162 = arith.addf %160, %161 : vector<2x128xf32>
    %163 = math.tanh %162 : vector<2x128xf32>
    %164 = arith.mulf %159, %163 : vector<2x128xf32>
    %165 = arith.select %18, %49, %119 : vector<2x512xi1>, vector<2x512xf32>
    %c0_115 = arith.constant 0 : index
    %c0_116 = arith.constant 0 : index
    %166 = vector.load %arg4[%c0_115, %c0_116] : memref<128x512xf32, #tpu.memory_space<vmem>>, vector<128x512xf32>
    %cst_117 = arith.constant dense<0.000000e+00> : vector<2x512xf32>
    %167 = tpu.matmul %164, %166, %cst_117 {dimension_numbers = #tpu.dot_dimension_numbers<[1], [0], [0], [1], [0, 0, 1, 1], [], []>} : vector<2x128xf32>, vector<128x512xf32>, vector<2x512xf32> -> vector<2x512xf32>
    %168 = arith.addf %165, %167 : vector<2x512xf32>
    %169 = vector.extract_strided_slice %168 {offsets = [0, 0], sizes = [2, 128], strides = [1, 1]} : vector<2x512xf32> to vector<2x128xf32>
    %170 = arith.negf %169 : vector<2x128xf32>
    %171 = math.exp %170 : vector<2x128xf32>
    %cst_118 = arith.constant 1.000000e+00 : f32
    %172 = vector.broadcast %cst_118 : f32 to vector<2x128xf32>
    %173 = arith.addf %172, %171 : vector<2x128xf32>
    %174 = arith.divf %172, %173 : vector<2x128xf32>
    %175 = vector.extract_strided_slice %168 {offsets = [0, 128], sizes = [2, 128], strides = [1, 1]} : vector<2x512xf32> to vector<2x128xf32>
    %176 = arith.negf %175 : vector<2x128xf32>
    %177 = math.exp %176 : vector<2x128xf32>
    %cst_119 = arith.constant 1.000000e+00 : f32
    %178 = vector.broadcast %cst_119 : f32 to vector<2x128xf32>
    %179 = arith.addf %178, %177 : vector<2x128xf32>
    %180 = arith.divf %178, %179 : vector<2x128xf32>
    %181 = vector.extract_strided_slice %168 {offsets = [0, 256], sizes = [2, 128], strides = [1, 1]} : vector<2x512xf32> to vector<2x128xf32>
    %182 = math.tanh %181 : vector<2x128xf32>
    %183 = vector.extract_strided_slice %168 {offsets = [0, 384], sizes = [2, 128], strides = [1, 1]} : vector<2x512xf32> to vector<2x128xf32>
    %184 = arith.negf %183 : vector<2x128xf32>
    %185 = math.exp %184 : vector<2x128xf32>
    %cst_120 = arith.constant 1.000000e+00 : f32
    %186 = vector.broadcast %cst_120 : f32 to vector<2x128xf32>
    %187 = arith.addf %186, %185 : vector<2x128xf32>
    %188 = arith.divf %186, %187 : vector<2x128xf32>
    %189 = arith.mulf %180, %162 : vector<2x128xf32>
    %190 = arith.mulf %174, %182 : vector<2x128xf32>
    %191 = arith.addf %189, %190 : vector<2x128xf32>
    %192 = math.tanh %191 : vector<2x128xf32>
    %193 = arith.mulf %188, %192 : vector<2x128xf32>
    %194 = arith.select %18, %63, %105 : vector<2x512xi1>, vector<2x512xf32>
    %c0_121 = arith.constant 0 : index
    %c0_122 = arith.constant 0 : index
    %195 = vector.load %arg4[%c0_121, %c0_122] : memref<128x512xf32, #tpu.memory_space<vmem>>, vector<128x512xf32>
    %cst_123 = arith.constant dense<0.000000e+00> : vector<2x512xf32>
    %196 = tpu.matmul %193, %195, %cst_123 {dimension_numbers = #tpu.dot_dimension_numbers<[1], [0], [0], [1], [0, 0, 1, 1], [], []>} : vector<2x128xf32>, vector<128x512xf32>, vector<2x512xf32> -> vector<2x512xf32>
    %197 = arith.addf %194, %196 : vector<2x512xf32>
    %198 = vector.extract_strided_slice %197 {offsets = [0, 0], sizes = [2, 128], strides = [1, 1]} : vector<2x512xf32> to vector<2x128xf32>
    %199 = arith.negf %198 : vector<2x128xf32>
    %200 = math.exp %199 : vector<2x128xf32>
    %cst_124 = arith.constant 1.000000e+00 : f32
    %201 = vector.broadcast %cst_124 : f32 to vector<2x128xf32>
    %202 = arith.addf %201, %200 : vector<2x128xf32>
    %203 = arith.divf %201, %202 : vector<2x128xf32>
    %204 = vector.extract_strided_slice %197 {offsets = [0, 128], sizes = [2, 128], strides = [1, 1]} : vector<2x512xf32> to vector<2x128xf32>
    %205 = arith.negf %204 : vector<2x128xf32>
    %206 = math.exp %205 : vector<2x128xf32>
    %cst_125 = arith.constant 1.000000e+00 : f32
    %207 = vector.broadcast %cst_125 : f32 to vector<2x128xf32>
    %208 = arith.addf %207, %206 : vector<2x128xf32>
    %209 = arith.divf %207, %208 : vector<2x128xf32>
    %210 = vector.extract_strided_slice %197 {offsets = [0, 256], sizes = [2, 128], strides = [1, 1]} : vector<2x512xf32> to vector<2x128xf32>
    %211 = math.tanh %210 : vector<2x128xf32>
    %212 = vector.extract_strided_slice %197 {offsets = [0, 384], sizes = [2, 128], strides = [1, 1]} : vector<2x512xf32> to vector<2x128xf32>
    %213 = arith.negf %212 : vector<2x128xf32>
    %214 = math.exp %213 : vector<2x128xf32>
    %cst_126 = arith.constant 1.000000e+00 : f32
    %215 = vector.broadcast %cst_126 : f32 to vector<2x128xf32>
    %216 = arith.addf %215, %214 : vector<2x128xf32>
    %217 = arith.divf %215, %216 : vector<2x128xf32>
    %218 = arith.mulf %209, %191 : vector<2x128xf32>
    %219 = arith.mulf %203, %211 : vector<2x128xf32>
    %220 = arith.addf %218, %219 : vector<2x128xf32>
    %221 = math.tanh %220 : vector<2x128xf32>
    %222 = arith.mulf %217, %221 : vector<2x128xf32>
    %223 = arith.select %18, %77, %91 : vector<2x512xi1>, vector<2x512xf32>
    %c0_127 = arith.constant 0 : index
    %c0_128 = arith.constant 0 : index
    %224 = vector.load %arg4[%c0_127, %c0_128] : memref<128x512xf32, #tpu.memory_space<vmem>>, vector<128x512xf32>
    %cst_129 = arith.constant dense<0.000000e+00> : vector<2x512xf32>
    %225 = tpu.matmul %222, %224, %cst_129 {dimension_numbers = #tpu.dot_dimension_numbers<[1], [0], [0], [1], [0, 0, 1, 1], [], []>} : vector<2x128xf32>, vector<128x512xf32>, vector<2x512xf32> -> vector<2x512xf32>
    %226 = arith.addf %223, %225 : vector<2x512xf32>
    %227 = vector.extract_strided_slice %226 {offsets = [0, 0], sizes = [2, 128], strides = [1, 1]} : vector<2x512xf32> to vector<2x128xf32>
    %228 = arith.negf %227 : vector<2x128xf32>
    %229 = math.exp %228 : vector<2x128xf32>
    %cst_130 = arith.constant 1.000000e+00 : f32
    %230 = vector.broadcast %cst_130 : f32 to vector<2x128xf32>
    %231 = arith.addf %230, %229 : vector<2x128xf32>
    %232 = arith.divf %230, %231 : vector<2x128xf32>
    %233 = vector.extract_strided_slice %226 {offsets = [0, 128], sizes = [2, 128], strides = [1, 1]} : vector<2x512xf32> to vector<2x128xf32>
    %234 = arith.negf %233 : vector<2x128xf32>
    %235 = math.exp %234 : vector<2x128xf32>
    %cst_131 = arith.constant 1.000000e+00 : f32
    %236 = vector.broadcast %cst_131 : f32 to vector<2x128xf32>
    %237 = arith.addf %236, %235 : vector<2x128xf32>
    %238 = arith.divf %236, %237 : vector<2x128xf32>
    %239 = vector.extract_strided_slice %226 {offsets = [0, 256], sizes = [2, 128], strides = [1, 1]} : vector<2x512xf32> to vector<2x128xf32>
    %240 = math.tanh %239 : vector<2x128xf32>
    %241 = vector.extract_strided_slice %226 {offsets = [0, 384], sizes = [2, 128], strides = [1, 1]} : vector<2x512xf32> to vector<2x128xf32>
    %242 = arith.negf %241 : vector<2x128xf32>
    %243 = math.exp %242 : vector<2x128xf32>
    %cst_132 = arith.constant 1.000000e+00 : f32
    %244 = vector.broadcast %cst_132 : f32 to vector<2x128xf32>
    %245 = arith.addf %244, %243 : vector<2x128xf32>
    %246 = arith.divf %244, %245 : vector<2x128xf32>
    %247 = arith.mulf %238, %220 : vector<2x128xf32>
    %248 = arith.mulf %232, %240 : vector<2x128xf32>
    %249 = arith.addf %247, %248 : vector<2x128xf32>
    %250 = math.tanh %249 : vector<2x128xf32>
    %251 = arith.mulf %246, %250 : vector<2x128xf32>
    %252 = arith.select %18, %91, %77 : vector<2x512xi1>, vector<2x512xf32>
    %c0_133 = arith.constant 0 : index
    %c0_134 = arith.constant 0 : index
    %253 = vector.load %arg4[%c0_133, %c0_134] : memref<128x512xf32, #tpu.memory_space<vmem>>, vector<128x512xf32>
    %cst_135 = arith.constant dense<0.000000e+00> : vector<2x512xf32>
    %254 = tpu.matmul %251, %253, %cst_135 {dimension_numbers = #tpu.dot_dimension_numbers<[1], [0], [0], [1], [0, 0, 1, 1], [], []>} : vector<2x128xf32>, vector<128x512xf32>, vector<2x512xf32> -> vector<2x512xf32>
    %255 = arith.addf %252, %254 : vector<2x512xf32>
    %256 = vector.extract_strided_slice %255 {offsets = [0, 0], sizes = [2, 128], strides = [1, 1]} : vector<2x512xf32> to vector<2x128xf32>
    %257 = arith.negf %256 : vector<2x128xf32>
    %258 = math.exp %257 : vector<2x128xf32>
    %cst_136 = arith.constant 1.000000e+00 : f32
    %259 = vector.broadcast %cst_136 : f32 to vector<2x128xf32>
    %260 = arith.addf %259, %258 : vector<2x128xf32>
    %261 = arith.divf %259, %260 : vector<2x128xf32>
    %262 = vector.extract_strided_slice %255 {offsets = [0, 128], sizes = [2, 128], strides = [1, 1]} : vector<2x512xf32> to vector<2x128xf32>
    %263 = arith.negf %262 : vector<2x128xf32>
    %264 = math.exp %263 : vector<2x128xf32>
    %cst_137 = arith.constant 1.000000e+00 : f32
    %265 = vector.broadcast %cst_137 : f32 to vector<2x128xf32>
    %266 = arith.addf %265, %264 : vector<2x128xf32>
    %267 = arith.divf %265, %266 : vector<2x128xf32>
    %268 = vector.extract_strided_slice %255 {offsets = [0, 256], sizes = [2, 128], strides = [1, 1]} : vector<2x512xf32> to vector<2x128xf32>
    %269 = math.tanh %268 : vector<2x128xf32>
    %270 = vector.extract_strided_slice %255 {offsets = [0, 384], sizes = [2, 128], strides = [1, 1]} : vector<2x512xf32> to vector<2x128xf32>
    %271 = arith.negf %270 : vector<2x128xf32>
    %272 = math.exp %271 : vector<2x128xf32>
    %cst_138 = arith.constant 1.000000e+00 : f32
    %273 = vector.broadcast %cst_138 : f32 to vector<2x128xf32>
    %274 = arith.addf %273, %272 : vector<2x128xf32>
    %275 = arith.divf %273, %274 : vector<2x128xf32>
    %276 = arith.mulf %267, %249 : vector<2x128xf32>
    %277 = arith.mulf %261, %269 : vector<2x128xf32>
    %278 = arith.addf %276, %277 : vector<2x128xf32>
    %279 = math.tanh %278 : vector<2x128xf32>
    %280 = arith.mulf %275, %279 : vector<2x128xf32>
    %281 = arith.select %18, %105, %63 : vector<2x512xi1>, vector<2x512xf32>
    %c0_139 = arith.constant 0 : index
    %c0_140 = arith.constant 0 : index
    %282 = vector.load %arg4[%c0_139, %c0_140] : memref<128x512xf32, #tpu.memory_space<vmem>>, vector<128x512xf32>
    %cst_141 = arith.constant dense<0.000000e+00> : vector<2x512xf32>
    %283 = tpu.matmul %280, %282, %cst_141 {dimension_numbers = #tpu.dot_dimension_numbers<[1], [0], [0], [1], [0, 0, 1, 1], [], []>} : vector<2x128xf32>, vector<128x512xf32>, vector<2x512xf32> -> vector<2x512xf32>
    %284 = arith.addf %281, %283 : vector<2x512xf32>
    %285 = vector.extract_strided_slice %284 {offsets = [0, 0], sizes = [2, 128], strides = [1, 1]} : vector<2x512xf32> to vector<2x128xf32>
    %286 = arith.negf %285 : vector<2x128xf32>
    %287 = math.exp %286 : vector<2x128xf32>
    %cst_142 = arith.constant 1.000000e+00 : f32
    %288 = vector.broadcast %cst_142 : f32 to vector<2x128xf32>
    %289 = arith.addf %288, %287 : vector<2x128xf32>
    %290 = arith.divf %288, %289 : vector<2x128xf32>
    %291 = vector.extract_strided_slice %284 {offsets = [0, 128], sizes = [2, 128], strides = [1, 1]} : vector<2x512xf32> to vector<2x128xf32>
    %292 = arith.negf %291 : vector<2x128xf32>
    %293 = math.exp %292 : vector<2x128xf32>
    %cst_143 = arith.constant 1.000000e+00 : f32
    %294 = vector.broadcast %cst_143 : f32 to vector<2x128xf32>
    %295 = arith.addf %294, %293 : vector<2x128xf32>
    %296 = arith.divf %294, %295 : vector<2x128xf32>
    %297 = vector.extract_strided_slice %284 {offsets = [0, 256], sizes = [2, 128], strides = [1, 1]} : vector<2x512xf32> to vector<2x128xf32>
    %298 = math.tanh %297 : vector<2x128xf32>
    %299 = vector.extract_strided_slice %284 {offsets = [0, 384], sizes = [2, 128], strides = [1, 1]} : vector<2x512xf32> to vector<2x128xf32>
    %300 = arith.negf %299 : vector<2x128xf32>
    %301 = math.exp %300 : vector<2x128xf32>
    %cst_144 = arith.constant 1.000000e+00 : f32
    %302 = vector.broadcast %cst_144 : f32 to vector<2x128xf32>
    %303 = arith.addf %302, %301 : vector<2x128xf32>
    %304 = arith.divf %302, %303 : vector<2x128xf32>
    %305 = arith.mulf %296, %278 : vector<2x128xf32>
    %306 = arith.mulf %290, %298 : vector<2x128xf32>
    %307 = arith.addf %305, %306 : vector<2x128xf32>
    %308 = math.tanh %307 : vector<2x128xf32>
    %309 = arith.mulf %304, %308 : vector<2x128xf32>
    %310 = arith.select %18, %119, %49 : vector<2x512xi1>, vector<2x512xf32>
    %c0_145 = arith.constant 0 : index
    %c0_146 = arith.constant 0 : index
    %311 = vector.load %arg4[%c0_145, %c0_146] : memref<128x512xf32, #tpu.memory_space<vmem>>, vector<128x512xf32>
    %cst_147 = arith.constant dense<0.000000e+00> : vector<2x512xf32>
    %312 = tpu.matmul %309, %311, %cst_147 {dimension_numbers = #tpu.dot_dimension_numbers<[1], [0], [0], [1], [0, 0, 1, 1], [], []>} : vector<2x128xf32>, vector<128x512xf32>, vector<2x512xf32> -> vector<2x512xf32>
    %313 = arith.addf %310, %312 : vector<2x512xf32>
    %314 = vector.extract_strided_slice %313 {offsets = [0, 0], sizes = [2, 128], strides = [1, 1]} : vector<2x512xf32> to vector<2x128xf32>
    %315 = arith.negf %314 : vector<2x128xf32>
    %316 = math.exp %315 : vector<2x128xf32>
    %cst_148 = arith.constant 1.000000e+00 : f32
    %317 = vector.broadcast %cst_148 : f32 to vector<2x128xf32>
    %318 = arith.addf %317, %316 : vector<2x128xf32>
    %319 = arith.divf %317, %318 : vector<2x128xf32>
    %320 = vector.extract_strided_slice %313 {offsets = [0, 128], sizes = [2, 128], strides = [1, 1]} : vector<2x512xf32> to vector<2x128xf32>
    %321 = arith.negf %320 : vector<2x128xf32>
    %322 = math.exp %321 : vector<2x128xf32>
    %cst_149 = arith.constant 1.000000e+00 : f32
    %323 = vector.broadcast %cst_149 : f32 to vector<2x128xf32>
    %324 = arith.addf %323, %322 : vector<2x128xf32>
    %325 = arith.divf %323, %324 : vector<2x128xf32>
    %326 = vector.extract_strided_slice %313 {offsets = [0, 256], sizes = [2, 128], strides = [1, 1]} : vector<2x512xf32> to vector<2x128xf32>
    %327 = math.tanh %326 : vector<2x128xf32>
    %328 = vector.extract_strided_slice %313 {offsets = [0, 384], sizes = [2, 128], strides = [1, 1]} : vector<2x512xf32> to vector<2x128xf32>
    %329 = arith.negf %328 : vector<2x128xf32>
    %330 = math.exp %329 : vector<2x128xf32>
    %cst_150 = arith.constant 1.000000e+00 : f32
    %331 = vector.broadcast %cst_150 : f32 to vector<2x128xf32>
    %332 = arith.addf %331, %330 : vector<2x128xf32>
    %333 = arith.divf %331, %332 : vector<2x128xf32>
    %334 = arith.mulf %325, %307 : vector<2x128xf32>
    %335 = arith.mulf %319, %327 : vector<2x128xf32>
    %336 = arith.addf %334, %335 : vector<2x128xf32>
    %337 = math.tanh %336 : vector<2x128xf32>
    %338 = arith.mulf %333, %337 : vector<2x128xf32>
    %339 = arith.select %18, %133, %35 : vector<2x512xi1>, vector<2x512xf32>
    %c0_151 = arith.constant 0 : index
    %c0_152 = arith.constant 0 : index
    %340 = vector.load %arg4[%c0_151, %c0_152] : memref<128x512xf32, #tpu.memory_space<vmem>>, vector<128x512xf32>
    %cst_153 = arith.constant dense<0.000000e+00> : vector<2x512xf32>
    %341 = tpu.matmul %338, %340, %cst_153 {dimension_numbers = #tpu.dot_dimension_numbers<[1], [0], [0], [1], [0, 0, 1, 1], [], []>} : vector<2x128xf32>, vector<128x512xf32>, vector<2x512xf32> -> vector<2x512xf32>
    %342 = arith.addf %339, %341 : vector<2x512xf32>
    %343 = vector.extract_strided_slice %342 {offsets = [0, 0], sizes = [2, 128], strides = [1, 1]} : vector<2x512xf32> to vector<2x128xf32>
    %344 = arith.negf %343 : vector<2x128xf32>
    %345 = math.exp %344 : vector<2x128xf32>
    %cst_154 = arith.constant 1.000000e+00 : f32
    %346 = vector.broadcast %cst_154 : f32 to vector<2x128xf32>
    %347 = arith.addf %346, %345 : vector<2x128xf32>
    %348 = arith.divf %346, %347 : vector<2x128xf32>
    %349 = vector.extract_strided_slice %342 {offsets = [0, 128], sizes = [2, 128], strides = [1, 1]} : vector<2x512xf32> to vector<2x128xf32>
    %350 = arith.negf %349 : vector<2x128xf32>
    %351 = math.exp %350 : vector<2x128xf32>
    %cst_155 = arith.constant 1.000000e+00 : f32
    %352 = vector.broadcast %cst_155 : f32 to vector<2x128xf32>
    %353 = arith.addf %352, %351 : vector<2x128xf32>
    %354 = arith.divf %352, %353 : vector<2x128xf32>
    %355 = vector.extract_strided_slice %342 {offsets = [0, 256], sizes = [2, 128], strides = [1, 1]} : vector<2x512xf32> to vector<2x128xf32>
    %356 = math.tanh %355 : vector<2x128xf32>
    %357 = vector.extract_strided_slice %342 {offsets = [0, 384], sizes = [2, 128], strides = [1, 1]} : vector<2x512xf32> to vector<2x128xf32>
    %358 = arith.negf %357 : vector<2x128xf32>
    %359 = math.exp %358 : vector<2x128xf32>
    %cst_156 = arith.constant 1.000000e+00 : f32
    %360 = vector.broadcast %cst_156 : f32 to vector<2x128xf32>
    %361 = arith.addf %360, %359 : vector<2x128xf32>
    %362 = arith.divf %360, %361 : vector<2x128xf32>
    %363 = arith.mulf %354, %336 : vector<2x128xf32>
    %364 = arith.mulf %348, %356 : vector<2x128xf32>
    %365 = arith.addf %363, %364 : vector<2x128xf32>
    %366 = math.tanh %365 : vector<2x128xf32>
    %367 = arith.mulf %362, %366 : vector<2x128xf32>
    %368 = arith.select %21, %164, %367 : vector<2x128xi1>, vector<2x128xf32>
    %369 = arith.select %21, %193, %338 : vector<2x128xi1>, vector<2x128xf32>
    %370 = arith.select %21, %222, %309 : vector<2x128xi1>, vector<2x128xf32>
    %371 = arith.select %21, %251, %280 : vector<2x128xi1>, vector<2x128xf32>
    %372 = arith.select %21, %280, %251 : vector<2x128xi1>, vector<2x128xf32>
    %373 = arith.select %21, %309, %222 : vector<2x128xi1>, vector<2x128xf32>
    %374 = arith.select %21, %338, %193 : vector<2x128xi1>, vector<2x128xf32>
    %375 = arith.select %21, %367, %164 : vector<2x128xi1>, vector<2x128xf32>
    %cst_157 = arith.constant 0.000000e+00 : f32
    %376 = vector.broadcast %cst_157 : f32 to vector<2x128xf32>
    %377 = arith.maximumf %368, %376 : vector<2x128xf32>
    %c0_158 = arith.constant 0 : index
    %c0_159 = arith.constant 0 : index
    %378 = vector.load %arg6[%c0_158, %c0_159] : memref<128x512xf32, #tpu.memory_space<vmem>>, vector<128x512xf32>
    %cst_160 = arith.constant dense<0.000000e+00> : vector<2x512xf32>
    %379 = tpu.matmul %377, %378, %cst_160 {dimension_numbers = #tpu.dot_dimension_numbers<[1], [0], [0], [1], [0, 0, 1, 1], [], []>} : vector<2x128xf32>, vector<128x512xf32>, vector<2x512xf32> -> vector<2x512xf32>
    %c0_161 = arith.constant 0 : index
    %c0_162 = arith.constant 0 : index
    %380 = vector.load %arg8[%c0_161, %c0_162] : memref<1x512xf32, #tpu.memory_space<vmem>>, vector<1x512xf32>
    %381 = vector.broadcast %380 : vector<1x512xf32> to vector<2x512xf32>
    %382 = arith.addf %379, %381 : vector<2x512xf32>
    %cst_163 = arith.constant 0.000000e+00 : f32
    %383 = vector.broadcast %cst_163 : f32 to vector<2x128xf32>
    %384 = arith.maximumf %369, %383 : vector<2x128xf32>
    %c0_164 = arith.constant 0 : index
    %c0_165 = arith.constant 0 : index
    %385 = vector.load %arg6[%c0_164, %c0_165] : memref<128x512xf32, #tpu.memory_space<vmem>>, vector<128x512xf32>
    %cst_166 = arith.constant dense<0.000000e+00> : vector<2x512xf32>
    %386 = tpu.matmul %384, %385, %cst_166 {dimension_numbers = #tpu.dot_dimension_numbers<[1], [0], [0], [1], [0, 0, 1, 1], [], []>} : vector<2x128xf32>, vector<128x512xf32>, vector<2x512xf32> -> vector<2x512xf32>
    %c0_167 = arith.constant 0 : index
    %c0_168 = arith.constant 0 : index
    %387 = vector.load %arg8[%c0_167, %c0_168] : memref<1x512xf32, #tpu.memory_space<vmem>>, vector<1x512xf32>
    %388 = vector.broadcast %387 : vector<1x512xf32> to vector<2x512xf32>
    %389 = arith.addf %386, %388 : vector<2x512xf32>
    %cst_169 = arith.constant 0.000000e+00 : f32
    %390 = vector.broadcast %cst_169 : f32 to vector<2x128xf32>
    %391 = arith.maximumf %370, %390 : vector<2x128xf32>
    %c0_170 = arith.constant 0 : index
    %c0_171 = arith.constant 0 : index
    %392 = vector.load %arg6[%c0_170, %c0_171] : memref<128x512xf32, #tpu.memory_space<vmem>>, vector<128x512xf32>
    %cst_172 = arith.constant dense<0.000000e+00> : vector<2x512xf32>
    %393 = tpu.matmul %391, %392, %cst_172 {dimension_numbers = #tpu.dot_dimension_numbers<[1], [0], [0], [1], [0, 0, 1, 1], [], []>} : vector<2x128xf32>, vector<128x512xf32>, vector<2x512xf32> -> vector<2x512xf32>
    %c0_173 = arith.constant 0 : index
    %c0_174 = arith.constant 0 : index
    %394 = vector.load %arg8[%c0_173, %c0_174] : memref<1x512xf32, #tpu.memory_space<vmem>>, vector<1x512xf32>
    %395 = vector.broadcast %394 : vector<1x512xf32> to vector<2x512xf32>
    %396 = arith.addf %393, %395 : vector<2x512xf32>
    %cst_175 = arith.constant 0.000000e+00 : f32
    %397 = vector.broadcast %cst_175 : f32 to vector<2x128xf32>
    %398 = arith.maximumf %371, %397 : vector<2x128xf32>
    %c0_176 = arith.constant 0 : index
    %c0_177 = arith.constant 0 : index
    %399 = vector.load %arg6[%c0_176, %c0_177] : memref<128x512xf32, #tpu.memory_space<vmem>>, vector<128x512xf32>
    %cst_178 = arith.constant dense<0.000000e+00> : vector<2x512xf32>
    %400 = tpu.matmul %398, %399, %cst_178 {dimension_numbers = #tpu.dot_dimension_numbers<[1], [0], [0], [1], [0, 0, 1, 1], [], []>} : vector<2x128xf32>, vector<128x512xf32>, vector<2x512xf32> -> vector<2x512xf32>
    %c0_179 = arith.constant 0 : index
    %c0_180 = arith.constant 0 : index
    %401 = vector.load %arg8[%c0_179, %c0_180] : memref<1x512xf32, #tpu.memory_space<vmem>>, vector<1x512xf32>
    %402 = vector.broadcast %401 : vector<1x512xf32> to vector<2x512xf32>
    %403 = arith.addf %400, %402 : vector<2x512xf32>
    %cst_181 = arith.constant 0.000000e+00 : f32
    %404 = vector.broadcast %cst_181 : f32 to vector<2x128xf32>
    %405 = arith.maximumf %372, %404 : vector<2x128xf32>
    %c0_182 = arith.constant 0 : index
    %c0_183 = arith.constant 0 : index
    %406 = vector.load %arg6[%c0_182, %c0_183] : memref<128x512xf32, #tpu.memory_space<vmem>>, vector<128x512xf32>
    %cst_184 = arith.constant dense<0.000000e+00> : vector<2x512xf32>
    %407 = tpu.matmul %405, %406, %cst_184 {dimension_numbers = #tpu.dot_dimension_numbers<[1], [0], [0], [1], [0, 0, 1, 1], [], []>} : vector<2x128xf32>, vector<128x512xf32>, vector<2x512xf32> -> vector<2x512xf32>
    %c0_185 = arith.constant 0 : index
    %c0_186 = arith.constant 0 : index
    %408 = vector.load %arg8[%c0_185, %c0_186] : memref<1x512xf32, #tpu.memory_space<vmem>>, vector<1x512xf32>
    %409 = vector.broadcast %408 : vector<1x512xf32> to vector<2x512xf32>
    %410 = arith.addf %407, %409 : vector<2x512xf32>
    %cst_187 = arith.constant 0.000000e+00 : f32
    %411 = vector.broadcast %cst_187 : f32 to vector<2x128xf32>
    %412 = arith.maximumf %373, %411 : vector<2x128xf32>
    %c0_188 = arith.constant 0 : index
    %c0_189 = arith.constant 0 : index
    %413 = vector.load %arg6[%c0_188, %c0_189] : memref<128x512xf32, #tpu.memory_space<vmem>>, vector<128x512xf32>
    %cst_190 = arith.constant dense<0.000000e+00> : vector<2x512xf32>
    %414 = tpu.matmul %412, %413, %cst_190 {dimension_numbers = #tpu.dot_dimension_numbers<[1], [0], [0], [1], [0, 0, 1, 1], [], []>} : vector<2x128xf32>, vector<128x512xf32>, vector<2x512xf32> -> vector<2x512xf32>
    %c0_191 = arith.constant 0 : index
    %c0_192 = arith.constant 0 : index
    %415 = vector.load %arg8[%c0_191, %c0_192] : memref<1x512xf32, #tpu.memory_space<vmem>>, vector<1x512xf32>
    %416 = vector.broadcast %415 : vector<1x512xf32> to vector<2x512xf32>
    %417 = arith.addf %414, %416 : vector<2x512xf32>
    %cst_193 = arith.constant 0.000000e+00 : f32
    %418 = vector.broadcast %cst_193 : f32 to vector<2x128xf32>
    %419 = arith.maximumf %374, %418 : vector<2x128xf32>
    %c0_194 = arith.constant 0 : index
    %c0_195 = arith.constant 0 : index
    %420 = vector.load %arg6[%c0_194, %c0_195] : memref<128x512xf32, #tpu.memory_space<vmem>>, vector<128x512xf32>
    %cst_196 = arith.constant dense<0.000000e+00> : vector<2x512xf32>
    %421 = tpu.matmul %419, %420, %cst_196 {dimension_numbers = #tpu.dot_dimension_numbers<[1], [0], [0], [1], [0, 0, 1, 1], [], []>} : vector<2x128xf32>, vector<128x512xf32>, vector<2x512xf32> -> vector<2x512xf32>
    %c0_197 = arith.constant 0 : index
    %c0_198 = arith.constant 0 : index
    %422 = vector.load %arg8[%c0_197, %c0_198] : memref<1x512xf32, #tpu.memory_space<vmem>>, vector<1x512xf32>
    %423 = vector.broadcast %422 : vector<1x512xf32> to vector<2x512xf32>
    %424 = arith.addf %421, %423 : vector<2x512xf32>
    %cst_199 = arith.constant 0.000000e+00 : f32
    %425 = vector.broadcast %cst_199 : f32 to vector<2x128xf32>
    %426 = arith.maximumf %375, %425 : vector<2x128xf32>
    %c0_200 = arith.constant 0 : index
    %c0_201 = arith.constant 0 : index
    %427 = vector.load %arg6[%c0_200, %c0_201] : memref<128x512xf32, #tpu.memory_space<vmem>>, vector<128x512xf32>
    %cst_202 = arith.constant dense<0.000000e+00> : vector<2x512xf32>
    %428 = tpu.matmul %426, %427, %cst_202 {dimension_numbers = #tpu.dot_dimension_numbers<[1], [0], [0], [1], [0, 0, 1, 1], [], []>} : vector<2x128xf32>, vector<128x512xf32>, vector<2x512xf32> -> vector<2x512xf32>
    %c0_203 = arith.constant 0 : index
    %c0_204 = arith.constant 0 : index
    %429 = vector.load %arg8[%c0_203, %c0_204] : memref<1x512xf32, #tpu.memory_space<vmem>>, vector<1x512xf32>
    %430 = vector.broadcast %429 : vector<1x512xf32> to vector<2x512xf32>
    %431 = arith.addf %428, %430 : vector<2x512xf32>
    %432 = arith.select %18, %382, %431 : vector<2x512xi1>, vector<2x512xf32>
    %c0_205 = arith.constant 0 : index
    %c0_206 = arith.constant 0 : index
    %433 = vector.load %arg7[%c0_205, %c0_206] : memref<128x512xf32, #tpu.memory_space<vmem>>, vector<128x512xf32>
    %cst_207 = arith.constant dense<0.000000e+00> : vector<2x512xf32>
    %434 = tpu.matmul %367, %433, %cst_207 {dimension_numbers = #tpu.dot_dimension_numbers<[1], [0], [0], [1], [0, 0, 1, 1], [], []>} : vector<2x128xf32>, vector<128x512xf32>, vector<2x512xf32> -> vector<2x512xf32>
    %435 = arith.addf %432, %434 : vector<2x512xf32>
    %436 = vector.extract_strided_slice %435 {offsets = [0, 0], sizes = [2, 128], strides = [1, 1]} : vector<2x512xf32> to vector<2x128xf32>
    %437 = arith.negf %436 : vector<2x128xf32>
    %438 = math.exp %437 : vector<2x128xf32>
    %cst_208 = arith.constant 1.000000e+00 : f32
    %439 = vector.broadcast %cst_208 : f32 to vector<2x128xf32>
    %440 = arith.addf %439, %438 : vector<2x128xf32>
    %441 = arith.divf %439, %440 : vector<2x128xf32>
    %442 = vector.extract_strided_slice %435 {offsets = [0, 128], sizes = [2, 128], strides = [1, 1]} : vector<2x512xf32> to vector<2x128xf32>
    %443 = arith.negf %442 : vector<2x128xf32>
    %444 = math.exp %443 : vector<2x128xf32>
    %cst_209 = arith.constant 1.000000e+00 : f32
    %445 = vector.broadcast %cst_209 : f32 to vector<2x128xf32>
    %446 = arith.addf %445, %444 : vector<2x128xf32>
    %447 = arith.divf %445, %446 : vector<2x128xf32>
    %448 = vector.extract_strided_slice %435 {offsets = [0, 256], sizes = [2, 128], strides = [1, 1]} : vector<2x512xf32> to vector<2x128xf32>
    %449 = math.tanh %448 : vector<2x128xf32>
    %450 = vector.extract_strided_slice %435 {offsets = [0, 384], sizes = [2, 128], strides = [1, 1]} : vector<2x512xf32> to vector<2x128xf32>
    %451 = arith.negf %450 : vector<2x128xf32>
    %452 = math.exp %451 : vector<2x128xf32>
    %cst_210 = arith.constant 1.000000e+00 : f32
    %453 = vector.broadcast %cst_210 : f32 to vector<2x128xf32>
    %454 = arith.addf %453, %452 : vector<2x128xf32>
    %455 = arith.divf %453, %454 : vector<2x128xf32>
    %456 = arith.mulf %447, %365 : vector<2x128xf32>
    %457 = arith.mulf %441, %449 : vector<2x128xf32>
    %458 = arith.addf %456, %457 : vector<2x128xf32>
    %459 = math.tanh %458 : vector<2x128xf32>
    %460 = arith.mulf %455, %459 : vector<2x128xf32>
    %461 = arith.select %18, %389, %424 : vector<2x512xi1>, vector<2x512xf32>
    %c0_211 = arith.constant 0 : index
    %c0_212 = arith.constant 0 : index
    %462 = vector.load %arg7[%c0_211, %c0_212] : memref<128x512xf32, #tpu.memory_space<vmem>>, vector<128x512xf32>
    %cst_213 = arith.constant dense<0.000000e+00> : vector<2x512xf32>
    %463 = tpu.matmul %460, %462, %cst_213 {dimension_numbers = #tpu.dot_dimension_numbers<[1], [0], [0], [1], [0, 0, 1, 1], [], []>} : vector<2x128xf32>, vector<128x512xf32>, vector<2x512xf32> -> vector<2x512xf32>
    %464 = arith.addf %461, %463 : vector<2x512xf32>
    %465 = vector.extract_strided_slice %464 {offsets = [0, 0], sizes = [2, 128], strides = [1, 1]} : vector<2x512xf32> to vector<2x128xf32>
    %466 = arith.negf %465 : vector<2x128xf32>
    %467 = math.exp %466 : vector<2x128xf32>
    %cst_214 = arith.constant 1.000000e+00 : f32
    %468 = vector.broadcast %cst_214 : f32 to vector<2x128xf32>
    %469 = arith.addf %468, %467 : vector<2x128xf32>
    %470 = arith.divf %468, %469 : vector<2x128xf32>
    %471 = vector.extract_strided_slice %464 {offsets = [0, 128], sizes = [2, 128], strides = [1, 1]} : vector<2x512xf32> to vector<2x128xf32>
    %472 = arith.negf %471 : vector<2x128xf32>
    %473 = math.exp %472 : vector<2x128xf32>
    %cst_215 = arith.constant 1.000000e+00 : f32
    %474 = vector.broadcast %cst_215 : f32 to vector<2x128xf32>
    %475 = arith.addf %474, %473 : vector<2x128xf32>
    %476 = arith.divf %474, %475 : vector<2x128xf32>
    %477 = vector.extract_strided_slice %464 {offsets = [0, 256], sizes = [2, 128], strides = [1, 1]} : vector<2x512xf32> to vector<2x128xf32>
    %478 = math.tanh %477 : vector<2x128xf32>
    %479 = vector.extract_strided_slice %464 {offsets = [0, 384], sizes = [2, 128], strides = [1, 1]} : vector<2x512xf32> to vector<2x128xf32>
    %480 = arith.negf %479 : vector<2x128xf32>
    %481 = math.exp %480 : vector<2x128xf32>
    %cst_216 = arith.constant 1.000000e+00 : f32
    %482 = vector.broadcast %cst_216 : f32 to vector<2x128xf32>
    %483 = arith.addf %482, %481 : vector<2x128xf32>
    %484 = arith.divf %482, %483 : vector<2x128xf32>
    %485 = arith.mulf %476, %458 : vector<2x128xf32>
    %486 = arith.mulf %470, %478 : vector<2x128xf32>
    %487 = arith.addf %485, %486 : vector<2x128xf32>
    %488 = math.tanh %487 : vector<2x128xf32>
    %489 = arith.mulf %484, %488 : vector<2x128xf32>
    %490 = arith.select %18, %396, %417 : vector<2x512xi1>, vector<2x512xf32>
    %c0_217 = arith.constant 0 : index
    %c0_218 = arith.constant 0 : index
    %491 = vector.load %arg7[%c0_217, %c0_218] : memref<128x512xf32, #tpu.memory_space<vmem>>, vector<128x512xf32>
    %cst_219 = arith.constant dense<0.000000e+00> : vector<2x512xf32>
    %492 = tpu.matmul %489, %491, %cst_219 {dimension_numbers = #tpu.dot_dimension_numbers<[1], [0], [0], [1], [0, 0, 1, 1], [], []>} : vector<2x128xf32>, vector<128x512xf32>, vector<2x512xf32> -> vector<2x512xf32>
    %493 = arith.addf %490, %492 : vector<2x512xf32>
    %494 = vector.extract_strided_slice %493 {offsets = [0, 0], sizes = [2, 128], strides = [1, 1]} : vector<2x512xf32> to vector<2x128xf32>
    %495 = arith.negf %494 : vector<2x128xf32>
    %496 = math.exp %495 : vector<2x128xf32>
    %cst_220 = arith.constant 1.000000e+00 : f32
    %497 = vector.broadcast %cst_220 : f32 to vector<2x128xf32>
    %498 = arith.addf %497, %496 : vector<2x128xf32>
    %499 = arith.divf %497, %498 : vector<2x128xf32>
    %500 = vector.extract_strided_slice %493 {offsets = [0, 128], sizes = [2, 128], strides = [1, 1]} : vector<2x512xf32> to vector<2x128xf32>
    %501 = arith.negf %500 : vector<2x128xf32>
    %502 = math.exp %501 : vector<2x128xf32>
    %cst_221 = arith.constant 1.000000e+00 : f32
    %503 = vector.broadcast %cst_221 : f32 to vector<2x128xf32>
    %504 = arith.addf %503, %502 : vector<2x128xf32>
    %505 = arith.divf %503, %504 : vector<2x128xf32>
    %506 = vector.extract_strided_slice %493 {offsets = [0, 256], sizes = [2, 128], strides = [1, 1]} : vector<2x512xf32> to vector<2x128xf32>
    %507 = math.tanh %506 : vector<2x128xf32>
    %508 = vector.extract_strided_slice %493 {offsets = [0, 384], sizes = [2, 128], strides = [1, 1]} : vector<2x512xf32> to vector<2x128xf32>
    %509 = arith.negf %508 : vector<2x128xf32>
    %510 = math.exp %509 : vector<2x128xf32>
    %cst_222 = arith.constant 1.000000e+00 : f32
    %511 = vector.broadcast %cst_222 : f32 to vector<2x128xf32>
    %512 = arith.addf %511, %510 : vector<2x128xf32>
    %513 = arith.divf %511, %512 : vector<2x128xf32>
    %514 = arith.mulf %505, %487 : vector<2x128xf32>
    %515 = arith.mulf %499, %507 : vector<2x128xf32>
    %516 = arith.addf %514, %515 : vector<2x128xf32>
    %517 = math.tanh %516 : vector<2x128xf32>
    %518 = arith.mulf %513, %517 : vector<2x128xf32>
    %519 = arith.select %18, %403, %410 : vector<2x512xi1>, vector<2x512xf32>
    %c0_223 = arith.constant 0 : index
    %c0_224 = arith.constant 0 : index
    %520 = vector.load %arg7[%c0_223, %c0_224] : memref<128x512xf32, #tpu.memory_space<vmem>>, vector<128x512xf32>
    %cst_225 = arith.constant dense<0.000000e+00> : vector<2x512xf32>
    %521 = tpu.matmul %518, %520, %cst_225 {dimension_numbers = #tpu.dot_dimension_numbers<[1], [0], [0], [1], [0, 0, 1, 1], [], []>} : vector<2x128xf32>, vector<128x512xf32>, vector<2x512xf32> -> vector<2x512xf32>
    %522 = arith.addf %519, %521 : vector<2x512xf32>
    %523 = vector.extract_strided_slice %522 {offsets = [0, 0], sizes = [2, 128], strides = [1, 1]} : vector<2x512xf32> to vector<2x128xf32>
    %524 = arith.negf %523 : vector<2x128xf32>
    %525 = math.exp %524 : vector<2x128xf32>
    %cst_226 = arith.constant 1.000000e+00 : f32
    %526 = vector.broadcast %cst_226 : f32 to vector<2x128xf32>
    %527 = arith.addf %526, %525 : vector<2x128xf32>
    %528 = arith.divf %526, %527 : vector<2x128xf32>
    %529 = vector.extract_strided_slice %522 {offsets = [0, 128], sizes = [2, 128], strides = [1, 1]} : vector<2x512xf32> to vector<2x128xf32>
    %530 = arith.negf %529 : vector<2x128xf32>
    %531 = math.exp %530 : vector<2x128xf32>
    %cst_227 = arith.constant 1.000000e+00 : f32
    %532 = vector.broadcast %cst_227 : f32 to vector<2x128xf32>
    %533 = arith.addf %532, %531 : vector<2x128xf32>
    %534 = arith.divf %532, %533 : vector<2x128xf32>
    %535 = vector.extract_strided_slice %522 {offsets = [0, 256], sizes = [2, 128], strides = [1, 1]} : vector<2x512xf32> to vector<2x128xf32>
    %536 = math.tanh %535 : vector<2x128xf32>
    %537 = vector.extract_strided_slice %522 {offsets = [0, 384], sizes = [2, 128], strides = [1, 1]} : vector<2x512xf32> to vector<2x128xf32>
    %538 = arith.negf %537 : vector<2x128xf32>
    %539 = math.exp %538 : vector<2x128xf32>
    %cst_228 = arith.constant 1.000000e+00 : f32
    %540 = vector.broadcast %cst_228 : f32 to vector<2x128xf32>
    %541 = arith.addf %540, %539 : vector<2x128xf32>
    %542 = arith.divf %540, %541 : vector<2x128xf32>
    %543 = arith.mulf %534, %516 : vector<2x128xf32>
    %544 = arith.mulf %528, %536 : vector<2x128xf32>
    %545 = arith.addf %543, %544 : vector<2x128xf32>
    %546 = math.tanh %545 : vector<2x128xf32>
    %547 = arith.mulf %542, %546 : vector<2x128xf32>
    %548 = arith.select %18, %410, %403 : vector<2x512xi1>, vector<2x512xf32>
    %c0_229 = arith.constant 0 : index
    %c0_230 = arith.constant 0 : index
    %549 = vector.load %arg7[%c0_229, %c0_230] : memref<128x512xf32, #tpu.memory_space<vmem>>, vector<128x512xf32>
    %cst_231 = arith.constant dense<0.000000e+00> : vector<2x512xf32>
    %550 = tpu.matmul %547, %549, %cst_231 {dimension_numbers = #tpu.dot_dimension_numbers<[1], [0], [0], [1], [0, 0, 1, 1], [], []>} : vector<2x128xf32>, vector<128x512xf32>, vector<2x512xf32> -> vector<2x512xf32>
    %551 = arith.addf %548, %550 : vector<2x512xf32>
    %552 = vector.extract_strided_slice %551 {offsets = [0, 0], sizes = [2, 128], strides = [1, 1]} : vector<2x512xf32> to vector<2x128xf32>
    %553 = arith.negf %552 : vector<2x128xf32>
    %554 = math.exp %553 : vector<2x128xf32>
    %cst_232 = arith.constant 1.000000e+00 : f32
    %555 = vector.broadcast %cst_232 : f32 to vector<2x128xf32>
    %556 = arith.addf %555, %554 : vector<2x128xf32>
    %557 = arith.divf %555, %556 : vector<2x128xf32>
    %558 = vector.extract_strided_slice %551 {offsets = [0, 128], sizes = [2, 128], strides = [1, 1]} : vector<2x512xf32> to vector<2x128xf32>
    %559 = arith.negf %558 : vector<2x128xf32>
    %560 = math.exp %559 : vector<2x128xf32>
    %cst_233 = arith.constant 1.000000e+00 : f32
    %561 = vector.broadcast %cst_233 : f32 to vector<2x128xf32>
    %562 = arith.addf %561, %560 : vector<2x128xf32>
    %563 = arith.divf %561, %562 : vector<2x128xf32>
    %564 = vector.extract_strided_slice %551 {offsets = [0, 256], sizes = [2, 128], strides = [1, 1]} : vector<2x512xf32> to vector<2x128xf32>
    %565 = math.tanh %564 : vector<2x128xf32>
    %566 = vector.extract_strided_slice %551 {offsets = [0, 384], sizes = [2, 128], strides = [1, 1]} : vector<2x512xf32> to vector<2x128xf32>
    %567 = arith.negf %566 : vector<2x128xf32>
    %568 = math.exp %567 : vector<2x128xf32>
    %cst_234 = arith.constant 1.000000e+00 : f32
    %569 = vector.broadcast %cst_234 : f32 to vector<2x128xf32>
    %570 = arith.addf %569, %568 : vector<2x128xf32>
    %571 = arith.divf %569, %570 : vector<2x128xf32>
    %572 = arith.mulf %563, %545 : vector<2x128xf32>
    %573 = arith.mulf %557, %565 : vector<2x128xf32>
    %574 = arith.addf %572, %573 : vector<2x128xf32>
    %575 = math.tanh %574 : vector<2x128xf32>
    %576 = arith.mulf %571, %575 : vector<2x128xf32>
    %577 = arith.select %18, %417, %396 : vector<2x512xi1>, vector<2x512xf32>
    %c0_235 = arith.constant 0 : index
    %c0_236 = arith.constant 0 : index
    %578 = vector.load %arg7[%c0_235, %c0_236] : memref<128x512xf32, #tpu.memory_space<vmem>>, vector<128x512xf32>
    %cst_237 = arith.constant dense<0.000000e+00> : vector<2x512xf32>
    %579 = tpu.matmul %576, %578, %cst_237 {dimension_numbers = #tpu.dot_dimension_numbers<[1], [0], [0], [1], [0, 0, 1, 1], [], []>} : vector<2x128xf32>, vector<128x512xf32>, vector<2x512xf32> -> vector<2x512xf32>
    %580 = arith.addf %577, %579 : vector<2x512xf32>
    %581 = vector.extract_strided_slice %580 {offsets = [0, 0], sizes = [2, 128], strides = [1, 1]} : vector<2x512xf32> to vector<2x128xf32>
    %582 = arith.negf %581 : vector<2x128xf32>
    %583 = math.exp %582 : vector<2x128xf32>
    %cst_238 = arith.constant 1.000000e+00 : f32
    %584 = vector.broadcast %cst_238 : f32 to vector<2x128xf32>
    %585 = arith.addf %584, %583 : vector<2x128xf32>
    %586 = arith.divf %584, %585 : vector<2x128xf32>
    %587 = vector.extract_strided_slice %580 {offsets = [0, 128], sizes = [2, 128], strides = [1, 1]} : vector<2x512xf32> to vector<2x128xf32>
    %588 = arith.negf %587 : vector<2x128xf32>
    %589 = math.exp %588 : vector<2x128xf32>
    %cst_239 = arith.constant 1.000000e+00 : f32
    %590 = vector.broadcast %cst_239 : f32 to vector<2x128xf32>
    %591 = arith.addf %590, %589 : vector<2x128xf32>
    %592 = arith.divf %590, %591 : vector<2x128xf32>
    %593 = vector.extract_strided_slice %580 {offsets = [0, 256], sizes = [2, 128], strides = [1, 1]} : vector<2x512xf32> to vector<2x128xf32>
    %594 = math.tanh %593 : vector<2x128xf32>
    %595 = vector.extract_strided_slice %580 {offsets = [0, 384], sizes = [2, 128], strides = [1, 1]} : vector<2x512xf32> to vector<2x128xf32>
    %596 = arith.negf %595 : vector<2x128xf32>
    %597 = math.exp %596 : vector<2x128xf32>
    %cst_240 = arith.constant 1.000000e+00 : f32
    %598 = vector.broadcast %cst_240 : f32 to vector<2x128xf32>
    %599 = arith.addf %598, %597 : vector<2x128xf32>
    %600 = arith.divf %598, %599 : vector<2x128xf32>
    %601 = arith.mulf %592, %574 : vector<2x128xf32>
    %602 = arith.mulf %586, %594 : vector<2x128xf32>
    %603 = arith.addf %601, %602 : vector<2x128xf32>
    %604 = math.tanh %603 : vector<2x128xf32>
    %605 = arith.mulf %600, %604 : vector<2x128xf32>
    %606 = arith.select %18, %424, %389 : vector<2x512xi1>, vector<2x512xf32>
    %c0_241 = arith.constant 0 : index
    %c0_242 = arith.constant 0 : index
    %607 = vector.load %arg7[%c0_241, %c0_242] : memref<128x512xf32, #tpu.memory_space<vmem>>, vector<128x512xf32>
    %cst_243 = arith.constant dense<0.000000e+00> : vector<2x512xf32>
    %608 = tpu.matmul %605, %607, %cst_243 {dimension_numbers = #tpu.dot_dimension_numbers<[1], [0], [0], [1], [0, 0, 1, 1], [], []>} : vector<2x128xf32>, vector<128x512xf32>, vector<2x512xf32> -> vector<2x512xf32>
    %609 = arith.addf %606, %608 : vector<2x512xf32>
    %610 = vector.extract_strided_slice %609 {offsets = [0, 0], sizes = [2, 128], strides = [1, 1]} : vector<2x512xf32> to vector<2x128xf32>
    %611 = arith.negf %610 : vector<2x128xf32>
    %612 = math.exp %611 : vector<2x128xf32>
    %cst_244 = arith.constant 1.000000e+00 : f32
    %613 = vector.broadcast %cst_244 : f32 to vector<2x128xf32>
    %614 = arith.addf %613, %612 : vector<2x128xf32>
    %615 = arith.divf %613, %614 : vector<2x128xf32>
    %616 = vector.extract_strided_slice %609 {offsets = [0, 128], sizes = [2, 128], strides = [1, 1]} : vector<2x512xf32> to vector<2x128xf32>
    %617 = arith.negf %616 : vector<2x128xf32>
    %618 = math.exp %617 : vector<2x128xf32>
    %cst_245 = arith.constant 1.000000e+00 : f32
    %619 = vector.broadcast %cst_245 : f32 to vector<2x128xf32>
    %620 = arith.addf %619, %618 : vector<2x128xf32>
    %621 = arith.divf %619, %620 : vector<2x128xf32>
    %622 = vector.extract_strided_slice %609 {offsets = [0, 256], sizes = [2, 128], strides = [1, 1]} : vector<2x512xf32> to vector<2x128xf32>
    %623 = math.tanh %622 : vector<2x128xf32>
    %624 = vector.extract_strided_slice %609 {offsets = [0, 384], sizes = [2, 128], strides = [1, 1]} : vector<2x512xf32> to vector<2x128xf32>
    %625 = arith.negf %624 : vector<2x128xf32>
    %626 = math.exp %625 : vector<2x128xf32>
    %cst_246 = arith.constant 1.000000e+00 : f32
    %627 = vector.broadcast %cst_246 : f32 to vector<2x128xf32>
    %628 = arith.addf %627, %626 : vector<2x128xf32>
    %629 = arith.divf %627, %628 : vector<2x128xf32>
    %630 = arith.mulf %621, %603 : vector<2x128xf32>
    %631 = arith.mulf %615, %623 : vector<2x128xf32>
    %632 = arith.addf %630, %631 : vector<2x128xf32>
    %633 = math.tanh %632 : vector<2x128xf32>
    %634 = arith.mulf %629, %633 : vector<2x128xf32>
    %635 = arith.select %18, %431, %382 : vector<2x512xi1>, vector<2x512xf32>
    %c0_247 = arith.constant 0 : index
    %c0_248 = arith.constant 0 : index
    %636 = vector.load %arg7[%c0_247, %c0_248] : memref<128x512xf32, #tpu.memory_space<vmem>>, vector<128x512xf32>
    %cst_249 = arith.constant dense<0.000000e+00> : vector<2x512xf32>
    %637 = tpu.matmul %634, %636, %cst_249 {dimension_numbers = #tpu.dot_dimension_numbers<[1], [0], [0], [1], [0, 0, 1, 1], [], []>} : vector<2x128xf32>, vector<128x512xf32>, vector<2x512xf32> -> vector<2x512xf32>
    %638 = arith.addf %635, %637 : vector<2x512xf32>
    %639 = vector.extract_strided_slice %638 {offsets = [0, 0], sizes = [2, 128], strides = [1, 1]} : vector<2x512xf32> to vector<2x128xf32>
    %640 = arith.negf %639 : vector<2x128xf32>
    %641 = math.exp %640 : vector<2x128xf32>
    %cst_250 = arith.constant 1.000000e+00 : f32
    %642 = vector.broadcast %cst_250 : f32 to vector<2x128xf32>
    %643 = arith.addf %642, %641 : vector<2x128xf32>
    %644 = arith.divf %642, %643 : vector<2x128xf32>
    %645 = vector.extract_strided_slice %638 {offsets = [0, 128], sizes = [2, 128], strides = [1, 1]} : vector<2x512xf32> to vector<2x128xf32>
    %646 = arith.negf %645 : vector<2x128xf32>
    %647 = math.exp %646 : vector<2x128xf32>
    %cst_251 = arith.constant 1.000000e+00 : f32
    %648 = vector.broadcast %cst_251 : f32 to vector<2x128xf32>
    %649 = arith.addf %648, %647 : vector<2x128xf32>
    %650 = arith.divf %648, %649 : vector<2x128xf32>
    %651 = vector.extract_strided_slice %638 {offsets = [0, 256], sizes = [2, 128], strides = [1, 1]} : vector<2x512xf32> to vector<2x128xf32>
    %652 = math.tanh %651 : vector<2x128xf32>
    %653 = vector.extract_strided_slice %638 {offsets = [0, 384], sizes = [2, 128], strides = [1, 1]} : vector<2x512xf32> to vector<2x128xf32>
    %654 = arith.negf %653 : vector<2x128xf32>
    %655 = math.exp %654 : vector<2x128xf32>
    %cst_252 = arith.constant 1.000000e+00 : f32
    %656 = vector.broadcast %cst_252 : f32 to vector<2x128xf32>
    %657 = arith.addf %656, %655 : vector<2x128xf32>
    %658 = arith.divf %656, %657 : vector<2x128xf32>
    %659 = arith.mulf %650, %632 : vector<2x128xf32>
    %660 = arith.mulf %644, %652 : vector<2x128xf32>
    %661 = arith.addf %659, %660 : vector<2x128xf32>
    %662 = math.tanh %661 : vector<2x128xf32>
    %663 = arith.mulf %658, %662 : vector<2x128xf32>
    %664 = arith.select %21, %460, %663 : vector<2x128xi1>, vector<2x128xf32>
    %665 = arith.select %21, %489, %634 : vector<2x128xi1>, vector<2x128xf32>
    %666 = arith.select %21, %518, %605 : vector<2x128xi1>, vector<2x128xf32>
    %667 = arith.select %21, %547, %576 : vector<2x128xi1>, vector<2x128xf32>
    %668 = arith.select %21, %576, %547 : vector<2x128xi1>, vector<2x128xf32>
    %669 = arith.select %21, %605, %518 : vector<2x128xi1>, vector<2x128xf32>
    %670 = arith.select %21, %634, %489 : vector<2x128xi1>, vector<2x128xf32>
    %671 = arith.select %21, %663, %460 : vector<2x128xi1>, vector<2x128xf32>
    %cst_253 = arith.constant 0.000000e+00 : f32
    %672 = vector.broadcast %cst_253 : f32 to vector<2x128xf32>
    %673 = arith.maximumf %664, %672 : vector<2x128xf32>
    %c0_254 = arith.constant 0 : index
    %c0_255 = arith.constant 0 : index
    %674 = vector.load %arg9[%c0_254, %c0_255] : memref<128x2xf32, #tpu.memory_space<vmem>>, vector<128x2xf32>
    %cst_256 = arith.constant dense<0.000000e+00> : vector<2x2xf32>
    %675 = tpu.matmul %673, %674, %cst_256 {dimension_numbers = #tpu.dot_dimension_numbers<[1], [0], [0], [1], [0, 0, 1, 1], [], []>} : vector<2x128xf32>, vector<128x2xf32>, vector<2x2xf32> -> vector<2x2xf32>
    %c0_257 = arith.constant 0 : index
    %c0_258 = arith.constant 0 : index
    %676 = vector.load %arg10[%c0_257, %c0_258] : memref<1x2xf32, #tpu.memory_space<vmem>>, vector<1x2xf32>
    %677 = vector.broadcast %676 : vector<1x2xf32> to vector<2x2xf32>
    %678 = arith.addf %675, %677 : vector<2x2xf32>
    %c0_259 = arith.constant 0 : index
    %c0_260 = arith.constant 0 : index
    %c0_261 = arith.constant 0 : index
    %679 = vector.load %arg11[%c0_259, %c0_260, %c0_261] : memref<8x2x2xf32, #tpu.memory_space<vmem>>, vector<1x2x2xf32>
    %680 = vector.shape_cast %679 : vector<1x2x2xf32> to vector<2x2xf32>
    %681 = vector.shape_cast %678 : vector<2x2xf32> to vector<1x2x2xf32>
    tpu.vector_store %arg11[%c0_259, %c0_260, %c0_261], %681 {strides = array<i32>} : memref<8x2x2xf32, #tpu.memory_space<vmem>>, vector<1x2x2xf32>,
    %cst_262 = arith.constant 0.000000e+00 : f32
    %682 = vector.broadcast %cst_262 : f32 to vector<2x128xf32>
    %683 = arith.maximumf %665, %682 : vector<2x128xf32>
    %c0_263 = arith.constant 0 : index
    %c0_264 = arith.constant 0 : index
    %684 = vector.load %arg9[%c0_263, %c0_264] : memref<128x2xf32, #tpu.memory_space<vmem>>, vector<128x2xf32>
    %cst_265 = arith.constant dense<0.000000e+00> : vector<2x2xf32>
    %685 = tpu.matmul %683, %684, %cst_265 {dimension_numbers = #tpu.dot_dimension_numbers<[1], [0], [0], [1], [0, 0, 1, 1], [], []>} : vector<2x128xf32>, vector<128x2xf32>, vector<2x2xf32> -> vector<2x2xf32>
    %c0_266 = arith.constant 0 : index
    %c0_267 = arith.constant 0 : index
    %686 = vector.load %arg10[%c0_266, %c0_267] : memref<1x2xf32, #tpu.memory_space<vmem>>, vector<1x2xf32>
    %687 = vector.broadcast %686 : vector<1x2xf32> to vector<2x2xf32>
    %688 = arith.addf %685, %687 : vector<2x2xf32>
    %c1_268 = arith.constant 1 : index
    %c0_269 = arith.constant 0 : index
    %c0_270 = arith.constant 0 : index
    %689 = vector.load %arg11[%c1_268, %c0_269, %c0_270] : memref<8x2x2xf32, #tpu.memory_space<vmem>>, vector<1x2x2xf32>
    %690 = vector.shape_cast %689 : vector<1x2x2xf32> to vector<2x2xf32>
    %691 = vector.shape_cast %688 : vector<2x2xf32> to vector<1x2x2xf32>
    tpu.vector_store %arg11[%c1_268, %c0_269, %c0_270], %691 {strides = array<i32>} : memref<8x2x2xf32, #tpu.memory_space<vmem>>, vector<1x2x2xf32>,
    %cst_271 = arith.constant 0.000000e+00 : f32
    %692 = vector.broadcast %cst_271 : f32 to vector<2x128xf32>
    %693 = arith.maximumf %666, %692 : vector<2x128xf32>
    %c0_272 = arith.constant 0 : index
    %c0_273 = arith.constant 0 : index
    %694 = vector.load %arg9[%c0_272, %c0_273] : memref<128x2xf32, #tpu.memory_space<vmem>>, vector<128x2xf32>
    %cst_274 = arith.constant dense<0.000000e+00> : vector<2x2xf32>
    %695 = tpu.matmul %693, %694, %cst_274 {dimension_numbers = #tpu.dot_dimension_numbers<[1], [0], [0], [1], [0, 0, 1, 1], [], []>} : vector<2x128xf32>, vector<128x2xf32>, vector<2x2xf32> -> vector<2x2xf32>
    %c0_275 = arith.constant 0 : index
    %c0_276 = arith.constant 0 : index
    %696 = vector.load %arg10[%c0_275, %c0_276] : memref<1x2xf32, #tpu.memory_space<vmem>>, vector<1x2xf32>
    %697 = vector.broadcast %696 : vector<1x2xf32> to vector<2x2xf32>
    %698 = arith.addf %695, %697 : vector<2x2xf32>
    %c2_277 = arith.constant 2 : index
    %c0_278 = arith.constant 0 : index
    %c0_279 = arith.constant 0 : index
    %699 = vector.load %arg11[%c2_277, %c0_278, %c0_279] : memref<8x2x2xf32, #tpu.memory_space<vmem>>, vector<1x2x2xf32>
    %700 = vector.shape_cast %699 : vector<1x2x2xf32> to vector<2x2xf32>
    %701 = vector.shape_cast %698 : vector<2x2xf32> to vector<1x2x2xf32>
    tpu.vector_store %arg11[%c2_277, %c0_278, %c0_279], %701 {strides = array<i32>} : memref<8x2x2xf32, #tpu.memory_space<vmem>>, vector<1x2x2xf32>,
    %cst_280 = arith.constant 0.000000e+00 : f32
    %702 = vector.broadcast %cst_280 : f32 to vector<2x128xf32>
    %703 = arith.maximumf %667, %702 : vector<2x128xf32>
    %c0_281 = arith.constant 0 : index
    %c0_282 = arith.constant 0 : index
    %704 = vector.load %arg9[%c0_281, %c0_282] : memref<128x2xf32, #tpu.memory_space<vmem>>, vector<128x2xf32>
    %cst_283 = arith.constant dense<0.000000e+00> : vector<2x2xf32>
    %705 = tpu.matmul %703, %704, %cst_283 {dimension_numbers = #tpu.dot_dimension_numbers<[1], [0], [0], [1], [0, 0, 1, 1], [], []>} : vector<2x128xf32>, vector<128x2xf32>, vector<2x2xf32> -> vector<2x2xf32>
    %c0_284 = arith.constant 0 : index
    %c0_285 = arith.constant 0 : index
    %706 = vector.load %arg10[%c0_284, %c0_285] : memref<1x2xf32, #tpu.memory_space<vmem>>, vector<1x2xf32>
    %707 = vector.broadcast %706 : vector<1x2xf32> to vector<2x2xf32>
    %708 = arith.addf %705, %707 : vector<2x2xf32>
    %c3_286 = arith.constant 3 : index
    %c0_287 = arith.constant 0 : index
    %c0_288 = arith.constant 0 : index
    %709 = vector.load %arg11[%c3_286, %c0_287, %c0_288] : memref<8x2x2xf32, #tpu.memory_space<vmem>>, vector<1x2x2xf32>
    %710 = vector.shape_cast %709 : vector<1x2x2xf32> to vector<2x2xf32>
    %711 = vector.shape_cast %708 : vector<2x2xf32> to vector<1x2x2xf32>
    tpu.vector_store %arg11[%c3_286, %c0_287, %c0_288], %711 {strides = array<i32>} : memref<8x2x2xf32, #tpu.memory_space<vmem>>, vector<1x2x2xf32>,
    %cst_289 = arith.constant 0.000000e+00 : f32
    %712 = vector.broadcast %cst_289 : f32 to vector<2x128xf32>
    %713 = arith.maximumf %668, %712 : vector<2x128xf32>
    %c0_290 = arith.constant 0 : index
    %c0_291 = arith.constant 0 : index
    %714 = vector.load %arg9[%c0_290, %c0_291] : memref<128x2xf32, #tpu.memory_space<vmem>>, vector<128x2xf32>
    %cst_292 = arith.constant dense<0.000000e+00> : vector<2x2xf32>
    %715 = tpu.matmul %713, %714, %cst_292 {dimension_numbers = #tpu.dot_dimension_numbers<[1], [0], [0], [1], [0, 0, 1, 1], [], []>} : vector<2x128xf32>, vector<128x2xf32>, vector<2x2xf32> -> vector<2x2xf32>
    %c0_293 = arith.constant 0 : index
    %c0_294 = arith.constant 0 : index
    %716 = vector.load %arg10[%c0_293, %c0_294] : memref<1x2xf32, #tpu.memory_space<vmem>>, vector<1x2xf32>
    %717 = vector.broadcast %716 : vector<1x2xf32> to vector<2x2xf32>
    %718 = arith.addf %715, %717 : vector<2x2xf32>
    %c4_295 = arith.constant 4 : index
    %c0_296 = arith.constant 0 : index
    %c0_297 = arith.constant 0 : index
    %719 = vector.load %arg11[%c4_295, %c0_296, %c0_297] : memref<8x2x2xf32, #tpu.memory_space<vmem>>, vector<1x2x2xf32>
    %720 = vector.shape_cast %719 : vector<1x2x2xf32> to vector<2x2xf32>
    %721 = vector.shape_cast %718 : vector<2x2xf32> to vector<1x2x2xf32>
    tpu.vector_store %arg11[%c4_295, %c0_296, %c0_297], %721 {strides = array<i32>} : memref<8x2x2xf32, #tpu.memory_space<vmem>>, vector<1x2x2xf32>,
    %cst_298 = arith.constant 0.000000e+00 : f32
    %722 = vector.broadcast %cst_298 : f32 to vector<2x128xf32>
    %723 = arith.maximumf %669, %722 : vector<2x128xf32>
    %c0_299 = arith.constant 0 : index
    %c0_300 = arith.constant 0 : index
    %724 = vector.load %arg9[%c0_299, %c0_300] : memref<128x2xf32, #tpu.memory_space<vmem>>, vector<128x2xf32>
    %cst_301 = arith.constant dense<0.000000e+00> : vector<2x2xf32>
    %725 = tpu.matmul %723, %724, %cst_301 {dimension_numbers = #tpu.dot_dimension_numbers<[1], [0], [0], [1], [0, 0, 1, 1], [], []>} : vector<2x128xf32>, vector<128x2xf32>, vector<2x2xf32> -> vector<2x2xf32>
    %c0_302 = arith.constant 0 : index
    %c0_303 = arith.constant 0 : index
    %726 = vector.load %arg10[%c0_302, %c0_303] : memref<1x2xf32, #tpu.memory_space<vmem>>, vector<1x2xf32>
    %727 = vector.broadcast %726 : vector<1x2xf32> to vector<2x2xf32>
    %728 = arith.addf %725, %727 : vector<2x2xf32>
    %c5_304 = arith.constant 5 : index
    %c0_305 = arith.constant 0 : index
    %c0_306 = arith.constant 0 : index
    %729 = vector.load %arg11[%c5_304, %c0_305, %c0_306] : memref<8x2x2xf32, #tpu.memory_space<vmem>>, vector<1x2x2xf32>
    %730 = vector.shape_cast %729 : vector<1x2x2xf32> to vector<2x2xf32>
    %731 = vector.shape_cast %728 : vector<2x2xf32> to vector<1x2x2xf32>
    tpu.vector_store %arg11[%c5_304, %c0_305, %c0_306], %731 {strides = array<i32>} : memref<8x2x2xf32, #tpu.memory_space<vmem>>, vector<1x2x2xf32>,
    %cst_307 = arith.constant 0.000000e+00 : f32
    %732 = vector.broadcast %cst_307 : f32 to vector<2x128xf32>
    %733 = arith.maximumf %670, %732 : vector<2x128xf32>
    %c0_308 = arith.constant 0 : index
    %c0_309 = arith.constant 0 : index
    %734 = vector.load %arg9[%c0_308, %c0_309] : memref<128x2xf32, #tpu.memory_space<vmem>>, vector<128x2xf32>
    %cst_310 = arith.constant dense<0.000000e+00> : vector<2x2xf32>
    %735 = tpu.matmul %733, %734, %cst_310 {dimension_numbers = #tpu.dot_dimension_numbers<[1], [0], [0], [1], [0, 0, 1, 1], [], []>} : vector<2x128xf32>, vector<128x2xf32>, vector<2x2xf32> -> vector<2x2xf32>
    %c0_311 = arith.constant 0 : index
    %c0_312 = arith.constant 0 : index
    %736 = vector.load %arg10[%c0_311, %c0_312] : memref<1x2xf32, #tpu.memory_space<vmem>>, vector<1x2xf32>
    %737 = vector.broadcast %736 : vector<1x2xf32> to vector<2x2xf32>
    %738 = arith.addf %735, %737 : vector<2x2xf32>
    %c6_313 = arith.constant 6 : index
    %c0_314 = arith.constant 0 : index
    %c0_315 = arith.constant 0 : index
    %739 = vector.load %arg11[%c6_313, %c0_314, %c0_315] : memref<8x2x2xf32, #tpu.memory_space<vmem>>, vector<1x2x2xf32>
    %740 = vector.shape_cast %739 : vector<1x2x2xf32> to vector<2x2xf32>
    %741 = vector.shape_cast %738 : vector<2x2xf32> to vector<1x2x2xf32>
    tpu.vector_store %arg11[%c6_313, %c0_314, %c0_315], %741 {strides = array<i32>} : memref<8x2x2xf32, #tpu.memory_space<vmem>>, vector<1x2x2xf32>,
    %cst_316 = arith.constant 0.000000e+00 : f32
    %742 = vector.broadcast %cst_316 : f32 to vector<2x128xf32>
    %743 = arith.maximumf %671, %742 : vector<2x128xf32>
    %c0_317 = arith.constant 0 : index
    %c0_318 = arith.constant 0 : index
    %744 = vector.load %arg9[%c0_317, %c0_318] : memref<128x2xf32, #tpu.memory_space<vmem>>, vector<128x2xf32>
    %cst_319 = arith.constant dense<0.000000e+00> : vector<2x2xf32>
    %745 = tpu.matmul %743, %744, %cst_319 {dimension_numbers = #tpu.dot_dimension_numbers<[1], [0], [0], [1], [0, 0, 1, 1], [], []>} : vector<2x128xf32>, vector<128x2xf32>, vector<2x2xf32> -> vector<2x2xf32>
    %c0_320 = arith.constant 0 : index
    %c0_321 = arith.constant 0 : index
    %746 = vector.load %arg10[%c0_320, %c0_321] : memref<1x2xf32, #tpu.memory_space<vmem>>, vector<1x2xf32>
    %747 = vector.broadcast %746 : vector<1x2xf32> to vector<2x2xf32>
    %748 = arith.addf %745, %747 : vector<2x2xf32>
    %c7_322 = arith.constant 7 : index
    %c0_323 = arith.constant 0 : index
    %c0_324 = arith.constant 0 : index
    %749 = vector.load %arg11[%c7_322, %c0_323, %c0_324] : memref<8x2x2xf32, #tpu.memory_space<vmem>>, vector<1x2x2xf32>
    %750 = vector.shape_cast %749 : vector<1x2x2xf32> to vector<2x2xf32>
    %751 = vector.shape_cast %748 : vector<2x2xf32> to vector<1x2x2xf32>
    tpu.vector_store %arg11[%c7_322, %c0_323, %c0_324], %751 {strides = array<i32>} : memref<8x2x2xf32, #tpu.memory_space<vmem>>, vector<1x2x2xf32>,
    return
  }
}

</mosaic_0001>

<bundles_post_ra>
// kernel: tec_lstm_forward.1
= control target key start
LH: loop header
LB: loop body
LE: loop exit
PB: predicated region body
PF: predicated region fallthrough
CT: control target
= control target key end

     0   :  { %16 = vsyncpa [#allocation3], 0  ;;  %s12565_s0 = inlined_call_operand.vmem [shape: f32[8,2,4], index: 0, kind: input, shape index: {}]   ;;  %s12566_s1 = inlined_call_operand.vmem [shape: f32[4,128], index: 1, kind: input, shape index: {}]   ;;  %s12567_s2 = inlined_call_operand.vmem [shape: f32[1,128], index: 2, kind: input, shape index: {}]   ;;  %s12568_s3 = inlined_call_operand.hbm [shape: f32[128,512], index: 3, kind: input, shape index: {}]   ;;  %s12569_s4 = inlined_call_operand.hbm [shape: f32[128,512], index: 4, kind: input, shape index: {}]   ;;  %s12570_s5 = inlined_call_operand.vmem [shape: f32[1,512], index: 5, kind: input, shape index: {}]   ;;  %s12571_s6 = inlined_call_operand.hbm [shape: f32[128,512], index: 6, kind: input, shape index: {}]   ;;  %s12572_s7 = inlined_call_operand.hbm [shape: f32[128,512], index: 7, kind: input, shape index: {}]   ;;  %s12573_s8 = inlined_call_operand.vmem [shape: f32[1,512], index: 8, kind: input, shape index: {}]   ;;  %s12574_s9 = inlined_call_operand.vmem [shape: f32[128,2], index: 9, kind: input, shape index: {}]   ;;  %s12575_s10 = inlined_call_operand.vmem [shape: f32[1,2], index: 10, kind: input, shape index: {}]   ;;  %s12576_s11 = inlined_call_operand.vmem [shape: f32[8,2,2], index: 11, kind: output, shape index: {}]  }
   0x1   :  { %17 = vsyncpa [#allocation5], 0 }
   0x2   :  { %18 = vsyncpa [#allocation8], 0  ;;  %s8093_s17 = smov [#allocation4]   ;;  %s8094_s19 = smov [#allocation2]  }
   0x3   :  { %s42_s18 = sshll.u32 %s8093_s17, 4  ;;  %s30_s20 = sshll.u32 %s8094_s19, 4  ;;  %s43_s18 = int_to_ptr.vmem [resolvable:$true] %s42_s18  ;;  %s31_s20 = int_to_ptr.vmem [resolvable:$true] %s30_s20 }
   0x4   :  { %s8015_s21 = scalar_lea.vmem %s43_s18, 8192  ;;  %p8020_p1 = scmp.lt.s32.totalorder %s43_s18, %s43_s18 }
   0x5   :  { %p8016_p0 = scmp.ne.s32.totalorder %s43_s18, %s8015_s21  ;;  %p8021_p2 = scmp.lt.s32.totalorder %s8015_s21, %s8015_s21 }
   0x7   :  { %p8022_p3 = por %p8021_p2, %p8020_p1 }
   0x9   :  { %p8023_p4 = pnand %p8022_p3, %p8016_p0 }
   0xb   :  { %8026 = shalt.err (!%p8023_p4)
}
   0xc   :  { %s8095_s22 = smov 512   ;;  %s8096_s23 = smov 32  }
   0xd   :  { %48 = dma.hbm_to_vmem [thread:$0]  %s12569_s4, 8192, %s43_s18, [#allocation5], %s8095_s22, %s8095_s22, %s8096_s23  }
   0xe   :  { %s8035_s26 = scalar_lea.vmem %s31_s20, 8192  ;;  %p8040_p6 = scmp.lt.s32.totalorder %s31_s20, %s31_s20 }
   0xf   :  { %p8036_p5 = scmp.ne.s32.totalorder %s31_s20, %s8035_s26  ;;  %p8041_p7 = scmp.lt.s32.totalorder %s8035_s26, %s8035_s26 }
  0x11   :  { %p8042_p8 = por %p8041_p7, %p8040_p6 }
  0x13   :  { %p8043_p9 = pnand %p8042_p8, %p8036_p5 }
  0x15   :  { %8046 = shalt.err (!%p8043_p9)
}
  0x16   :  { %36 = dma.hbm_to_vmem [thread:$0]  %s12568_s3, 8192, %s31_s20, [#allocation3], %s8095_s22, %s8095_s22, %s8096_s23  }
  0x17   :  { %s8097_s29 = smov [#allocation6]   ;;  %s8098_s12 = smov [#allocation7]  }
  0x18   :  { %s56_s30 = sshll.u32 %s8097_s29, 4  ;;  %s68_s13 = sshll.u32 %s8098_s12, 4  ;;  %s57_s30 = int_to_ptr.vmem [resolvable:$true] %s56_s30  ;;  %s69_s13 = int_to_ptr.vmem [resolvable:$true] %s68_s13 }
  0x19   :  { %s8055_s4 = scalar_lea.vmem %s57_s30, 8192  ;;  %p8060_p11 = scmp.lt.s32.totalorder %s57_s30, %s57_s30 }
  0x1a   :  { %p8056_p10 = scmp.ne.s32.totalorder %s57_s30, %s8055_s4  ;;  %p8061_p12 = scmp.lt.s32.totalorder %s8055_s4, %s8055_s4 }
  0x1c   :  { %p8062_p13 = por %p8061_p12, %p8060_p11 }
  0x1e   :  { %p8063_p0 = pnand %p8062_p13, %p8056_p10 }
  0x20   :  { %8066 = shalt.err (!%p8063_p0)
}
  0x21   :  { %62 = dma.hbm_to_vmem [thread:$0]  %s12571_s6, 8192, %s57_s30, [#allocation5], %s8095_s22, %s8095_s22, %s8096_s23  }
  0x22   :  { %s8075_s3 = scalar_lea.vmem %s69_s13, 8192  ;;  %p8080_p2 = scmp.lt.s32.totalorder %s69_s13, %s69_s13 }
  0x23   :  { %p8076_p1 = scmp.ne.s32.totalorder %s69_s13, %s8075_s3  ;;  %p8081_p3 = scmp.lt.s32.totalorder %s8075_s3, %s8075_s3 }
  0x25   :  { %p8082_p4 = por %p8081_p3, %p8080_p2 }
  0x27   :  { %p8083_p5 = pnand %p8082_p4, %p8076_p1 }
  0x29   :  { %8086 = shalt.err (!%p8083_p5)
}
  0x2a   :  { %74 = dma.hbm_to_vmem [thread:$0]  %s12572_s7, 8192, %s69_s13, [#allocation8], %s8095_s22, %s8095_s22, %s8096_s23  }
  0x2b   :  { %8087 = dma.done.wait [#allocation3], 8192  }
  0x2c   :  { %8088 = vsyncadd [#allocation3], 4294959104 }
  0x2d   :  { %8089 = dma.done.wait [#allocation5], 16384  }
  0x2e   :  { %8090 = vsyncadd [#allocation5], 4294950912 }
  0x2f   :  { %8091 = dma.done.wait [#allocation8], 8192  }
  0x30   :  { %8092 = vsyncadd [#allocation8], 4294959104  ;;  %v12577_v0 = vmov 0.0   ;;  %vm8100_vm0 = vmmov 0   ;;  %vm164_vm1 = vcmask 1043456   ;;  %vm160_vm2 = vcmask 31744  }
  0x31   :  { %7165 = vmatprep.subr.mxu0 %v12577_v0  ;;  %7167 = vmatprep.mubr.msk.f32.mxu0 %vm8100_vm0, %v12577_v0  ;;  %v8192_v1 = vld [vmem:[%s12566_s1] sm:$0xf]  ;;  %v8197_v3 = vld [vmem:[#allocation2 + $0x1e8] sm:$0xff]  ;;  %v8204_v5 = vld [vmem:[#allocation2 + $0x1f8] sm:$0xff]  ;;  %vm6245_vm7 = vcmask 9216  }
  0x32   :  { %389 = vmatprep.mubr.f32.mxu1 %v12577_v0  ;;  %v151_v2 = vld [vmem:[%s12565_s0] sm:$0x3]  ;;  %13039 = vst [vmem:[#allocation12_spill] sm:$0xff] %v8197_v3  ;;  %7166 = vmatpush3.msk.msra.mxu0 %vm164_vm1, %v8192_v1  ;;  %v8206_v6 = vld [vmem:[#allocation2 + $0x1c8] sm:$0xff]  ;;  %v8210_v7 = vld [vmem:[#allocation2 + $0x1f0] sm:$0xff] }
  0x33   :  { %325 = vmatprep.subr.mxu1 %v8197_v3  ;;  %v8202_v4 = vld [vmem:[#allocation2 + $0x1e0] sm:$0xff]  ;;  %7168 = vmatmul.mubr.msk.f32.vlgmr.msra.gmra.mxu0 %vm160_vm2, %v151_v2  ;;  %v8214_v9 = vld [vmem:[#allocation2 + $0x1d8] sm:$0xff]  ;;  %v8218_v10 = vld [vmem:[#allocation2 + $0x1a8] sm:$0xff] }
  0x34   :  { %326 = vmatpush1.msra.mxu1 %v8202_v4  ;;  %v8212_v8 = vld [vmem:[#allocation2 + $0x1c0] sm:$0xff]  ;;  %396 = vmatprep.subr.mxu0 %v8204_v5  ;;  %v8220_v11 = vld [vmem:[#allocation2 + $0x1d0] sm:$0xff]  ;;  %v8226_v13 = vld [vmem:[#allocation2 + $0x1b8] sm:$0xff] }
  0x35   :  { %327 = vmatprep.subr.mxu1 %v8206_v6  ;;  %v8222_v12 = vld [vmem:[#allocation2 + $0x1a0] sm:$0xff]  ;;  %397 = vmatpush1.msra.mxu0 %v8210_v7  ;;  %v8228_v14 = vld [vmem:[#allocation2 + $0x188] sm:$0xff]  ;;  %v8232_v15 = vld [vmem:[#allocation2 + $0x1b0] sm:$0xff] }
  0x36   :  { %328 = vmatpush1.msra.mxu1 %v8212_v8  ;;  %398 = vmatprep.subr.mxu0 %v8214_v9  ;;  %v8234_v16 = vld [vmem:[#allocation2 + $0x180] sm:$0xff]  ;;  %v8238_v17 = vld [vmem:[#allocation2 + $0x198] sm:$0xff]  ;;  %v8240_v18 = vld [vmem:[#allocation2 + $0x168] sm:$0xff] }
  0x37   :  { %329 = vmatprep.subr.mxu1 %v8218_v10  ;;  %399 = vmatpush1.msra.mxu0 %v8220_v11  ;;  %v8244_v19 = vld [vmem:[#allocation2 + $0x190] sm:$0xff]  ;;  %v8246_v20 = vld [vmem:[#allocation2 + $0x160] sm:$0xff]  ;;  %v8250_v21 = vld [vmem:[#allocation2 + $0x178] sm:$0xff] }
  0x38   :  { %330 = vmatpush1.msra.mxu1 %v8222_v12  ;;  %400 = vmatprep.subr.mxu0 %v8226_v13  ;;  %v8252_v22 = vld [vmem:[#allocation2 + $0x148] sm:$0xff]  ;;  %v8256_v23 = vld [vmem:[#allocation2 + $0x170] sm:$0xff]  ;;  %v8258_v24 = vld [vmem:[#allocation2 + $0x140] sm:$0xff] }
  0x39   :  { %331 = vmatprep.subr.mxu1 %v8228_v14  ;;  %401 = vmatpush1.msra.mxu0 %v8232_v15  ;;  %v8262_v25 = vld [vmem:[#allocation2 + $0x158] sm:$0xff]  ;;  %v8264_v26 = vld [vmem:[#allocation2 + $0x128] sm:$0xff]  ;;  %v8268_v27 = vld [vmem:[#allocation2 + $0x150] sm:$0xff] }
  0x3a   :  { %332 = vmatpush1.msra.mxu1 %v8234_v16  ;;  %402 = vmatprep.subr.mxu0 %v8238_v17  ;;  %v8270_v28 = vld [vmem:[#allocation2 + $0x120] sm:$0xff]  ;;  %v8274_v29 = vld [vmem:[#allocation2 + $0x138] sm:$0xff]  ;;  %v8276_v30 = vld [vmem:[#allocation2 + $0x108] sm:$0xff] }
  0x3b   :  { %333 = vmatprep.subr.mxu1 %v8240_v18  ;;  %403 = vmatpush1.msra.mxu0 %v8244_v19  ;;  %v8280_v31 = vld [vmem:[#allocation2 + $0x130] sm:$0xff]  ;;  %v8282_v32 = vld [vmem:[#allocation2 + $0x100] sm:$0xff]  ;;  %v8286_v33 = vld [vmem:[#allocation2 + $0x118] sm:$0xff] }
  0x3c   :  { %334 = vmatpush1.msra.mxu1 %v8246_v20  ;;  %404 = vmatprep.subr.mxu0 %v8250_v21  ;;  %v8288_v34 = vld [vmem:[#allocation2 + $0xe8] sm:$0xff]  ;;  %v8292_v35 = vld [vmem:[#allocation2 + $0x110] sm:$0xff]  ;;  %v8294_v36 = vld [vmem:[#allocation2 + $0xe0] sm:$0xff] }
  0x3d   :  { %335 = vmatprep.subr.mxu1 %v8252_v22  ;;  %405 = vmatpush1.msra.mxu0 %v8256_v23  ;;  %v8298_v37 = vld [vmem:[#allocation2 + $0xf8] sm:$0xff]  ;;  %v8300_v38 = vld [vmem:[#allocation2 + $0xc8] sm:$0xff]  ;;  %v8304_v39 = vld [vmem:[#allocation2 + $0xf0] sm:$0xff] }
  0x3e   :  { %336 = vmatpush1.msra.mxu1 %v8258_v24  ;;  %406 = vmatprep.subr.mxu0 %v8262_v25  ;;  %v8306_v40 = vld [vmem:[#allocation2 + $0xc0] sm:$0xff]  ;;  %v8310_v41 = vld [vmem:[#allocation2 + $0xd8] sm:$0xff]  ;;  %v8312_v42 = vld [vmem:[#allocation2 + $0xa8] sm:$0xff] }
  0x3f   :  { %337 = vmatprep.subr.mxu1 %v8264_v26  ;;  %407 = vmatpush1.msra.mxu0 %v8268_v27  ;;  %v8316_v43 = vld [vmem:[#allocation2 + $0xd0] sm:$0xff]  ;;  %v8318_v44 = vld [vmem:[#allocation2 + $0xa0] sm:$0xff]  ;;  %v8322_v45 = vld [vmem:[#allocation2 + $0xb8] sm:$0xff] }
  0x40   :  { %338 = vmatpush1.msra.mxu1 %v8270_v28  ;;  %408 = vmatprep.subr.mxu0 %v8274_v29  ;;  %v8324_v46 = vld [vmem:[#allocation2 + $0x88] sm:$0xff]  ;;  %v8328_v47 = vld [vmem:[#allocation2 + $0xb0] sm:$0xff]  ;;  %v8330_v48 = vld [vmem:[#allocation2 + $0x80] sm:$0xff] }
  0x41   :  { %339 = vmatprep.subr.mxu1 %v8276_v30  ;;  %409 = vmatpush1.msra.mxu0 %v8280_v31  ;;  %v8334_v49 = vld [vmem:[#allocation2 + $0x98] sm:$0xff]  ;;  %v8336_v50 = vld [vmem:[#allocation2 + $0x68] sm:$0xff]  ;;  %v8340_v51 = vld [vmem:[#allocation2 + $0x90] sm:$0xff] }
  0x42   :  { %340 = vmatpush1.msra.mxu1 %v8282_v32  ;;  %410 = vmatprep.subr.mxu0 %v8286_v33  ;;  %13040 = vst [vmem:[#allocation13_spill] sm:$0xff] %v8340_v51  ;;  %v8342_v52 = vld [vmem:[#allocation2 + $0x60] sm:$0xff]  ;;  %v8346_v53 = vld [vmem:[#allocation2 + $0x78] sm:$0xff]  ;;  %v8348_v54 = vld [vmem:[#allocation2 + $0x48] sm:$0xff] }
  0x43   :  { %341 = vmatprep.subr.mxu1 %v8288_v34  ;;  %411 = vmatpush1.msra.mxu0 %v8292_v35  ;;  %13041 = vst [vmem:[#allocation14_spill] sm:$0xff] %v8342_v52  ;;  %13042 = vst [vmem:[#allocation15_spill] sm:$0xff] %v8348_v54  ;;  %v8352_v55 = vld [vmem:[#allocation2 + $0x70] sm:$0xff]  ;;  %v8354_v56 = vld [vmem:[#allocation2 + $0x40] sm:$0xff] }
  0x44   :  { %342 = vmatpush1.msra.mxu1 %v8294_v36  ;;  %412 = vmatprep.subr.mxu0 %v8298_v37  ;;  %13043 = vst [vmem:[#allocation16_spill] sm:$0xff] %v8352_v55  ;;  %13044 = vst [vmem:[#allocation17_spill] sm:$0xff] %v8354_v56  ;;  %v8358_v57 = vld [vmem:[#allocation2 + $0x58] sm:$0xff]  ;;  %v8366_v58 = vld [vmem:[#allocation2 + $0x50] sm:$0xff] }
  0x45   :  { %343 = vmatprep.subr.mxu1 %v8300_v38  ;;  %413 = vmatpush1.msra.mxu0 %v8304_v39  ;;  %13045 = vst [vmem:[#allocation18_spill] sm:$0xff] %v8358_v57  ;;  %13046 = vst [vmem:[#allocation19_spill] sm:$0xff] %v8366_v58  ;;  %v8368_v59 = vld [vmem:[#allocation2 + $0x28] sm:$0xff]  ;;  %v8371_v60 = vld [vmem:[#allocation2 + $0x38] sm:$0xff] }
  0x46   :  { %344 = vmatpush1.msra.mxu1 %v8306_v40  ;;  %414 = vmatprep.subr.mxu0 %v8310_v41  ;;  %13047 = vst [vmem:[#allocation20_spill] sm:$0xff] %v8368_v59  ;;  %13048 = vst [vmem:[#allocation21_spill] sm:$0xff] %v8371_v60  ;;  %v8374_v61 = vld [vmem:[#allocation2 + $0x20] sm:$0xff]  ;;  %v8377_v62 = vld [vmem:[#allocation2 + $0x30] sm:$0xff] }
  0x47   :  { %345 = vmatprep.subr.mxu1 %v8312_v42  ;;  %415 = vmatpush1.msra.mxu0 %v8316_v43  ;;  %13049 = vst [vmem:[#allocation22_spill] sm:$0xff] %v8374_v61  ;;  %13050 = vst [vmem:[#allocation23_spill] sm:$0xff] %v8377_v62  ;;  %v8380_v63 = vld [vmem:[#allocation2 + $0x8] sm:$0xff]  ;;  %v8383_v2 = vld [vmem:[#allocation2 + $0x18] sm:$0xff] }
  0x48   :  { %346 = vmatpush1.msra.mxu1 %v8318_v44  ;;  %416 = vmatprep.subr.mxu0 %v8322_v45  ;;  %13051 = vst [vmem:[#allocation24_spill] sm:$0xff] %v8380_v63  ;;  %13052 = vst [vmem:[#allocation25_spill] sm:$0xff] %v8383_v2 }
  0x49   :  { %347 = vmatprep.subr.mxu1 %v8324_v46  ;;  %417 = vmatpush1.msra.mxu0 %v8328_v47 }
  0x4a   :  { %348 = vmatpush1.msra.mxu1 %v8330_v48  ;;  %418 = vmatprep.subr.mxu0 %v8334_v49 }
  0x4b   :  { %349 = vmatprep.subr.mxu1 %v8336_v50  ;;  %419 = vmatpush1.msra.mxu0 %v8340_v51 }
  0x4c   :  { %350 = vmatpush1.msra.mxu1 %v8342_v52  ;;  %420 = vmatprep.subr.mxu0 %v8346_v53 }
  0x4d   :  { %351 = vmatprep.subr.mxu1 %v8348_v54  ;;  %421 = vmatpush1.msra.mxu0 %v8352_v55 }
  0x4e   :  { %352 = vmatpush1.msra.mxu1 %v8354_v56  ;;  %422 = vmatprep.subr.mxu0 %v8358_v57 }
  0x4f   :  { %460 = vmatprep.mubr.f32.mxu0 %v12577_v0  ;;  %423 = vmatpush1.msra.mxu0 %v8366_v58  ;;  %v8386_v0 = vld [vmem:[#allocation2] sm:$0xff]  ;;  %v8389_v58 = vld [vmem:[#allocation2 + $0x10] sm:$0xff] }
  0x50   :  { %353 = vmatprep.subr.mxu1 %v8368_v59  ;;  %424 = vmatprep.subr.mxu0 %v8371_v60  ;;  %13053 = vst [vmem:[#allocation26_spill] sm:$0xff] %v8386_v0  ;;  %v13054_v60 = vmov 0.0  }
  0x51   :  { %354 = vmatpush1.msra.mxu1 %v8374_v61  ;;  %425 = vmatpush1.msra.mxu0 %v8377_v62  ;;  %v8398_v62 = vld [vmem:[%s12567_s2] ss:$0 sm:$0xff] }
  0x52   :  { %355 = vmatprep.subr.mxu1 %v8380_v63  ;;  %426 = vmatprep.subr.mxu0 %v8383_v2 }
  0x53   :  { %356 = vmatpush1.msra.mxu1 %v8386_v0  ;;  %427 = vmatpush1.msra.mxu0 %v8389_v58 }
  0x54   :  { %7170 = vmatprep.subr.mxu1 %v13054_v60  ;;  %543 = vmatprep.subr.mxu0 %v8197_v3  ;;  %v6929_v3 = vld [vmem:[%s12565_s0 + $0x2] sm:$0x3] }
  0xf3   :  { %v234_v63 = vpop.f32.mrf.mxu0 }
  0xf4   :  { %v235_v61 = vadd.f32 %v8398_v62, %v234_v63  ;;  %v13058_v63 = vld [vmem:[#allocation24_spill] sm:$0xff] }
  0xf5   :  { %v7169_v57 = vpop.f32.mrf.mxu0 }
  0xf6   :  { %v238_v2 = vmax.f32 %v235_v61, 0.0  ;;  %v13056_v57 = vld [vmem:[#allocation22_spill] sm:$0xff]  ;;  %v13057_v61 = vld [vmem:[#allocation19_spill] sm:$0xff] }
  0xf8   :  { %390 = vmatmul.mubr.f32.vlgmr.msra.gmra.mxu1 %v238_v2  ;;  %461 = vmatmul.mubr.f32.vlgmr.msra.gmra.mxu0 %v238_v2  ;;  %v13059_v2 = vld [vmem:[#allocation21_spill] sm:$0xff] }
  0xf9   :  { %7171 = vmatpush3.msk.msra.mxu1 %vm164_vm1, %v8192_v1  ;;  %7172 = vmatprep.mubr.msk.f32.mxu1 %vm8100_vm0, %v13054_v60 }
  0xfa   :  { %544 = vmatpush1.msra.mxu0 %v8202_v4  ;;  %614 = vmatprep.subr.mxu1 %v8204_v5 }
  0xfb   :  { %545 = vmatprep.subr.mxu0 %v8206_v6  ;;  %607 = vmatprep.mubr.f32.mxu0 %v13054_v60 }
  0xfc   :  { %7173 = vmatmul.mubr.msk.f32.vlgmr.msra.gmra.mxu1 %vm160_vm2, %v6929_v3  ;;  %546 = vmatpush1.msra.mxu0 %v8212_v8  ;;  %v13055_v3 = vld [vmem:[#allocation18_spill] sm:$0xff] }
  0xfd   :  { %615 = vmatpush1.msra.mxu1 %v8210_v7  ;;  %547 = vmatprep.subr.mxu0 %v8218_v10 }
  0xfe   :  { %616 = vmatprep.subr.mxu1 %v8214_v9  ;;  %548 = vmatpush1.msra.mxu0 %v8222_v12 }
  0xff   :  { %617 = vmatpush1.msra.mxu1 %v8220_v11  ;;  %549 = vmatprep.subr.mxu0 %v8228_v14 }
 0x100   :  { %618 = vmatprep.subr.mxu1 %v8226_v13  ;;  %550 = vmatpush1.msra.mxu0 %v8234_v16 }
 0x101   :  { %619 = vmatpush1.msra.mxu1 %v8232_v15  ;;  %551 = vmatprep.subr.mxu0 %v8240_v18 }
 0x102   :  { %620 = vmatprep.subr.mxu1 %v8238_v17  ;;  %552 = vmatpush1.msra.mxu0 %v8246_v20 }
 0x103   :  { %621 = vmatpush1.msra.mxu1 %v8244_v19  ;;  %553 = vmatprep.subr.mxu0 %v8252_v22 }
 0x104   :  { %622 = vmatprep.subr.mxu1 %v8250_v21  ;;  %554 = vmatpush1.msra.mxu0 %v8258_v24 }
 0x105   :  { %623 = vmatpush1.msra.mxu1 %v8256_v23  ;;  %555 = vmatprep.subr.mxu0 %v8264_v26 }
 0x106   :  { %624 = vmatprep.subr.mxu1 %v8262_v25  ;;  %556 = vmatpush1.msra.mxu0 %v8270_v28 }
 0x107   :  { %625 = vmatpush1.msra.mxu1 %v8268_v27  ;;  %557 = vmatprep.subr.mxu0 %v8276_v30 }
 0x108   :  { %626 = vmatprep.subr.mxu1 %v8274_v29  ;;  %558 = vmatpush1.msra.mxu0 %v8282_v32 }
 0x109   :  { %627 = vmatpush1.msra.mxu1 %v8280_v31  ;;  %559 = vmatprep.subr.mxu0 %v8288_v34 }
 0x10a   :  { %628 = vmatprep.subr.mxu1 %v8286_v33  ;;  %560 = vmatpush1.msra.mxu0 %v8294_v36 }
 0x10b   :  { %629 = vmatpush1.msra.mxu1 %v8292_v35  ;;  %561 = vmatprep.subr.mxu0 %v8300_v38 }
 0x10c   :  { %630 = vmatprep.subr.mxu1 %v8298_v37  ;;  %562 = vmatpush1.msra.mxu0 %v8306_v40 }
 0x10d   :  { %631 = vmatpush1.msra.mxu1 %v8304_v39  ;;  %563 = vmatprep.subr.mxu0 %v8312_v42 }
 0x10e   :  { %632 = vmatprep.subr.mxu1 %v8310_v41  ;;  %564 = vmatpush1.msra.mxu0 %v8318_v44 }
 0x10f   :  { %633 = vmatpush1.msra.mxu1 %v8316_v43  ;;  %565 = vmatprep.subr.mxu0 %v8324_v46 }
 0x110   :  { %634 = vmatprep.subr.mxu1 %v8322_v45  ;;  %566 = vmatpush1.msra.mxu0 %v8330_v48 }
 0x111   :  { %635 = vmatpush1.msra.mxu1 %v8328_v47  ;;  %567 = vmatprep.subr.mxu0 %v8336_v50 }
 0x112   :  { %636 = vmatprep.subr.mxu1 %v8334_v49  ;;  %568 = vmatpush1.msra.mxu0 %v8342_v52 }
 0x113   :  { %637 = vmatpush1.msra.mxu1 %v8340_v51  ;;  %569 = vmatprep.subr.mxu0 %v8348_v54  ;;  %v13060_v54 = vld [vmem:[#allocation23_spill] sm:$0xff] }
 0x114   :  { %638 = vmatprep.subr.mxu1 %v8346_v53  ;;  %570 = vmatpush1.msra.mxu0 %v8354_v56  ;;  %v13061_v56 = vld [vmem:[#allocation25_spill] sm:$0xff] }
 0x115   :  { %639 = vmatpush1.msra.mxu1 %v8352_v55  ;;  %571 = vmatprep.subr.mxu0 %v8368_v59 }
 0x116   :  { %640 = vmatprep.subr.mxu1 %v13055_v3  ;;  %572 = vmatpush1.msra.mxu0 %v13056_v57  ;;  %v13062_v3 = vld [vmem:[#allocation12_spill] sm:$0xff] }
 0x117   :  { %641 = vmatpush1.msra.mxu1 %v13057_v61  ;;  %573 = vmatprep.subr.mxu0 %v13058_v63 }
 0x118   :  { %642 = vmatprep.subr.mxu1 %v13059_v2  ;;  %574 = vmatpush1.msra.mxu0 %v8386_v0 }
 0x119   :  { %643 = vmatpush1.msra.mxu1 %v13060_v54  ;;  %678 = vmatprep.mubr.f32.mxu1 %v13054_v60 }
 0x11a   :  { %644 = vmatprep.subr.mxu1 %v13061_v56  ;;  %7175 = vmatprep.subr.mxu0 %v13054_v60 }
 0x11b   :  { %645 = vmatpush1.msra.mxu1 %v8389_v58 }
 0x11c   :  { %761 = vmatprep.subr.mxu1 %v13062_v3  ;;  %v6932_v3 = vld [vmem:[%s12565_s0 + $0x4] sm:$0x3] }
 0x1b8   :  { %v8476_v57 = vpop.f32.mrf.mxu1 }
 0x1b9   :  { %13063 = vst [vmem:[#allocation25_spill] sm:$0xff] %v8476_v57  ;;  %v13071_v57 = vld [vmem:[#allocation24_spill] sm:$0xff] }
 0x1ba   :  { %v8478_v61 = vpop.f32.mrf.mxu1 }
 0x1bb   :  { %13064 = vst [vmem:[#allocation27_spill] sm:$0xff] %v8478_v61  ;;  %v13070_v61 = vld [vmem:[#allocation19_spill] sm:$0xff] }
 0x1bc   :  { %v538_v63 = vpop.f32.mrf.mxu1 }
 0x1bd   :  { %v539_v2 = vadd.f32 %v8398_v62, %v538_v63  ;;  %v13068_v63 = vld [vmem:[#allocation18_spill] sm:$0xff] }
 0x1be   :  { %v7174_v0 = vpop.f32.mrf.mxu1 }
 0x1bf   :  { %v542_v59 = vmax.f32 %v539_v2, 0.0  ;;  %v13065_v0 = vld [vmem:[#allocation15_spill] sm:$0xff]  ;;  %v13069_v2 = vld [vmem:[#allocation22_spill] sm:$0xff] }
 0x1c1   :  { %608 = vmatmul.mubr.f32.vlgmr.msra.gmra.mxu0 %v542_v59  ;;  %679 = vmatmul.mubr.f32.vlgmr.msra.gmra.mxu1 %v542_v59  ;;  %v13066_v59 = vld [vmem:[#allocation17_spill] sm:$0xff] }
 0x1c2   :  { %7176 = vmatpush3.msk.msra.mxu0 %vm164_vm1, %v8192_v1  ;;  %7177 = vmatprep.mubr.msk.f32.mxu0 %vm8100_vm0, %v13054_v60 }
 0x1c3   :  { %762 = vmatpush1.msra.mxu1 %v8202_v4  ;;  %832 = vmatprep.subr.mxu0 %v8204_v5 }
 0x1c4   :  { %763 = vmatprep.subr.mxu1 %v8206_v6  ;;  %825 = vmatprep.mubr.f32.mxu1 %v13054_v60 }
 0x1c5   :  { %7178 = vmatmul.mubr.msk.f32.vlgmr.msra.gmra.mxu0 %vm160_vm2, %v6932_v3  ;;  %764 = vmatpush1.msra.mxu1 %v8212_v8  ;;  %v13067_v3 = vld [vmem:[#allocation20_spill] sm:$0xff] }
 0x1c6   :  { %833 = vmatpush1.msra.mxu0 %v8210_v7  ;;  %765 = vmatprep.subr.mxu1 %v8218_v10 }
 0x1c7   :  { %834 = vmatprep.subr.mxu0 %v8214_v9  ;;  %766 = vmatpush1.msra.mxu1 %v8222_v12 }
 0x1c8   :  { %835 = vmatpush1.msra.mxu0 %v8220_v11  ;;  %767 = vmatprep.subr.mxu1 %v8228_v14 }
 0x1c9   :  { %836 = vmatprep.subr.mxu0 %v8226_v13  ;;  %768 = vmatpush1.msra.mxu1 %v8234_v16 }
 0x1ca   :  { %837 = vmatpush1.msra.mxu0 %v8232_v15  ;;  %769 = vmatprep.subr.mxu1 %v8240_v18 }
 0x1cb   :  { %838 = vmatprep.subr.mxu0 %v8238_v17  ;;  %770 = vmatpush1.msra.mxu1 %v8246_v20 }
 0x1cc   :  { %839 = vmatpush1.msra.mxu0 %v8244_v19  ;;  %771 = vmatprep.subr.mxu1 %v8252_v22 }
 0x1cd   :  { %840 = vmatprep.subr.mxu0 %v8250_v21  ;;  %772 = vmatpush1.msra.mxu1 %v8258_v24 }
 0x1ce   :  { %841 = vmatpush1.msra.mxu0 %v8256_v23  ;;  %773 = vmatprep.subr.mxu1 %v8264_v26 }
 0x1cf   :  { %842 = vmatprep.subr.mxu0 %v8262_v25  ;;  %774 = vmatpush1.msra.mxu1 %v8270_v28 }
 0x1d0   :  { %843 = vmatpush1.msra.mxu0 %v8268_v27  ;;  %775 = vmatprep.subr.mxu1 %v8276_v30 }
 0x1d1   :  { %844 = vmatprep.subr.mxu0 %v8274_v29  ;;  %776 = vmatpush1.msra.mxu1 %v8282_v32 }
 0x1d2   :  { %845 = vmatpush1.msra.mxu0 %v8280_v31  ;;  %777 = vmatprep.subr.mxu1 %v8288_v34 }
 0x1d3   :  { %846 = vmatprep.subr.mxu0 %v8286_v33  ;;  %778 = vmatpush1.msra.mxu1 %v8294_v36 }
 0x1d4   :  { %847 = vmatpush1.msra.mxu0 %v8292_v35  ;;  %779 = vmatprep.subr.mxu1 %v8300_v38 }
 0x1d5   :  { %848 = vmatprep.subr.mxu0 %v8298_v37  ;;  %780 = vmatpush1.msra.mxu1 %v8306_v40 }
 0x1d6   :  { %849 = vmatpush1.msra.mxu0 %v8304_v39  ;;  %781 = vmatprep.subr.mxu1 %v8312_v42 }
 0x1d7   :  { %850 = vmatprep.subr.mxu0 %v8310_v41  ;;  %782 = vmatpush1.msra.mxu1 %v8318_v44 }
 0x1d8   :  { %851 = vmatpush1.msra.mxu0 %v8316_v43  ;;  %783 = vmatprep.subr.mxu1 %v8324_v46 }
 0x1d9   :  { %852 = vmatprep.subr.mxu0 %v8322_v45  ;;  %784 = vmatpush1.msra.mxu1 %v8330_v48 }
 0x1da   :  { %853 = vmatpush1.msra.mxu0 %v8328_v47  ;;  %785 = vmatprep.subr.mxu1 %v8336_v50 }
 0x1db   :  { %854 = vmatprep.subr.mxu0 %v8334_v49  ;;  %786 = vmatpush1.msra.mxu1 %v8342_v52  ;;  %v13072_v52 = vld [vmem:[#allocation21_spill] sm:$0xff] }
 0x1dc   :  { %855 = vmatpush1.msra.mxu0 %v8340_v51  ;;  %787 = vmatprep.subr.mxu1 %v13065_v0  ;;  %v13073_v51 = vld [vmem:[#allocation26_spill] sm:$0xff] }
 0x1dd   :  { %856 = vmatprep.subr.mxu0 %v8346_v53  ;;  %788 = vmatpush1.msra.mxu1 %v13066_v59 }
 0x1de   :  { %857 = vmatpush1.msra.mxu0 %v8352_v55  ;;  %789 = vmatprep.subr.mxu1 %v13067_v3 }
 0x1df   :  { %858 = vmatprep.subr.mxu0 %v13068_v63  ;;  %790 = vmatpush1.msra.mxu1 %v13069_v2  ;;  %v13074_v63 = vld [vmem:[#allocation12_spill] sm:$0xff]  ;;  %v8556_v2 = vpop.f32.mrf.mxu0 }
 0x1e0   :  { %859 = vmatpush1.msra.mxu0 %v13070_v61  ;;  %791 = vmatprep.subr.mxu1 %v13071_v57  ;;  %13075 = vst [vmem:[#allocation17_spill] sm:$0xff] %v8556_v2  ;;  %v13084_v2 = vld [vmem:[#allocation22_spill] sm:$0xff] }
 0x1e1   :  { %860 = vmatprep.subr.mxu0 %v13072_v52  ;;  %792 = vmatpush1.msra.mxu1 %v13073_v51  ;;  %v8558_v61 = vpop.f32.mrf.mxu0 }
 0x1e2   :  { %861 = vmatpush1.msra.mxu0 %v13060_v54  ;;  %896 = vmatprep.mubr.f32.mxu0 %v13054_v60  ;;  %13076 = vst [vmem:[#allocation12_spill] sm:$0xff] %v8558_v61  ;;  %v6935_v61 = vld [vmem:[%s12565_s0 + $0x6] sm:$0x3] }
 0x1e3   :  { %862 = vmatprep.subr.mxu0 %v13061_v56  ;;  %7180 = vmatprep.subr.mxu1 %v13054_v60 }
 0x1e4   :  { %863 = vmatpush1.msra.mxu0 %v8389_v58 }
 0x1e5   :  { %979 = vmatprep.subr.mxu0 %v13074_v63 }
 0x281   :  { %v8560_v57 = vpop.f32.mrf.mxu0 }
 0x282   :  { %13077 = vst [vmem:[#allocation28_spill] sm:$0xff] %v8560_v57  ;;  %v13086_v57 = vld [vmem:[#allocation24_spill] sm:$0xff] }
 0x283   :  { %v8562_v52 = vpop.f32.mrf.mxu0 }
 0x284   :  { %13078 = vst [vmem:[#allocation29_spill] sm:$0xff] %v8562_v52  ;;  %v13085_v52 = vld [vmem:[#allocation19_spill] sm:$0xff] }
 0x285   :  { %v756_v51 = vpop.f32.mrf.mxu0 }
 0x286   :  { %v757_v54 = vadd.f32 %v8398_v62, %v756_v51  ;;  %v13079_v51 = vld [vmem:[#allocation14_spill] sm:$0xff] }
 0x287   :  { %v7179_v3 = vpop.f32.mrf.mxu0 }
 0x288   :  { %v760_v55 = vmax.f32 %v757_v54, 0.0  ;;  %v13080_v54 = vld [vmem:[#allocation13_spill] sm:$0xff]  ;;  %v13083_v3 = vld [vmem:[#allocation18_spill] sm:$0xff] }
 0x28a   :  { %826 = vmatmul.mubr.f32.vlgmr.msra.gmra.mxu1 %v760_v55  ;;  %897 = vmatmul.mubr.f32.vlgmr.msra.gmra.mxu0 %v760_v55  ;;  %v13081_v55 = vld [vmem:[#allocation16_spill] sm:$0xff] }
 0x28b   :  { %7181 = vmatpush3.msk.msra.mxu1 %vm164_vm1, %v8192_v1  ;;  %7182 = vmatprep.mubr.msk.f32.mxu1 %vm8100_vm0, %v13054_v60 }
 0x28c   :  { %980 = vmatpush1.msra.mxu0 %v8202_v4  ;;  %1050 = vmatprep.subr.mxu1 %v8204_v5 }
 0x28d   :  { %981 = vmatprep.subr.mxu0 %v8206_v6  ;;  %1043 = vmatprep.mubr.f32.mxu0 %v13054_v60 }
 0x28e   :  { %7183 = vmatmul.mubr.msk.f32.vlgmr.msra.gmra.mxu1 %vm160_vm2, %v6935_v61  ;;  %982 = vmatpush1.msra.mxu0 %v8212_v8  ;;  %v13082_v61 = vld [vmem:[#allocation20_spill] sm:$0xff] }
 0x28f   :  { %1051 = vmatpush1.msra.mxu1 %v8210_v7  ;;  %983 = vmatprep.subr.mxu0 %v8218_v10 }
 0x290   :  { %1052 = vmatprep.subr.mxu1 %v8214_v9  ;;  %984 = vmatpush1.msra.mxu0 %v8222_v12 }
 0x291   :  { %1053 = vmatpush1.msra.mxu1 %v8220_v11  ;;  %985 = vmatprep.subr.mxu0 %v8228_v14 }
 0x292   :  { %1054 = vmatprep.subr.mxu1 %v8226_v13  ;;  %986 = vmatpush1.msra.mxu0 %v8234_v16 }
 0x293   :  { %1055 = vmatpush1.msra.mxu1 %v8232_v15  ;;  %987 = vmatprep.subr.mxu0 %v8240_v18 }
 0x294   :  { %1056 = vmatprep.subr.mxu1 %v8238_v17  ;;  %988 = vmatpush1.msra.mxu0 %v8246_v20 }
 0x295   :  { %1057 = vmatpush1.msra.mxu1 %v8244_v19  ;;  %989 = vmatprep.subr.mxu0 %v8252_v22 }
 0x296   :  { %1058 = vmatprep.subr.mxu1 %v8250_v21  ;;  %990 = vmatpush1.msra.mxu0 %v8258_v24 }
 0x297   :  { %1059 = vmatpush1.msra.mxu1 %v8256_v23  ;;  %991 = vmatprep.subr.mxu0 %v8264_v26 }
 0x298   :  { %1060 = vmatprep.subr.mxu1 %v8262_v25  ;;  %992 = vmatpush1.msra.mxu0 %v8270_v28 }
 0x299   :  { %1061 = vmatpush1.msra.mxu1 %v8268_v27  ;;  %993 = vmatprep.subr.mxu0 %v8276_v30 }
 0x29a   :  { %1062 = vmatprep.subr.mxu1 %v8274_v29  ;;  %994 = vmatpush1.msra.mxu0 %v8282_v32 }
 0x29b   :  { %1063 = vmatpush1.msra.mxu1 %v8280_v31  ;;  %995 = vmatprep.subr.mxu0 %v8288_v34 }
 0x29c   :  { %1064 = vmatprep.subr.mxu1 %v8286_v33  ;;  %996 = vmatpush1.msra.mxu0 %v8294_v36 }
 0x29d   :  { %1065 = vmatpush1.msra.mxu1 %v8292_v35  ;;  %997 = vmatprep.subr.mxu0 %v8300_v38 }
 0x29e   :  { %1066 = vmatprep.subr.mxu1 %v8298_v37  ;;  %998 = vmatpush1.msra.mxu0 %v8306_v40 }
 0x29f   :  { %1067 = vmatpush1.msra.mxu1 %v8304_v39  ;;  %999 = vmatprep.subr.mxu0 %v8312_v42 }
 0x2a0   :  { %1068 = vmatprep.subr.mxu1 %v8310_v41  ;;  %1000 = vmatpush1.msra.mxu0 %v8318_v44 }
 0x2a1   :  { %1069 = vmatpush1.msra.mxu1 %v8316_v43  ;;  %1001 = vmatprep.subr.mxu0 %v8324_v46 }
 0x2a2   :  { %1070 = vmatprep.subr.mxu1 %v8322_v45  ;;  %1002 = vmatpush1.msra.mxu0 %v8330_v48 }
 0x2a3   :  { %1071 = vmatpush1.msra.mxu1 %v8328_v47  ;;  %1003 = vmatprep.subr.mxu0 %v8336_v50 }
 0x2a4   :  { %1072 = vmatprep.subr.mxu1 %v8334_v49  ;;  %1004 = vmatpush1.msra.mxu0 %v13079_v51  ;;  %v13087_v51 = vld [vmem:[#allocation21_spill] sm:$0xff] }
 0x2a5   :  { %1073 = vmatpush1.msra.mxu1 %v13080_v54  ;;  %1005 = vmatprep.subr.mxu0 %v13065_v0  ;;  %v13088_v54 = vld [vmem:[#allocation26_spill] sm:$0xff]  ;;  %v13089_v0 = vld [vmem:[#allocation23_spill] sm:$0xff] }
 0x2a6   :  { %1074 = vmatprep.subr.mxu1 %v8346_v53  ;;  %1006 = vmatpush1.msra.mxu0 %v13066_v59 }
 0x2a7   :  { %1075 = vmatpush1.msra.mxu1 %v13081_v55  ;;  %1007 = vmatprep.subr.mxu0 %v13082_v61 }
 0x2a8   :  { %1076 = vmatprep.subr.mxu1 %v13083_v3  ;;  %1008 = vmatpush1.msra.mxu0 %v13084_v2  ;;  %v8640_v2 = vpop.f32.mrf.mxu1 }
 0x2a9   :  { %1077 = vmatpush1.msra.mxu1 %v13085_v52  ;;  %1009 = vmatprep.subr.mxu0 %v13086_v57  ;;  %13090 = vst [vmem:[#allocation16_spill] sm:$0xff] %v8640_v2  ;;  %v13099_v2 = vld [vmem:[#allocation22_spill] sm:$0xff] }
 0x2aa   :  { %1078 = vmatprep.subr.mxu1 %v13087_v51  ;;  %1010 = vmatpush1.msra.mxu0 %v13088_v54  ;;  %v8642_v52 = vpop.f32.mrf.mxu1 }
 0x2ab   :  { %1079 = vmatpush1.msra.mxu1 %v13089_v0  ;;  %1114 = vmatprep.mubr.f32.mxu1 %v13054_v60  ;;  %13091 = vst [vmem:[#allocation30_spill] sm:$0xff] %v8642_v52  ;;  %v6938_v52 = vld [vmem:[%s12565_s0 + $0x8] sm:$0x3] }
 0x2ac   :  { %1080 = vmatprep.subr.mxu1 %v13061_v56  ;;  %7185 = vmatprep.subr.mxu0 %v13054_v60 }
 0x2ad   :  { %1081 = vmatpush1.msra.mxu1 %v8389_v58 }
 0x2ae   :  { %1197 = vmatprep.subr.mxu1 %v13074_v63 }
 0x34a   :  { %v8644_v57 = vpop.f32.mrf.mxu1 }
 0x34b   :  { %13092 = vst [vmem:[#allocation31_spill] sm:$0xff] %v8644_v57  ;;  %v13101_v57 = vld [vmem:[#allocation24_spill] sm:$0xff] }
 0x34c   :  { %v8646_v51 = vpop.f32.mrf.mxu1 }
 0x34d   :  { %13093 = vst [vmem:[#allocation32_spill] sm:$0xff] %v8646_v51  ;;  %v13100_v51 = vld [vmem:[#allocation19_spill] sm:$0xff] }
 0x34e   :  { %v974_v54 = vpop.f32.mrf.mxu1 }
 0x34f   :  { %v975_v0 = vadd.f32 %v8398_v62, %v974_v54  ;;  %v13096_v54 = vld [vmem:[#allocation15_spill] sm:$0xff] }
 0x350   :  { %v7184_v3 = vpop.f32.mrf.mxu1 }
 0x351   :  { %v978_v61 = vmax.f32 %v975_v0, 0.0  ;;  %v13095_v0 = vld [vmem:[#allocation13_spill] sm:$0xff]  ;;  %v13098_v3 = vld [vmem:[#allocation18_spill] sm:$0xff] }
 0x353   :  { %1044 = vmatmul.mubr.f32.vlgmr.msra.gmra.mxu0 %v978_v61  ;;  %1115 = vmatmul.mubr.f32.vlgmr.msra.gmra.mxu1 %v978_v61  ;;  %v13097_v61 = vld [vmem:[#allocation20_spill] sm:$0xff] }
 0x354   :  { %7186 = vmatpush3.msk.msra.mxu0 %vm164_vm1, %v8192_v1  ;;  %7187 = vmatprep.mubr.msk.f32.mxu0 %vm8100_vm0, %v13054_v60 }
 0x355   :  { %1198 = vmatpush1.msra.mxu1 %v8202_v4  ;;  %1268 = vmatprep.subr.mxu0 %v8204_v5 }
 0x356   :  { %1199 = vmatprep.subr.mxu1 %v8206_v6  ;;  %1261 = vmatprep.mubr.f32.mxu1 %v13054_v60 }
 0x357   :  { %7188 = vmatmul.mubr.msk.f32.vlgmr.msra.gmra.mxu0 %vm160_vm2, %v6938_v52  ;;  %1200 = vmatpush1.msra.mxu1 %v8212_v8  ;;  %v13094_v52 = vld [vmem:[#allocation14_spill] sm:$0xff] }
 0x358   :  { %1269 = vmatpush1.msra.mxu0 %v8210_v7  ;;  %1201 = vmatprep.subr.mxu1 %v8218_v10 }
 0x359   :  { %1270 = vmatprep.subr.mxu0 %v8214_v9  ;;  %1202 = vmatpush1.msra.mxu1 %v8222_v12 }
 0x35a   :  { %1271 = vmatpush1.msra.mxu0 %v8220_v11  ;;  %1203 = vmatprep.subr.mxu1 %v8228_v14 }
 0x35b   :  { %1272 = vmatprep.subr.mxu0 %v8226_v13  ;;  %1204 = vmatpush1.msra.mxu1 %v8234_v16 }
 0x35c   :  { %1273 = vmatpush1.msra.mxu0 %v8232_v15  ;;  %1205 = vmatprep.subr.mxu1 %v8240_v18 }
 0x35d   :  { %1274 = vmatprep.subr.mxu0 %v8238_v17  ;;  %1206 = vmatpush1.msra.mxu1 %v8246_v20 }
 0x35e   :  { %1275 = vmatpush1.msra.mxu0 %v8244_v19  ;;  %1207 = vmatprep.subr.mxu1 %v8252_v22 }
 0x35f   :  { %1276 = vmatprep.subr.mxu0 %v8250_v21  ;;  %1208 = vmatpush1.msra.mxu1 %v8258_v24 }
 0x360   :  { %1277 = vmatpush1.msra.mxu0 %v8256_v23  ;;  %1209 = vmatprep.subr.mxu1 %v8264_v26 }
 0x361   :  { %1278 = vmatprep.subr.mxu0 %v8262_v25  ;;  %1210 = vmatpush1.msra.mxu1 %v8270_v28 }
 0x362   :  { %1279 = vmatpush1.msra.mxu0 %v8268_v27  ;;  %1211 = vmatprep.subr.mxu1 %v8276_v30 }
 0x363   :  { %1280 = vmatprep.subr.mxu0 %v8274_v29  ;;  %1212 = vmatpush1.msra.mxu1 %v8282_v32 }
 0x364   :  { %1281 = vmatpush1.msra.mxu0 %v8280_v31  ;;  %1213 = vmatprep.subr.mxu1 %v8288_v34 }
 0x365   :  { %1282 = vmatprep.subr.mxu0 %v8286_v33  ;;  %1214 = vmatpush1.msra.mxu1 %v8294_v36 }
 0x366   :  { %1283 = vmatpush1.msra.mxu0 %v8292_v35  ;;  %1215 = vmatprep.subr.mxu1 %v8300_v38 }
 0x367   :  { %1284 = vmatprep.subr.mxu0 %v8298_v37  ;;  %1216 = vmatpush1.msra.mxu1 %v8306_v40 }
 0x368   :  { %1285 = vmatpush1.msra.mxu0 %v8304_v39  ;;  %1217 = vmatprep.subr.mxu1 %v8312_v42 }
 0x369   :  { %1286 = vmatprep.subr.mxu0 %v8310_v41  ;;  %1218 = vmatpush1.msra.mxu1 %v8318_v44 }
 0x36a   :  { %1287 = vmatpush1.msra.mxu0 %v8316_v43  ;;  %1219 = vmatprep.subr.mxu1 %v8324_v46 }
 0x36b   :  { %1288 = vmatprep.subr.mxu0 %v8322_v45  ;;  %1220 = vmatpush1.msra.mxu1 %v8330_v48 }
 0x36c   :  { %1289 = vmatpush1.msra.mxu0 %v8328_v47  ;;  %1221 = vmatprep.subr.mxu1 %v8336_v50 }
 0x36d   :  { %1290 = vmatprep.subr.mxu0 %v8334_v49  ;;  %1222 = vmatpush1.msra.mxu1 %v13094_v52  ;;  %v13102_v52 = vld [vmem:[#allocation21_spill] sm:$0xff] }
 0x36e   :  { %1291 = vmatpush1.msra.mxu0 %v13095_v0  ;;  %1223 = vmatprep.subr.mxu1 %v13096_v54  ;;  %v13103_v0 = vld [vmem:[#allocation26_spill] sm:$0xff]  ;;  %v13104_v54 = vld [vmem:[#allocation23_spill] sm:$0xff] }
 0x36f   :  { %1292 = vmatprep.subr.mxu0 %v8346_v53  ;;  %1224 = vmatpush1.msra.mxu1 %v13066_v59 }
 0x370   :  { %1293 = vmatpush1.msra.mxu0 %v13081_v55  ;;  %1225 = vmatprep.subr.mxu1 %v13097_v61 }
 0x371   :  { %1294 = vmatprep.subr.mxu0 %v13098_v3  ;;  %1226 = vmatpush1.msra.mxu1 %v13099_v2  ;;  %v8724_v2 = vpop.f32.mrf.mxu0 }
 0x372   :  { %1295 = vmatpush1.msra.mxu0 %v13100_v51  ;;  %1227 = vmatprep.subr.mxu1 %v13101_v57 }
 0x373   :  { %1296 = vmatprep.subr.mxu0 %v13102_v52  ;;  %1228 = vmatpush1.msra.mxu1 %v13103_v0  ;;  %v8726_v51 = vpop.f32.mrf.mxu0 }
 0x374   :  { %1297 = vmatpush1.msra.mxu0 %v13104_v54  ;;  %1332 = vmatprep.mubr.f32.mxu0 %v13054_v60 }
 0x375   :  { %1298 = vmatprep.subr.mxu0 %v13061_v56  ;;  %7190 = vmatprep.subr.mxu1 %v13054_v60 }
 0x376   :  { %1299 = vmatpush1.msra.mxu0 %v8389_v58 }
 0x377   :  { %1415 = vmatprep.subr.mxu0 %v13074_v63  ;;  %v6941_v63 = vld [vmem:[%s12565_s0 + $0xa] sm:$0x3] }
 0x413   :  { %v8728_v57 = vpop.f32.mrf.mxu0 }
 0x415   :  { %v8730_v52 = vpop.f32.mrf.mxu0 }
 0x417   :  { %v1192_v0 = vpop.f32.mrf.mxu0 }
 0x418   :  { %v1193_v54 = vadd.f32 %v8398_v62, %v1192_v0 }
 0x419   :  { %v7189_v3 = vpop.f32.mrf.mxu0 }
 0x41a   :  { %v1196_v61 = vmax.f32 %v1193_v54, 0.0  ;;  %v6944_v3 = vld [vmem:[%s12565_s0 + $0xc] sm:$0x3]  ;;  %v9032_v54 = vld [vmem:[#allocation2 + $0xd8] sm:$0xff] }
 0x41c   :  { %1262 = vmatmul.mubr.f32.vlgmr.msra.gmra.mxu1 %v1196_v61  ;;  %1333 = vmatmul.mubr.f32.vlgmr.msra.gmra.mxu0 %v1196_v61 }
 0x41d   :  { %7191 = vmatpush3.msk.msra.mxu1 %vm164_vm1, %v8192_v1  ;;  %7192 = vmatprep.mubr.msk.f32.mxu1 %vm8100_vm0, %v13054_v60  ;;  %v13105_v1 = vld [vmem:[#allocation14_spill] sm:$0xff] }
 0x41e   :  { %1416 = vmatpush1.msra.mxu0 %v8202_v4  ;;  %1486 = vmatprep.subr.mxu1 %v8204_v5  ;;  %v13106_v4 = vld [vmem:[#allocation13_spill] sm:$0xff]  ;;  %v13107_v5 = vld [vmem:[#allocation15_spill] sm:$0xff] }
 0x41f   :  { %1417 = vmatprep.subr.mxu0 %v8206_v6  ;;  %1479 = vmatprep.mubr.f32.mxu0 %v13054_v60  ;;  %v13108_v6 = vld [vmem:[#allocation20_spill] sm:$0xff] }
 0x420   :  { %7193 = vmatmul.mubr.msk.f32.vlgmr.msra.gmra.mxu1 %vm160_vm2, %v6941_v63  ;;  %1418 = vmatpush1.msra.mxu0 %v8212_v8  ;;  %v13110_v8 = vld [vmem:[#allocation22_spill] sm:$0xff]  ;;  %v8916_v63 = vld [vmem:[#allocation2 + $0x1e0] sm:$0xff] }
 0x421   :  { %1487 = vmatpush1.msra.mxu1 %v8210_v7  ;;  %1419 = vmatprep.subr.mxu0 %v8218_v10  ;;  %v13109_v7 = vld [vmem:[#allocation18_spill] sm:$0xff]  ;;  %v13112_v10 = vld [vmem:[#allocation24_spill] sm:$0xff] }
 0x422   :  { %1488 = vmatprep.subr.mxu1 %v8214_v9  ;;  %1420 = vmatpush1.msra.mxu0 %v8222_v12  ;;  %v13111_v9 = vld [vmem:[#allocation19_spill] sm:$0xff]  ;;  %v13114_v12 = vld [vmem:[#allocation26_spill] sm:$0xff] }
 0x423   :  { %1489 = vmatpush1.msra.mxu1 %v8220_v11  ;;  %1421 = vmatprep.subr.mxu0 %v8228_v14  ;;  %v13113_v11 = vld [vmem:[#allocation21_spill] sm:$0xff] }
 0x424   :  { %1490 = vmatprep.subr.mxu1 %v8226_v13  ;;  %1422 = vmatpush1.msra.mxu0 %v8234_v16  ;;  %v13115_v13 = vld [vmem:[#allocation23_spill] sm:$0xff]  ;;  %v8807_v14 = vld [vmem:[#allocation2 + $0x1e8] sm:$0xff] }
 0x425   :  { %1491 = vmatpush1.msra.mxu1 %v8232_v15  ;;  %1423 = vmatprep.subr.mxu0 %v8240_v18  ;;  %v93_v15 = vlaneseq }
 0x426   :  { %1492 = vmatprep.subr.mxu1 %v8238_v17  ;;  %1424 = vmatpush1.msra.mxu0 %v8246_v20 }
 0x427   :  { %1493 = vmatpush1.msra.mxu1 %v8244_v19  ;;  %1425 = vmatprep.subr.mxu0 %v8252_v22  ;;  %v8810_v16 = vand.u32 127, %v93_v15  ;;  %v8812_v17 = vshrl.u32 %v93_v15, 7  ;;  %v8954_v15 = vld [vmem:[#allocation2 + $0x1b0] sm:$0xff] }
 0x428   :  { %1494 = vmatprep.subr.mxu1 %v8250_v21  ;;  %1426 = vmatpush1.msra.mxu0 %v8258_v24  ;;  %v1116_v21 = vpop.f32.mrf.mxu1  ;;  %v303_v24 = vld [vmem:[%s12570_s5] sm:$0xf] }
 0x429   :  { %1495 = vmatpush1.msra.mxu1 %v8256_v23  ;;  %1427 = vmatprep.subr.mxu0 %v8264_v26  ;;  %13116 = vst [vmem:[#allocation14_spill] sm:$0xff] %v8810_v16  ;;  %13117 = vst [vmem:[#allocation13_spill] sm:$0xff] %v8812_v17  ;;  %v96_v18 = vadd.s32 256, %v8810_v16  ;;  %v95_v19 = vadd.s32 128, %v8810_v16  ;;  %v97_v20 = vadd.s32 384, %v8810_v16  ;;  %v12614_v22 = vsub.s32 0, %v8812_v17 }
 0x42a   :  { %1496 = vmatprep.subr.mxu1 %v8262_v25  ;;  %1428 = vmatpush1.msra.mxu0 %v8270_v28  ;;  %v12613_v23 = vsub.s32 2, %v8812_v17  ;;  %v12612_v25 = vsub.s32 1, %v8812_v17  ;;  %v12611_v26 = vsub.s32 3, %v8812_v17  ;;  %vm146_vm3 = vcmp.lt.s32.totalorder %v8810_v16, 64  ;;  %v9044_v17 = vld [vmem:[#allocation2 + $0xb8] sm:$0xff]  ;;  %v9464_v16 = vld [vmem:[#allocation4 + $0x20] sm:$0xff] }
 0x42b   :  { %1497 = vmatpush1.msra.mxu1 %v8268_v27  ;;  %1429 = vmatprep.subr.mxu0 %v8276_v30  ;;  %v116_v27 = vand.u32 127, %v96_v18  ;;  %v109_v28 = vand.u32 127, %v95_v19  ;;  %v1118_v30 = vpop.f32.mrf.mxu1  ;;  %v8957_v18 = vld [vmem:[#allocation2 + $0x168] sm:$0xff]  ;;  %v8960_v19 = vld [vmem:[#allocation2 + $0x198] sm:$0xff]  ;;  %13141 = vst [vmem:[#allocation41_spill] sm:$0xff] %v9044_v17 }
 0x42c   :  { %1498 = vmatprep.subr.mxu1 %v8274_v29  ;;  %1430 = vmatpush1.msra.mxu0 %v8282_v32  ;;  %v123_v29 = vand.u32 127, %v97_v20  ;;  %v8830_v32 = vrot.slane %v303_v24, %v12613_v23  ;;  %v8963_v20 = vld [vmem:[#allocation2 + $0x160] sm:$0xff] }
 0x42d   :  { %1499 = vmatpush1.msra.mxu1 %v8280_v31  ;;  %1431 = vmatprep.subr.mxu0 %v8288_v34  ;;  %v8826_v31 = vrot.slane %v303_v24, %v12614_v22  ;;  %v8838_v34 = vrot.slane %v303_v24, %v12611_v26  ;;  %vm8841_vm4 = vcmp.lt.s32.totalorder %v116_v27, 64  ;;  %vm8854_vm5 = vcmp.lt.s32.totalorder %v109_v28, 64  ;;  %v8972_v27 = vld [vmem:[#allocation2 + $0x178] sm:$0xff]  ;;  %v8975_v28 = vld [vmem:[#allocation2 + $0x140] sm:$0xff]  ;;  %v9017_v26 = vld [vmem:[#allocation2 + $0xc8] sm:$0xff] }
 0x42e   :  { %1500 = vmatprep.subr.mxu1 %v8286_v33  ;;  %1432 = vmatpush1.msra.mxu0 %v8294_v36  ;;  %13119 = vst [vmem:[#allocation20_spill] sm:$0xff] %v8830_v32  ;;  %v8834_v33 = vrot.slane %v303_v24, %v12612_v25  ;;  %vm8858_vm6 = vcmp.lt.s32.totalorder %v123_v29, 64  ;;  %v8969_v24 = vld [vmem:[#allocation2 + $0x148] sm:$0xff]  ;;  %v8978_v29 = vld [vmem:[#allocation2 + $0x170] sm:$0xff]  ;;  %v9020_v25 = vld [vmem:[#allocation2 + $0xf8] sm:$0xff] }
 0x42f   :  { %1501 = vmatpush1.msra.mxu1 %v8292_v35  ;;  %1433 = vmatprep.subr.mxu0 %v8300_v38  ;;  %13118 = vst [vmem:[#allocation15_spill] sm:$0xff] %v8826_v31  ;;  %13121 = vst [vmem:[#allocation22_spill] sm:$0xff] %v8838_v34  ;;  %v13122_v35 = vmov 0  ;;  %v1046_v38 = vadd.f32 %v8728_v57, %v8826_v31  ;;  %v9023_v23 = vld [vmem:[#allocation2 + $0xc0] sm:$0xff]  ;;  %v9026_v22 = vld [vmem:[#allocation2 + $0xf0] sm:$0xff] }
 0x430   :  { %1502 = vmatprep.subr.mxu1 %v8298_v37  ;;  %1434 = vmatpush1.msra.mxu0 %v8306_v40  ;;  %13120 = vst [vmem:[#allocation18_spill] sm:$0xff] %v8834_v33  ;;  %v13123_v35 = vsel %vm8841_vm4, 4294967295, %v13122_v35  ;;  %v9029_v57 = vld [vmem:[#allocation2 + $0xa8] sm:$0xff] }
 0x431   :  { %1503 = vmatpush1.msra.mxu1 %v8304_v39  ;;  %1435 = vmatprep.subr.mxu0 %v8312_v42  ;;  %13124 = vst [vmem:[#allocation19_spill] sm:$0xff] %v13123_v35  ;;  %v8848_v39 = vadd.f32 %v1116_v21, %v8830_v32  ;;  %v13127_v42 = vmov 0  ;;  %v8966_v21 = vld [vmem:[#allocation2 + $0x190] sm:$0xff]  ;;  %v9460_v35 = vld [vmem:[#allocation4 + $0x38] sm:$0xff] }
 0x432   :  { %1504 = vmatprep.subr.mxu1 %v8310_v41  ;;  %1436 = vmatpush1.msra.mxu0 %v8318_v44  ;;  %v13128_v42 = vsel %vm8854_vm5, 4294967295, %v13127_v42  ;;  %v8864_v44 = vadd.f32 %v8730_v52, %v8834_v33  ;;  %v9035_v52 = vld [vmem:[#allocation2 + $0xa0] sm:$0xff] }
 0x433   :  { %1505 = vmatpush1.msra.mxu1 %v8316_v43  ;;  %1437 = vmatprep.subr.mxu0 %v8324_v46  ;;  %13125 = vst [vmem:[#allocation24_spill] sm:$0xff] %v8848_v39  ;;  %13129 = vst [vmem:[#allocation26_spill] sm:$0xff] %v13128_v42  ;;  %v13130_v43 = vmov 0  ;;  %v9053_v39 = vld [vmem:[#allocation2 + $0x68] sm:$0xff] }
 0x434   :  { %1506 = vmatprep.subr.mxu1 %v8322_v45  ;;  %1438 = vmatpush1.msra.mxu0 %v8330_v48  ;;  %v13131_v43 = vsel %vm8858_vm6, 4294967295, %v13130_v43  ;;  %13133 = vst [vmem:[#allocation33_spill] sm:$0xff] %v8864_v44  ;;  %13144 = vst [vmem:[#allocation44_spill] sm:$0xff] %v9053_v39  ;;  %v9065_v44 = vld [vmem:[#allocation2 + $0x48] sm:$0xff] }
 0x435   :  { %1507 = vmatpush1.msra.mxu1 %v8328_v47  ;;  %1439 = vmatprep.subr.mxu0 %v8336_v50  ;;  %13132 = vst [vmem:[#allocation23_spill] sm:$0xff] %v13131_v43  ;;  %v9038_v50 = vld [vmem:[#allocation2 + $0xd0] sm:$0xff]  ;;  %13148 = vst [vmem:[#allocation48_spill] sm:$0xff] %v9065_v44  ;;  %v9458_v42 = vld [vmem:[#allocation4 + $0x28] sm:$0xff] }
 0x436   :  { %1508 = vmatprep.subr.mxu1 %v8334_v49  ;;  %1440 = vmatpush1.msra.mxu0 %v13105_v1  ;;  %v8919_v1 = vld [vmem:[#allocation2 + $0x1f8] sm:$0xff]  ;;  %13139 = vst [vmem:[#allocation39_spill] sm:$0xff] %v9038_v50  ;;  %v9454_v43 = vld [vmem:[#allocation4 + $0x50] sm:$0xff] }
 0x437   :  { %1509 = vmatpush1.msra.mxu1 %v13106_v4  ;;  %1441 = vmatprep.subr.mxu0 %v13107_v5  ;;  %v8922_v4 = vld [vmem:[#allocation2 + $0x1c8] sm:$0xff]  ;;  %v8927_v5 = vld [vmem:[#allocation2 + $0x1c0] sm:$0xff] }
 0x438   :  { %1510 = vmatprep.subr.mxu1 %v8346_v53  ;;  %1442 = vmatpush1.msra.mxu0 %v13066_v59  ;;  %v8881_v53 = vadd.f32 %v1118_v30, %v8838_v34  ;;  %v8981_v30 = vld [vmem:[#allocation2 + $0x128] sm:$0xff] }
 0x439   :  { %1511 = vmatpush1.msra.mxu1 %v13081_v55  ;;  %1443 = vmatprep.subr.mxu0 %v13108_v6  ;;  %v8930_v6 = vld [vmem:[#allocation2 + $0x1f0] sm:$0xff]  ;;  %v9041_v55 = vld [vmem:[#allocation2 + $0x88] sm:$0xff] }
 0x43a   :  { %1512 = vmatprep.subr.mxu1 %v13109_v7  ;;  %1444 = vmatpush1.msra.mxu0 %v13110_v8  ;;  %13137 = vst [vmem:[#allocation37_spill] sm:$0xff] %v8881_v53  ;;  %v8933_v7 = vld [vmem:[#allocation2 + $0x1a8] sm:$0xff]  ;;  %v8936_v8 = vld [vmem:[#allocation2 + $0x1d8] sm:$0xff]  ;;  %13140 = vst [vmem:[#allocation40_spill] sm:$0xff] %v9041_v55 }
 0x43b   :  { %1513 = vmatpush1.msra.mxu1 %v13111_v9  ;;  %1445 = vmatprep.subr.mxu0 %v13112_v10  ;;  %v8939_v9 = vld [vmem:[#allocation2 + $0x1a0] sm:$0xff]  ;;  %v8942_v10 = vld [vmem:[#allocation2 + $0x1d0] sm:$0xff]  ;;  %v9056_v53 = vld [vmem:[#allocation2 + $0x98] sm:$0xff] }
 0x43c   :  { %1514 = vmatprep.subr.mxu1 %v13113_v11  ;;  %1446 = vmatpush1.msra.mxu0 %v13114_v12  ;;  %v8945_v11 = vld [vmem:[#allocation2 + $0x188] sm:$0xff]  ;;  %v8948_v12 = vld [vmem:[#allocation2 + $0x1b8] sm:$0xff]  ;;  %13145 = vst [vmem:[#allocation45_spill] sm:$0xff] %v9056_v53 }
 0x43d   :  { %1515 = vmatpush1.msra.mxu1 %v13115_v13  ;;  %1550 = vmatprep.mubr.f32.mxu1 %v13054_v60  ;;  %v8951_v13 = vld [vmem:[#allocation2 + $0x180] sm:$0xff] }
 0x43e   :  { %1516 = vmatprep.subr.mxu1 %v13061_v56  ;;  %7195 = vmatprep.subr.mxu0 %v13054_v60 }
 0x43f   :  { %1517 = vmatpush1.msra.mxu1 %v8389_v58 }
 0x440   :  { %1633 = vmatprep.subr.mxu1 %v8807_v14 }
 0x4dc   :  { %v1263_v36 = vpop.f32.mrf.mxu1  ;;  %v1334_v37 = vpop.f32.mrf.mxu0 }
 0x4dd   :  { %v1264_v40 = vadd.f32 %v1263_v36, %v8826_v31  ;;  %v8852_v41 = vadd.f32 %v1334_v37, %v8830_v32  ;;  %v8984_v36 = vld [vmem:[#allocation2 + $0x158] sm:$0xff]  ;;  %v8987_v37 = vld [vmem:[#allocation2 + $0x120] sm:$0xff] }
 0x4de   :  { %v1265_v45 = vpop.f32.mrf.mxu1  ;;  %v1336_v46 = vpop.f32.mrf.mxu0 }
 0x4df   :  { %13126 = vst [vmem:[#allocation21_spill] sm:$0xff] %v8852_v41  ;;  %v8867_v47 = vadd.f32 %v1265_v45, %v8834_v33  ;;  %v8870_v48 = vadd.f32 %v1336_v46, %v8838_v34  ;;  %v8874_v49 = vsel %vm146_vm3, %v1046_v38, %v1264_v40  ;;  %v8885_v58 = vsel %vm146_vm3, %v1264_v40, %v1046_v38  ;;  %v8990_v38 = vld [vmem:[#allocation2 + $0x150] sm:$0xff]  ;;  %v8993_v40 = vld [vmem:[#allocation2 + $0x108] sm:$0xff]  ;;  %v8996_v45 = vld [vmem:[#allocation2 + $0x138] sm:$0xff] }
 0x4e0   :  { %13136 = vst [vmem:[#allocation36_spill] sm:$0xff] %v8874_v49  ;;  %v1410_v56 = vpop.f32.mrf.mxu1  ;;  %13138 = vst [vmem:[#allocation38_spill] sm:$0xff] %v8885_v58  ;;  %v8999_v46 = vld [vmem:[#allocation2 + $0x100] sm:$0xff]  ;;  %v9050_v41 = vld [vmem:[#allocation2 + $0xb0] sm:$0xff] }
 0x4e1   :  { %13134 = vst [vmem:[#allocation34_spill] sm:$0xff] %v8867_v47  ;;  %13135 = vst [vmem:[#allocation35_spill] sm:$0xff] %v8870_v48  ;;  %v1411_v59 = vadd.f32 %v8398_v62, %v1410_v56  ;;  %v8907_v62 = vld [vmem:[%s12566_s1] sm:$0xf]  ;;  %v9002_v56 = vld [vmem:[#allocation2 + $0x130] sm:$0xff] }
 0x4e2   :  { %v7194_v0 = vpop.f32.mrf.mxu1  ;;  %v9047_v58 = vld [vmem:[#allocation2 + $0x80] sm:$0xff]  ;;  %13143 = vst [vmem:[#allocation43_spill] sm:$0xff] %v9050_v41  ;;  %v9062_v47 = vld [vmem:[#allocation2 + $0x90] sm:$0xff]  ;;  %v9068_v49 = vld [vmem:[#allocation2 + $0x78] sm:$0xff] }
 0x4e3   :  { %v1414_v61 = vmax.f32 %v1411_v59, 0.0  ;;  %v9005_v59 = vld [vmem:[#allocation2 + $0xe8] sm:$0xff]  ;;  %v9008_v0 = vld [vmem:[#allocation2 + $0x118] sm:$0xff]  ;;  %13142 = vst [vmem:[#allocation42_spill] sm:$0xff] %v9047_v58  ;;  %v9059_v48 = vld [vmem:[#allocation2 + $0x60] sm:$0xff] }
 0x4e4   :  { %13146 = vst [vmem:[#allocation46_spill] sm:$0xff] %v9059_v48  ;;  %13147 = vst [vmem:[#allocation47_spill] sm:$0xff] %v9062_v47 }
 0x4e5   :  { %1480 = vmatmul.mubr.f32.vlgmr.msra.gmra.mxu0 %v1414_v61  ;;  %1551 = vmatmul.mubr.f32.vlgmr.msra.gmra.mxu1 %v1414_v61  ;;  %v9011_v61 = vld [vmem:[#allocation2 + $0xe0] sm:$0xff]  ;;  %13149 = vst [vmem:[#allocation49_spill] sm:$0xff] %v9068_v49 }
 0x4e6   :  { %7196 = vmatpush3.msk.msra.mxu0 %vm164_vm1, %v8907_v62  ;;  %7197 = vmatprep.mubr.msk.f32.mxu0 %vm8100_vm0, %v13054_v60 }
 0x4e7   :  { %1634 = vmatpush1.msra.mxu1 %v8916_v63  ;;  %1704 = vmatprep.subr.mxu0 %v8919_v1 }
 0x4e8   :  { %1635 = vmatprep.subr.mxu1 %v8922_v4  ;;  %1697 = vmatprep.mubr.f32.mxu1 %v13054_v60 }
 0x4e9   :  { %7198 = vmatmul.mubr.msk.f32.vlgmr.msra.gmra.mxu0 %vm160_vm2, %v6944_v3  ;;  %1636 = vmatpush1.msra.mxu1 %v8927_v5  ;;  %v9014_v3 = vld [vmem:[#allocation2 + $0x110] sm:$0xff] }
 0x4ea   :  { %1705 = vmatpush1.msra.mxu0 %v8930_v6  ;;  %1637 = vmatprep.subr.mxu1 %v8933_v7 }
 0x4eb   :  { %1706 = vmatprep.subr.mxu0 %v8936_v8  ;;  %1638 = vmatpush1.msra.mxu1 %v8939_v9 }
 0x4ec   :  { %1707 = vmatpush1.msra.mxu0 %v8942_v10  ;;  %1639 = vmatprep.subr.mxu1 %v8945_v11 }
 0x4ed   :  { %1708 = vmatprep.subr.mxu0 %v8948_v12  ;;  %1640 = vmatpush1.msra.mxu1 %v8951_v13 }
 0x4ee   :  { %1709 = vmatpush1.msra.mxu0 %v8954_v15  ;;  %1641 = vmatprep.subr.mxu1 %v8957_v18 }
 0x4ef   :  { %1710 = vmatprep.subr.mxu0 %v8960_v19  ;;  %1642 = vmatpush1.msra.mxu1 %v8963_v20 }
 0x4f0   :  { %1711 = vmatpush1.msra.mxu0 %v8966_v21  ;;  %1643 = vmatprep.subr.mxu1 %v8969_v24 }
 0x4f1   :  { %1712 = vmatprep.subr.mxu0 %v8972_v27  ;;  %1644 = vmatpush1.msra.mxu1 %v8975_v28 }
 0x4f2   :  { %1713 = vmatpush1.msra.mxu0 %v8978_v29  ;;  %1645 = vmatprep.subr.mxu1 %v8981_v30 }
 0x4f3   :  { %1714 = vmatprep.subr.mxu0 %v8984_v36  ;;  %1646 = vmatpush1.msra.mxu1 %v8987_v37 }
 0x4f4   :  { %1715 = vmatpush1.msra.mxu0 %v8990_v38  ;;  %1647 = vmatprep.subr.mxu1 %v8993_v40 }
 0x4f5   :  { %1716 = vmatprep.subr.mxu0 %v8996_v45  ;;  %1648 = vmatpush1.msra.mxu1 %v8999_v46 }
 0x4f6   :  { %1717 = vmatpush1.msra.mxu0 %v9002_v56  ;;  %1649 = vmatprep.subr.mxu1 %v9005_v59 }
 0x4f7   :  { %1718 = vmatprep.subr.mxu0 %v9008_v0  ;;  %1650 = vmatpush1.msra.mxu1 %v9011_v61 }
 0x4f8   :  { %1719 = vmatpush1.msra.mxu0 %v9014_v3  ;;  %1651 = vmatprep.subr.mxu1 %v9017_v26 }
 0x4f9   :  { %1720 = vmatprep.subr.mxu0 %v9020_v25  ;;  %1652 = vmatpush1.msra.mxu1 %v9023_v23 }
 0x4fa   :  { %1721 = vmatpush1.msra.mxu0 %v9026_v22  ;;  %1653 = vmatprep.subr.mxu1 %v9029_v57 }
 0x4fb   :  { %1722 = vmatprep.subr.mxu0 %v9032_v54  ;;  %1654 = vmatpush1.msra.mxu1 %v9035_v52 }
 0x4fc   :  { %1723 = vmatpush1.msra.mxu0 %v9038_v50  ;;  %1655 = vmatprep.subr.mxu1 %v9041_v55 }
 0x4fd   :  { %1724 = vmatprep.subr.mxu0 %v9044_v17  ;;  %1656 = vmatpush1.msra.mxu1 %v9047_v58  ;;  %v13165_v17 = vld [vmem:[#allocation32_spill] sm:$0xff] }
 0x4fe   :  { %1725 = vmatpush1.msra.mxu0 %v9050_v41  ;;  %1657 = vmatprep.subr.mxu1 %v9053_v39  ;;  %v9071_v39 = vld [vmem:[#allocation2 + $0x40] sm:$0xff]  ;;  %v9122_v55 = vadd.f32 %v13165_v17, %v8834_v33  ;;  %v9140_v17 = vadd.f32 %v8726_v51, %v8838_v34 }
 0x4ff   :  { %1726 = vmatprep.subr.mxu0 %v9056_v53  ;;  %1658 = vmatpush1.msra.mxu1 %v9059_v48  ;;  %13150 = vst [vmem:[#allocation50_spill] sm:$0xff] %v9071_v39  ;;  %v9074_v53 = vld [vmem:[#allocation2 + $0x70] sm:$0xff]  ;;  %v9077_v48 = vld [vmem:[#allocation2 + $0x28] sm:$0xff]  ;;  %v9404_v51 = vld [vmem:[#allocation4 + $0xc0] sm:$0xff] }
 0x500   :  { %1727 = vmatpush1.msra.mxu0 %v9062_v47  ;;  %1659 = vmatprep.subr.mxu1 %v9065_v44  ;;  %13151 = vst [vmem:[#allocation51_spill] sm:$0xff] %v9074_v53  ;;  %13152 = vst [vmem:[#allocation52_spill] sm:$0xff] %v9077_v48  ;;  %v9080_v47 = vld [vmem:[#allocation2 + $0x58] sm:$0xff]  ;;  %v9083_v44 = vld [vmem:[#allocation2 + $0x20] sm:$0xff] }
 0x501   :  { %1728 = vmatprep.subr.mxu0 %v9068_v49  ;;  %1660 = vmatpush1.msra.mxu1 %v9071_v39  ;;  %13153 = vst [vmem:[#allocation53_spill] sm:$0xff] %v9080_v47  ;;  %13154 = vst [vmem:[#allocation54_spill] sm:$0xff] %v9083_v44  ;;  %v9086_v49 = vld [vmem:[#allocation2 + $0x50] sm:$0xff]  ;;  %v9089_v39 = vld [vmem:[#allocation2 + $0x8] sm:$0xff] }
 0x502   :  { %1729 = vmatpush1.msra.mxu0 %v9074_v53  ;;  %1661 = vmatprep.subr.mxu1 %v9077_v48  ;;  %13155 = vst [vmem:[#allocation55_spill] sm:$0xff] %v9086_v49  ;;  %13156 = vst [vmem:[#allocation56_spill] sm:$0xff] %v9089_v39  ;;  %v9092_v53 = vld [vmem:[#allocation2 + $0x38] sm:$0xff]  ;;  %v9095_v48 = vld [vmem:[#allocation2] sm:$0xff] }
 0x503   :  { %1730 = vmatprep.subr.mxu0 %v9080_v47  ;;  %1662 = vmatpush1.msra.mxu1 %v9083_v44  ;;  %13157 = vst [vmem:[#allocation57_spill] sm:$0xff] %v9092_v53  ;;  %13158 = vst [vmem:[#allocation58_spill] sm:$0xff] %v9095_v48  ;;  %v9098_v47 = vld [vmem:[#allocation2 + $0x30] sm:$0xff]  ;;  %v9102_v44 = vld [vmem:[#allocation2 + $0x18] sm:$0xff] }
 0x504   :  { %1731 = vmatpush1.msra.mxu0 %v9086_v49  ;;  %1663 = vmatprep.subr.mxu1 %v9089_v39  ;;  %13159 = vst [vmem:[#allocation59_spill] sm:$0xff] %v9098_v47  ;;  %13160 = vst [vmem:[#allocation60_spill] sm:$0xff] %v9102_v44  ;;  %v9106_v39 = vld [vmem:[#allocation2 + $0x10] sm:$0xff]  ;;  %v13162_v49 = vld [vmem:[#allocation31_spill] sm:$0xff] }
 0x505   :  { %1732 = vmatprep.subr.mxu0 %v9092_v53  ;;  %1664 = vmatpush1.msra.mxu1 %v9095_v48  ;;  %13161 = vst [vmem:[#allocation61_spill] sm:$0xff] %v9106_v39  ;;  %v828_v41 = vadd.f32 %v13162_v49, %v8826_v31  ;;  %13166 = vst [vmem:[#allocation32_spill] sm:$0xff] %v9122_v55  ;;  %v9430_v55 = vld [vmem:[#allocation4 + $0x90] sm:$0xff] }
 0x506   :  { %1733 = vmatpush1.msra.mxu0 %v9098_v47  ;;  %1768 = vmatprep.mubr.f32.mxu0 %v13054_v60  ;;  %v9114_v47 = vadd.f32 %v8724_v2, %v8830_v32  ;;  %13170 = vst [vmem:[#allocation66_spill] sm:$0xff] %v9140_v17  ;;  %v9422_v17 = vld [vmem:[#allocation4 + $0x88] sm:$0xff] }
 0x507   :  { %1734 = vmatprep.subr.mxu0 %v9102_v44  ;;  %7200 = vmatprep.subr.mxu1 %v13054_v60 }
 0x508   :  { %1735 = vmatpush1.msra.mxu0 %v9106_v39  ;;  %13163 = vst [vmem:[#allocation31_spill] sm:$0xff] %v9114_v47  ;;  %v9418_v47 = vld [vmem:[#allocation4 + $0xb0] sm:$0xff] }
 0x509   :  { %1851 = vmatprep.subr.mxu0 %v8807_v14 }
 0x5a5   :  { %v1481_v53 = vpop.f32.mrf.mxu0  ;;  %v1552_v48 = vpop.f32.mrf.mxu1 }
 0x5a6   :  { %v1482_v58 = vadd.f32 %v1481_v53, %v8826_v31  ;;  %v9118_v44 = vadd.f32 %v1552_v48, %v8830_v32 }
 0x5a7   :  { %v1483_v39 = vpop.f32.mrf.mxu0  ;;  %v1554_v14 = vpop.f32.mrf.mxu1 }
 0x5a8   :  { %13164 = vst [vmem:[#allocation62_spill] sm:$0xff] %v9118_v44  ;;  %v9125_v50 = vadd.f32 %v1483_v39, %v8834_v33  ;;  %v9128_v49 = vadd.f32 %v1554_v14, %v8838_v34  ;;  %v9132_v2 = vsel %vm146_vm3, %v828_v41, %v1482_v58  ;;  %v9144_v39 = vsel %vm146_vm3, %v1482_v58, %v828_v41  ;;  %v9398_v14 = vld [vmem:[#allocation4 + $0xc8] sm:$0xff]  ;;  %v9400_v41 = vld [vmem:[#allocation4 + $0xd8] sm:$0xff]  ;;  %v9416_v44 = vld [vmem:[#allocation4 + $0xa0] sm:$0xff] }
 0x5a9   :  { %13169 = vst [vmem:[#allocation65_spill] sm:$0xff] %v9132_v2  ;;  %v1628_v53 = vpop.f32.mrf.mxu0  ;;  %13171 = vst [vmem:[#allocation67_spill] sm:$0xff] %v9144_v39  ;;  %v9153_v2 = vld [vmem:[%s12567_s2] ss:$0 sm:$0xff] }
 0x5aa   :  { %13167 = vst [vmem:[#allocation63_spill] sm:$0xff] %v9125_v50  ;;  %13168 = vst [vmem:[#allocation64_spill] sm:$0xff] %v9128_v49  ;;  %v1629_v48 = vadd.f32 %v9153_v2, %v1628_v53  ;;  %v6947_v53 = vld [vmem:[%s12565_s0 + $0xe] sm:$0x3]  ;;  %v9424_v49 = vld [vmem:[#allocation4 + $0x98] sm:$0xff] }
 0x5ab   :  { %v7199_v58 = vpop.f32.mrf.mxu0  ;;  %v9428_v50 = vld [vmem:[#allocation4 + $0x80] sm:$0xff] }
 0x5ac   :  { %v1632_v39 = vmax.f32 %v1629_v48, 0.0  ;;  %v13206_v48 = vld [vmem:[#allocation30_spill] sm:$0xff] }
 0x5ae   :  { %1698 = vmatmul.mubr.f32.vlgmr.msra.gmra.mxu1 %v1632_v39  ;;  %1769 = vmatmul.mubr.f32.vlgmr.msra.gmra.mxu0 %v1632_v39  ;;  %v9277_v39 = vadd.f32 %v13206_v48, %v8838_v34  ;;  %v9374_v48 = vld [vmem:[#allocation4 + $0x108] sm:$0xff] }
 0x5af   :  { %7201 = vmatpush3.msk.msra.mxu1 %vm164_vm1, %v8907_v62  ;;  %7202 = vmatprep.mubr.msk.f32.mxu1 %vm8100_vm0, %v13054_v60  ;;  %v13172_v62 = vld [vmem:[#allocation39_spill] sm:$0xff] }
 0x5b0   :  { %1922 = vmatprep.subr.mxu1 %v8919_v1  ;;  %1852 = vmatpush1.msra.mxu0 %v8916_v63  ;;  %v13173_v63 = vld [vmem:[#allocation40_spill] sm:$0xff]  ;;  %v13174_v1 = vld [vmem:[#allocation41_spill] sm:$0xff] }
 0x5b1   :  { %1853 = vmatprep.subr.mxu0 %v8922_v4  ;;  %1915 = vmatprep.mubr.f32.mxu0 %v13054_v60  ;;  %v13175_v4 = vld [vmem:[#allocation42_spill] sm:$0xff] }
 0x5b2   :  { %7203 = vmatmul.mubr.msk.f32.vlgmr.msra.gmra.mxu1 %vm160_vm2, %v6947_v53  ;;  %1854 = vmatpush1.msra.mxu0 %v8927_v5  ;;  %v13183_v5 = vld [vmem:[#allocation50_spill] sm:$0xff] }
 0x5b3   :  { %1923 = vmatpush1.msra.mxu1 %v8930_v6  ;;  %1855 = vmatprep.subr.mxu0 %v8933_v7  ;;  %v13184_v6 = vld [vmem:[#allocation51_spill] sm:$0xff]  ;;  %v13185_v7 = vld [vmem:[#allocation52_spill] sm:$0xff]  ;;  %13210 = vst [vmem:[#allocation50_spill] sm:$0xff] %v9422_v17 }
 0x5b4   :  { %1924 = vmatprep.subr.mxu1 %v8936_v8  ;;  %1856 = vmatpush1.msra.mxu0 %v8939_v9  ;;  %v13186_v8 = vld [vmem:[#allocation53_spill] sm:$0xff]  ;;  %v13187_v9 = vld [vmem:[#allocation54_spill] sm:$0xff]  ;;  %13211 = vst [vmem:[#allocation51_spill] sm:$0xff] %v9424_v49  ;;  %13212 = vst [vmem:[#allocation52_spill] sm:$0xff] %v9428_v50 }
 0x5b5   :  { %1925 = vmatpush1.msra.mxu1 %v8942_v10  ;;  %1857 = vmatprep.subr.mxu0 %v8945_v11  ;;  %v13188_v10 = vld [vmem:[#allocation55_spill] sm:$0xff]  ;;  %v13189_v11 = vld [vmem:[#allocation56_spill] sm:$0xff]  ;;  %13213 = vst [vmem:[#allocation53_spill] sm:$0xff] %v9430_v55 }
 0x5b6   :  { %1926 = vmatprep.subr.mxu1 %v8948_v12  ;;  %1858 = vmatpush1.msra.mxu0 %v8951_v13  ;;  %v13190_v12 = vld [vmem:[#allocation57_spill] sm:$0xff]  ;;  %v13191_v13 = vld [vmem:[#allocation58_spill] sm:$0xff] }
 0x5b7   :  { %1927 = vmatpush1.msra.mxu1 %v8954_v15  ;;  %1859 = vmatprep.subr.mxu0 %v8957_v18  ;;  %v13192_v15 = vld [vmem:[#allocation59_spill] sm:$0xff]  ;;  %v13193_v18 = vld [vmem:[#allocation60_spill] sm:$0xff] }
 0x5b8   :  { %1928 = vmatprep.subr.mxu1 %v8960_v19  ;;  %1860 = vmatpush1.msra.mxu0 %v8963_v20  ;;  %v13194_v19 = vld [vmem:[#allocation61_spill] sm:$0xff] }
 0x5b9   :  { %1929 = vmatpush1.msra.mxu1 %v8966_v21  ;;  %1861 = vmatprep.subr.mxu0 %v8969_v24  ;;  %v9241_v20 = vld [vmem:[#allocation4 + $0x1e8] sm:$0xff]  ;;  %v9243_v21 = vld [vmem:[#allocation4 + $0x1f8] sm:$0xff]  ;;  %13221 = vst [vmem:[#allocation61_spill] sm:$0xff] %v9454_v43 }
 0x5ba   :  { %1930 = vmatprep.subr.mxu1 %v8972_v27  ;;  %1862 = vmatpush1.msra.mxu0 %v8975_v28  ;;  %13195 = vst [vmem:[#allocation39_spill] sm:$0xff] %v9241_v20  ;;  %13196 = vst [vmem:[#allocation40_spill] sm:$0xff] %v9243_v21  ;;  %v13197_v28 = vld [vmem:[#allocation28_spill] sm:$0xff] }
 0x5bb   :  { %1931 = vmatpush1.msra.mxu1 %v8978_v29  ;;  %1863 = vmatprep.subr.mxu0 %v8981_v30  ;;  %v610_v29 = vadd.f32 %v13197_v28, %v8826_v31  ;;  %v13198_v30 = vld [vmem:[#allocation16_spill] sm:$0xff]  ;;  %v9352_v28 = vld [vmem:[#allocation4 + $0x158] sm:$0xff]  ;;  %13222 = vst [vmem:[#allocation28_spill] sm:$0xff] %v9458_v42 }
 0x5bc   :  { %1932 = vmatprep.subr.mxu1 %v8984_v36  ;;  %1864 = vmatpush1.msra.mxu0 %v8987_v37  ;;  %v9251_v36 = vadd.f32 %v13198_v30, %v8830_v32  ;;  %v9358_v30 = vld [vmem:[#allocation4 + $0x150] sm:$0xff]  ;;  %13223 = vst [vmem:[#allocation16_spill] sm:$0xff] %v9460_v35 }
 0x5bd   :  { %1933 = vmatpush1.msra.mxu1 %v8990_v38  ;;  %1865 = vmatprep.subr.mxu0 %v8993_v40  ;;  %v13201_v40 = vld [vmem:[#allocation29_spill] sm:$0xff] }
 0x5be   :  { %1934 = vmatprep.subr.mxu1 %v8996_v45  ;;  %1866 = vmatpush1.msra.mxu0 %v8999_v46  ;;  %13199 = vst [vmem:[#allocation41_spill] sm:$0xff] %v9251_v36  ;;  %v9259_v45 = vadd.f32 %v13201_v40, %v8834_v33  ;;  %v9364_v40 = vld [vmem:[#allocation4 + $0x138] sm:$0xff]  ;;  %13224 = vst [vmem:[#allocation29_spill] sm:$0xff] %v9464_v16 }
 0x5bf   :  { %1935 = vmatpush1.msra.mxu1 %v9002_v56  ;;  %1867 = vmatprep.subr.mxu0 %v9005_v59  ;;  %v9436_v36 = vld [vmem:[#allocation4 + $0x78] sm:$0xff] }
 0x5c0   :  { %1936 = vmatprep.subr.mxu1 %v9008_v0  ;;  %1868 = vmatpush1.msra.mxu0 %v9011_v61  ;;  %13215 = vst [vmem:[#allocation55_spill] sm:$0xff] %v9436_v36 }
 0x5c1   :  { %1937 = vmatpush1.msra.mxu1 %v9014_v3  ;;  %1869 = vmatprep.subr.mxu0 %v9017_v26  ;;  %v13176_v26 = vld [vmem:[#allocation43_spill] sm:$0xff]  ;;  %v9406_v3 = vld [vmem:[#allocation4 + $0xd0] sm:$0xff] }
 0x5c2   :  { %1938 = vmatprep.subr.mxu1 %v9020_v25  ;;  %1870 = vmatpush1.msra.mxu0 %v9023_v23  ;;  %v13177_v25 = vld [vmem:[#allocation44_spill] sm:$0xff]  ;;  %v13178_v23 = vld [vmem:[#allocation45_spill] sm:$0xff]  ;;  %13202 = vst [vmem:[#allocation43_spill] sm:$0xff] %v9259_v45  ;;  %v9448_v45 = vld [vmem:[#allocation4 + $0x58] sm:$0xff] }
 0x5c3   :  { %1939 = vmatpush1.msra.mxu1 %v9026_v22  ;;  %1871 = vmatprep.subr.mxu0 %v9029_v57  ;;  %v13179_v22 = vld [vmem:[#allocation46_spill] sm:$0xff]  ;;  %v13180_v57 = vld [vmem:[#allocation47_spill] sm:$0xff]  ;;  %13219 = vst [vmem:[#allocation59_spill] sm:$0xff] %v9448_v45 }
 0x5c4   :  { %1940 = vmatprep.subr.mxu1 %v9032_v54  ;;  %1872 = vmatpush1.msra.mxu0 %v9035_v52  ;;  %v13181_v54 = vld [vmem:[#allocation48_spill] sm:$0xff]  ;;  %v13182_v52 = vld [vmem:[#allocation49_spill] sm:$0xff]  ;;  %13207 = vst [vmem:[#allocation47_spill] sm:$0xff] %v9277_v39 }
 0x5c5   :  { %1941 = vmatpush1.msra.mxu1 %v13172_v62  ;;  %1873 = vmatprep.subr.mxu0 %v13173_v63  ;;  %v9388_v62 = vld [vmem:[#allocation4 + $0xf8] sm:$0xff]  ;;  %13209 = vst [vmem:[#allocation49_spill] sm:$0xff] %v9416_v44  ;;  %v9440_v39 = vld [vmem:[#allocation4 + $0x60] sm:$0xff] }
 0x5c6   :  { %1942 = vmatprep.subr.mxu1 %v13174_v1  ;;  %1874 = vmatpush1.msra.mxu0 %v13175_v4  ;;  %v9394_v4 = vld [vmem:[#allocation4 + $0xf0] sm:$0xff]  ;;  %v9410_v1 = vld [vmem:[#allocation4 + $0xa8] sm:$0xff]  ;;  %13216 = vst [vmem:[#allocation56_spill] sm:$0xff] %v9440_v39 }
 0x5c7   :  { %1943 = vmatpush1.msra.mxu1 %v13176_v26  ;;  %1875 = vmatprep.subr.mxu0 %v13177_v25  ;;  %v9392_v25 = vld [vmem:[#allocation4 + $0xe0] sm:$0xff] }
 0x5c8   :  { %1944 = vmatprep.subr.mxu1 %v13178_v23  ;;  %1876 = vmatpush1.msra.mxu0 %v13179_v22  ;;  %v9300_v22 = vld [vmem:[#allocation4 + $0x1e0] sm:$0xff] }
 0x5c9   :  { %1945 = vmatpush1.msra.mxu1 %v13180_v57  ;;  %1877 = vmatprep.subr.mxu0 %v13181_v54  ;;  %v9304_v57 = vld [vmem:[#allocation4 + $0x1c8] sm:$0xff]  ;;  %v9306_v54 = vld [vmem:[#allocation4 + $0x1d8] sm:$0xff] }
 0x5ca   :  { %1946 = vmatprep.subr.mxu1 %v13182_v52  ;;  %1878 = vmatpush1.msra.mxu0 %v13183_v5  ;;  %v9308_v52 = vld [vmem:[#allocation4 + $0x1c0] sm:$0xff]  ;;  %v9310_v5 = vld [vmem:[#allocation4 + $0x1d0] sm:$0xff] }
 0x5cb   :  { %1947 = vmatpush1.msra.mxu1 %v13184_v6  ;;  %1879 = vmatprep.subr.mxu0 %v13185_v7  ;;  %v9314_v6 = vld [vmem:[#allocation4 + $0x1a8] sm:$0xff]  ;;  %v9316_v7 = vld [vmem:[#allocation4 + $0x1b8] sm:$0xff] }
 0x5cc   :  { %1948 = vmatprep.subr.mxu1 %v13186_v8  ;;  %1880 = vmatpush1.msra.mxu0 %v13187_v9  ;;  %v9320_v8 = vld [vmem:[#allocation4 + $0x1a0] sm:$0xff]  ;;  %v9322_v9 = vld [vmem:[#allocation4 + $0x1b0] sm:$0xff] }
 0x5cd   :  { %1949 = vmatpush1.msra.mxu1 %v13188_v10  ;;  %1881 = vmatprep.subr.mxu0 %v13189_v11  ;;  %v9326_v10 = vld [vmem:[#allocation4 + $0x188] sm:$0xff]  ;;  %v9328_v11 = vld [vmem:[#allocation4 + $0x198] sm:$0xff] }
 0x5ce   :  { %1950 = vmatprep.subr.mxu1 %v13190_v12  ;;  %1882 = vmatpush1.msra.mxu0 %v13191_v13  ;;  %v9332_v12 = vld [vmem:[#allocation4 + $0x180] sm:$0xff]  ;;  %v9334_v13 = vld [vmem:[#allocation4 + $0x190] sm:$0xff] }
 0x5cf   :  { %1951 = vmatpush1.msra.mxu1 %v13192_v15  ;;  %1986 = vmatprep.mubr.f32.mxu1 %v13054_v60  ;;  %v9338_v15 = vld [vmem:[#allocation4 + $0x168] sm:$0xff] }
 0x5d0   :  { %1952 = vmatprep.subr.mxu1 %v13193_v18  ;;  %2061 = vmatprep.subr.mxu0 %v9241_v20  ;;  %v9340_v18 = vld [vmem:[#allocation4 + $0x178] sm:$0xff] }
 0x5d1   :  { %1953 = vmatpush1.msra.mxu1 %v13194_v19  ;;  %v9344_v19 = vld [vmem:[#allocation4 + $0x160] sm:$0xff] }
 0x5d2   :  { %2132 = vmatprep.subr.mxu1 %v9243_v21 }
 0x66e   :  { %v1699_v24 = vpop.f32.mrf.mxu1  ;;  %v1770_v27 = vpop.f32.mrf.mxu0 }
 0x66f   :  { %v1700_v37 = vadd.f32 %v1699_v24, %v8826_v31  ;;  %v9255_v38 = vadd.f32 %v1770_v27, %v8830_v32  ;;  %v9346_v24 = vld [vmem:[#allocation4 + $0x170] sm:$0xff]  ;;  %v9350_v27 = vld [vmem:[#allocation4 + $0x148] sm:$0xff]  ;;  %v9472_v32 = vld [vmem:[#allocation4 + $0x18] sm:$0xff] }
 0x670   :  { %v1701_v46 = vpop.f32.mrf.mxu1  ;;  %v1772_v56 = vpop.f32.mrf.mxu0  ;;  %13227 = vst [vmem:[#allocation69_spill] sm:$0xff] %v9472_v32  ;;  %v9476_v31 = vld [vmem:[#allocation4] sm:$0xff] }
 0x671   :  { %13200 = vst [vmem:[#allocation42_spill] sm:$0xff] %v9255_v38  ;;  %v9262_v59 = vadd.f32 %v1701_v46, %v8834_v33  ;;  %v9265_v0 = vadd.f32 %v1772_v56, %v8838_v34  ;;  %v9269_v61 = vsel %vm146_vm3, %v610_v29, %v1700_v37  ;;  %v9281_v53 = vsel %vm146_vm3, %v1700_v37, %v610_v29  ;;  %v9356_v29 = vld [vmem:[#allocation4 + $0x140] sm:$0xff]  ;;  %v9362_v37 = vld [vmem:[#allocation4 + $0x128] sm:$0xff]  ;;  %v9370_v56 = vld [vmem:[#allocation4 + $0x130] sm:$0xff] }
 0x672   :  { %13205 = vst [vmem:[#allocation46_spill] sm:$0xff] %v9269_v61  ;;  %v1846_v58 = vpop.f32.mrf.mxu1  ;;  %13208 = vst [vmem:[#allocation48_spill] sm:$0xff] %v9281_v53  ;;  %v9368_v46 = vld [vmem:[#allocation4 + $0x120] sm:$0xff]  ;;  %v9412_v53 = vld [vmem:[#allocation4 + $0xb8] sm:$0xff] }
 0x673   :  { %13203 = vst [vmem:[#allocation44_spill] sm:$0xff] %v9262_v59  ;;  %13204 = vst [vmem:[#allocation45_spill] sm:$0xff] %v9265_v0  ;;  %v1847_v63 = vadd.f32 %v9153_v2, %v1846_v58  ;;  %v9302_v2 = vld [vmem:[#allocation4 + $0x1f0] sm:$0xff]  ;;  %v9376_v58 = vld [vmem:[#allocation4 + $0x118] sm:$0xff] }
 0x674   :  { %v7204_v26 = vpop.f32.mrf.mxu1  ;;  %v9434_v38 = vld [vmem:[#allocation4 + $0x68] sm:$0xff]  ;;  %v9442_v0 = vld [vmem:[#allocation4 + $0x70] sm:$0xff]  ;;  %v9452_v61 = vld [vmem:[#allocation4 + $0x40] sm:$0xff]  ;;  %13228 = vst [vmem:[#allocation70_spill] sm:$0xff] %v9476_v31 }
 0x675   :  { %v1850_v23 = vmax.f32 %v1847_v63, 0.0  ;;  %v9380_v63 = vld [vmem:[#allocation4 + $0x100] sm:$0xff]  ;;  %v9382_v26 = vld [vmem:[#allocation4 + $0x110] sm:$0xff]  ;;  %13214 = vst [vmem:[#allocation54_spill] sm:$0xff] %v9434_v38  ;;  %13217 = vst [vmem:[#allocation57_spill] sm:$0xff] %v9442_v0 }
 0x676   :  { %v9446_v59 = vld [vmem:[#allocation4 + $0x48] sm:$0xff]  ;;  %13220 = vst [vmem:[#allocation60_spill] sm:$0xff] %v9452_v61  ;;  %v9466_v34 = vld [vmem:[#allocation4 + $0x30] sm:$0xff] }
 0x677   :  { %1916 = vmatmul.mubr.f32.vlgmr.msra.gmra.mxu0 %v1850_v23  ;;  %1987 = vmatmul.mubr.f32.vlgmr.msra.gmra.mxu1 %v1850_v23  ;;  %v9386_v23 = vld [vmem:[#allocation4 + $0xe8] sm:$0xff]  ;;  %13218 = vst [vmem:[#allocation58_spill] sm:$0xff] %v9446_v59  ;;  %13225 = vst [vmem:[#allocation30_spill] sm:$0xff] %v9466_v34 }
 0x678   :  { %2062 = vmatpush1.msra.mxu0 %v9300_v22  ;;  %2133 = vmatpush1.msra.mxu1 %v9302_v2  ;;  %v9470_v33 = vld [vmem:[#allocation4 + $0x8] sm:$0xff] }
 0x679   :  { %2063 = vmatprep.subr.mxu0 %v9304_v57  ;;  %2134 = vmatprep.subr.mxu1 %v9306_v54  ;;  %13226 = vst [vmem:[#allocation68_spill] sm:$0xff] %v9470_v33 }
 0x67a   :  { %2064 = vmatpush1.msra.mxu0 %v9308_v52  ;;  %2135 = vmatpush1.msra.mxu1 %v9310_v5 }
 0x67b   :  { %2065 = vmatprep.subr.mxu0 %v9314_v6  ;;  %2136 = vmatprep.subr.mxu1 %v9316_v7 }
 0x67c   :  { %2066 = vmatpush1.msra.mxu0 %v9320_v8  ;;  %2137 = vmatpush1.msra.mxu1 %v9322_v9 }
 0x67d   :  { %2067 = vmatprep.subr.mxu0 %v9326_v10  ;;  %2138 = vmatprep.subr.mxu1 %v9328_v11 }
 0x67e   :  { %2068 = vmatpush1.msra.mxu0 %v9332_v12  ;;  %2139 = vmatpush1.msra.mxu1 %v9334_v13 }
 0x67f   :  { %2069 = vmatprep.subr.mxu0 %v9338_v15  ;;  %2140 = vmatprep.subr.mxu1 %v9340_v18 }
 0x680   :  { %2070 = vmatpush1.msra.mxu0 %v9344_v19  ;;  %2141 = vmatpush1.msra.mxu1 %v9346_v24 }
 0x681   :  { %2071 = vmatprep.subr.mxu0 %v9350_v27  ;;  %2142 = vmatprep.subr.mxu1 %v9352_v28 }
 0x682   :  { %2072 = vmatpush1.msra.mxu0 %v9356_v29  ;;  %2143 = vmatpush1.msra.mxu1 %v9358_v30 }
 0x683   :  { %2073 = vmatprep.subr.mxu0 %v9362_v37  ;;  %2144 = vmatprep.subr.mxu1 %v9364_v40 }
 0x684   :  { %2074 = vmatpush1.msra.mxu0 %v9368_v46  ;;  %2145 = vmatpush1.msra.mxu1 %v9370_v56 }
 0x685   :  { %2075 = vmatprep.subr.mxu0 %v9374_v48  ;;  %2146 = vmatprep.subr.mxu1 %v9376_v58 }
 0x686   :  { %2076 = vmatpush1.msra.mxu0 %v9380_v63  ;;  %2147 = vmatpush1.msra.mxu1 %v9382_v26 }
 0x687   :  { %2077 = vmatprep.subr.mxu0 %v9386_v23  ;;  %2148 = vmatprep.subr.mxu1 %v9388_v62 }
 0x688   :  { %2078 = vmatpush1.msra.mxu0 %v9392_v25  ;;  %2149 = vmatpush1.msra.mxu1 %v9394_v4 }
 0x689   :  { %2079 = vmatprep.subr.mxu0 %v9398_v14  ;;  %2150 = vmatprep.subr.mxu1 %v9400_v41 }
 0x68a   :  { %2080 = vmatpush1.msra.mxu0 %v9404_v51  ;;  %2151 = vmatpush1.msra.mxu1 %v9406_v3 }
 0x68b   :  { %2081 = vmatprep.subr.mxu0 %v9410_v1  ;;  %2152 = vmatprep.subr.mxu1 %v9412_v53 }
 0x68c   :  { %2082 = vmatpush1.msra.mxu0 %v9416_v44  ;;  %2153 = vmatpush1.msra.mxu1 %v9418_v47 }
 0x68d   :  { %2083 = vmatprep.subr.mxu0 %v9422_v17  ;;  %2154 = vmatprep.subr.mxu1 %v9424_v49 }
 0x68e   :  { %2084 = vmatpush1.msra.mxu0 %v9428_v50  ;;  %2155 = vmatpush1.msra.mxu1 %v9430_v55 }
 0x68f   :  { %2085 = vmatprep.subr.mxu0 %v9434_v38  ;;  %2156 = vmatprep.subr.mxu1 %v9436_v36 }
 0x690   :  { %2086 = vmatpush1.msra.mxu0 %v9440_v39  ;;  %2157 = vmatpush1.msra.mxu1 %v9442_v0 }
 0x691   :  { %2087 = vmatprep.subr.mxu0 %v9446_v59  ;;  %2158 = vmatprep.subr.mxu1 %v9448_v45  ;;  %v9480_v45 = vld [vmem:[#allocation4 + $0x10] sm:$0xff] }
 0x692   :  { %2088 = vmatpush1.msra.mxu0 %v9452_v61  ;;  %2159 = vmatpush1.msra.mxu1 %v9454_v43  ;;  %13229 = vst [vmem:[#allocation71_spill] sm:$0xff] %v9480_v45 }
 0x693   :  { %2089 = vmatprep.subr.mxu0 %v9458_v42  ;;  %2160 = vmatprep.subr.mxu1 %v9460_v35 }
 0x694   :  { %2090 = vmatpush1.msra.mxu0 %v9464_v16  ;;  %2161 = vmatpush1.msra.mxu1 %v9466_v34 }
 0x695   :  { %2091 = vmatprep.subr.mxu0 %v9470_v33  ;;  %2162 = vmatprep.subr.mxu1 %v9472_v32 }
 0x696   :  { %2092 = vmatpush1.msra.mxu0 %v9476_v31  ;;  %2125 = vmatprep.mubr.f32.mxu0 %v13054_v60 }
 0x697   :  { %2163 = vmatpush1.msra.mxu1 %v9480_v45  ;;  %2196 = vmatprep.mubr.f32.mxu1 %v13054_v60 }
 0x698   :  { %2126 = vmatmul.mubr.f32.vlgmr.msra.gmra.mxu0 %v13054_v60  ;;  %2197 = vmatmul.mubr.f32.vlgmr.msra.gmra.mxu1 %v13054_v60 }
 0x699   :  { %2235 = vmatprep.subr.mxu0 %v9241_v20  ;;  %2306 = vmatprep.subr.mxu1 %v9243_v21 }
 0x69a   :  { %2236 = vmatpush1.msra.mxu0 %v9300_v22  ;;  %2307 = vmatpush1.msra.mxu1 %v9302_v2 }
 0x69b   :  { %2237 = vmatprep.subr.mxu0 %v9304_v57  ;;  %2308 = vmatprep.subr.mxu1 %v9306_v54 }
 0x69c   :  { %2238 = vmatpush1.msra.mxu0 %v9308_v52  ;;  %2309 = vmatpush1.msra.mxu1 %v9310_v5 }
 0x69d   :  { %2239 = vmatprep.subr.mxu0 %v9314_v6  ;;  %2310 = vmatprep.subr.mxu1 %v9316_v7 }
 0x69e   :  { %2240 = vmatpush1.msra.mxu0 %v9320_v8  ;;  %2311 = vmatpush1.msra.mxu1 %v9322_v9 }
 0x69f   :  { %2241 = vmatprep.subr.mxu0 %v9326_v10  ;;  %2312 = vmatprep.subr.mxu1 %v9328_v11 }
 0x6a0   :  { %2242 = vmatpush1.msra.mxu0 %v9332_v12  ;;  %2313 = vmatpush1.msra.mxu1 %v9334_v13 }
 0x6a1   :  { %2243 = vmatprep.subr.mxu0 %v9338_v15  ;;  %2314 = vmatprep.subr.mxu1 %v9340_v18 }
 0x6a2   :  { %2244 = vmatpush1.msra.mxu0 %v9344_v19  ;;  %2315 = vmatpush1.msra.mxu1 %v9346_v24 }
 0x6a3   :  { %2245 = vmatprep.subr.mxu0 %v9350_v27  ;;  %2316 = vmatprep.subr.mxu1 %v9352_v28 }
 0x6a4   :  { %2246 = vmatpush1.msra.mxu0 %v9356_v29  ;;  %2317 = vmatpush1.msra.mxu1 %v9358_v30 }
 0x6a5   :  { %2247 = vmatprep.subr.mxu0 %v9362_v37  ;;  %2318 = vmatprep.subr.mxu1 %v9364_v40 }
 0x6a6   :  { %2248 = vmatpush1.msra.mxu0 %v9368_v46  ;;  %2319 = vmatpush1.msra.mxu1 %v9370_v56 }
 0x6a7   :  { %2249 = vmatprep.subr.mxu0 %v9374_v48  ;;  %2320 = vmatprep.subr.mxu1 %v9376_v58 }
 0x6a8   :  { %2250 = vmatpush1.msra.mxu0 %v9380_v63  ;;  %2321 = vmatpush1.msra.mxu1 %v9382_v26 }
 0x6a9   :  { %2251 = vmatprep.subr.mxu0 %v9386_v23  ;;  %2322 = vmatprep.subr.mxu1 %v9388_v62 }
 0x6aa   :  { %2252 = vmatpush1.msra.mxu0 %v9392_v25  ;;  %2323 = vmatpush1.msra.mxu1 %v9394_v4 }
 0x6ab   :  { %2253 = vmatprep.subr.mxu0 %v9398_v14  ;;  %2324 = vmatprep.subr.mxu1 %v9400_v41 }
 0x6ac   :  { %2254 = vmatpush1.msra.mxu0 %v9404_v51  ;;  %2325 = vmatpush1.msra.mxu1 %v9406_v3 }
 0x6ad   :  { %2255 = vmatprep.subr.mxu0 %v9410_v1  ;;  %2326 = vmatprep.subr.mxu1 %v9412_v53 }
 0x6ae   :  { %2256 = vmatpush1.msra.mxu0 %v9416_v44  ;;  %2327 = vmatpush1.msra.mxu1 %v9418_v47  ;;  %v13230_v44 = vld [vmem:[#allocation59_spill] sm:$0xff] }
 0x6af   :  { %2257 = vmatprep.subr.mxu0 %v9422_v17  ;;  %2328 = vmatprep.subr.mxu1 %v9424_v49 }
 0x6b0   :  { %2258 = vmatpush1.msra.mxu0 %v9428_v50  ;;  %2329 = vmatpush1.msra.mxu1 %v9430_v55 }
 0x6b1   :  { %2259 = vmatprep.subr.mxu0 %v9434_v38  ;;  %2330 = vmatprep.subr.mxu1 %v9436_v36 }
 0x6b2   :  { %2260 = vmatpush1.msra.mxu0 %v9440_v39  ;;  %2331 = vmatpush1.msra.mxu1 %v9442_v0  ;;  %v13241_v39 = vld [vmem:[#allocation12_spill] sm:$0xff] }
 0x6b3   :  { %2261 = vmatprep.subr.mxu0 %v9446_v59  ;;  %2332 = vmatprep.subr.mxu1 %v13230_v44  ;;  %v13237_v59 = vld [vmem:[#allocation18_spill] sm:$0xff] }
 0x6b4   :  { %2262 = vmatpush1.msra.mxu0 %v9452_v61  ;;  %2333 = vmatpush1.msra.mxu1 %v9454_v43  ;;  %v13232_v43 = vld [vmem:[#allocation20_spill] sm:$0xff]  ;;  %v13235_v61 = vld [vmem:[#allocation17_spill] sm:$0xff] }
 0x6b5   :  { %2263 = vmatprep.subr.mxu0 %v9458_v42  ;;  %2334 = vmatprep.subr.mxu1 %v9460_v35  ;;  %v13231_v42 = vld [vmem:[#allocation15_spill] sm:$0xff]  ;;  %v9566_v44 = vadd.f32 %v13235_v61, %v13232_v43 }
 0x6b6   :  { %2264 = vmatpush1.msra.mxu0 %v9464_v16  ;;  %2335 = vmatpush1.msra.mxu1 %v9466_v34 }
 0x6b7   :  { %2265 = vmatprep.subr.mxu0 %v9470_v33  ;;  %2336 = vmatprep.subr.mxu1 %v9472_v32  ;;  %v13234_v32 = vld [vmem:[#allocation25_spill] sm:$0xff]  ;;  %13236 = vst [vmem:[#allocation20_spill] sm:$0xff] %v9566_v44 }
 0x6b8   :  { %2266 = vmatpush1.msra.mxu0 %v9476_v31  ;;  %2299 = vmatprep.mubr.f32.mxu0 %v13054_v60  ;;  %v392_v31 = vadd.f32 %v13234_v32, %v13231_v42 }
 0x6b9   :  { %2337 = vmatpush1.msra.mxu1 %v9480_v45  ;;  %2370 = vmatprep.mubr.f32.mxu1 %v13054_v60 }
 0x6ba   :  { %2409 = vmatprep.subr.mxu0 %v9241_v20  ;;  %2480 = vmatprep.subr.mxu1 %v9243_v21  ;;  %v13238_v20 = vld [vmem:[#allocation27_spill] sm:$0xff]  ;;  %v13240_v21 = vld [vmem:[#allocation22_spill] sm:$0xff] }
 0x6bb   :  { %v9570_v0 = vadd.f32 %v13238_v20, %v13237_v59  ;;  %v9574_v36 = vadd.f32 %v13241_v39, %v13240_v21 }
 0x6bd   :  { %13239 = vst [vmem:[#allocation25_spill] sm:$0xff] %v9570_v0  ;;  %13242 = vst [vmem:[#allocation17_spill] sm:$0xff] %v9574_v36 }
 0x737   :  { %v1917_v35 = vpop.f32.mrf.mxu0  ;;  %v1988_v16 = vpop.f32.mrf.mxu1 }
 0x738   :  { %v1918_v34 = vadd.f32 %v1917_v35, %v13231_v42  ;;  %v9560_v33 = vadd.f32 %v1988_v16, %v13232_v43 }
 0x739   :  { %v1919_v45 = vpop.f32.mrf.mxu0  ;;  %v1990_v60 = vpop.f32.mrf.mxu1 }
 0x73a   :  { %13233 = vst [vmem:[#allocation15_spill] sm:$0xff] %v9560_v33  ;;  %v9577_v16 = vadd.f32 %v1919_v45, %v13237_v59  ;;  %v9580_v35 = vadd.f32 %v1990_v60, %v13240_v21  ;;  %v9584_v42 = vsel %vm146_vm3, %v1918_v34, %v392_v31  ;;  %v1993_v21 = vsel %vm146_vm3, %v392_v31, %v1918_v34 }
 0x73b   :  { %13246 = vst [vmem:[#allocation22_spill] sm:$0xff] %v9584_v42 }
 0x73c   :  { %13243 = vst [vmem:[#allocation18_spill] sm:$0xff] %v9577_v16  ;;  %13244 = vst [vmem:[#allocation27_spill] sm:$0xff] %v9580_v35  ;;  %v1994_v20 = vsel %vm8854_vm5, %v9570_v0, %v9577_v16  ;;  %v1996_v31 = vsel %vm8858_vm6, %v9574_v36, %v9580_v35  ;;  %v13269_v16 = vld [vmem:[#allocation69_spill] sm:$0xff] }
 0x758   :  { %v2127_v59 = vpop.f32.mrf.mxu0  ;;  %v2198_v39 = vpop.f32.mrf.mxu1 }
 0x759   :  { %v2203_v42 = vadd.f32 %v2127_v59, %v1993_v21  ;;  %v1995_v21 = vsel %vm8841_vm4, %v9566_v44, %v9560_v33  ;;  %v13267_v44 = vld [vmem:[#allocation30_spill] sm:$0xff]  ;;  %v13268_v33 = vld [vmem:[#allocation68_spill] sm:$0xff] }
 0x75a   :  { %v2129_v38 = vpop.f32.mrf.mxu0  ;;  %v2200_v17 = vpop.f32.mrf.mxu1  ;;  %v2205_v59 = vadd.f32 %v2198_v39, %v1995_v21 }
 0x75b   :  { %v6950_v55 = vmul.f32 -1.442695, %v2203_v42  ;;  %v2204_v50 = vadd.f32 %v2129_v38, %v1994_v20  ;;  %v2206_v34 = vadd.f32 %v2200_v17, %v1996_v31 }
 0x75d   :  { %7493 = vpow2.f32 %v6950_v55  ;;  %v6951_v49 = vmul.f32 -1.442695, %v2204_v50  ;;  %v6952_v60 = vmul.f32 -1.442695, %v2206_v34 }
 0x75f   :  { %7495 = vpow2.f32 %v6951_v49 }
 0x760   :  { %7497 = vtanh.f32 %v2205_v59  ;;  %v13255_v59 = vld [vmem:[#allocation53_spill] sm:$0xff] }
 0x761   :  { %7499 = vpow2.f32 %v6952_v60  ;;  %v13254_v60 = vld [vmem:[#allocation52_spill] sm:$0xff] }
 0x76a   :  { %v7494_v42 = vpop.eup %7493 }
 0x76b   :  { %v2210_v38 = vadd.f32 1.0, %v7494_v42  ;;  %v13256_v42 = vld [vmem:[#allocation54_spill] sm:$0xff] }
 0x76c   :  { %v7496_v55 = vpop.eup %7495 }
 0x76d   :  { %7501 = vrcp.f32 %v2210_v38  ;;  %v2216_v50 = vadd.f32 1.0, %v7496_v55  ;;  %v7498_v49 = vpop.eup %7497  ;;  %v13257_v38 = vld [vmem:[#allocation55_spill] sm:$0xff]  ;;  %v13258_v55 = vld [vmem:[#allocation56_spill] sm:$0xff] }
 0x76e   :  { %v7500_v20 = vpop.eup %7499 }
 0x76f   :  { %7503 = vrcp.f32 %v2216_v50  ;;  %v2223_v31 = vadd.f32 1.0, %v7500_v20  ;;  %v13259_v50 = vld [vmem:[#allocation57_spill] sm:$0xff]  ;;  %v13261_v20 = vld [vmem:[#allocation59_spill] sm:$0xff] }
 0x771   :  { %7505 = vrcp.f32 %v2223_v31  ;;  %v13263_v31 = vld [vmem:[#allocation61_spill] sm:$0xff] }
 0x77a   :  { %v7502_v32 = vpop.eup %7501 }
 0x77b   :  { %v2227_v36 = vmul.f32 %v7502_v32, %v7498_v49  ;;  %v13253_v32 = vld [vmem:[#allocation51_spill] sm:$0xff]  ;;  %v13260_v49 = vld [vmem:[#allocation58_spill] sm:$0xff] }
 0x77c   :  { %v7504_v17 = vpop.eup %7503 }
 0x77d   :  { %v2226_v35 = vmul.f32 0.0, %v7504_v17  ;;  %v13262_v17 = vld [vmem:[#allocation60_spill] sm:$0xff] }
 0x77e   :  { %v7506_v39 = vpop.eup %7505 }
 0x77f   :  { %v9612_v0 = vadd.f32 %v2227_v36, %v2226_v35  ;;  %v13251_v36 = vld [vmem:[#allocation49_spill] sm:$0xff]  ;;  %v13252_v35 = vld [vmem:[#allocation50_spill] sm:$0xff] }
 0x781   :  { %7507 = vtanh.f32 %v9612_v0 }
 0x78e   :  { %v7508_v34 = vpop.eup %7507 }
 0x78f   :  { %v9615_v21 = vmul.f32 %v7508_v34, %v7506_v39  ;;  %v13264_v39 = vld [vmem:[#allocation28_spill] sm:$0xff] }
 0x790   :  { %v13265_v34 = vld [vmem:[#allocation16_spill] sm:$0xff] }
 0x791   :  { %13250 = vst [vmem:[#allocation12_spill] sm:$0xff] %v9615_v21  ;;  %2300 = vmatmul.mubr.f32.vlgmr.msra.gmra.mxu0 %v9615_v21  ;;  %2371 = vmatmul.mubr.f32.vlgmr.msra.gmra.mxu1 %v9615_v21  ;;  %v13266_v21 = vld [vmem:[#allocation29_spill] sm:$0xff] }
 0x792   :  { %2410 = vmatpush1.msra.mxu0 %v9300_v22  ;;  %2481 = vmatpush1.msra.mxu1 %v9302_v2 }
 0x793   :  { %2411 = vmatprep.subr.mxu0 %v9304_v57  ;;  %2482 = vmatprep.subr.mxu1 %v9306_v54 }
 0x794   :  { %2412 = vmatpush1.msra.mxu0 %v9308_v52  ;;  %2483 = vmatpush1.msra.mxu1 %v9310_v5 }
 0x795   :  { %2413 = vmatprep.subr.mxu0 %v9314_v6  ;;  %2484 = vmatprep.subr.mxu1 %v9316_v7 }
 0x796   :  { %2414 = vmatpush1.msra.mxu0 %v9320_v8  ;;  %2485 = vmatpush1.msra.mxu1 %v9322_v9 }
 0x797   :  { %2415 = vmatprep.subr.mxu0 %v9326_v10  ;;  %2486 = vmatprep.subr.mxu1 %v9328_v11 }
 0x798   :  { %2416 = vmatpush1.msra.mxu0 %v9332_v12  ;;  %2487 = vmatpush1.msra.mxu1 %v9334_v13 }
 0x799   :  { %2417 = vmatprep.subr.mxu0 %v9338_v15  ;;  %2488 = vmatprep.subr.mxu1 %v9340_v18 }
 0x79a   :  { %2418 = vmatpush1.msra.mxu0 %v9344_v19  ;;  %2489 = vmatpush1.msra.mxu1 %v9346_v24 }
 0x79b   :  { %2419 = vmatprep.subr.mxu0 %v9350_v27  ;;  %2490 = vmatprep.subr.mxu1 %v9352_v28 }
 0x79c   :  { %2420 = vmatpush1.msra.mxu0 %v9356_v29  ;;  %2491 = vmatpush1.msra.mxu1 %v9358_v30 }
 0x79d   :  { %2421 = vmatprep.subr.mxu0 %v9362_v37  ;;  %2492 = vmatprep.subr.mxu1 %v9364_v40 }
 0x79e   :  { %2422 = vmatpush1.msra.mxu0 %v9368_v46  ;;  %2493 = vmatpush1.msra.mxu1 %v9370_v56 }
 0x79f   :  { %2423 = vmatprep.subr.mxu0 %v9374_v48  ;;  %2494 = vmatprep.subr.mxu1 %v9376_v58 }
 0x7a0   :  { %2424 = vmatpush1.msra.mxu0 %v9380_v63  ;;  %2495 = vmatpush1.msra.mxu1 %v9382_v26 }
 0x7a1   :  { %2425 = vmatprep.subr.mxu0 %v9386_v23  ;;  %2496 = vmatprep.subr.mxu1 %v9388_v62 }
 0x7a2   :  { %2426 = vmatpush1.msra.mxu0 %v9392_v25  ;;  %2497 = vmatpush1.msra.mxu1 %v9394_v4 }
 0x7a3   :  { %2427 = vmatprep.subr.mxu0 %v9398_v14  ;;  %2498 = vmatprep.subr.mxu1 %v9400_v41 }
 0x7a4   :  { %2428 = vmatpush1.msra.mxu0 %v9404_v51  ;;  %2499 = vmatpush1.msra.mxu1 %v9406_v3 }
 0x7a5   :  { %2429 = vmatprep.subr.mxu0 %v9410_v1  ;;  %2500 = vmatprep.subr.mxu1 %v9412_v53 }
 0x7a6   :  { %2430 = vmatpush1.msra.mxu0 %v13251_v36  ;;  %2501 = vmatpush1.msra.mxu1 %v9418_v47 }
 0x7a7   :  { %2431 = vmatprep.subr.mxu0 %v13252_v35  ;;  %2502 = vmatprep.subr.mxu1 %v13253_v32 }
 0x7a8   :  { %2432 = vmatpush1.msra.mxu0 %v13254_v60  ;;  %2503 = vmatpush1.msra.mxu1 %v13255_v59  ;;  %v13279_v59 = vld [vmem:[#allocation45_spill] sm:$0xff] }
 0x7a9   :  { %2433 = vmatprep.subr.mxu0 %v13256_v42  ;;  %2504 = vmatprep.subr.mxu1 %v13257_v38 }
 0x7aa   :  { %2434 = vmatpush1.msra.mxu0 %v13258_v55  ;;  %2505 = vmatpush1.msra.mxu1 %v13259_v50  ;;  %v13270_v50 = vld [vmem:[#allocation70_spill] sm:$0xff] }
 0x7ab   :  { %2435 = vmatprep.subr.mxu0 %v13260_v49  ;;  %2506 = vmatprep.subr.mxu1 %v13261_v20  ;;  %v13271_v49 = vmov 0.0   ;;  %v13272_v20 = vld [vmem:[#allocation71_spill] sm:$0xff] }
 0x7ac   :  { %2436 = vmatpush1.msra.mxu0 %v13262_v17  ;;  %2507 = vmatpush1.msra.mxu1 %v13263_v31  ;;  %v13273_v31 = vld [vmem:[#allocation39_spill] sm:$0xff] }
 0x7ad   :  { %2437 = vmatprep.subr.mxu0 %v13264_v39  ;;  %2508 = vmatprep.subr.mxu1 %v13265_v34  ;;  %v13274_v39 = vld [vmem:[#allocation40_spill] sm:$0xff] }
 0x7ae   :  { %2438 = vmatpush1.msra.mxu0 %v13266_v21  ;;  %2509 = vmatpush1.msra.mxu1 %v13267_v44  ;;  %v13275_v21 = vld [vmem:[#allocation46_spill] sm:$0xff] }
 0x7af   :  { %2439 = vmatprep.subr.mxu0 %v13268_v33  ;;  %2510 = vmatprep.subr.mxu1 %v13269_v16  ;;  %v13276_v16 = vld [vmem:[#allocation43_spill] sm:$0xff]  ;;  %v13277_v33 = vld [vmem:[#allocation44_spill] sm:$0xff] }
 0x7b0   :  { %2440 = vmatpush1.msra.mxu0 %v13270_v50  ;;  %2473 = vmatprep.mubr.f32.mxu0 %v13271_v49  ;;  %v13278_v50 = vsel %vm8854_vm5, %v13276_v16, %v13277_v33 }
 0x7b1   :  { %2511 = vmatpush1.msra.mxu1 %v13272_v20  ;;  %2544 = vmatprep.mubr.f32.mxu1 %v13271_v49 }
 0x7b2   :  { %2583 = vmatprep.subr.mxu0 %v13273_v31  ;;  %2654 = vmatprep.subr.mxu1 %v13274_v39  ;;  %v13280_v31 = vld [vmem:[#allocation47_spill] sm:$0xff] }
 0x7b3   :  { %v2234_v39 = vsel %vm8858_vm6, %v13280_v31, %v13279_v59 }
 0x851   :  { %v2301_v34 = vpop.f32.mrf.mxu0  ;;  %v2372_v42 = vpop.f32.mrf.mxu1 }
 0x852   :  { %v2377_v17 = vadd.f32 %v2301_v34, %v13275_v21  ;;  %v13281_v21 = vld [vmem:[#allocation41_spill] sm:$0xff] }
 0x853   :  { %v2303_v44 = vpop.f32.mrf.mxu0  ;;  %v2374_v49 = vpop.f32.mrf.mxu1 }
 0x854   :  { %v6953_v55 = vmul.f32 -1.442695, %v2377_v17  ;;  %v2378_v38 = vadd.f32 %v2303_v44, %v13278_v50  ;;  %v2380_v60 = vadd.f32 %v2374_v49, %v2234_v39  ;;  %v13282_v17 = vld [vmem:[#allocation42_spill] sm:$0xff] }
 0x855   :  { %v13283_v34 = vsel %vm8841_vm4, %v13281_v21, %v13282_v17  ;;  %v13302_v21 = vld [vmem:[#allocation70_spill] sm:$0xff]  ;;  %v13303_v17 = vmov 0.0  }
 0x856   :  { %7509 = vpow2.f32 %v6953_v55  ;;  %v6954_v20 = vmul.f32 -1.442695, %v2378_v38  ;;  %v2379_v61 = vadd.f32 %v2372_v42, %v13283_v34  ;;  %v6955_v32 = vmul.f32 -1.442695, %v2380_v60  ;;  %v13289_v42 = vld [vmem:[#allocation55_spill] sm:$0xff]  ;;  %v13291_v34 = vld [vmem:[#allocation57_spill] sm:$0xff] }
 0x858   :  { %7511 = vpow2.f32 %v6954_v20 }
 0x859   :  { %7513 = vtanh.f32 %v2379_v61 }
 0x85a   :  { %7515 = vpow2.f32 %v6955_v32  ;;  %v13287_v32 = vld [vmem:[#allocation53_spill] sm:$0xff] }
 0x863   :  { %v7510_v16 = vpop.eup %7509 }
 0x864   :  { %v2384_v44 = vadd.f32 1.0, %v7510_v16 }
 0x865   :  { %v7512_v55 = vpop.eup %7511 }
 0x866   :  { %7517 = vrcp.f32 %v2384_v44  ;;  %v2390_v38 = vadd.f32 1.0, %v7512_v55  ;;  %v7514_v50 = vpop.eup %7513  ;;  %v13292_v44 = vld [vmem:[#allocation58_spill] sm:$0xff]  ;;  %v13293_v55 = vld [vmem:[#allocation59_spill] sm:$0xff] }
 0x867   :  { %v7516_v20 = vpop.eup %7515 }
 0x868   :  { %7519 = vrcp.f32 %v2390_v38  ;;  %v2397_v39 = vadd.f32 1.0, %v7516_v20  ;;  %v13294_v38 = vld [vmem:[#allocation60_spill] sm:$0xff] }
 0x869   :  { %v13296_v20 = vld [vmem:[#allocation28_spill] sm:$0xff] }
 0x86a   :  { %7521 = vrcp.f32 %v2397_v39  ;;  %v13298_v39 = vld [vmem:[#allocation29_spill] sm:$0xff] }
 0x873   :  { %v7518_v33 = vpop.eup %7517 }
 0x874   :  { %v2401_v31 = vmul.f32 %v7518_v33, %v7514_v50  ;;  %v13285_v33 = vld [vmem:[#allocation51_spill] sm:$0xff]  ;;  %v13295_v50 = vld [vmem:[#allocation61_spill] sm:$0xff] }
 0x875   :  { %v7520_v49 = vpop.eup %7519 }
 0x876   :  { %v2400_v59 = vmul.f32 %v7520_v49, %v9612_v0  ;;  %v13286_v0 = vld [vmem:[#allocation52_spill] sm:$0xff] }
 0x877   :  { %v7522_v16 = vpop.eup %7521  ;;  %v13297_v49 = vld [vmem:[#allocation16_spill] sm:$0xff] }
 0x878   :  { %v9701_v43 = vadd.f32 %v2401_v31, %v2400_v59  ;;  %v13288_v59 = vld [vmem:[#allocation54_spill] sm:$0xff]  ;;  %v13290_v31 = vld [vmem:[#allocation56_spill] sm:$0xff] }
 0x87a   :  { %7523 = vtanh.f32 %v9701_v43 }
 0x887   :  { %v7524_v61 = vpop.eup %7523 }
 0x888   :  { %v9704_v60 = vmul.f32 %v7524_v61, %v7522_v16  ;;  %v13299_v16 = vld [vmem:[#allocation30_spill] sm:$0xff]  ;;  %v13300_v61 = vld [vmem:[#allocation68_spill] sm:$0xff] }
 0x88a   :  { %13284 = vst [vmem:[#allocation49_spill] sm:$0xff] %v9704_v60  ;;  %2474 = vmatmul.mubr.f32.vlgmr.msra.gmra.mxu0 %v9704_v60  ;;  %2545 = vmatmul.mubr.f32.vlgmr.msra.gmra.mxu1 %v9704_v60  ;;  %v13301_v60 = vld [vmem:[#allocation69_spill] sm:$0xff] }
 0x88b   :  { %2584 = vmatpush1.msra.mxu0 %v9300_v22  ;;  %2655 = vmatpush1.msra.mxu1 %v9302_v2 }
 0x88c   :  { %2585 = vmatprep.subr.mxu0 %v9304_v57  ;;  %2656 = vmatprep.subr.mxu1 %v9306_v54 }
 0x88d   :  { %2586 = vmatpush1.msra.mxu0 %v9308_v52  ;;  %2657 = vmatpush1.msra.mxu1 %v9310_v5 }
 0x88e   :  { %2587 = vmatprep.subr.mxu0 %v9314_v6  ;;  %2658 = vmatprep.subr.mxu1 %v9316_v7 }
 0x88f   :  { %2588 = vmatpush1.msra.mxu0 %v9320_v8  ;;  %2659 = vmatpush1.msra.mxu1 %v9322_v9 }
 0x890   :  { %2589 = vmatprep.subr.mxu0 %v9326_v10  ;;  %2660 = vmatprep.subr.mxu1 %v9328_v11 }
 0x891   :  { %2590 = vmatpush1.msra.mxu0 %v9332_v12  ;;  %2661 = vmatpush1.msra.mxu1 %v9334_v13 }
 0x892   :  { %2591 = vmatprep.subr.mxu0 %v9338_v15  ;;  %2662 = vmatprep.subr.mxu1 %v9340_v18 }
 0x893   :  { %2592 = vmatpush1.msra.mxu0 %v9344_v19  ;;  %2663 = vmatpush1.msra.mxu1 %v9346_v24 }
 0x894   :  { %2593 = vmatprep.subr.mxu0 %v9350_v27  ;;  %2664 = vmatprep.subr.mxu1 %v9352_v28 }
 0x895   :  { %2594 = vmatpush1.msra.mxu0 %v9356_v29  ;;  %2665 = vmatpush1.msra.mxu1 %v9358_v30 }
 0x896   :  { %2595 = vmatprep.subr.mxu0 %v9362_v37  ;;  %2666 = vmatprep.subr.mxu1 %v9364_v40 }
 0x897   :  { %2596 = vmatpush1.msra.mxu0 %v9368_v46  ;;  %2667 = vmatpush1.msra.mxu1 %v9370_v56 }
 0x898   :  { %2597 = vmatprep.subr.mxu0 %v9374_v48  ;;  %2668 = vmatprep.subr.mxu1 %v9376_v58 }
 0x899   :  { %2598 = vmatpush1.msra.mxu0 %v9380_v63  ;;  %2669 = vmatpush1.msra.mxu1 %v9382_v26 }
 0x89a   :  { %2599 = vmatprep.subr.mxu0 %v9386_v23  ;;  %2670 = vmatprep.subr.mxu1 %v9388_v62 }
 0x89b   :  { %2600 = vmatpush1.msra.mxu0 %v9392_v25  ;;  %2671 = vmatpush1.msra.mxu1 %v9394_v4 }
 0x89c   :  { %2601 = vmatprep.subr.mxu0 %v9398_v14  ;;  %2672 = vmatprep.subr.mxu1 %v9400_v41 }
 0x89d   :  { %2602 = vmatpush1.msra.mxu0 %v9404_v51  ;;  %2673 = vmatpush1.msra.mxu1 %v9406_v3 }
 0x89e   :  { %2603 = vmatprep.subr.mxu0 %v9410_v1  ;;  %2674 = vmatprep.subr.mxu1 %v9412_v53 }
 0x89f   :  { %2604 = vmatpush1.msra.mxu0 %v13251_v36  ;;  %2675 = vmatpush1.msra.mxu1 %v9418_v47 }
 0x8a0   :  { %2605 = vmatprep.subr.mxu0 %v13252_v35  ;;  %2676 = vmatprep.subr.mxu1 %v13285_v33 }
 0x8a1   :  { %2606 = vmatpush1.msra.mxu0 %v13286_v0  ;;  %2677 = vmatpush1.msra.mxu1 %v13287_v32 }
 0x8a2   :  { %2607 = vmatprep.subr.mxu0 %v13288_v59  ;;  %2678 = vmatprep.subr.mxu1 %v13289_v42  ;;  %v13312_v59 = vld [vmem:[#allocation64_spill] sm:$0xff] }
 0x8a3   :  { %2608 = vmatpush1.msra.mxu0 %v13290_v31  ;;  %2679 = vmatpush1.msra.mxu1 %v13291_v34  ;;  %v13310_v34 = vld [vmem:[#allocation63_spill] sm:$0xff] }
 0x8a4   :  { %2609 = vmatprep.subr.mxu0 %v13292_v44  ;;  %2680 = vmatprep.subr.mxu1 %v13293_v55  ;;  %v13304_v55 = vld [vmem:[#allocation71_spill] sm:$0xff] }
 0x8a5   :  { %2610 = vmatpush1.msra.mxu0 %v13294_v38  ;;  %2681 = vmatpush1.msra.mxu1 %v13295_v50  ;;  %v13305_v50 = vld [vmem:[#allocation39_spill] sm:$0xff] }
 0x8a6   :  { %2611 = vmatprep.subr.mxu0 %v13296_v20  ;;  %2682 = vmatprep.subr.mxu1 %v13297_v49  ;;  %v13306_v20 = vld [vmem:[#allocation40_spill] sm:$0xff] }
 0x8a7   :  { %2612 = vmatpush1.msra.mxu0 %v13298_v39  ;;  %2683 = vmatpush1.msra.mxu1 %v13299_v16  ;;  %v13307_v39 = vld [vmem:[#allocation65_spill] sm:$0xff] }
 0x8a8   :  { %2613 = vmatprep.subr.mxu0 %v13300_v61  ;;  %2684 = vmatprep.subr.mxu1 %v13301_v60  ;;  %v13309_v60 = vld [vmem:[#allocation32_spill] sm:$0xff] }
 0x8a9   :  { %2614 = vmatpush1.msra.mxu0 %v13302_v21  ;;  %2647 = vmatprep.mubr.f32.mxu0 %v13303_v17  ;;  %v13311_v21 = vsel %vm8854_vm5, %v13309_v60, %v13310_v34 }
 0x8aa   :  { %2685 = vmatpush1.msra.mxu1 %v13304_v55  ;;  %2718 = vmatprep.mubr.f32.mxu1 %v13303_v17 }
 0x8ab   :  { %2757 = vmatprep.subr.mxu0 %v13305_v50  ;;  %2828 = vmatprep.subr.mxu1 %v13306_v20  ;;  %v13313_v50 = vld [vmem:[#allocation66_spill] sm:$0xff] }
 0x8ac   :  { %v2408_v20 = vsel %vm8858_vm6, %v13313_v50, %v13312_v59 }
 0x94a   :  { %v2475_v49 = vpop.f32.mrf.mxu0  ;;  %v2546_v42 = vpop.f32.mrf.mxu1 }
 0x94b   :  { %v2551_v38 = vadd.f32 %v2475_v49, %v13307_v39  ;;  %v13316_v39 = vld [vmem:[#allocation62_spill] sm:$0xff] }
 0x94c   :  { %v2477_v16 = vpop.f32.mrf.mxu0  ;;  %v2548_v17 = vpop.f32.mrf.mxu1 }
 0x94d   :  { %v6956_v44 = vmul.f32 -1.442695, %v2551_v38  ;;  %v2552_v31 = vadd.f32 %v2477_v16, %v13311_v21  ;;  %v2554_v32 = vadd.f32 %v2548_v17, %v2408_v20  ;;  %v13315_v38 = vld [vmem:[#allocation31_spill] sm:$0xff] }
 0x94e   :  { %v13317_v61 = vsel %vm8841_vm4, %v13315_v38, %v13316_v39  ;;  %v10013_v38 = vld [vmem:[#allocation4 + $0xb0] sm:$0xff]  ;;  %v10016_v39 = vld [vmem:[#allocation4 + $0x88] sm:$0xff] }
 0x94f   :  { %7525 = vpow2.f32 %v6956_v44  ;;  %v6957_v55 = vmul.f32 -1.442695, %v2552_v31  ;;  %v2553_v0 = vadd.f32 %v2546_v42, %v13317_v61  ;;  %v6958_v33 = vmul.f32 -1.442695, %v2554_v32 }
 0x951   :  { %7527 = vpow2.f32 %v6957_v55 }
 0x952   :  { %7529 = vtanh.f32 %v2553_v0 }
 0x953   :  { %7531 = vpow2.f32 %v6958_v33 }
 0x95c   :  { %v7526_v60 = vpop.eup %7525 }
 0x95d   :  { %v2558_v21 = vadd.f32 1.0, %v7526_v60 }
 0x95e   :  { %v7528_v44 = vpop.eup %7527 }
 0x95f   :  { %7533 = vrcp.f32 %v2558_v21  ;;  %v2564_v31 = vadd.f32 1.0, %v7528_v44  ;;  %v7530_v55 = vpop.eup %7529 }
 0x960   :  { %v7532_v16 = vpop.eup %7531 }
 0x961   :  { %7535 = vrcp.f32 %v2564_v31  ;;  %v2571_v20 = vadd.f32 1.0, %v7532_v16 }
 0x963   :  { %7537 = vrcp.f32 %v2571_v20 }
 0x96c   :  { %v7534_v34 = vpop.eup %7533 }
 0x96d   :  { %v2575_v50 = vmul.f32 %v7534_v34, %v7530_v55 }
 0x96e   :  { %v7536_v17 = vpop.eup %7535 }
 0x96f   :  { %v2574_v59 = vmul.f32 %v7536_v17, %v9701_v43  ;;  %v13350_v43 = vld [vmem:[#allocation21_spill] sm:$0xff] }
 0x970   :  { %v7538_v60 = vpop.eup %7537 }
 0x971   :  { %v9790_v49 = vadd.f32 %v2575_v50, %v2574_v59 }
 0x973   :  { %7539 = vtanh.f32 %v9790_v49 }
 0x980   :  { %v7540_v0 = vpop.eup %7539 }
 0x981   :  { %v9793_v32 = vmul.f32 %v7540_v0, %v7538_v60 }
 0x983   :  { %13318 = vst [vmem:[#allocation50_spill] sm:$0xff] %v9793_v32  ;;  %2648 = vmatmul.mubr.f32.vlgmr.msra.gmra.mxu0 %v9793_v32  ;;  %2719 = vmatmul.mubr.f32.vlgmr.msra.gmra.mxu1 %v9793_v32  ;;  %v10010_v32 = vld [vmem:[#allocation4 + $0xa0] sm:$0xff] }
 0x984   :  { %2758 = vmatpush1.msra.mxu0 %v9300_v22  ;;  %2829 = vmatpush1.msra.mxu1 %v9302_v2  ;;  %v13329_v22 = vld [vmem:[#allocation61_spill] sm:$0xff]  ;;  %v13330_v2 = vld [vmem:[#allocation28_spill] sm:$0xff] }
 0x985   :  { %2759 = vmatprep.subr.mxu0 %v9304_v57  ;;  %2830 = vmatprep.subr.mxu1 %v9306_v54  ;;  %v13331_v57 = vld [vmem:[#allocation16_spill] sm:$0xff]  ;;  %v13332_v54 = vld [vmem:[#allocation29_spill] sm:$0xff] }
 0x986   :  { %2760 = vmatpush1.msra.mxu0 %v9308_v52  ;;  %2831 = vmatpush1.msra.mxu1 %v9310_v5  ;;  %v13333_v52 = vld [vmem:[#allocation30_spill] sm:$0xff]  ;;  %v13334_v5 = vld [vmem:[#allocation68_spill] sm:$0xff] }
 0x987   :  { %2761 = vmatprep.subr.mxu0 %v9314_v6  ;;  %2832 = vmatprep.subr.mxu1 %v9316_v7  ;;  %v13335_v6 = vld [vmem:[#allocation69_spill] sm:$0xff]  ;;  %v13336_v7 = vld [vmem:[#allocation70_spill] sm:$0xff] }
 0x988   :  { %2762 = vmatpush1.msra.mxu0 %v9320_v8  ;;  %2833 = vmatpush1.msra.mxu1 %v9322_v9  ;;  %v13337_v8 = vmov 0.0   ;;  %v13338_v9 = vld [vmem:[#allocation71_spill] sm:$0xff] }
 0x989   :  { %2763 = vmatprep.subr.mxu0 %v9326_v10  ;;  %2834 = vmatprep.subr.mxu1 %v9328_v11  ;;  %v9861_v10 = vld [vmem:[#allocation4 + $0x1e8] sm:$0xff]  ;;  %v9864_v11 = vld [vmem:[#allocation4 + $0x1f8] sm:$0xff] }
 0x98a   :  { %2764 = vmatpush1.msra.mxu0 %v9332_v12  ;;  %2835 = vmatpush1.msra.mxu1 %v9334_v13  ;;  %13339 = vst [vmem:[#allocation46_spill] sm:$0xff] %v9861_v10  ;;  %13340 = vst [vmem:[#allocation39_spill] sm:$0xff] %v9864_v11  ;;  %v13341_v13 = vld [vmem:[#allocation36_spill] sm:$0xff] }
 0x98b   :  { %2765 = vmatprep.subr.mxu0 %v9338_v15  ;;  %2836 = vmatprep.subr.mxu1 %v9340_v18 }
 0x98c   :  { %2766 = vmatpush1.msra.mxu0 %v9344_v19  ;;  %2837 = vmatpush1.msra.mxu1 %v9346_v24 }
 0x98d   :  { %2767 = vmatprep.subr.mxu0 %v9350_v27  ;;  %2838 = vmatprep.subr.mxu1 %v9352_v28  ;;  %v13343_v27 = vld [vmem:[#allocation33_spill] sm:$0xff]  ;;  %v13344_v28 = vld [vmem:[#allocation34_spill] sm:$0xff] }
 0x98e   :  { %2768 = vmatpush1.msra.mxu0 %v9356_v29  ;;  %2839 = vmatpush1.msra.mxu1 %v9358_v30  ;;  %v13345_v29 = vsel %vm8854_vm5, %v13343_v27, %v13344_v28 }
 0x98f   :  { %2769 = vmatprep.subr.mxu0 %v9362_v37  ;;  %2840 = vmatprep.subr.mxu1 %v9364_v40 }
 0x990   :  { %2770 = vmatpush1.msra.mxu0 %v9368_v46  ;;  %2841 = vmatpush1.msra.mxu1 %v9370_v56  ;;  %v13346_v56 = vld [vmem:[#allocation35_spill] sm:$0xff] }
 0x991   :  { %2771 = vmatprep.subr.mxu0 %v9374_v48  ;;  %2842 = vmatprep.subr.mxu1 %v9376_v58  ;;  %v13347_v48 = vld [vmem:[#allocation37_spill] sm:$0xff] }
 0x992   :  { %2772 = vmatpush1.msra.mxu0 %v9380_v63  ;;  %2843 = vmatpush1.msra.mxu1 %v9382_v26  ;;  %v2582_v58 = vsel %vm8858_vm6, %v13347_v48, %v13346_v56 }
 0x993   :  { %2773 = vmatprep.subr.mxu0 %v9386_v23  ;;  %2844 = vmatprep.subr.mxu1 %v9388_v62  ;;  %v13319_v62 = vld [vmem:[#allocation51_spill] sm:$0xff]  ;;  %v13349_v23 = vld [vmem:[#allocation24_spill] sm:$0xff] }
 0x994   :  { %2774 = vmatpush1.msra.mxu0 %v9392_v25  ;;  %2845 = vmatpush1.msra.mxu1 %v9394_v4  ;;  %v13320_v4 = vld [vmem:[#allocation52_spill] sm:$0xff]  ;;  %v13327_v25 = vld [vmem:[#allocation59_spill] sm:$0xff] }
 0x995   :  { %2775 = vmatprep.subr.mxu0 %v9398_v14  ;;  %2846 = vmatprep.subr.mxu1 %v9400_v41  ;;  %v13321_v14 = vld [vmem:[#allocation53_spill] sm:$0xff]  ;;  %v13322_v41 = vld [vmem:[#allocation54_spill] sm:$0xff] }
 0x996   :  { %2776 = vmatpush1.msra.mxu0 %v9404_v51  ;;  %2847 = vmatpush1.msra.mxu1 %v9406_v3  ;;  %v13323_v51 = vld [vmem:[#allocation55_spill] sm:$0xff]  ;;  %v13324_v3 = vld [vmem:[#allocation56_spill] sm:$0xff]  ;;  %13356 = vst [vmem:[#allocation53_spill] sm:$0xff] %v10010_v32  ;;  %13357 = vst [vmem:[#allocation54_spill] sm:$0xff] %v10013_v38 }
 0x997   :  { %2777 = vmatprep.subr.mxu0 %v9410_v1  ;;  %2848 = vmatprep.subr.mxu1 %v9412_v53  ;;  %v13325_v1 = vld [vmem:[#allocation57_spill] sm:$0xff]  ;;  %v13326_v53 = vld [vmem:[#allocation58_spill] sm:$0xff]  ;;  %13358 = vst [vmem:[#allocation55_spill] sm:$0xff] %v10016_v39 }
 0x998   :  { %2778 = vmatpush1.msra.mxu0 %v13251_v36  ;;  %2849 = vmatpush1.msra.mxu1 %v9418_v47  ;;  %v13328_v47 = vld [vmem:[#allocation60_spill] sm:$0xff]  ;;  %v13351_v36 = vsel %vm8841_vm4, %v13349_v23, %v13350_v43 }
 0x999   :  { %2779 = vmatprep.subr.mxu0 %v13252_v35  ;;  %2850 = vmatprep.subr.mxu1 %v13319_v62 }
 0x99a   :  { %2780 = vmatpush1.msra.mxu0 %v13320_v4  ;;  %2851 = vmatpush1.msra.mxu1 %v13321_v14  ;;  %v9890_v4 = vld [vmem:[#allocation4 + $0x1e0] sm:$0xff]  ;;  %v9893_v14 = vld [vmem:[#allocation4 + $0x1f0] sm:$0xff] }
 0x99b   :  { %2781 = vmatprep.subr.mxu0 %v13322_v41  ;;  %2852 = vmatprep.subr.mxu1 %v13323_v51  ;;  %v9899_v41 = vld [vmem:[#allocation4 + $0x1d8] sm:$0xff]  ;;  %v9902_v51 = vld [vmem:[#allocation4 + $0x1c0] sm:$0xff] }
 0x99c   :  { %2782 = vmatpush1.msra.mxu0 %v13324_v3  ;;  %2853 = vmatpush1.msra.mxu1 %v13325_v1  ;;  %v9905_v3 = vld [vmem:[#allocation4 + $0x1d0] sm:$0xff]  ;;  %v9908_v1 = vld [vmem:[#allocation4 + $0x1a8] sm:$0xff] }
 0x99d   :  { %2783 = vmatprep.subr.mxu0 %v13326_v53  ;;  %2854 = vmatprep.subr.mxu1 %v13327_v25  ;;  %v9911_v53 = vld [vmem:[#allocation4 + $0x1b8] sm:$0xff]  ;;  %v9914_v25 = vld [vmem:[#allocation4 + $0x1a0] sm:$0xff] }
 0x99e   :  { %2784 = vmatpush1.msra.mxu0 %v13328_v47  ;;  %2855 = vmatpush1.msra.mxu1 %v13329_v22  ;;  %v9917_v47 = vld [vmem:[#allocation4 + $0x1b0] sm:$0xff]  ;;  %v9920_v22 = vld [vmem:[#allocation4 + $0x188] sm:$0xff] }
 0x99f   :  { %2785 = vmatprep.subr.mxu0 %v13330_v2  ;;  %2856 = vmatprep.subr.mxu1 %v13331_v57 }
 0x9a0   :  { %2786 = vmatpush1.msra.mxu0 %v13332_v54  ;;  %2857 = vmatpush1.msra.mxu1 %v13333_v52 }
 0x9a1   :  { %2787 = vmatprep.subr.mxu0 %v13334_v5  ;;  %2858 = vmatprep.subr.mxu1 %v13335_v6 }
 0x9a2   :  { %2788 = vmatpush1.msra.mxu0 %v13336_v7  ;;  %2821 = vmatprep.mubr.f32.mxu0 %v13337_v8 }
 0x9a3   :  { %2859 = vmatpush1.msra.mxu1 %v13338_v9  ;;  %2892 = vmatprep.mubr.f32.mxu1 %v13337_v8 }
 0x9a4   :  { %2931 = vmatprep.subr.mxu0 %v9861_v10  ;;  %3002 = vmatprep.subr.mxu1 %v9864_v11 }
 0xa43   :  { %v2649_v12 = vpop.f32.mrf.mxu0  ;;  %v2720_v37 = vpop.f32.mrf.mxu1 }
 0xa44   :  { %v2725_v15 = vadd.f32 %v2649_v12, %v13341_v13  ;;  %v2727_v35 = vadd.f32 %v2720_v37, %v13351_v36  ;;  %v9923_v12 = vld [vmem:[#allocation4 + $0x198] sm:$0xff]  ;;  %v9926_v13 = vld [vmem:[#allocation4 + $0x180] sm:$0xff]  ;;  %v9944_v37 = vld [vmem:[#allocation4 + $0x148] sm:$0xff] }
 0xa45   :  { %v2651_v18 = vpop.f32.mrf.mxu0  ;;  %v2722_v46 = vpop.f32.mrf.mxu1  ;;  %v9959_v36 = vld [vmem:[#allocation4 + $0x138] sm:$0xff] }
 0xa46   :  { %v6959_v19 = vmul.f32 -1.442695, %v2725_v15  ;;  %v2726_v30 = vadd.f32 %v2651_v18, %v13345_v29  ;;  %v2728_v63 = vadd.f32 %v2722_v46, %v2582_v58  ;;  %v9929_v15 = vld [vmem:[#allocation4 + $0x190] sm:$0xff]  ;;  %v9932_v18 = vld [vmem:[#allocation4 + $0x168] sm:$0xff]  ;;  %v9938_v29 = vld [vmem:[#allocation4 + $0x160] sm:$0xff] }
 0xa47   :  { %v9950_v46 = vld [vmem:[#allocation4 + $0x140] sm:$0xff]  ;;  %v9953_v58 = vld [vmem:[#allocation4 + $0x150] sm:$0xff] }
 0xa48   :  { %7541 = vpow2.f32 %v6959_v19  ;;  %v6960_v40 = vmul.f32 -1.442695, %v2726_v30  ;;  %v6961_v33 = vmul.f32 -1.442695, %v2728_v63  ;;  %v9935_v19 = vld [vmem:[#allocation4 + $0x178] sm:$0xff]  ;;  %v9941_v30 = vld [vmem:[#allocation4 + $0x170] sm:$0xff] }
 0xa49   :  { %v9956_v63 = vld [vmem:[#allocation4 + $0x128] sm:$0xff] }
 0xa4a   :  { %7543 = vpow2.f32 %v6960_v40  ;;  %v9947_v40 = vld [vmem:[#allocation4 + $0x158] sm:$0xff] }
 0xa4b   :  { %7545 = vtanh.f32 %v2727_v35  ;;  %v9962_v35 = vld [vmem:[#allocation4 + $0x120] sm:$0xff] }
 0xa4c   :  { %7547 = vpow2.f32 %v6961_v33  ;;  %v9965_v33 = vld [vmem:[#allocation4 + $0x130] sm:$0xff] }
 0xa55   :  { %v7542_v59 = vpop.eup %7541 }
 0xa56   :  { %v2732_v42 = vadd.f32 1.0, %v7542_v59  ;;  %v9968_v59 = vld [vmem:[#allocation4 + $0x108] sm:$0xff] }
 0xa57   :  { %v7544_v34 = vpop.eup %7543 }
 0xa58   :  { %7549 = vrcp.f32 %v2732_v42  ;;  %v2738_v61 = vadd.f32 1.0, %v7544_v34  ;;  %v7546_v50 = vpop.eup %7545  ;;  %v9971_v42 = vld [vmem:[#allocation4 + $0x118] sm:$0xff]  ;;  %v9974_v34 = vld [vmem:[#allocation4 + $0x100] sm:$0xff] }
 0xa59   :  { %v7548_v21 = vpop.eup %7547 }
 0xa5a   :  { %7551 = vrcp.f32 %v2738_v61  ;;  %v2745_v16 = vadd.f32 1.0, %v7548_v21  ;;  %v9977_v61 = vld [vmem:[#allocation4 + $0x110] sm:$0xff]  ;;  %v9983_v21 = vld [vmem:[#allocation4 + $0xf8] sm:$0xff] }
 0xa5c   :  { %7553 = vrcp.f32 %v2745_v16  ;;  %v9995_v16 = vld [vmem:[#allocation4 + $0xd8] sm:$0xff] }
 0xa65   :  { %v7550_v44 = vpop.eup %7549 }
 0xa66   :  { %v2749_v31 = vmul.f32 %v7550_v44, %v7546_v50  ;;  %v9980_v50 = vld [vmem:[#allocation4 + $0xe8] sm:$0xff]  ;;  %v9986_v44 = vld [vmem:[#allocation4 + $0xe0] sm:$0xff] }
 0xa67   :  { %v7552_v55 = vpop.eup %7551 }
 0xa68   :  { %v2748_v17 = vmul.f32 %v7552_v55, %v9790_v49  ;;  %v9896_v49 = vld [vmem:[#allocation4 + $0x1c8] sm:$0xff] }
 0xa69   :  { %v7554_v60 = vpop.eup %7553  ;;  %v9992_v55 = vld [vmem:[#allocation4 + $0xc8] sm:$0xff] }
 0xa6a   :  { %v9883_v20 = vadd.f32 %v2749_v31, %v2748_v17  ;;  %v9989_v31 = vld [vmem:[#allocation4 + $0xf0] sm:$0xff]  ;;  %v9998_v17 = vld [vmem:[#allocation4 + $0xc0] sm:$0xff] }
 0xa6c   :  { %7555 = vtanh.f32 %v9883_v20 }
 0xa79   :  { %v7556_v0 = vpop.eup %7555 }
 0xa7a   :  { %v9886_v62 = vmul.f32 %v7556_v0, %v7554_v60  ;;  %v10001_v60 = vld [vmem:[#allocation4 + $0xd0] sm:$0xff]  ;;  %v10004_v0 = vld [vmem:[#allocation4 + $0xa8] sm:$0xff] }
 0xa7b   :  { %13353 = vst [vmem:[#allocation65_spill] sm:$0xff] %v10001_v60  ;;  %13354 = vst [vmem:[#allocation51_spill] sm:$0xff] %v10004_v0 }
 0xa7c   :  { %13352 = vst [vmem:[#allocation40_spill] sm:$0xff] %v9886_v62  ;;  %2822 = vmatmul.mubr.f32.vlgmr.msra.gmra.mxu0 %v9886_v62  ;;  %2893 = vmatmul.mubr.f32.vlgmr.msra.gmra.mxu1 %v9886_v62  ;;  %v10007_v62 = vld [vmem:[#allocation4 + $0xb8] sm:$0xff] }
 0xa7d   :  { %2932 = vmatpush1.msra.mxu0 %v9890_v4  ;;  %3003 = vmatpush1.msra.mxu1 %v9893_v14  ;;  %13355 = vst [vmem:[#allocation52_spill] sm:$0xff] %v10007_v62 }
 0xa7e   :  { %2933 = vmatprep.subr.mxu0 %v9896_v49  ;;  %3004 = vmatprep.subr.mxu1 %v9899_v41 }
 0xa7f   :  { %2934 = vmatpush1.msra.mxu0 %v9902_v51  ;;  %3005 = vmatpush1.msra.mxu1 %v9905_v3 }
 0xa80   :  { %2935 = vmatprep.subr.mxu0 %v9908_v1  ;;  %3006 = vmatprep.subr.mxu1 %v9911_v53 }
 0xa81   :  { %2936 = vmatpush1.msra.mxu0 %v9914_v25  ;;  %3007 = vmatpush1.msra.mxu1 %v9917_v47 }
 0xa82   :  { %2937 = vmatprep.subr.mxu0 %v9920_v22  ;;  %3008 = vmatprep.subr.mxu1 %v9923_v12 }
 0xa83   :  { %2938 = vmatpush1.msra.mxu0 %v9926_v13  ;;  %3009 = vmatpush1.msra.mxu1 %v9929_v15 }
 0xa84   :  { %2939 = vmatprep.subr.mxu0 %v9932_v18  ;;  %3010 = vmatprep.subr.mxu1 %v9935_v19 }
 0xa85   :  { %2940 = vmatpush1.msra.mxu0 %v9938_v29  ;;  %3011 = vmatpush1.msra.mxu1 %v9941_v30 }
 0xa86   :  { %2941 = vmatprep.subr.mxu0 %v9944_v37  ;;  %3012 = vmatprep.subr.mxu1 %v9947_v40 }
 0xa87   :  { %2942 = vmatpush1.msra.mxu0 %v9950_v46  ;;  %3013 = vmatpush1.msra.mxu1 %v9953_v58 }
 0xa88   :  { %2943 = vmatprep.subr.mxu0 %v9956_v63  ;;  %3014 = vmatprep.subr.mxu1 %v9959_v36 }
 0xa89   :  { %2944 = vmatpush1.msra.mxu0 %v9962_v35  ;;  %3015 = vmatpush1.msra.mxu1 %v9965_v33 }
 0xa8a   :  { %2945 = vmatprep.subr.mxu0 %v9968_v59  ;;  %3016 = vmatprep.subr.mxu1 %v9971_v42 }
 0xa8b   :  { %2946 = vmatpush1.msra.mxu0 %v9974_v34  ;;  %3017 = vmatpush1.msra.mxu1 %v9977_v61 }
 0xa8c   :  { %2947 = vmatprep.subr.mxu0 %v9980_v50  ;;  %3018 = vmatprep.subr.mxu1 %v9983_v21 }
 0xa8d   :  { %2948 = vmatpush1.msra.mxu0 %v9986_v44  ;;  %3019 = vmatpush1.msra.mxu1 %v9989_v31 }
 0xa8e   :  { %2949 = vmatprep.subr.mxu0 %v9992_v55  ;;  %3020 = vmatprep.subr.mxu1 %v9995_v16 }
 0xa8f   :  { %2950 = vmatpush1.msra.mxu0 %v9998_v17  ;;  %3021 = vmatpush1.msra.mxu1 %v10001_v60  ;;  %v10019_v60 = vld [vmem:[#allocation4 + $0x98] sm:$0xff] }
 0xa90   :  { %2951 = vmatprep.subr.mxu0 %v10004_v0  ;;  %3022 = vmatprep.subr.mxu1 %v10007_v62  ;;  %13359 = vst [vmem:[#allocation56_spill] sm:$0xff] %v10019_v60  ;;  %v10022_v0 = vld [vmem:[#allocation4 + $0x80] sm:$0xff]  ;;  %v10025_v62 = vld [vmem:[#allocation4 + $0x90] sm:$0xff] }
 0xa91   :  { %2952 = vmatpush1.msra.mxu0 %v10010_v32  ;;  %3023 = vmatpush1.msra.mxu1 %v10013_v38  ;;  %13360 = vst [vmem:[#allocation57_spill] sm:$0xff] %v10022_v0  ;;  %13361 = vst [vmem:[#allocation58_spill] sm:$0xff] %v10025_v62  ;;  %v10028_v32 = vld [vmem:[#allocation4 + $0x68] sm:$0xff]  ;;  %v10031_v38 = vld [vmem:[#allocation4 + $0x78] sm:$0xff] }
 0xa92   :  { %2953 = vmatprep.subr.mxu0 %v10016_v39  ;;  %3024 = vmatprep.subr.mxu1 %v10019_v60  ;;  %13362 = vst [vmem:[#allocation59_spill] sm:$0xff] %v10028_v32  ;;  %13363 = vst [vmem:[#allocation60_spill] sm:$0xff] %v10031_v38  ;;  %v10034_v39 = vld [vmem:[#allocation4 + $0x60] sm:$0xff]  ;;  %v10037_v60 = vld [vmem:[#allocation4 + $0x70] sm:$0xff] }
 0xa93   :  { %2954 = vmatpush1.msra.mxu0 %v10022_v0  ;;  %3025 = vmatpush1.msra.mxu1 %v10025_v62  ;;  %13364 = vst [vmem:[#allocation61_spill] sm:$0xff] %v10034_v39  ;;  %13365 = vst [vmem:[#allocation28_spill] sm:$0xff] %v10037_v60  ;;  %v10040_v0 = vld [vmem:[#allocation4 + $0x48] sm:$0xff]  ;;  %v10043_v62 = vld [vmem:[#allocation4 + $0x58] sm:$0xff] }
 0xa94   :  { %2955 = vmatprep.subr.mxu0 %v10028_v32  ;;  %3026 = vmatprep.subr.mxu1 %v10031_v38  ;;  %13366 = vst [vmem:[#allocation16_spill] sm:$0xff] %v10040_v0  ;;  %13367 = vst [vmem:[#allocation29_spill] sm:$0xff] %v10043_v62  ;;  %v10046_v32 = vld [vmem:[#allocation4 + $0x40] sm:$0xff]  ;;  %v10049_v38 = vld [vmem:[#allocation4 + $0x50] sm:$0xff] }
 0xa95   :  { %2956 = vmatpush1.msra.mxu0 %v10034_v39  ;;  %3027 = vmatpush1.msra.mxu1 %v10037_v60  ;;  %13368 = vst [vmem:[#allocation30_spill] sm:$0xff] %v10046_v32  ;;  %13369 = vst [vmem:[#allocation68_spill] sm:$0xff] %v10049_v38 }
 0xa96   :  { %2957 = vmatprep.subr.mxu0 %v10040_v0  ;;  %3028 = vmatprep.subr.mxu1 %v10043_v62 }
 0xa97   :  { %2958 = vmatpush1.msra.mxu0 %v10046_v32  ;;  %3029 = vmatpush1.msra.mxu1 %v10049_v38 }
 0xa98   :  { %2959 = vmatprep.subr.mxu0 %v13330_v2  ;;  %3030 = vmatprep.subr.mxu1 %v13331_v57  ;;  %v13370_v57 = vld [vmem:[#allocation38_spill] sm:$0xff] }
 0xa99   :  { %2960 = vmatpush1.msra.mxu0 %v13332_v54  ;;  %3031 = vmatpush1.msra.mxu1 %v13333_v52 }
 0xa9a   :  { %2961 = vmatprep.subr.mxu0 %v13334_v5  ;;  %3032 = vmatprep.subr.mxu1 %v13335_v6  ;;  %v13371_v5 = vsel %vm8854_vm5, %v13344_v28, %v13343_v27 }
 0xa9b   :  { %2962 = vmatpush1.msra.mxu0 %v13336_v7  ;;  %2995 = vmatprep.mubr.f32.mxu0 %v13337_v8 }
 0xa9c   :  { %3033 = vmatpush1.msra.mxu1 %v13338_v9  ;;  %3066 = vmatprep.mubr.f32.mxu1 %v13337_v8 }
 0xa9d   :  { %3105 = vmatprep.subr.mxu0 %v9861_v10  ;;  %3176 = vmatprep.subr.mxu1 %v9864_v11  ;;  %v13372_v11 = vsel %vm8858_vm6, %v13346_v56, %v13347_v48 }
 0xb3c   :  { %v2823_v2 = vpop.f32.mrf.mxu0  ;;  %v2894_v7 = vpop.f32.mrf.mxu1 }
 0xb3d   :  { %v2899_v54 = vadd.f32 %v2823_v2, %v13370_v57  ;;  %v13373_v2 = vsel %vm8841_vm4, %v13350_v43, %v13349_v23 }
 0xb3e   :  { %v2825_v52 = vpop.f32.mrf.mxu0  ;;  %v2896_v8 = vpop.f32.mrf.mxu1  ;;  %v2901_v57 = vadd.f32 %v2894_v7, %v13373_v2  ;;  %v13376_v7 = vld [vmem:[#allocation51_spill] sm:$0xff]  ;;  %v13377_v2 = vld [vmem:[#allocation52_spill] sm:$0xff] }
 0xb3f   :  { %v6962_v38 = vmul.f32 -1.442695, %v2899_v54  ;;  %v2900_v6 = vadd.f32 %v2825_v52, %v13371_v5  ;;  %v2902_v10 = vadd.f32 %v2896_v8, %v13372_v11 }
 0xb41   :  { %7557 = vpow2.f32 %v6962_v38  ;;  %v6963_v9 = vmul.f32 -1.442695, %v2900_v6  ;;  %v6964_v54 = vmul.f32 -1.442695, %v2902_v10 }
 0xb43   :  { %7559 = vpow2.f32 %v6963_v9 }
 0xb44   :  { %7561 = vtanh.f32 %v2901_v57  ;;  %v13378_v57 = vld [vmem:[#allocation53_spill] sm:$0xff] }
 0xb45   :  { %7563 = vpow2.f32 %v6964_v54  ;;  %v13379_v54 = vld [vmem:[#allocation54_spill] sm:$0xff] }
 0xb4e   :  { %v7558_v27 = vpop.eup %7557 }
 0xb4f   :  { %v2906_v28 = vadd.f32 1.0, %v7558_v27  ;;  %v13380_v27 = vld [vmem:[#allocation55_spill] sm:$0xff] }
 0xb50   :  { %v7560_v38 = vpop.eup %7559 }
 0xb51   :  { %7565 = vrcp.f32 %v2906_v28  ;;  %v2912_v52 = vadd.f32 1.0, %v7560_v38  ;;  %v7562_v5 = vpop.eup %7561  ;;  %v13381_v28 = vld [vmem:[#allocation56_spill] sm:$0xff]  ;;  %v13382_v38 = vld [vmem:[#allocation57_spill] sm:$0xff] }
 0xb52   :  { %v7564_v6 = vpop.eup %7563 }
 0xb53   :  { %7567 = vrcp.f32 %v2912_v52  ;;  %v2919_v11 = vadd.f32 1.0, %v7564_v6  ;;  %v13383_v52 = vld [vmem:[#allocation58_spill] sm:$0xff]  ;;  %v13385_v6 = vld [vmem:[#allocation60_spill] sm:$0xff] }
 0xb55   :  { %7569 = vrcp.f32 %v2919_v11  ;;  %v10148_v11 = vld [vmem:[#allocation4 + $0x20] sm:$0xff] }
 0xb56   :  { %13389 = vst [vmem:[#allocation36_spill] sm:$0xff] %v10148_v11 }
 0xb5e   :  { %v7566_v9 = vpop.eup %7565 }
 0xb5f   :  { %v2923_v56 = vmul.f32 %v7566_v9, %v7562_v5  ;;  %v13384_v5 = vld [vmem:[#allocation59_spill] sm:$0xff]  ;;  %v13386_v9 = vld [vmem:[#allocation68_spill] sm:$0xff] }
 0xb60   :  { %v7568_v8 = vpop.eup %7567 }
 0xb61   :  { %v2922_v48 = vmul.f32 %v7568_v8, %v9883_v20  ;;  %v13375_v20 = vld [vmem:[#allocation65_spill] sm:$0xff]  ;;  %v10145_v8 = vld [vmem:[#allocation4 + $0x38] sm:$0xff] }
 0xb62   :  { %v7570_v10 = vpop.eup %7569  ;;  %13388 = vst [vmem:[#allocation71_spill] sm:$0xff] %v10145_v8 }
 0xb63   :  { %v10081_v26 = vadd.f32 %v2923_v56, %v2922_v48  ;;  %v10142_v56 = vld [vmem:[#allocation4 + $0x28] sm:$0xff]  ;;  %v10151_v48 = vld [vmem:[#allocation4 + $0x30] sm:$0xff] }
 0xb64   :  { %13387 = vst [vmem:[#allocation70_spill] sm:$0xff] %v10142_v56  ;;  %13390 = vst [vmem:[#allocation33_spill] sm:$0xff] %v10151_v48 }
 0xb65   :  { %7571 = vtanh.f32 %v10081_v26 }
 0xb72   :  { %v7572_v23 = vpop.eup %7571 }
 0xb73   :  { %v10084_v43 = vmul.f32 %v7572_v23, %v7570_v10  ;;  %v10154_v10 = vld [vmem:[#allocation4 + $0x8] sm:$0xff]  ;;  %v10157_v23 = vld [vmem:[#allocation4 + $0x18] sm:$0xff] }
 0xb74   :  { %13391 = vst [vmem:[#allocation34_spill] sm:$0xff] %v10154_v10  ;;  %13392 = vst [vmem:[#allocation35_spill] sm:$0xff] %v10157_v23 }
 0xb75   :  { %13374 = vst [vmem:[#allocation69_spill] sm:$0xff] %v10084_v43  ;;  %2996 = vmatmul.mubr.f32.vlgmr.msra.gmra.mxu0 %v10084_v43  ;;  %3067 = vmatmul.mubr.f32.vlgmr.msra.gmra.mxu1 %v10084_v43  ;;  %v10160_v43 = vld [vmem:[#allocation4] sm:$0xff] }
 0xb76   :  { %3106 = vmatpush1.msra.mxu0 %v9890_v4  ;;  %3177 = vmatpush1.msra.mxu1 %v9893_v14  ;;  %13393 = vst [vmem:[#allocation37_spill] sm:$0xff] %v10160_v43 }
 0xb77   :  { %3107 = vmatprep.subr.mxu0 %v9896_v49  ;;  %3178 = vmatprep.subr.mxu1 %v9899_v41 }
 0xb78   :  { %3108 = vmatpush1.msra.mxu0 %v9902_v51  ;;  %3179 = vmatpush1.msra.mxu1 %v9905_v3 }
 0xb79   :  { %3109 = vmatprep.subr.mxu0 %v9908_v1  ;;  %3180 = vmatprep.subr.mxu1 %v9911_v53 }
 0xb7a   :  { %3110 = vmatpush1.msra.mxu0 %v9914_v25  ;;  %3181 = vmatpush1.msra.mxu1 %v9917_v47 }
 0xb7b   :  { %3111 = vmatprep.subr.mxu0 %v9920_v22  ;;  %3182 = vmatprep.subr.mxu1 %v9923_v12 }
 0xb7c   :  { %3112 = vmatpush1.msra.mxu0 %v9926_v13  ;;  %3183 = vmatpush1.msra.mxu1 %v9929_v15 }
 0xb7d   :  { %3113 = vmatprep.subr.mxu0 %v9932_v18  ;;  %3184 = vmatprep.subr.mxu1 %v9935_v19 }
 0xb7e   :  { %3114 = vmatpush1.msra.mxu0 %v9938_v29  ;;  %3185 = vmatpush1.msra.mxu1 %v9941_v30 }
 0xb7f   :  { %3115 = vmatprep.subr.mxu0 %v9944_v37  ;;  %3186 = vmatprep.subr.mxu1 %v9947_v40 }
 0xb80   :  { %3116 = vmatpush1.msra.mxu0 %v9950_v46  ;;  %3187 = vmatpush1.msra.mxu1 %v9953_v58 }
 0xb81   :  { %3117 = vmatprep.subr.mxu0 %v9956_v63  ;;  %3188 = vmatprep.subr.mxu1 %v9959_v36 }
 0xb82   :  { %3118 = vmatpush1.msra.mxu0 %v9962_v35  ;;  %3189 = vmatpush1.msra.mxu1 %v9965_v33 }
 0xb83   :  { %3119 = vmatprep.subr.mxu0 %v9968_v59  ;;  %3190 = vmatprep.subr.mxu1 %v9971_v42 }
 0xb84   :  { %3120 = vmatpush1.msra.mxu0 %v9974_v34  ;;  %3191 = vmatpush1.msra.mxu1 %v9977_v61 }
 0xb85   :  { %3121 = vmatprep.subr.mxu0 %v9980_v50  ;;  %3192 = vmatprep.subr.mxu1 %v9983_v21 }
 0xb86   :  { %3122 = vmatpush1.msra.mxu0 %v9986_v44  ;;  %3193 = vmatpush1.msra.mxu1 %v9989_v31 }
 0xb87   :  { %3123 = vmatprep.subr.mxu0 %v9992_v55  ;;  %3194 = vmatprep.subr.mxu1 %v9995_v16 }
 0xb88   :  { %3124 = vmatpush1.msra.mxu0 %v9998_v17  ;;  %3195 = vmatpush1.msra.mxu1 %v13375_v20 }
 0xb89   :  { %3125 = vmatprep.subr.mxu0 %v13376_v7  ;;  %3196 = vmatprep.subr.mxu1 %v13377_v2 }
 0xb8a   :  { %3126 = vmatpush1.msra.mxu0 %v13378_v57  ;;  %3197 = vmatpush1.msra.mxu1 %v13379_v54 }
 0xb8b   :  { %3127 = vmatprep.subr.mxu0 %v13380_v27  ;;  %3198 = vmatprep.subr.mxu1 %v13381_v28 }
 0xb8c   :  { %3128 = vmatpush1.msra.mxu0 %v13382_v38  ;;  %3199 = vmatpush1.msra.mxu1 %v13383_v52 }
 0xb8d   :  { %3129 = vmatprep.subr.mxu0 %v13384_v5  ;;  %3200 = vmatprep.subr.mxu1 %v13385_v6 }
 0xb8e   :  { %3130 = vmatpush1.msra.mxu0 %v10034_v39  ;;  %3201 = vmatpush1.msra.mxu1 %v10037_v60 }
 0xb8f   :  { %3131 = vmatprep.subr.mxu0 %v10040_v0  ;;  %3202 = vmatprep.subr.mxu1 %v10043_v62  ;;  %v13400_v0 = vld [vmem:[#allocation32_spill] sm:$0xff] }
 0xb90   :  { %3132 = vmatpush1.msra.mxu0 %v10046_v32  ;;  %3203 = vmatpush1.msra.mxu1 %v13386_v9  ;;  %v13398_v9 = vld [vmem:[#allocation67_spill] sm:$0xff] }
 0xb91   :  { %3133 = vmatprep.subr.mxu0 %v10142_v56  ;;  %3204 = vmatprep.subr.mxu1 %v10145_v8  ;;  %v13394_v8 = vmov 0.0   ;;  %v10164_v56 = vld [vmem:[#allocation4 + $0x10] sm:$0xff] }
 0xb92   :  { %3134 = vmatpush1.msra.mxu0 %v10148_v11  ;;  %3205 = vmatpush1.msra.mxu1 %v10151_v48  ;;  %13395 = vst [vmem:[#allocation24_spill] sm:$0xff] %v10164_v56  ;;  %v13396_v48 = vld [vmem:[#allocation46_spill] sm:$0xff]  ;;  %v13397_v11 = vld [vmem:[#allocation39_spill] sm:$0xff] }
 0xb93   :  { %3135 = vmatprep.subr.mxu0 %v10154_v10  ;;  %3206 = vmatprep.subr.mxu1 %v10157_v23 }
 0xb94   :  { %3136 = vmatpush1.msra.mxu0 %v10160_v43  ;;  %3169 = vmatprep.mubr.f32.mxu0 %v13394_v8  ;;  %v13399_v43 = vld [vmem:[#allocation63_spill] sm:$0xff] }
 0xb95   :  { %3207 = vmatpush1.msra.mxu1 %v10164_v56  ;;  %3240 = vmatprep.mubr.f32.mxu1 %v13394_v8  ;;  %v13401_v60 = vsel %vm8854_vm5, %v13399_v43, %v13400_v0 }
 0xb96   :  { %3279 = vmatprep.subr.mxu0 %v13396_v48  ;;  %3350 = vmatprep.subr.mxu1 %v13397_v11  ;;  %v13402_v48 = vld [vmem:[#allocation64_spill] sm:$0xff]  ;;  %v13403_v11 = vld [vmem:[#allocation66_spill] sm:$0xff] }
 0xb97   :  { %v13404_v5 = vsel %vm8858_vm6, %v13402_v48, %v13403_v11 }
 0xc35   :  { %v2997_v10 = vpop.f32.mrf.mxu0  ;;  %v3068_v6 = vpop.f32.mrf.mxu1 }
 0xc36   :  { %v3073_v32 = vadd.f32 %v2997_v10, %v13398_v9  ;;  %v13407_v10 = vld [vmem:[#allocation31_spill] sm:$0xff] }
 0xc37   :  { %v2999_v23 = vpop.f32.mrf.mxu0  ;;  %v3070_v8 = vpop.f32.mrf.mxu1 }
 0xc38   :  { %v6965_v62 = vmul.f32 -1.442695, %v3073_v32  ;;  %v3074_v39 = vadd.f32 %v2999_v23, %v13401_v60  ;;  %v3076_v52 = vadd.f32 %v3070_v8, %v13404_v5  ;;  %v13406_v32 = vld [vmem:[#allocation62_spill] sm:$0xff] }
 0xc39   :  { %v13408_v24 = vsel %vm8841_vm4, %v13406_v32, %v13407_v10 }
 0xc3a   :  { %7573 = vpow2.f32 %v6965_v62  ;;  %v6966_v56 = vmul.f32 -1.442695, %v3074_v39  ;;  %v3075_v38 = vadd.f32 %v3068_v6, %v13408_v24  ;;  %v6967_v28 = vmul.f32 -1.442695, %v3076_v52 }
 0xc3c   :  { %7575 = vpow2.f32 %v6966_v56 }
 0xc3d   :  { %7577 = vtanh.f32 %v3075_v38 }
 0xc3e   :  { %7579 = vpow2.f32 %v6967_v28 }
 0xc47   :  { %v7574_v0 = vpop.eup %7573 }
 0xc48   :  { %v3080_v60 = vadd.f32 1.0, %v7574_v0 }
 0xc49   :  { %v7576_v62 = vpop.eup %7575 }
 0xc4a   :  { %7581 = vrcp.f32 %v3080_v60  ;;  %v3086_v39 = vadd.f32 1.0, %v7576_v62  ;;  %v7578_v43 = vpop.eup %7577 }
 0xc4b   :  { %v7580_v56 = vpop.eup %7579 }
 0xc4c   :  { %7583 = vrcp.f32 %v3086_v39  ;;  %v3093_v8 = vadd.f32 1.0, %v7580_v56 }
 0xc4e   :  { %7585 = vrcp.f32 %v3093_v8 }
 0xc57   :  { %v7582_v23 = vpop.eup %7581 }
 0xc58   :  { %v3097_v48 = vmul.f32 %v7582_v23, %v7578_v43 }
 0xc59   :  { %v7584_v5 = vpop.eup %7583 }
 0xc5a   :  { %v3096_v11 = vmul.f32 %v7584_v5, %v10081_v26  ;;  %v13410_v26 = vld [vmem:[#allocation56_spill] sm:$0xff] }
 0xc5b   :  { %v7586_v24 = vpop.eup %7585 }
 0xc5c   :  { %v10187_v9 = vadd.f32 %v3097_v48, %v3096_v11  ;;  %v10284_v11 = vld [vmem:[#allocation6 + $0x1e8] sm:$0xff] }
 0xc5d   :  { %13443 = vst [vmem:[#allocation65_spill] sm:$0xff] %v10284_v11 }
 0xc5e   :  { %7587 = vtanh.f32 %v10187_v9 }
 0xc6b   :  { %v7588_v38 = vpop.eup %7587 }
 0xc6c   :  { %v10190_v52 = vmul.f32 %v7588_v38, %v7586_v24  ;;  %v10290_v24 = vld [vmem:[#allocation6 + $0x1e0] sm:$0xff]  ;;  %v10292_v38 = vld [vmem:[#allocation6 + $0x1f0] sm:$0xff] }
 0xc6e   :  { %13409 = vst [vmem:[#allocation21_spill] sm:$0xff] %v10190_v52  ;;  %3170 = vmatmul.mubr.f32.vlgmr.msra.gmra.mxu0 %v10190_v52  ;;  %3241 = vmatmul.mubr.f32.vlgmr.msra.gmra.mxu1 %v10190_v52  ;;  %v10450_v52 = vld [vmem:[#allocation6 + $0x38] sm:$0xff] }
 0xc6f   :  { %3280 = vmatpush1.msra.mxu0 %v9890_v4  ;;  %3351 = vmatpush1.msra.mxu1 %v9893_v14  ;;  %v13411_v4 = vld [vmem:[#allocation57_spill] sm:$0xff]  ;;  %v13412_v14 = vld [vmem:[#allocation58_spill] sm:$0xff] }
 0xc70   :  { %3281 = vmatprep.subr.mxu0 %v9896_v49  ;;  %3352 = vmatprep.subr.mxu1 %v9899_v41  ;;  %v13413_v49 = vld [vmem:[#allocation59_spill] sm:$0xff]  ;;  %v13414_v41 = vld [vmem:[#allocation60_spill] sm:$0xff] }
 0xc71   :  { %3282 = vmatpush1.msra.mxu0 %v9902_v51  ;;  %3353 = vmatpush1.msra.mxu1 %v9905_v3  ;;  %v13415_v51 = vld [vmem:[#allocation61_spill] sm:$0xff]  ;;  %v13416_v3 = vld [vmem:[#allocation28_spill] sm:$0xff]  ;;  %13461 = vst [vmem:[#allocation59_spill] sm:$0xff] %v10450_v52 }
 0xc72   :  { %3283 = vmatprep.subr.mxu0 %v9908_v1  ;;  %3354 = vmatprep.subr.mxu1 %v9911_v53  ;;  %v13417_v1 = vld [vmem:[#allocation16_spill] sm:$0xff]  ;;  %v13418_v53 = vld [vmem:[#allocation29_spill] sm:$0xff] }
 0xc73   :  { %3284 = vmatpush1.msra.mxu0 %v9914_v25  ;;  %3355 = vmatpush1.msra.mxu1 %v9917_v47  ;;  %v13419_v25 = vld [vmem:[#allocation30_spill] sm:$0xff]  ;;  %v13420_v47 = vld [vmem:[#allocation68_spill] sm:$0xff] }
 0xc74   :  { %3285 = vmatprep.subr.mxu0 %v9920_v22  ;;  %3356 = vmatprep.subr.mxu1 %v9923_v12  ;;  %v13421_v22 = vld [vmem:[#allocation70_spill] sm:$0xff]  ;;  %v13422_v12 = vld [vmem:[#allocation71_spill] sm:$0xff] }
 0xc75   :  { %3286 = vmatpush1.msra.mxu0 %v9926_v13  ;;  %3357 = vmatpush1.msra.mxu1 %v9929_v15  ;;  %v13423_v13 = vld [vmem:[#allocation36_spill] sm:$0xff]  ;;  %v13424_v15 = vld [vmem:[#allocation33_spill] sm:$0xff] }
 0xc76   :  { %3287 = vmatprep.subr.mxu0 %v9932_v18  ;;  %3358 = vmatprep.subr.mxu1 %v9935_v19  ;;  %v13425_v18 = vld [vmem:[#allocation34_spill] sm:$0xff]  ;;  %v13426_v19 = vld [vmem:[#allocation35_spill] sm:$0xff] }
 0xc77   :  { %3288 = vmatpush1.msra.mxu0 %v9938_v29  ;;  %3359 = vmatpush1.msra.mxu1 %v9941_v30  ;;  %v13427_v29 = vld [vmem:[#allocation37_spill] sm:$0xff]  ;;  %v13428_v30 = vmov 0.0  }
 0xc78   :  { %3289 = vmatprep.subr.mxu0 %v9944_v37  ;;  %3360 = vmatprep.subr.mxu1 %v9947_v40  ;;  %v13429_v37 = vld [vmem:[#allocation24_spill] sm:$0xff] }
 0xc79   :  { %3290 = vmatpush1.msra.mxu0 %v9950_v46  ;;  %3361 = vmatpush1.msra.mxu1 %v9953_v58  ;;  %v13430_v46 = vld [vmem:[#allocation48_spill] sm:$0xff] }
 0xc7a   :  { %3291 = vmatprep.subr.mxu0 %v9956_v63  ;;  %3362 = vmatprep.subr.mxu1 %v9959_v36 }
 0xc7b   :  { %3292 = vmatpush1.msra.mxu0 %v9962_v35  ;;  %3363 = vmatpush1.msra.mxu1 %v9965_v33  ;;  %v13432_v33 = vld [vmem:[#allocation44_spill] sm:$0xff] }
 0xc7c   :  { %3293 = vmatprep.subr.mxu0 %v9968_v59  ;;  %3364 = vmatprep.subr.mxu1 %v9971_v42  ;;  %v13433_v59 = vld [vmem:[#allocation43_spill] sm:$0xff] }
 0xc7d   :  { %3294 = vmatpush1.msra.mxu0 %v9974_v34  ;;  %3365 = vmatpush1.msra.mxu1 %v9977_v61  ;;  %v13434_v42 = vsel %vm8854_vm5, %v13432_v33, %v13433_v59  ;;  %v10368_v33 = vld [vmem:[#allocation6 + $0x108] sm:$0xff]  ;;  %v10370_v59 = vld [vmem:[#allocation6 + $0x118] sm:$0xff] }
 0xc7e   :  { %3295 = vmatprep.subr.mxu0 %v9980_v50  ;;  %3366 = vmatprep.subr.mxu1 %v9983_v21 }
 0xc7f   :  { %3296 = vmatpush1.msra.mxu0 %v9986_v44  ;;  %3367 = vmatpush1.msra.mxu1 %v9989_v31  ;;  %v13435_v44 = vld [vmem:[#allocation45_spill] sm:$0xff]  ;;  %v13436_v31 = vld [vmem:[#allocation47_spill] sm:$0xff] }
 0xc80   :  { %3297 = vmatprep.subr.mxu0 %v9992_v55  ;;  %3368 = vmatprep.subr.mxu1 %v9995_v16  ;;  %v13437_v55 = vsel %vm8858_vm6, %v13435_v44, %v13436_v31  ;;  %v10386_v44 = vld [vmem:[#allocation6 + $0xf0] sm:$0xff]  ;;  %v10388_v31 = vld [vmem:[#allocation6 + $0xc8] sm:$0xff] }
 0xc81   :  { %3298 = vmatpush1.msra.mxu0 %v9998_v17  ;;  %3369 = vmatpush1.msra.mxu1 %v13375_v20  ;;  %v13439_v20 = vld [vmem:[#allocation42_spill] sm:$0xff]  ;;  %13445 = vst [vmem:[#allocation52_spill] sm:$0xff] %v10388_v31 }
 0xc82   :  { %3299 = vmatprep.subr.mxu0 %v13376_v7  ;;  %3370 = vmatprep.subr.mxu1 %v13377_v2  ;;  %v13440_v7 = vld [vmem:[#allocation41_spill] sm:$0xff] }
 0xc83   :  { %3300 = vmatpush1.msra.mxu0 %v13378_v57  ;;  %3371 = vmatpush1.msra.mxu1 %v13379_v54  ;;  %v13441_v2 = vsel %vm8841_vm4, %v13439_v20, %v13440_v7  ;;  %v10396_v20 = vld [vmem:[#allocation6 + $0xd0] sm:$0xff]  ;;  %v10400_v7 = vld [vmem:[#allocation6 + $0xa8] sm:$0xff] }
 0xc84   :  { %3301 = vmatprep.subr.mxu0 %v13380_v27  ;;  %3372 = vmatprep.subr.mxu1 %v13410_v26  ;;  %v10296_v26 = vld [vmem:[#allocation6 + $0x1c8] sm:$0xff] }
 0xc85   :  { %3302 = vmatpush1.msra.mxu0 %v13411_v4  ;;  %3373 = vmatpush1.msra.mxu1 %v13412_v14  ;;  %v10298_v4 = vld [vmem:[#allocation6 + $0x1d8] sm:$0xff]  ;;  %v10302_v14 = vld [vmem:[#allocation6 + $0x1c0] sm:$0xff] }
 0xc86   :  { %3303 = vmatprep.subr.mxu0 %v13413_v49  ;;  %3374 = vmatprep.subr.mxu1 %v13414_v41  ;;  %v10304_v49 = vld [vmem:[#allocation6 + $0x1d0] sm:$0xff]  ;;  %v10308_v41 = vld [vmem:[#allocation6 + $0x1a8] sm:$0xff] }
 0xc87   :  { %3304 = vmatpush1.msra.mxu0 %v13415_v51  ;;  %3375 = vmatpush1.msra.mxu1 %v13416_v3  ;;  %v10310_v51 = vld [vmem:[#allocation6 + $0x1b8] sm:$0xff]  ;;  %v10314_v3 = vld [vmem:[#allocation6 + $0x1a0] sm:$0xff] }
 0xc88   :  { %3305 = vmatprep.subr.mxu0 %v13417_v1  ;;  %3376 = vmatprep.subr.mxu1 %v13418_v53  ;;  %v10316_v1 = vld [vmem:[#allocation6 + $0x1b0] sm:$0xff]  ;;  %v10320_v53 = vld [vmem:[#allocation6 + $0x188] sm:$0xff] }
 0xc89   :  { %3306 = vmatpush1.msra.mxu0 %v13419_v25  ;;  %3377 = vmatpush1.msra.mxu1 %v13420_v47  ;;  %v10322_v25 = vld [vmem:[#allocation6 + $0x198] sm:$0xff]  ;;  %v10326_v47 = vld [vmem:[#allocation6 + $0x180] sm:$0xff] }
 0xc8a   :  { %3307 = vmatprep.subr.mxu0 %v13421_v22  ;;  %3378 = vmatprep.subr.mxu1 %v13422_v12  ;;  %v10328_v22 = vld [vmem:[#allocation6 + $0x190] sm:$0xff]  ;;  %v10332_v12 = vld [vmem:[#allocation6 + $0x168] sm:$0xff] }
 0xc8b   :  { %3308 = vmatpush1.msra.mxu0 %v13423_v13  ;;  %3379 = vmatpush1.msra.mxu1 %v13424_v15  ;;  %v10334_v13 = vld [vmem:[#allocation6 + $0x178] sm:$0xff]  ;;  %v10338_v15 = vld [vmem:[#allocation6 + $0x160] sm:$0xff] }
 0xc8c   :  { %3309 = vmatprep.subr.mxu0 %v13425_v18  ;;  %3380 = vmatprep.subr.mxu1 %v13426_v19  ;;  %v10340_v18 = vld [vmem:[#allocation6 + $0x170] sm:$0xff]  ;;  %v10344_v19 = vld [vmem:[#allocation6 + $0x148] sm:$0xff] }
 0xc8d   :  { %3310 = vmatpush1.msra.mxu0 %v13427_v29  ;;  %3343 = vmatprep.mubr.f32.mxu0 %v13428_v30  ;;  %v10346_v29 = vld [vmem:[#allocation6 + $0x158] sm:$0xff] }
 0xc8e   :  { %3381 = vmatpush1.msra.mxu1 %v13429_v37  ;;  %3414 = vmatprep.mubr.f32.mxu1 %v13428_v30  ;;  %v10350_v37 = vld [vmem:[#allocation6 + $0x140] sm:$0xff] }
 0xc8f   :  { %3544 = vmatprep.subr.mxu0 %v10284_v11 }
 0xd2e   :  { %v3171_v40 = vpop.f32.mrf.mxu0  ;;  %v3242_v61 = vpop.f32.mrf.mxu1 }
 0xd2f   :  { %v3247_v58 = vadd.f32 %v3171_v40, %v13430_v46  ;;  %v3249_v57 = vadd.f32 %v3242_v61, %v13441_v2  ;;  %v10352_v40 = vld [vmem:[#allocation6 + $0x150] sm:$0xff]  ;;  %v10356_v46 = vld [vmem:[#allocation6 + $0x128] sm:$0xff]  ;;  %v10402_v2 = vld [vmem:[#allocation6 + $0xb8] sm:$0xff] }
 0xd30   :  { %v3173_v63 = vpop.f32.mrf.mxu0  ;;  %v3244_v21 = vpop.f32.mrf.mxu1  ;;  %v10378_v61 = vld [vmem:[#allocation6 + $0xe8] sm:$0xff] }
 0xd31   :  { %v6968_v36 = vmul.f32 -1.442695, %v3247_v58  ;;  %v3248_v34 = vadd.f32 %v3173_v63, %v13434_v42  ;;  %v3250_v16 = vadd.f32 %v3244_v21, %v13437_v55  ;;  %v10358_v58 = vld [vmem:[#allocation6 + $0x138] sm:$0xff]  ;;  %v10362_v63 = vld [vmem:[#allocation6 + $0x120] sm:$0xff] }
 0xd32   :  { %v10372_v42 = vld [vmem:[#allocation6 + $0x100] sm:$0xff]  ;;  %v10392_v55 = vld [vmem:[#allocation6 + $0xd8] sm:$0xff] }
 0xd33   :  { %7589 = vpow2.f32 %v6968_v36  ;;  %v6969_v50 = vmul.f32 -1.442695, %v3248_v34  ;;  %v6970_v54 = vmul.f32 -1.442695, %v3250_v16  ;;  %v10364_v36 = vld [vmem:[#allocation6 + $0x130] sm:$0xff]  ;;  %v10384_v21 = vld [vmem:[#allocation6 + $0xe0] sm:$0xff] }
 0xd34   :  { %v10376_v34 = vld [vmem:[#allocation6 + $0x110] sm:$0xff]  ;;  %13446 = vst [vmem:[#allocation53_spill] sm:$0xff] %v10392_v55  ;;  %v10394_v16 = vld [vmem:[#allocation6 + $0xc0] sm:$0xff] }
 0xd35   :  { %7591 = vpow2.f32 %v6969_v50  ;;  %v10380_v50 = vld [vmem:[#allocation6 + $0xf8] sm:$0xff]  ;;  %13447 = vst [vmem:[#allocation54_spill] sm:$0xff] %v10394_v16 }
 0xd36   :  { %7593 = vtanh.f32 %v3249_v57  ;;  %v10406_v57 = vld [vmem:[#allocation6 + $0xa0] sm:$0xff] }
 0xd37   :  { %7595 = vpow2.f32 %v6970_v54  ;;  %v10408_v54 = vld [vmem:[#allocation6 + $0xb0] sm:$0xff] }
 0xd40   :  { %v7590_v27 = vpop.eup %7589 }
 0xd41   :  { %v3254_v28 = vadd.f32 1.0, %v7590_v27  ;;  %v10412_v27 = vld [vmem:[#allocation6 + $0x88] sm:$0xff] }
 0xd42   :  { %v7592_v6 = vpop.eup %7591  ;;  %13448 = vst [vmem:[#allocation55_spill] sm:$0xff] %v10412_v27 }
 0xd43   :  { %7597 = vrcp.f32 %v3254_v28  ;;  %v3260_v32 = vadd.f32 1.0, %v7592_v6  ;;  %v7594_v10 = vpop.eup %7593  ;;  %v10414_v28 = vld [vmem:[#allocation6 + $0x98] sm:$0xff]  ;;  %v10418_v6 = vld [vmem:[#allocation6 + $0x80] sm:$0xff] }
 0xd44   :  { %v7596_v0 = vpop.eup %7595  ;;  %13449 = vst [vmem:[#allocation46_spill] sm:$0xff] %v10414_v28  ;;  %13450 = vst [vmem:[#allocation39_spill] sm:$0xff] %v10418_v6 }
 0xd45   :  { %7599 = vrcp.f32 %v3260_v32  ;;  %v3267_v43 = vadd.f32 1.0, %v7596_v0  ;;  %v10420_v32 = vld [vmem:[#allocation6 + $0x90] sm:$0xff]  ;;  %v10426_v0 = vld [vmem:[#allocation6 + $0x78] sm:$0xff] }
 0xd46   :  { %13451 = vst [vmem:[#allocation67_spill] sm:$0xff] %v10420_v32  ;;  %13453 = vst [vmem:[#allocation32_spill] sm:$0xff] %v10426_v0 }
 0xd47   :  { %7601 = vrcp.f32 %v3267_v43  ;;  %v10438_v43 = vld [vmem:[#allocation6 + $0x58] sm:$0xff] }
 0xd48   :  { %13457 = vst [vmem:[#allocation31_spill] sm:$0xff] %v10438_v43 }
 0xd50   :  { %v7598_v60 = vpop.eup %7597 }
 0xd51   :  { %v3271_v62 = vmul.f32 %v7598_v60, %v7594_v10  ;;  %v10424_v10 = vld [vmem:[#allocation6 + $0x68] sm:$0xff]  ;;  %v10430_v60 = vld [vmem:[#allocation6 + $0x60] sm:$0xff] }
 0xd52   :  { %v7600_v39 = vpop.eup %7599  ;;  %13452 = vst [vmem:[#allocation63_spill] sm:$0xff] %v10424_v10  ;;  %13454 = vst [vmem:[#allocation64_spill] sm:$0xff] %v10430_v60 }
 0xd53   :  { %v3270_v56 = vmul.f32 %v7600_v39, %v10187_v9  ;;  %v10286_v9 = vld [vmem:[#allocation6 + $0x1f8] sm:$0xff]  ;;  %v10436_v39 = vld [vmem:[#allocation6 + $0x48] sm:$0xff] }
 0xd54   :  { %v7602_v48 = vpop.eup %7601  ;;  %13444 = vst [vmem:[#allocation51_spill] sm:$0xff] %v10286_v9  ;;  %3615 = vmatprep.subr.mxu1 %v10286_v9  ;;  %13456 = vst [vmem:[#allocation62_spill] sm:$0xff] %v10436_v39 }
 0xd55   :  { %v10275_v23 = vadd.f32 %v3271_v62, %v3270_v56  ;;  %v10432_v62 = vld [vmem:[#allocation6 + $0x70] sm:$0xff]  ;;  %v10442_v56 = vld [vmem:[#allocation6 + $0x40] sm:$0xff] }
 0xd56   :  { %13455 = vst [vmem:[#allocation66_spill] sm:$0xff] %v10432_v62  ;;  %13458 = vst [vmem:[#allocation56_spill] sm:$0xff] %v10442_v56 }
 0xd57   :  { %7603 = vtanh.f32 %v10275_v23 }
 0xd64   :  { %v7604_v5 = vpop.eup %7603 }
 0xd65   :  { %v10278_v8 = vmul.f32 %v7604_v5, %v7602_v48  ;;  %v10444_v48 = vld [vmem:[#allocation6 + $0x50] sm:$0xff]  ;;  %v10448_v5 = vld [vmem:[#allocation6 + $0x28] sm:$0xff] }
 0xd66   :  { %13459 = vst [vmem:[#allocation57_spill] sm:$0xff] %v10444_v48  ;;  %13460 = vst [vmem:[#allocation58_spill] sm:$0xff] %v10448_v5 }
 0xd67   :  { %13442 = vst [vmem:[#allocation38_spill] sm:$0xff] %v10278_v8  ;;  %3344 = vmatmul.mubr.f32.vlgmr.msra.gmra.mxu0 %v10278_v8  ;;  %3415 = vmatmul.mubr.f32.vlgmr.msra.gmra.mxu1 %v10278_v8  ;;  %v10456_v8 = vld [vmem:[#allocation6 + $0x30] sm:$0xff] }
 0xd68   :  { %3608 = vmatprep.mubr.f32.mxu0 %v13428_v30  ;;  %3679 = vmatprep.mubr.f32.mxu1 %v13428_v30  ;;  %v10454_v30 = vld [vmem:[#allocation6 + $0x20] sm:$0xff]  ;;  %13463 = vst [vmem:[#allocation61_spill] sm:$0xff] %v10456_v8 }
 0xd69   :  { %3545 = vmatpush1.msra.mxu0 %v10290_v24  ;;  %3616 = vmatpush1.msra.mxu1 %v10292_v38  ;;  %13462 = vst [vmem:[#allocation60_spill] sm:$0xff] %v10454_v30 }
 0xd6a   :  { %3546 = vmatprep.subr.mxu0 %v10296_v26  ;;  %3617 = vmatprep.subr.mxu1 %v10298_v4 }
 0xd6b   :  { %3547 = vmatpush1.msra.mxu0 %v10302_v14  ;;  %3618 = vmatpush1.msra.mxu1 %v10304_v49 }
 0xd6c   :  { %3548 = vmatprep.subr.mxu0 %v10308_v41  ;;  %3619 = vmatprep.subr.mxu1 %v10310_v51 }
 0xd6d   :  { %3549 = vmatpush1.msra.mxu0 %v10314_v3  ;;  %3620 = vmatpush1.msra.mxu1 %v10316_v1 }
 0xd6e   :  { %3550 = vmatprep.subr.mxu0 %v10320_v53  ;;  %3621 = vmatprep.subr.mxu1 %v10322_v25 }
 0xd6f   :  { %3551 = vmatpush1.msra.mxu0 %v10326_v47  ;;  %3622 = vmatpush1.msra.mxu1 %v10328_v22  ;;  %v13498_v17 = vld [vmem:[#allocation61_spill] sm:$0xff] }
 0xd70   :  { %3552 = vmatprep.subr.mxu0 %v10332_v12  ;;  %3623 = vmatprep.subr.mxu1 %v10334_v13 }
 0xd71   :  { %3553 = vmatpush1.msra.mxu0 %v10338_v15  ;;  %3624 = vmatpush1.msra.mxu1 %v10340_v18 }
 0xd72   :  { %3554 = vmatprep.subr.mxu0 %v10344_v19  ;;  %3625 = vmatprep.subr.mxu1 %v10346_v29 }
 0xd73   :  { %3555 = vmatpush1.msra.mxu0 %v10350_v37  ;;  %3626 = vmatpush1.msra.mxu1 %v10352_v40 }
 0xd74   :  { %3556 = vmatprep.subr.mxu0 %v10356_v46  ;;  %3627 = vmatprep.subr.mxu1 %v10358_v58 }
 0xd75   :  { %3557 = vmatpush1.msra.mxu0 %v10362_v63  ;;  %3628 = vmatpush1.msra.mxu1 %v10364_v36 }
 0xd76   :  { %3558 = vmatprep.subr.mxu0 %v10368_v33  ;;  %3629 = vmatprep.subr.mxu1 %v10370_v59 }
 0xd77   :  { %3559 = vmatpush1.msra.mxu0 %v10372_v42  ;;  %3630 = vmatpush1.msra.mxu1 %v10376_v34 }
 0xd78   :  { %3560 = vmatprep.subr.mxu0 %v10378_v61  ;;  %3631 = vmatprep.subr.mxu1 %v10380_v50 }
 0xd79   :  { %3561 = vmatpush1.msra.mxu0 %v10384_v21  ;;  %3632 = vmatpush1.msra.mxu1 %v10386_v44 }
 0xd7a   :  { %3562 = vmatprep.subr.mxu0 %v10388_v31  ;;  %3633 = vmatprep.subr.mxu1 %v10392_v55 }
 0xd7b   :  { %3563 = vmatpush1.msra.mxu0 %v10394_v16  ;;  %3634 = vmatpush1.msra.mxu1 %v10396_v20 }
 0xd7c   :  { %3564 = vmatprep.subr.mxu0 %v10400_v7  ;;  %3635 = vmatprep.subr.mxu1 %v10402_v2 }
 0xd7d   :  { %3565 = vmatpush1.msra.mxu0 %v10406_v57  ;;  %3636 = vmatpush1.msra.mxu1 %v10408_v54 }
 0xd7e   :  { %3566 = vmatprep.subr.mxu0 %v10412_v27  ;;  %3637 = vmatprep.subr.mxu1 %v10414_v28 }
 0xd7f   :  { %3567 = vmatpush1.msra.mxu0 %v10418_v6  ;;  %3638 = vmatpush1.msra.mxu1 %v10420_v32 }
 0xd80   :  { %3568 = vmatprep.subr.mxu0 %v10424_v10  ;;  %3639 = vmatprep.subr.mxu1 %v10426_v0  ;;  %v10460_v0 = vld [vmem:[#allocation6 + $0x8] sm:$0xff] }
 0xd81   :  { %3569 = vmatpush1.msra.mxu0 %v10430_v60  ;;  %3640 = vmatpush1.msra.mxu1 %v10432_v62  ;;  %13464 = vst [vmem:[#allocation28_spill] sm:$0xff] %v10460_v0  ;;  %v10462_v60 = vld [vmem:[#allocation6 + $0x18] sm:$0xff]  ;;  %v10466_v62 = vld [vmem:[#allocation6] sm:$0xff] }
 0xd82   :  { %3570 = vmatprep.subr.mxu0 %v10436_v39  ;;  %3641 = vmatprep.subr.mxu1 %v10438_v43  ;;  %13465 = vst [vmem:[#allocation16_spill] sm:$0xff] %v10462_v60  ;;  %13466 = vst [vmem:[#allocation29_spill] sm:$0xff] %v10466_v62  ;;  %v10468_v39 = vld [vmem:[#allocation6 + $0x10] sm:$0xff] }
 0xd83   :  { %3571 = vmatpush1.msra.mxu0 %v10442_v56  ;;  %3642 = vmatpush1.msra.mxu1 %v10444_v48  ;;  %13467 = vst [vmem:[#allocation30_spill] sm:$0xff] %v10468_v39 }
 0xd84   :  { %3572 = vmatprep.subr.mxu0 %v10448_v5  ;;  %3643 = vmatprep.subr.mxu1 %v10450_v52  ;;  %v13468_v5 = vld [vmem:[#allocation22_spill] sm:$0xff] }
 0xd85   :  { %3573 = vmatpush1.msra.mxu0 %v10454_v30  ;;  %3644 = vmatpush1.msra.mxu1 %v10456_v8  ;;  %v13469_v8 = vld [vmem:[#allocation18_spill] sm:$0xff]  ;;  %v13470_v30 = vld [vmem:[#allocation25_spill] sm:$0xff] }
 0xd86   :  { %3574 = vmatprep.subr.mxu0 %v10460_v0  ;;  %3645 = vmatprep.subr.mxu1 %v10462_v60  ;;  %v13471_v0 = vsel %vm8854_vm5, %v13469_v8, %v13470_v30 }
 0xd87   :  { %3575 = vmatpush1.msra.mxu0 %v10466_v62  ;;  %3646 = vmatpush1.msra.mxu1 %v10468_v39 }
 0xd88   :  { %3687 = vmatprep.subr.mxu0 %v10284_v11  ;;  %3758 = vmatprep.subr.mxu1 %v10286_v9  ;;  %v13472_v11 = vld [vmem:[#allocation27_spill] sm:$0xff]  ;;  %v13473_v9 = vld [vmem:[#allocation17_spill] sm:$0xff] }
 0xd89   :  { %v13474_v32 = vsel %vm8858_vm6, %v13472_v11, %v13473_v9 }
 0xe27   :  { %v3345_v52 = vpop.f32.mrf.mxu0  ;;  %v3416_v60 = vpop.f32.mrf.mxu1 }
 0xe28   :  { %v3421_v48 = vadd.f32 %v3345_v52, %v13468_v5  ;;  %v13475_v52 = vld [vmem:[#allocation15_spill] sm:$0xff] }
 0xe29   :  { %v3347_v56 = vpop.f32.mrf.mxu0  ;;  %v3418_v39 = vpop.f32.mrf.mxu1 }
 0xe2a   :  { %v6971_v43 = vmul.f32 -1.442695, %v3421_v48  ;;  %v3422_v10 = vadd.f32 %v3347_v56, %v13471_v0  ;;  %v3424_v6 = vadd.f32 %v3418_v39, %v13474_v32  ;;  %v13476_v48 = vld [vmem:[#allocation20_spill] sm:$0xff] }
 0xe2b   :  { %v13477_v5 = vsel %vm8841_vm4, %v13475_v52, %v13476_v48  ;;  %v11124_v52 = vld [vmem:[#allocation7 + $0x18] sm:$0xff] }
 0xe2c   :  { %7605 = vpow2.f32 %v6971_v43  ;;  %v6972_v62 = vmul.f32 -1.442695, %v3422_v10  ;;  %v3423_v35 = vadd.f32 %v3416_v60, %v13477_v5  ;;  %v6973_v28 = vmul.f32 -1.442695, %v3424_v6 }
 0xe2e   :  { %7607 = vpow2.f32 %v6972_v62 }
 0xe2f   :  { %7609 = vtanh.f32 %v3423_v35 }
 0xe30   :  { %7611 = vpow2.f32 %v6973_v28  ;;  %v13480_v28 = vld [vmem:[#allocation12_spill] sm:$0xff] }
 0xe39   :  { %v7606_v30 = vpop.eup %7605 }
 0xe3a   :  { %v3428_v8 = vadd.f32 1.0, %v7606_v30  ;;  %v13483_v30 = vld [vmem:[#allocation39_spill] sm:$0xff] }
 0xe3b   :  { %v7608_v0 = vpop.eup %7607 }
 0xe3c   :  { %7613 = vrcp.f32 %v3428_v8  ;;  %v3434_v10 = vadd.f32 1.0, %v7608_v0  ;;  %v7610_v62 = vpop.eup %7609  ;;  %v13484_v8 = vld [vmem:[#allocation67_spill] sm:$0xff] }
 0xe3d   :  { %v7612_v43 = vpop.eup %7611  ;;  %v13485_v0 = vld [vmem:[#allocation63_spill] sm:$0xff] }
 0xe3e   :  { %7615 = vrcp.f32 %v3434_v10  ;;  %v3441_v32 = vadd.f32 1.0, %v7612_v43  ;;  %v13486_v10 = vld [vmem:[#allocation32_spill] sm:$0xff]  ;;  %v13488_v43 = vld [vmem:[#allocation66_spill] sm:$0xff] }
 0xe40   :  { %7617 = vrcp.f32 %v3441_v32  ;;  %v13492_v32 = vld [vmem:[#allocation57_spill] sm:$0xff] }
 0xe49   :  { %v7614_v56 = vpop.eup %7613 }
 0xe4a   :  { %v3445_v11 = vmul.f32 %v7614_v56, %v7610_v62  ;;  %v13487_v62 = vld [vmem:[#allocation64_spill] sm:$0xff]  ;;  %v13489_v56 = vld [vmem:[#allocation62_spill] sm:$0xff] }
 0xe4b   :  { %v7616_v9 = vpop.eup %7615 }
 0xe4c   :  { %v3444_v39 = vmul.f32 %v7616_v9, %v10275_v23  ;;  %v13482_v23 = vld [vmem:[#allocation46_spill] sm:$0xff]  ;;  %v13491_v9 = vld [vmem:[#allocation56_spill] sm:$0xff] }
 0xe4d   :  { %v7618_v6 = vpop.eup %7617 }
 0xe4e   :  { %v10495_v45 = vadd.f32 %v3445_v11, %v3444_v39  ;;  %v13490_v11 = vld [vmem:[#allocation31_spill] sm:$0xff]  ;;  %v13493_v39 = vld [vmem:[#allocation58_spill] sm:$0xff] }
 0xe50   :  { %13478 = vst [vmem:[#allocation68_spill] sm:$0xff] %v10495_v45  ;;  %7619 = vtanh.f32 %v10495_v45  ;;  %v13497_v45 = vld [vmem:[#allocation60_spill] sm:$0xff] }
 0xe5d   :  { %v7620_v35 = vpop.eup %7619 }
 0xe5e   :  { %v10498_v60 = vmul.f32 %v7620_v35, %v7618_v6  ;;  %v13494_v6 = vld [vmem:[#allocation59_spill] sm:$0xff]  ;;  %v13495_v35 = vld [vmem:[#allocation38_spill] sm:$0xff] }
 0xe60   :  { %13479 = vst [vmem:[#allocation70_spill] sm:$0xff] %v10498_v60  ;;  %v3449_v48 = vsel %vm146_vm3, %v13480_v28, %v10498_v60  ;;  %v13499_v60 = vld [vmem:[#allocation28_spill] sm:$0xff] }
 0xe61   :  { %v3457_v5 = vmax.f32 %v3449_v48, 0.0  ;;  %v13496_v48 = vld [vmem:[#allocation49_spill] sm:$0xff]  ;;  %v13500_v28 = vld [vmem:[#allocation16_spill] sm:$0xff] }
 0xe63   :  { %3609 = vmatmul.mubr.f32.vlgmr.msra.gmra.mxu0 %v3457_v5  ;;  %3680 = vmatmul.mubr.f32.vlgmr.msra.gmra.mxu1 %v3457_v5  ;;  %v3450_v5 = vsel %vm146_vm3, %v13496_v48, %v13495_v35  ;;  %v13504_v35 = vld [vmem:[#allocation65_spill] sm:$0xff]  ;;  %v13505_v48 = vld [vmem:[#allocation51_spill] sm:$0xff] }
 0xe64   :  { %3688 = vmatpush1.msra.mxu0 %v10290_v24  ;;  %3759 = vmatpush1.msra.mxu1 %v10292_v38  ;;  %13570 = vst [vmem:[#allocation65_spill] sm:$0xff] %v11124_v52 }
 0xe65   :  { %3689 = vmatprep.subr.mxu0 %v10296_v26  ;;  %3760 = vmatprep.subr.mxu1 %v10298_v4 }
 0xe66   :  { %3690 = vmatpush1.msra.mxu0 %v10302_v14  ;;  %3761 = vmatpush1.msra.mxu1 %v10304_v49 }
 0xe67   :  { %3691 = vmatprep.subr.mxu0 %v10308_v41  ;;  %3762 = vmatprep.subr.mxu1 %v10310_v51 }
 0xe68   :  { %3692 = vmatpush1.msra.mxu0 %v10314_v3  ;;  %3763 = vmatpush1.msra.mxu1 %v10316_v1 }
 0xe69   :  { %3693 = vmatprep.subr.mxu0 %v10320_v53  ;;  %3764 = vmatprep.subr.mxu1 %v10322_v25 }
 0xe6a   :  { %3694 = vmatpush1.msra.mxu0 %v10326_v47  ;;  %3765 = vmatpush1.msra.mxu1 %v10328_v22 }
 0xe6b   :  { %3695 = vmatprep.subr.mxu0 %v10332_v12  ;;  %3766 = vmatprep.subr.mxu1 %v10334_v13 }
 0xe6c   :  { %3696 = vmatpush1.msra.mxu0 %v10338_v15  ;;  %3767 = vmatpush1.msra.mxu1 %v10340_v18 }
 0xe6d   :  { %3697 = vmatprep.subr.mxu0 %v10344_v19  ;;  %3768 = vmatprep.subr.mxu1 %v10346_v29 }
 0xe6e   :  { %3698 = vmatpush1.msra.mxu0 %v10350_v37  ;;  %3769 = vmatpush1.msra.mxu1 %v10352_v40 }
 0xe6f   :  { %3699 = vmatprep.subr.mxu0 %v10356_v46  ;;  %3770 = vmatprep.subr.mxu1 %v10358_v58 }
 0xe70   :  { %3700 = vmatpush1.msra.mxu0 %v10362_v63  ;;  %3771 = vmatpush1.msra.mxu1 %v10364_v36 }
 0xe71   :  { %3701 = vmatprep.subr.mxu0 %v10368_v33  ;;  %3772 = vmatprep.subr.mxu1 %v10370_v59 }
 0xe72   :  { %3702 = vmatpush1.msra.mxu0 %v10372_v42  ;;  %3773 = vmatpush1.msra.mxu1 %v10376_v34 }
 0xe73   :  { %3703 = vmatprep.subr.mxu0 %v10378_v61  ;;  %3774 = vmatprep.subr.mxu1 %v10380_v50 }
 0xe74   :  { %3704 = vmatpush1.msra.mxu0 %v10384_v21  ;;  %3775 = vmatpush1.msra.mxu1 %v10386_v44 }
 0xe75   :  { %3705 = vmatprep.subr.mxu0 %v10388_v31  ;;  %3776 = vmatprep.subr.mxu1 %v10392_v55 }
 0xe76   :  { %3706 = vmatpush1.msra.mxu0 %v10394_v16  ;;  %3777 = vmatpush1.msra.mxu1 %v10396_v20 }
 0xe77   :  { %3707 = vmatprep.subr.mxu0 %v10400_v7  ;;  %3778 = vmatprep.subr.mxu1 %v10402_v2 }
 0xe78   :  { %3708 = vmatpush1.msra.mxu0 %v10406_v57  ;;  %3779 = vmatpush1.msra.mxu1 %v10408_v54 }
 0xe79   :  { %3709 = vmatprep.subr.mxu0 %v10412_v27  ;;  %3780 = vmatprep.subr.mxu1 %v13482_v23 }
 0xe7a   :  { %3710 = vmatpush1.msra.mxu0 %v13483_v30  ;;  %3781 = vmatpush1.msra.mxu1 %v13484_v8 }
 0xe7b   :  { %3711 = vmatprep.subr.mxu0 %v13485_v0  ;;  %3782 = vmatprep.subr.mxu1 %v13486_v10 }
 0xe7c   :  { %3712 = vmatpush1.msra.mxu0 %v13487_v62  ;;  %3783 = vmatpush1.msra.mxu1 %v13488_v43 }
 0xe7d   :  { %3713 = vmatprep.subr.mxu0 %v13489_v56  ;;  %3784 = vmatprep.subr.mxu1 %v13490_v11  ;;  %v13503_v11 = vld [vmem:[#allocation30_spill] sm:$0xff] }
 0xe7e   :  { %3714 = vmatpush1.msra.mxu0 %v13491_v9  ;;  %3785 = vmatpush1.msra.mxu1 %v13492_v32  ;;  %v13501_v9 = vld [vmem:[#allocation29_spill] sm:$0xff]  ;;  %v13502_v32 = vmov 0.0  }
 0xe7f   :  { %3715 = vmatprep.subr.mxu0 %v13493_v39  ;;  %3786 = vmatprep.subr.mxu1 %v13494_v6  ;;  %v3686_v39 = vmax.f32 %v3450_v5, 0.0  ;;  %v13507_v5 = vld [vmem:[#allocation56_spill] sm:$0xff] }
 0xe80   :  { %3716 = vmatpush1.msra.mxu0 %v13497_v45  ;;  %3787 = vmatpush1.msra.mxu1 %v13498_v17 }
 0xe81   :  { %3717 = vmatprep.subr.mxu0 %v13499_v60  ;;  %3788 = vmatprep.subr.mxu1 %v13500_v28 }
 0xe82   :  { %3718 = vmatpush1.msra.mxu0 %v13501_v9  ;;  %3751 = vmatprep.mubr.f32.mxu0 %v13502_v32 }
 0xe83   :  { %3789 = vmatpush1.msra.mxu1 %v13503_v11  ;;  %3822 = vmatprep.mubr.f32.mxu1 %v13502_v32 }
 0xe84   :  { %3752 = vmatmul.mubr.f32.vlgmr.msra.gmra.mxu0 %v3686_v39  ;;  %3823 = vmatmul.mubr.f32.vlgmr.msra.gmra.mxu1 %v3686_v39  ;;  %v13506_v39 = vld [vmem:[#allocation31_spill] sm:$0xff] }
 0xe85   :  { %3830 = vmatprep.subr.mxu0 %v13504_v35  ;;  %3901 = vmatprep.subr.mxu1 %v13505_v48 }
 0xe86   :  { %3831 = vmatpush1.msra.mxu0 %v10290_v24  ;;  %3902 = vmatpush1.msra.mxu1 %v10292_v38 }
 0xe87   :  { %3832 = vmatprep.subr.mxu0 %v10296_v26  ;;  %3903 = vmatprep.subr.mxu1 %v10298_v4 }
 0xe88   :  { %3833 = vmatpush1.msra.mxu0 %v10302_v14  ;;  %3904 = vmatpush1.msra.mxu1 %v10304_v49 }
 0xe89   :  { %3834 = vmatprep.subr.mxu0 %v10308_v41  ;;  %3905 = vmatprep.subr.mxu1 %v10310_v51 }
 0xe8a   :  { %3835 = vmatpush1.msra.mxu0 %v10314_v3  ;;  %3906 = vmatpush1.msra.mxu1 %v10316_v1 }
 0xe8b   :  { %3836 = vmatprep.subr.mxu0 %v10320_v53  ;;  %3907 = vmatprep.subr.mxu1 %v10322_v25 }
 0xe8c   :  { %3837 = vmatpush1.msra.mxu0 %v10326_v47  ;;  %3908 = vmatpush1.msra.mxu1 %v10328_v22 }
 0xe8d   :  { %3838 = vmatprep.subr.mxu0 %v10332_v12  ;;  %3909 = vmatprep.subr.mxu1 %v10334_v13 }
 0xe8e   :  { %3839 = vmatpush1.msra.mxu0 %v10338_v15  ;;  %3910 = vmatpush1.msra.mxu1 %v10340_v18 }
 0xe8f   :  { %3840 = vmatprep.subr.mxu0 %v10344_v19  ;;  %3911 = vmatprep.subr.mxu1 %v10346_v29 }
 0xe90   :  { %3841 = vmatpush1.msra.mxu0 %v10350_v37  ;;  %3912 = vmatpush1.msra.mxu1 %v10352_v40 }
 0xe91   :  { %3842 = vmatprep.subr.mxu0 %v10356_v46  ;;  %3913 = vmatprep.subr.mxu1 %v10358_v58 }
 0xe92   :  { %3843 = vmatpush1.msra.mxu0 %v10362_v63  ;;  %3914 = vmatpush1.msra.mxu1 %v10364_v36 }
 0xe93   :  { %3844 = vmatprep.subr.mxu0 %v10368_v33  ;;  %3915 = vmatprep.subr.mxu1 %v10370_v59 }
 0xe94   :  { %3845 = vmatpush1.msra.mxu0 %v10372_v42  ;;  %3916 = vmatpush1.msra.mxu1 %v10376_v34 }
 0xe95   :  { %3846 = vmatprep.subr.mxu0 %v10378_v61  ;;  %3917 = vmatprep.subr.mxu1 %v10380_v50 }
 0xe96   :  { %3847 = vmatpush1.msra.mxu0 %v10384_v21  ;;  %3918 = vmatpush1.msra.mxu1 %v10386_v44 }
 0xe97   :  { %3848 = vmatprep.subr.mxu0 %v10388_v31  ;;  %3919 = vmatprep.subr.mxu1 %v10392_v55 }
 0xe98   :  { %3849 = vmatpush1.msra.mxu0 %v10394_v16  ;;  %3920 = vmatpush1.msra.mxu1 %v10396_v20 }
 0xe99   :  { %3850 = vmatprep.subr.mxu0 %v10400_v7  ;;  %3921 = vmatprep.subr.mxu1 %v10402_v2 }
 0xe9a   :  { %3851 = vmatpush1.msra.mxu0 %v10406_v57  ;;  %3922 = vmatpush1.msra.mxu1 %v10408_v54 }
 0xe9b   :  { %3852 = vmatprep.subr.mxu0 %v10412_v27  ;;  %3923 = vmatprep.subr.mxu1 %v13482_v23  ;;  %v13508_v27 = vld [vmem:[#allocation57_spill] sm:$0xff]  ;;  %v13509_v23 = vld [vmem:[#allocation58_spill] sm:$0xff] }
 0xe9c   :  { %3853 = vmatpush1.msra.mxu0 %v13483_v30  ;;  %3924 = vmatpush1.msra.mxu1 %v13484_v8  ;;  %v13510_v8 = vld [vmem:[#allocation21_spill] sm:$0xff] }
 0xe9d   :  { %3854 = vmatprep.subr.mxu0 %v13485_v0  ;;  %3925 = vmatprep.subr.mxu1 %v13486_v10  ;;  %v13511_v0 = vld [vmem:[#allocation50_spill] sm:$0xff] }
 0xe9e   :  { %3855 = vmatpush1.msra.mxu0 %v13487_v62  ;;  %3926 = vmatpush1.msra.mxu1 %v13488_v43  ;;  %v3451_v10 = vsel %vm146_vm3, %v13511_v0, %v13510_v8  ;;  %v13514_v8 = vld [vmem:[#allocation67_spill] sm:$0xff] }
 0xe9f   :  { %3856 = vmatprep.subr.mxu0 %v13489_v56  ;;  %3927 = vmatprep.subr.mxu1 %v13506_v39  ;;  %v13515_v0 = vld [vmem:[#allocation63_spill] sm:$0xff] }
 0xea0   :  { %3857 = vmatpush1.msra.mxu0 %v13507_v5  ;;  %3928 = vmatpush1.msra.mxu1 %v13508_v27 }
 0xea1   :  { %3858 = vmatprep.subr.mxu0 %v13509_v23  ;;  %3929 = vmatprep.subr.mxu1 %v13494_v6  ;;  %v3829_v23 = vmax.f32 %v3451_v10, 0.0  ;;  %v13513_v10 = vld [vmem:[#allocation46_spill] sm:$0xff] }
 0xea2   :  { %3859 = vmatpush1.msra.mxu0 %v13497_v45  ;;  %3930 = vmatpush1.msra.mxu1 %v13498_v17 }
 0xea3   :  { %3860 = vmatprep.subr.mxu0 %v13499_v60  ;;  %3931 = vmatprep.subr.mxu1 %v13500_v28 }
 0xea4   :  { %3861 = vmatpush1.msra.mxu0 %v13501_v9  ;;  %3894 = vmatprep.mubr.f32.mxu0 %v13502_v32 }
 0xea5   :  { %3932 = vmatpush1.msra.mxu1 %v13503_v11  ;;  %3965 = vmatprep.mubr.f32.mxu1 %v13502_v32 }
 0xea6   :  { %3895 = vmatmul.mubr.f32.vlgmr.msra.gmra.mxu0 %v3829_v23  ;;  %3966 = vmatmul.mubr.f32.vlgmr.msra.gmra.mxu1 %v3829_v23  ;;  %v13512_v23 = vld [vmem:[#allocation55_spill] sm:$0xff] }
 0xea7   :  { %3973 = vmatprep.subr.mxu0 %v13504_v35  ;;  %4044 = vmatprep.subr.mxu1 %v13505_v48 }
 0xea8   :  { %3974 = vmatpush1.msra.mxu0 %v10290_v24  ;;  %4045 = vmatpush1.msra.mxu1 %v10292_v38 }
 0xea9   :  { %3975 = vmatprep.subr.mxu0 %v10296_v26  ;;  %4046 = vmatprep.subr.mxu1 %v10298_v4 }
 0xeaa   :  { %3976 = vmatpush1.msra.mxu0 %v10302_v14  ;;  %4047 = vmatpush1.msra.mxu1 %v10304_v49 }
 0xeab   :  { %3977 = vmatprep.subr.mxu0 %v10308_v41  ;;  %4048 = vmatprep.subr.mxu1 %v10310_v51 }
 0xeac   :  { %3978 = vmatpush1.msra.mxu0 %v10314_v3  ;;  %4049 = vmatpush1.msra.mxu1 %v10316_v1 }
 0xead   :  { %3979 = vmatprep.subr.mxu0 %v10320_v53  ;;  %4050 = vmatprep.subr.mxu1 %v10322_v25 }
 0xeae   :  { %3980 = vmatpush1.msra.mxu0 %v10326_v47  ;;  %4051 = vmatpush1.msra.mxu1 %v10328_v22 }
 0xeaf   :  { %3981 = vmatprep.subr.mxu0 %v10332_v12  ;;  %4052 = vmatprep.subr.mxu1 %v10334_v13 }
 0xeb0   :  { %3982 = vmatpush1.msra.mxu0 %v10338_v15  ;;  %4053 = vmatpush1.msra.mxu1 %v10340_v18 }
 0xeb1   :  { %3983 = vmatprep.subr.mxu0 %v10344_v19  ;;  %4054 = vmatprep.subr.mxu1 %v10346_v29 }
 0xeb2   :  { %3984 = vmatpush1.msra.mxu0 %v10350_v37  ;;  %4055 = vmatpush1.msra.mxu1 %v10352_v40 }
 0xeb3   :  { %3985 = vmatprep.subr.mxu0 %v10356_v46  ;;  %4056 = vmatprep.subr.mxu1 %v10358_v58 }
 0xeb4   :  { %3986 = vmatpush1.msra.mxu0 %v10362_v63  ;;  %4057 = vmatpush1.msra.mxu1 %v10364_v36 }
 0xeb5   :  { %3987 = vmatprep.subr.mxu0 %v10368_v33  ;;  %4058 = vmatprep.subr.mxu1 %v10370_v59 }
 0xeb6   :  { %3988 = vmatpush1.msra.mxu0 %v10372_v42  ;;  %4059 = vmatpush1.msra.mxu1 %v10376_v34 }
 0xeb7   :  { %3989 = vmatprep.subr.mxu0 %v10378_v61  ;;  %4060 = vmatprep.subr.mxu1 %v10380_v50 }
 0xeb8   :  { %3990 = vmatpush1.msra.mxu0 %v10384_v21  ;;  %4061 = vmatpush1.msra.mxu1 %v10386_v44 }
 0xeb9   :  { %3991 = vmatprep.subr.mxu0 %v10388_v31  ;;  %4062 = vmatprep.subr.mxu1 %v10392_v55 }
 0xeba   :  { %3992 = vmatpush1.msra.mxu0 %v10394_v16  ;;  %4063 = vmatpush1.msra.mxu1 %v10396_v20  ;;  %v13516_v16 = vld [vmem:[#allocation32_spill] sm:$0xff] }
 0xebb   :  { %3993 = vmatprep.subr.mxu0 %v10400_v7  ;;  %4064 = vmatprep.subr.mxu1 %v10402_v2 }
 0xebc   :  { %3994 = vmatpush1.msra.mxu0 %v10406_v57  ;;  %4065 = vmatpush1.msra.mxu1 %v10408_v54 }
 0xebd   :  { %3995 = vmatprep.subr.mxu0 %v13512_v23  ;;  %4066 = vmatprep.subr.mxu1 %v13513_v10  ;;  %v13517_v10 = vld [vmem:[#allocation58_spill] sm:$0xff] }
 0xebe   :  { %3996 = vmatpush1.msra.mxu0 %v13483_v30  ;;  %4067 = vmatpush1.msra.mxu1 %v13514_v8  ;;  %v13518_v8 = vld [vmem:[#allocation69_spill] sm:$0xff] }
 0xebf   :  { %3997 = vmatprep.subr.mxu0 %v13515_v0  ;;  %4068 = vmatprep.subr.mxu1 %v13516_v16  ;;  %v13519_v0 = vld [vmem:[#allocation40_spill] sm:$0xff] }
 0xec0   :  { %3998 = vmatpush1.msra.mxu0 %v13487_v62  ;;  %4069 = vmatpush1.msra.mxu1 %v13488_v43  ;;  %v3452_v16 = vsel %vm146_vm3, %v13519_v0, %v13518_v8 }
 0xec1   :  { %3999 = vmatprep.subr.mxu0 %v13489_v56  ;;  %4070 = vmatprep.subr.mxu1 %v13506_v39 }
 0xec2   :  { %4000 = vmatpush1.msra.mxu0 %v13507_v5  ;;  %4071 = vmatpush1.msra.mxu1 %v13508_v27 }
 0xec3   :  { %4001 = vmatprep.subr.mxu0 %v13517_v10  ;;  %4072 = vmatprep.subr.mxu1 %v13494_v6  ;;  %v3972_v10 = vmax.f32 %v3452_v16, 0.0  ;;  %v13520_v16 = vld [vmem:[#allocation54_spill] sm:$0xff] }
 0xec4   :  { %4002 = vmatpush1.msra.mxu0 %v13497_v45  ;;  %4073 = vmatpush1.msra.mxu1 %v13498_v17 }
 0xec5   :  { %4003 = vmatprep.subr.mxu0 %v13499_v60  ;;  %4074 = vmatprep.subr.mxu1 %v13500_v28 }
 0xec6   :  { %4004 = vmatpush1.msra.mxu0 %v13501_v9  ;;  %4037 = vmatprep.mubr.f32.mxu0 %v13502_v32 }
 0xec7   :  { %4075 = vmatpush1.msra.mxu1 %v13503_v11  ;;  %4108 = vmatprep.mubr.f32.mxu1 %v13502_v32 }
 0xec8   :  { %4038 = vmatmul.mubr.f32.vlgmr.msra.gmra.mxu0 %v3972_v10  ;;  %4109 = vmatmul.mubr.f32.vlgmr.msra.gmra.mxu1 %v3972_v10  ;;  %v13521_v10 = vld [vmem:[#allocation46_spill] sm:$0xff] }
 0xec9   :  { %4116 = vmatprep.subr.mxu0 %v13504_v35  ;;  %4187 = vmatprep.subr.mxu1 %v13505_v48 }
 0xeca   :  { %4117 = vmatpush1.msra.mxu0 %v10290_v24  ;;  %4188 = vmatpush1.msra.mxu1 %v10292_v38 }
 0xecb   :  { %4118 = vmatprep.subr.mxu0 %v10296_v26  ;;  %4189 = vmatprep.subr.mxu1 %v10298_v4 }
 0xecc   :  { %4119 = vmatpush1.msra.mxu0 %v10302_v14  ;;  %4190 = vmatpush1.msra.mxu1 %v10304_v49 }
 0xecd   :  { %4120 = vmatprep.subr.mxu0 %v10308_v41  ;;  %4191 = vmatprep.subr.mxu1 %v10310_v51 }
 0xece   :  { %4121 = vmatpush1.msra.mxu0 %v10314_v3  ;;  %4192 = vmatpush1.msra.mxu1 %v10316_v1 }
 0xecf   :  { %4122 = vmatprep.subr.mxu0 %v10320_v53  ;;  %4193 = vmatprep.subr.mxu1 %v10322_v25 }
 0xed0   :  { %4123 = vmatpush1.msra.mxu0 %v10326_v47  ;;  %4194 = vmatpush1.msra.mxu1 %v10328_v22 }
 0xed1   :  { %4124 = vmatprep.subr.mxu0 %v10332_v12  ;;  %4195 = vmatprep.subr.mxu1 %v10334_v13 }
 0xed2   :  { %4125 = vmatpush1.msra.mxu0 %v10338_v15  ;;  %4196 = vmatpush1.msra.mxu1 %v10340_v18 }
 0xed3   :  { %4126 = vmatprep.subr.mxu0 %v10344_v19  ;;  %4197 = vmatprep.subr.mxu1 %v10346_v29 }
 0xed4   :  { %4127 = vmatpush1.msra.mxu0 %v10350_v37  ;;  %4198 = vmatpush1.msra.mxu1 %v10352_v40 }
 0xed5   :  { %4128 = vmatprep.subr.mxu0 %v10356_v46  ;;  %4199 = vmatprep.subr.mxu1 %v10358_v58 }
 0xed6   :  { %4129 = vmatpush1.msra.mxu0 %v10362_v63  ;;  %4200 = vmatpush1.msra.mxu1 %v10364_v36 }
 0xed7   :  { %4130 = vmatprep.subr.mxu0 %v10368_v33  ;;  %4201 = vmatprep.subr.mxu1 %v10370_v59 }
 0xed8   :  { %4131 = vmatpush1.msra.mxu0 %v10372_v42  ;;  %4202 = vmatpush1.msra.mxu1 %v10376_v34 }
 0xed9   :  { %4132 = vmatprep.subr.mxu0 %v10378_v61  ;;  %4203 = vmatprep.subr.mxu1 %v10380_v50 }
 0xeda   :  { %4133 = vmatpush1.msra.mxu0 %v10384_v21  ;;  %4204 = vmatpush1.msra.mxu1 %v10386_v44 }
 0xedb   :  { %4134 = vmatprep.subr.mxu0 %v10388_v31  ;;  %4205 = vmatprep.subr.mxu1 %v10392_v55  ;;  %v13522_v31 = vld [vmem:[#allocation67_spill] sm:$0xff] }
 0xedc   :  { %4135 = vmatpush1.msra.mxu0 %v13520_v16  ;;  %4206 = vmatpush1.msra.mxu1 %v10396_v20  ;;  %v13523_v55 = vld [vmem:[#allocation63_spill] sm:$0xff]  ;;  %v13524_v16 = vld [vmem:[#allocation32_spill] sm:$0xff] }
 0xedd   :  { %4136 = vmatprep.subr.mxu0 %v10400_v7  ;;  %4207 = vmatprep.subr.mxu1 %v10402_v2 }
 0xede   :  { %4137 = vmatpush1.msra.mxu0 %v10406_v57  ;;  %4208 = vmatpush1.msra.mxu1 %v10408_v54 }
 0xedf   :  { %4138 = vmatprep.subr.mxu0 %v13512_v23  ;;  %4209 = vmatprep.subr.mxu1 %v13521_v10  ;;  %v13525_v10 = vld [vmem:[#allocation58_spill] sm:$0xff] }
 0xee0   :  { %4139 = vmatpush1.msra.mxu0 %v13483_v30  ;;  %4210 = vmatpush1.msra.mxu1 %v13522_v31 }
 0xee1   :  { %4140 = vmatprep.subr.mxu0 %v13523_v55  ;;  %4211 = vmatprep.subr.mxu1 %v13524_v16  ;;  %v3453_v16 = vsel %vm146_vm3, %v13518_v8, %v13519_v0  ;;  %v13530_v8 = vld [vmem:[#allocation32_spill] sm:$0xff]  ;;  %v13531_v0 = vld [vmem:[#allocation58_spill] sm:$0xff] }
 0xee2   :  { %4141 = vmatpush1.msra.mxu0 %v13487_v62  ;;  %4212 = vmatpush1.msra.mxu1 %v13488_v43 }
 0xee3   :  { %4142 = vmatprep.subr.mxu0 %v13489_v56  ;;  %4213 = vmatprep.subr.mxu1 %v13506_v39 }
 0xee4   :  { %4143 = vmatpush1.msra.mxu0 %v13507_v5  ;;  %4214 = vmatpush1.msra.mxu1 %v13508_v27 }
 0xee5   :  { %4144 = vmatprep.subr.mxu0 %v13525_v10  ;;  %4215 = vmatprep.subr.mxu1 %v13494_v6  ;;  %v4115_v10 = vmax.f32 %v3453_v16, 0.0 }
 0xee6   :  { %4145 = vmatpush1.msra.mxu0 %v13497_v45  ;;  %4216 = vmatpush1.msra.mxu1 %v13498_v17 }
 0xee7   :  { %4146 = vmatprep.subr.mxu0 %v13499_v60  ;;  %4217 = vmatprep.subr.mxu1 %v13500_v28 }
 0xee8   :  { %4147 = vmatpush1.msra.mxu0 %v13501_v9  ;;  %4180 = vmatprep.mubr.f32.mxu0 %v13502_v32 }
 0xee9   :  { %4218 = vmatpush1.msra.mxu1 %v13503_v11  ;;  %4251 = vmatprep.mubr.f32.mxu1 %v13502_v32 }
 0xeea   :  { %4181 = vmatmul.mubr.f32.vlgmr.msra.gmra.mxu0 %v4115_v10  ;;  %4252 = vmatmul.mubr.f32.vlgmr.msra.gmra.mxu1 %v4115_v10 }
 0xeeb   :  { %4259 = vmatprep.subr.mxu0 %v13504_v35  ;;  %4330 = vmatprep.subr.mxu1 %v13505_v48  ;;  %v13532_v35 = vld [vmem:[#allocation50_spill] sm:$0xff]  ;;  %v13533_v48 = vld [vmem:[#allocation21_spill] sm:$0xff] }
 0xeec   :  { %4260 = vmatpush1.msra.mxu0 %v10290_v24  ;;  %4331 = vmatpush1.msra.mxu1 %v10292_v38  ;;  %v13526_v24 = vld [vmem:[#allocation52_spill] sm:$0xff]  ;;  %v13527_v38 = vld [vmem:[#allocation53_spill] sm:$0xff]  ;;  %v3454_v16 = vsel %vm146_vm3, %v13533_v48, %v13532_v35  ;;  %v10855_v48 = vld [vmem:[#allocation6 + $0x1f8] sm:$0xff] }
 0xeed   :  { %4261 = vmatprep.subr.mxu0 %v10296_v26  ;;  %4332 = vmatprep.subr.mxu1 %v10298_v4  ;;  %v13528_v26 = vld [vmem:[#allocation54_spill] sm:$0xff]  ;;  %v4258_v10 = vmax.f32 %v3454_v16, 0.0  ;;  %v10852_v35 = vld [vmem:[#allocation6 + $0x1e8] sm:$0xff] }
 0xeee   :  { %4262 = vmatpush1.msra.mxu0 %v10302_v14  ;;  %4333 = vmatpush1.msra.mxu1 %v10304_v49  ;;  %v13529_v4 = vld [vmem:[#allocation46_spill] sm:$0xff]  ;;  %v10864_v16 = vld [vmem:[#allocation6 + $0x1c8] sm:$0xff] }
 0xeef   :  { %4263 = vmatprep.subr.mxu0 %v10308_v41  ;;  %4334 = vmatprep.subr.mxu1 %v10310_v51 }
 0xef0   :  { %4264 = vmatpush1.msra.mxu0 %v10314_v3  ;;  %4335 = vmatpush1.msra.mxu1 %v10316_v1 }
 0xef1   :  { %4265 = vmatprep.subr.mxu0 %v10320_v53  ;;  %4336 = vmatprep.subr.mxu1 %v10322_v25 }
 0xef2   :  { %4266 = vmatpush1.msra.mxu0 %v10326_v47  ;;  %4337 = vmatpush1.msra.mxu1 %v10328_v22 }
 0xef3   :  { %4267 = vmatprep.subr.mxu0 %v10332_v12  ;;  %4338 = vmatprep.subr.mxu1 %v10334_v13 }
 0xef4   :  { %4268 = vmatpush1.msra.mxu0 %v10338_v15  ;;  %4339 = vmatpush1.msra.mxu1 %v10340_v18 }
 0xef5   :  { %4269 = vmatprep.subr.mxu0 %v10344_v19  ;;  %4340 = vmatprep.subr.mxu1 %v10346_v29 }
 0xef6   :  { %4270 = vmatpush1.msra.mxu0 %v10350_v37  ;;  %4341 = vmatpush1.msra.mxu1 %v10352_v40 }
 0xef7   :  { %4271 = vmatprep.subr.mxu0 %v10356_v46  ;;  %4342 = vmatprep.subr.mxu1 %v10358_v58 }
 0xef8   :  { %4272 = vmatpush1.msra.mxu0 %v10362_v63  ;;  %4343 = vmatpush1.msra.mxu1 %v10364_v36 }
 0xef9   :  { %4273 = vmatprep.subr.mxu0 %v10368_v33  ;;  %4344 = vmatprep.subr.mxu1 %v10370_v59 }
 0xefa   :  { %4274 = vmatpush1.msra.mxu0 %v10372_v42  ;;  %4345 = vmatpush1.msra.mxu1 %v10376_v34 }
 0xefb   :  { %4275 = vmatprep.subr.mxu0 %v10378_v61  ;;  %4346 = vmatprep.subr.mxu1 %v10380_v50 }
 0xefc   :  { %4276 = vmatpush1.msra.mxu0 %v10384_v21  ;;  %4347 = vmatpush1.msra.mxu1 %v10386_v44 }
 0xefd   :  { %4277 = vmatprep.subr.mxu0 %v13526_v24  ;;  %4348 = vmatprep.subr.mxu1 %v13527_v38 }
 0xefe   :  { %4278 = vmatpush1.msra.mxu0 %v13528_v26  ;;  %4349 = vmatpush1.msra.mxu1 %v10396_v20 }
 0xeff   :  { %4279 = vmatprep.subr.mxu0 %v10400_v7  ;;  %4350 = vmatprep.subr.mxu1 %v10402_v2 }
 0xf00   :  { %4280 = vmatpush1.msra.mxu0 %v10406_v57  ;;  %4351 = vmatpush1.msra.mxu1 %v10408_v54 }
 0xf01   :  { %4281 = vmatprep.subr.mxu0 %v13512_v23  ;;  %4352 = vmatprep.subr.mxu1 %v13529_v4 }
 0xf02   :  { %4282 = vmatpush1.msra.mxu0 %v13483_v30  ;;  %4353 = vmatpush1.msra.mxu1 %v13522_v31 }
 0xf03   :  { %4283 = vmatprep.subr.mxu0 %v13523_v55  ;;  %4354 = vmatprep.subr.mxu1 %v13530_v8 }
 0xf04   :  { %4284 = vmatpush1.msra.mxu0 %v13487_v62  ;;  %4355 = vmatpush1.msra.mxu1 %v13488_v43 }
 0xf05   :  { %4285 = vmatprep.subr.mxu0 %v13489_v56  ;;  %4356 = vmatprep.subr.mxu1 %v13506_v39 }
 0xf06   :  { %4286 = vmatpush1.msra.mxu0 %v13507_v5  ;;  %4357 = vmatpush1.msra.mxu1 %v13508_v27 }
 0xf07   :  { %4287 = vmatprep.subr.mxu0 %v13531_v0  ;;  %4358 = vmatprep.subr.mxu1 %v13494_v6 }
 0xf08   :  { %4288 = vmatpush1.msra.mxu0 %v13497_v45  ;;  %4359 = vmatpush1.msra.mxu1 %v13498_v17 }
 0xf09   :  { %4289 = vmatprep.subr.mxu0 %v13499_v60  ;;  %4360 = vmatprep.subr.mxu1 %v13500_v28  ;;  %v10858_v28 = vld [vmem:[#allocation6 + $0x1e0] sm:$0xff] }
 0xf0a   :  { %4290 = vmatpush1.msra.mxu0 %v13501_v9  ;;  %4323 = vmatprep.mubr.f32.mxu0 %v13502_v32  ;;  %v10861_v9 = vld [vmem:[#allocation6 + $0x1f0] sm:$0xff] }
 0xf0b   :  { %4361 = vmatpush1.msra.mxu1 %v13503_v11  ;;  %4394 = vmatprep.mubr.f32.mxu1 %v13502_v32 }
 0xf0c   :  { %4324 = vmatmul.mubr.f32.vlgmr.msra.gmra.mxu0 %v4258_v10  ;;  %4395 = vmatmul.mubr.f32.vlgmr.msra.gmra.mxu1 %v4258_v10  ;;  %v10867_v10 = vld [vmem:[#allocation6 + $0x1d8] sm:$0xff] }
 0xf0d   :  { %4402 = vmatprep.subr.mxu0 %v10852_v35  ;;  %4473 = vmatprep.subr.mxu1 %v10855_v48 }
 0xf0e   :  { %4403 = vmatpush1.msra.mxu0 %v10858_v28  ;;  %4474 = vmatpush1.msra.mxu1 %v10861_v9 }
 0xf0f   :  { %4404 = vmatprep.subr.mxu0 %v10864_v16  ;;  %4475 = vmatprep.subr.mxu1 %v10867_v10 }
 0xf10   :  { %4405 = vmatpush1.msra.mxu0 %v10302_v14  ;;  %4476 = vmatpush1.msra.mxu1 %v10304_v49  ;;  %v13534_v14 = vld [vmem:[#allocation49_spill] sm:$0xff]  ;;  %v13535_v49 = vld [vmem:[#allocation38_spill] sm:$0xff] }
 0xf11   :  { %4406 = vmatprep.subr.mxu0 %v10308_v41  ;;  %4477 = vmatprep.subr.mxu1 %v10310_v51  ;;  %v3455_v41 = vsel %vm146_vm3, %v13535_v49, %v13534_v14  ;;  %v13536_v51 = vld [vmem:[#allocation16_spill] sm:$0xff]  ;;  %v7938_v14 = vld [vmem:[#allocation6 + $0x30] sm:$0xff]  ;;  %v7939_v49 = vld [vmem:[#allocation6 + $0x8] sm:$0xff] }
 0xf12   :  { %4407 = vmatpush1.msra.mxu0 %v10314_v3  ;;  %4478 = vmatpush1.msra.mxu1 %v10316_v1  ;;  %v13537_v3 = vld [vmem:[#allocation29_spill] sm:$0xff]  ;;  %v4401_v1 = vmax.f32 %v3455_v41, 0.0  ;;  %v7940_v41 = vld [vmem:[#allocation6 + $0x18] sm:$0xff] }
 0xf13   :  { %4408 = vmatprep.subr.mxu0 %v10320_v53  ;;  %4479 = vmatprep.subr.mxu1 %v10322_v25  ;;  %v7887_v53 = vld [vmem:[#allocation6 + $0x1a8] sm:$0xff]  ;;  %v7888_v25 = vld [vmem:[#allocation6 + $0x1b8] sm:$0xff] }
 0xf14   :  { %4409 = vmatpush1.msra.mxu0 %v10326_v47  ;;  %4480 = vmatpush1.msra.mxu1 %v10328_v22  ;;  %v7889_v47 = vld [vmem:[#allocation6 + $0x1a0] sm:$0xff]  ;;  %v7890_v22 = vld [vmem:[#allocation6 + $0x1b0] sm:$0xff] }
 0xf15   :  { %4410 = vmatprep.subr.mxu0 %v10332_v12  ;;  %4481 = vmatprep.subr.mxu1 %v10334_v13  ;;  %v7891_v12 = vld [vmem:[#allocation6 + $0x188] sm:$0xff]  ;;  %v7892_v13 = vld [vmem:[#allocation6 + $0x198] sm:$0xff] }
 0xf16   :  { %4411 = vmatpush1.msra.mxu0 %v10338_v15  ;;  %4482 = vmatpush1.msra.mxu1 %v10340_v18  ;;  %v7893_v15 = vld [vmem:[#allocation6 + $0x180] sm:$0xff]  ;;  %v7894_v18 = vld [vmem:[#allocation6 + $0x190] sm:$0xff] }
 0xf17   :  { %4412 = vmatprep.subr.mxu0 %v10344_v19  ;;  %4483 = vmatprep.subr.mxu1 %v10346_v29  ;;  %v7895_v19 = vld [vmem:[#allocation6 + $0x168] sm:$0xff]  ;;  %v7896_v29 = vld [vmem:[#allocation6 + $0x178] sm:$0xff] }
 0xf18   :  { %4413 = vmatpush1.msra.mxu0 %v10350_v37  ;;  %4484 = vmatpush1.msra.mxu1 %v10352_v40  ;;  %v7897_v37 = vld [vmem:[#allocation6 + $0x160] sm:$0xff]  ;;  %v7898_v40 = vld [vmem:[#allocation6 + $0x170] sm:$0xff] }
 0xf19   :  { %4414 = vmatprep.subr.mxu0 %v10356_v46  ;;  %4485 = vmatprep.subr.mxu1 %v10358_v58  ;;  %v7899_v46 = vld [vmem:[#allocation6 + $0x148] sm:$0xff]  ;;  %v7900_v58 = vld [vmem:[#allocation6 + $0x158] sm:$0xff] }
 0xf1a   :  { %4415 = vmatpush1.msra.mxu0 %v10362_v63  ;;  %4486 = vmatpush1.msra.mxu1 %v10364_v36  ;;  %v7901_v63 = vld [vmem:[#allocation6 + $0x140] sm:$0xff]  ;;  %v7902_v36 = vld [vmem:[#allocation6 + $0x150] sm:$0xff] }
 0xf1b   :  { %4416 = vmatprep.subr.mxu0 %v10368_v33  ;;  %4487 = vmatprep.subr.mxu1 %v10370_v59  ;;  %v7903_v33 = vld [vmem:[#allocation6 + $0x128] sm:$0xff]  ;;  %v7904_v59 = vld [vmem:[#allocation6 + $0x138] sm:$0xff] }
 0xf1c   :  { %4417 = vmatpush1.msra.mxu0 %v10372_v42  ;;  %4488 = vmatpush1.msra.mxu1 %v10376_v34  ;;  %v7905_v42 = vld [vmem:[#allocation6 + $0x120] sm:$0xff]  ;;  %v7906_v34 = vld [vmem:[#allocation6 + $0x130] sm:$0xff] }
 0xf1d   :  { %4418 = vmatprep.subr.mxu0 %v10378_v61  ;;  %4489 = vmatprep.subr.mxu1 %v10380_v50  ;;  %v7907_v61 = vld [vmem:[#allocation6 + $0x108] sm:$0xff]  ;;  %v7908_v50 = vld [vmem:[#allocation6 + $0x118] sm:$0xff] }
 0xf1e   :  { %4419 = vmatpush1.msra.mxu0 %v10384_v21  ;;  %4490 = vmatpush1.msra.mxu1 %v10386_v44  ;;  %v7909_v21 = vld [vmem:[#allocation6 + $0x100] sm:$0xff]  ;;  %v7910_v44 = vld [vmem:[#allocation6 + $0x110] sm:$0xff] }
 0xf1f   :  { %4420 = vmatprep.subr.mxu0 %v13526_v24  ;;  %4491 = vmatprep.subr.mxu1 %v13527_v38  ;;  %v7931_v24 = vld [vmem:[#allocation6 + $0x48] sm:$0xff]  ;;  %v7932_v38 = vld [vmem:[#allocation6 + $0x58] sm:$0xff] }
 0xf20   :  { %4421 = vmatpush1.msra.mxu0 %v13528_v26  ;;  %4492 = vmatpush1.msra.mxu1 %v10396_v20  ;;  %v7913_v20 = vld [vmem:[#allocation6 + $0xe0] sm:$0xff] }
 0xf21   :  { %4422 = vmatprep.subr.mxu0 %v10400_v7  ;;  %4493 = vmatprep.subr.mxu1 %v10402_v2  ;;  %v7914_v7 = vld [vmem:[#allocation6 + $0xf0] sm:$0xff]  ;;  %v7915_v2 = vld [vmem:[#allocation6 + $0xc8] sm:$0xff]  ;;  %v7933_v26 = vld [vmem:[#allocation6 + $0x40] sm:$0xff] }
 0xf22   :  { %4423 = vmatpush1.msra.mxu0 %v10406_v57  ;;  %4494 = vmatpush1.msra.mxu1 %v10408_v54  ;;  %v7916_v57 = vld [vmem:[#allocation6 + $0xd8] sm:$0xff]  ;;  %v7917_v54 = vld [vmem:[#allocation6 + $0xc0] sm:$0xff] }
 0xf23   :  { %4424 = vmatprep.subr.mxu0 %v13512_v23  ;;  %4495 = vmatprep.subr.mxu1 %v13529_v4  ;;  %v7930_v23 = vld [vmem:[#allocation6 + $0x70] sm:$0xff] }
 0xf24   :  { %4425 = vmatpush1.msra.mxu0 %v13483_v30  ;;  %4496 = vmatpush1.msra.mxu1 %v13522_v31  ;;  %v7911_v31 = vld [vmem:[#allocation6 + $0xe8] sm:$0xff]  ;;  %v7921_v30 = vld [vmem:[#allocation6 + $0xa0] sm:$0xff]  ;;  %v7934_v4 = vld [vmem:[#allocation6 + $0x50] sm:$0xff] }
 0xf25   :  { %4426 = vmatprep.subr.mxu0 %v13523_v55  ;;  %4497 = vmatprep.subr.mxu1 %v13530_v8  ;;  %v7912_v55 = vld [vmem:[#allocation6 + $0xf8] sm:$0xff]  ;;  %v7935_v8 = vld [vmem:[#allocation6 + $0x28] sm:$0xff] }
 0xf26   :  { %4427 = vmatpush1.msra.mxu0 %v13487_v62  ;;  %4498 = vmatpush1.msra.mxu1 %v13488_v43  ;;  %v7922_v62 = vld [vmem:[#allocation6 + $0xb0] sm:$0xff]  ;;  %v7923_v43 = vld [vmem:[#allocation6 + $0x88] sm:$0xff] }
 0xf27   :  { %4428 = vmatprep.subr.mxu0 %v13489_v56  ;;  %4499 = vmatprep.subr.mxu1 %v13506_v39  ;;  %v7924_v56 = vld [vmem:[#allocation6 + $0x98] sm:$0xff] }
 0xf28   :  { %4429 = vmatpush1.msra.mxu0 %v13507_v5  ;;  %4500 = vmatpush1.msra.mxu1 %v13508_v27  ;;  %v7918_v27 = vld [vmem:[#allocation6 + $0xd0] sm:$0xff]  ;;  %v7928_v39 = vld [vmem:[#allocation6 + $0x78] sm:$0xff]  ;;  %v7929_v5 = vld [vmem:[#allocation6 + $0x60] sm:$0xff] }
 0xf29   :  { %4430 = vmatprep.subr.mxu0 %v13531_v0  ;;  %4501 = vmatprep.subr.mxu1 %v13494_v6  ;;  %v7927_v6 = vld [vmem:[#allocation6 + $0x68] sm:$0xff]  ;;  %v7936_v0 = vld [vmem:[#allocation6 + $0x38] sm:$0xff] }
 0xf2a   :  { %4431 = vmatpush1.msra.mxu0 %v13497_v45  ;;  %4502 = vmatpush1.msra.mxu1 %v13498_v17  ;;  %v7885_v45 = vld [vmem:[#allocation6 + $0x1c0] sm:$0xff]  ;;  %v7886_v17 = vld [vmem:[#allocation6 + $0x1d0] sm:$0xff] }
 0xf2b   :  { %4432 = vmatprep.subr.mxu0 %v13499_v60  ;;  %4503 = vmatprep.subr.mxu1 %v13536_v51  ;;  %v7919_v60 = vld [vmem:[#allocation6 + $0xa8] sm:$0xff]  ;;  %v7941_v51 = vld [vmem:[#allocation6] sm:$0xff] }
 0xf2c   :  { %4433 = vmatpush1.msra.mxu0 %v13537_v3  ;;  %4466 = vmatprep.mubr.f32.mxu0 %v13502_v32 }
 0xf2d   :  { %4504 = vmatpush1.msra.mxu1 %v13503_v11  ;;  %4537 = vmatprep.mubr.f32.mxu1 %v13502_v32  ;;  %v7925_v11 = vld [vmem:[#allocation6 + $0x80] sm:$0xff] }
 0xf2e   :  { %4467 = vmatmul.mubr.f32.vlgmr.msra.gmra.mxu0 %v4401_v1  ;;  %4538 = vmatmul.mubr.f32.vlgmr.msra.gmra.mxu1 %v4401_v1  ;;  %v10945_v1 = vld [vmem:[#allocation7 + $0x1e8] sm:$0xff] }
 0xf2f   :  { %4545 = vmatprep.subr.mxu0 %v10852_v35  ;;  %4616 = vmatprep.subr.mxu1 %v10855_v48  ;;  %v13538_v35 = vld [vmem:[#allocation12_spill] sm:$0xff]  ;;  %v13539_v48 = vld [vmem:[#allocation70_spill] sm:$0xff]  ;;  %13540 = vst [vmem:[#allocation71_spill] sm:$0xff] %v10945_v1 }
 0xf30   :  { %4546 = vmatpush1.msra.mxu0 %v10858_v28  ;;  %4617 = vmatpush1.msra.mxu1 %v10861_v9  ;;  %v7920_v28 = vld [vmem:[#allocation6 + $0xb8] sm:$0xff]  ;;  %v7926_v9 = vld [vmem:[#allocation6 + $0x90] sm:$0xff] }
 0xf31   :  { %4547 = vmatprep.subr.mxu0 %v10864_v16  ;;  %4618 = vmatprep.subr.mxu1 %v10867_v10  ;;  %v3456_v16 = vsel %vm146_vm3, %v13539_v48, %v13538_v35  ;;  %v7937_v10 = vld [vmem:[#allocation6 + $0x20] sm:$0xff]  ;;  %v11098_v35 = vld [vmem:[#allocation7 + $0x48] sm:$0xff] }
 0xf32   :  { %4548 = vmatpush1.msra.mxu0 %v7885_v45  ;;  %4619 = vmatpush1.msra.mxu1 %v7886_v17  ;;  %v4544_v3 = vmax.f32 %v3456_v16, 0.0  ;;  %v10947_v45 = vld [vmem:[#allocation7 + $0x1f8] sm:$0xff]  ;;  %v7942_v17 = vld [vmem:[#allocation6 + $0x10] sm:$0xff]  ;;  %13561 = vst [vmem:[#allocation39_spill] sm:$0xff] %v11098_v35 }
 0xf33   :  { %4549 = vmatprep.subr.mxu0 %v7887_v53  ;;  %4620 = vmatprep.subr.mxu1 %v7888_v25  ;;  %13541 = vst [vmem:[#allocation36_spill] sm:$0xff] %v10947_v45  ;;  %v10950_v53 = vld [vmem:[#allocation7 + $0x1e0] sm:$0xff]  ;;  %v10952_v25 = vld [vmem:[#allocation7 + $0x1f0] sm:$0xff]  ;;  %v11100_v16 = vld [vmem:[#allocation7 + $0x58] sm:$0xff] }
 0xf34   :  { %4550 = vmatpush1.msra.mxu0 %v7889_v47  ;;  %4621 = vmatpush1.msra.mxu1 %v7890_v22  ;;  %v10954_v47 = vld [vmem:[#allocation7 + $0x1c8] sm:$0xff]  ;;  %v10956_v22 = vld [vmem:[#allocation7 + $0x1d8] sm:$0xff]  ;;  %13562 = vst [vmem:[#allocation64_spill] sm:$0xff] %v11100_v16 }
 0xf35   :  { %4551 = vmatprep.subr.mxu0 %v7891_v12  ;;  %4622 = vmatprep.subr.mxu1 %v7892_v13  ;;  %v10960_v12 = vld [vmem:[#allocation7 + $0x1c0] sm:$0xff]  ;;  %v10962_v13 = vld [vmem:[#allocation7 + $0x1d0] sm:$0xff] }
 0xf36   :  { %4552 = vmatpush1.msra.mxu0 %v7893_v15  ;;  %4623 = vmatpush1.msra.mxu1 %v7894_v18  ;;  %v10966_v15 = vld [vmem:[#allocation7 + $0x1a8] sm:$0xff]  ;;  %v10968_v18 = vld [vmem:[#allocation7 + $0x1b8] sm:$0xff] }
 0xf37   :  { %4553 = vmatprep.subr.mxu0 %v7895_v19  ;;  %4624 = vmatprep.subr.mxu1 %v7896_v29  ;;  %v10972_v19 = vld [vmem:[#allocation7 + $0x1a0] sm:$0xff]  ;;  %v10974_v29 = vld [vmem:[#allocation7 + $0x1b0] sm:$0xff] }
 0xf38   :  { %4554 = vmatpush1.msra.mxu0 %v7897_v37  ;;  %4625 = vmatpush1.msra.mxu1 %v7898_v40  ;;  %v10978_v37 = vld [vmem:[#allocation7 + $0x188] sm:$0xff]  ;;  %v10980_v40 = vld [vmem:[#allocation7 + $0x198] sm:$0xff] }
 0xf39   :  { %4555 = vmatprep.subr.mxu0 %v7899_v46  ;;  %4626 = vmatprep.subr.mxu1 %v7900_v58  ;;  %v10984_v46 = vld [vmem:[#allocation7 + $0x180] sm:$0xff]  ;;  %v10986_v58 = vld [vmem:[#allocation7 + $0x190] sm:$0xff] }
 0xf3a   :  { %4556 = vmatpush1.msra.mxu0 %v7901_v63  ;;  %4627 = vmatpush1.msra.mxu1 %v7902_v36  ;;  %v10990_v63 = vld [vmem:[#allocation7 + $0x168] sm:$0xff]  ;;  %v10992_v36 = vld [vmem:[#allocation7 + $0x178] sm:$0xff] }
 0xf3b   :  { %4557 = vmatprep.subr.mxu0 %v7903_v33  ;;  %4628 = vmatprep.subr.mxu1 %v7904_v59  ;;  %v10996_v33 = vld [vmem:[#allocation7 + $0x160] sm:$0xff]  ;;  %v10998_v59 = vld [vmem:[#allocation7 + $0x170] sm:$0xff] }
 0xf3c   :  { %4558 = vmatpush1.msra.mxu0 %v7905_v42  ;;  %4629 = vmatpush1.msra.mxu1 %v7906_v34  ;;  %v11002_v42 = vld [vmem:[#allocation7 + $0x148] sm:$0xff]  ;;  %v11004_v34 = vld [vmem:[#allocation7 + $0x158] sm:$0xff] }
 0xf3d   :  { %4559 = vmatprep.subr.mxu0 %v7907_v61  ;;  %4630 = vmatprep.subr.mxu1 %v7908_v50  ;;  %v11008_v61 = vld [vmem:[#allocation7 + $0x140] sm:$0xff]  ;;  %v11010_v50 = vld [vmem:[#allocation7 + $0x150] sm:$0xff] }
 0xf3e   :  { %4560 = vmatpush1.msra.mxu0 %v7909_v21  ;;  %4631 = vmatpush1.msra.mxu1 %v7910_v44  ;;  %v11014_v21 = vld [vmem:[#allocation7 + $0x128] sm:$0xff]  ;;  %v11016_v44 = vld [vmem:[#allocation7 + $0x138] sm:$0xff] }
 0xf3f   :  { %4561 = vmatprep.subr.mxu0 %v7911_v31  ;;  %4632 = vmatprep.subr.mxu1 %v7912_v55  ;;  %v11020_v31 = vld [vmem:[#allocation7 + $0x120] sm:$0xff]  ;;  %v11022_v55 = vld [vmem:[#allocation7 + $0x130] sm:$0xff] }
 0xf40   :  { %4562 = vmatpush1.msra.mxu0 %v7913_v20  ;;  %4633 = vmatpush1.msra.mxu1 %v7914_v7  ;;  %v11026_v20 = vld [vmem:[#allocation7 + $0x108] sm:$0xff]  ;;  %v11028_v7 = vld [vmem:[#allocation7 + $0x118] sm:$0xff] }
 0xf41   :  { %4563 = vmatprep.subr.mxu0 %v7915_v2  ;;  %4634 = vmatprep.subr.mxu1 %v7916_v57  ;;  %v11032_v2 = vld [vmem:[#allocation7 + $0x100] sm:$0xff]  ;;  %v11034_v57 = vld [vmem:[#allocation7 + $0x110] sm:$0xff] }
 0xf42   :  { %4564 = vmatpush1.msra.mxu0 %v7917_v54  ;;  %4635 = vmatpush1.msra.mxu1 %v7918_v27  ;;  %v11038_v54 = vld [vmem:[#allocation7 + $0xe8] sm:$0xff]  ;;  %v11040_v27 = vld [vmem:[#allocation7 + $0xf8] sm:$0xff] }
 0xf43   :  { %4565 = vmatprep.subr.mxu0 %v7919_v60  ;;  %4636 = vmatprep.subr.mxu1 %v7920_v28  ;;  %13542 = vst [vmem:[#allocation33_spill] sm:$0xff] %v11040_v27  ;;  %v11044_v60 = vld [vmem:[#allocation7 + $0xe0] sm:$0xff]  ;;  %v11046_v28 = vld [vmem:[#allocation7 + $0xf0] sm:$0xff] }
 0xf44   :  { %4566 = vmatpush1.msra.mxu0 %v7921_v30  ;;  %4637 = vmatpush1.msra.mxu1 %v7922_v62  ;;  %13543 = vst [vmem:[#allocation34_spill] sm:$0xff] %v11044_v60  ;;  %13544 = vst [vmem:[#allocation35_spill] sm:$0xff] %v11046_v28  ;;  %v11050_v30 = vld [vmem:[#allocation7 + $0xc8] sm:$0xff]  ;;  %v11052_v62 = vld [vmem:[#allocation7 + $0xd8] sm:$0xff] }
 0xf45   :  { %4567 = vmatprep.subr.mxu0 %v7923_v43  ;;  %4638 = vmatprep.subr.mxu1 %v7924_v56  ;;  %13545 = vst [vmem:[#allocation37_spill] sm:$0xff] %v11050_v30  ;;  %13546 = vst [vmem:[#allocation24_spill] sm:$0xff] %v11052_v62  ;;  %v11056_v43 = vld [vmem:[#allocation7 + $0xc0] sm:$0xff]  ;;  %v11058_v56 = vld [vmem:[#allocation7 + $0xd0] sm:$0xff] }
 0xf46   :  { %4568 = vmatpush1.msra.mxu0 %v7925_v11  ;;  %4639 = vmatpush1.msra.mxu1 %v7926_v9  ;;  %13547 = vst [vmem:[#allocation48_spill] sm:$0xff] %v11056_v43  ;;  %13548 = vst [vmem:[#allocation44_spill] sm:$0xff] %v11058_v56  ;;  %v11062_v11 = vld [vmem:[#allocation7 + $0xa8] sm:$0xff]  ;;  %v11064_v9 = vld [vmem:[#allocation7 + $0xb8] sm:$0xff] }
 0xf47   :  { %4569 = vmatprep.subr.mxu0 %v7927_v6  ;;  %4640 = vmatprep.subr.mxu1 %v7928_v39  ;;  %13549 = vst [vmem:[#allocation43_spill] sm:$0xff] %v11062_v11  ;;  %13550 = vst [vmem:[#allocation45_spill] sm:$0xff] %v11064_v9  ;;  %v11068_v6 = vld [vmem:[#allocation7 + $0xa0] sm:$0xff]  ;;  %v11070_v39 = vld [vmem:[#allocation7 + $0xb0] sm:$0xff] }
 0xf48   :  { %4570 = vmatpush1.msra.mxu0 %v7929_v5  ;;  %4641 = vmatpush1.msra.mxu1 %v7930_v23  ;;  %13551 = vst [vmem:[#allocation47_spill] sm:$0xff] %v11068_v6  ;;  %13552 = vst [vmem:[#allocation42_spill] sm:$0xff] %v11070_v39  ;;  %v11074_v5 = vld [vmem:[#allocation7 + $0x88] sm:$0xff]  ;;  %v11076_v23 = vld [vmem:[#allocation7 + $0x98] sm:$0xff] }
 0xf49   :  { %4571 = vmatprep.subr.mxu0 %v7931_v24  ;;  %4642 = vmatprep.subr.mxu1 %v7932_v38  ;;  %13553 = vst [vmem:[#allocation41_spill] sm:$0xff] %v11074_v5  ;;  %13554 = vst [vmem:[#allocation22_spill] sm:$0xff] %v11076_v23  ;;  %v11080_v24 = vld [vmem:[#allocation7 + $0x80] sm:$0xff]  ;;  %v11082_v38 = vld [vmem:[#allocation7 + $0x90] sm:$0xff] }
 0xf4a   :  { %4572 = vmatpush1.msra.mxu0 %v7933_v26  ;;  %4643 = vmatpush1.msra.mxu1 %v7934_v4  ;;  %13555 = vst [vmem:[#allocation18_spill] sm:$0xff] %v11080_v24  ;;  %13556 = vst [vmem:[#allocation25_spill] sm:$0xff] %v11082_v38  ;;  %v11086_v26 = vld [vmem:[#allocation7 + $0x68] sm:$0xff]  ;;  %v11088_v4 = vld [vmem:[#allocation7 + $0x78] sm:$0xff] }
 0xf4b   :  { %4573 = vmatprep.subr.mxu0 %v7935_v8  ;;  %4644 = vmatprep.subr.mxu1 %v7936_v0  ;;  %13557 = vst [vmem:[#allocation27_spill] sm:$0xff] %v11086_v26  ;;  %13558 = vst [vmem:[#allocation17_spill] sm:$0xff] %v11088_v4  ;;  %v11092_v8 = vld [vmem:[#allocation7 + $0x60] sm:$0xff]  ;;  %v11094_v0 = vld [vmem:[#allocation7 + $0x70] sm:$0xff] }
 0xf4c   :  { %4574 = vmatpush1.msra.mxu0 %v7937_v10  ;;  %4645 = vmatpush1.msra.mxu1 %v7938_v14  ;;  %13559 = vst [vmem:[#allocation15_spill] sm:$0xff] %v11092_v8  ;;  %13560 = vst [vmem:[#allocation20_spill] sm:$0xff] %v11094_v0  ;;  %v11104_v10 = vld [vmem:[#allocation7 + $0x40] sm:$0xff]  ;;  %v11106_v14 = vld [vmem:[#allocation7 + $0x50] sm:$0xff] }
 0xf4d   :  { %4575 = vmatprep.subr.mxu0 %v7939_v49  ;;  %4646 = vmatprep.subr.mxu1 %v7940_v41  ;;  %13563 = vst [vmem:[#allocation66_spill] sm:$0xff] %v11104_v10  ;;  %13564 = vst [vmem:[#allocation62_spill] sm:$0xff] %v11106_v14  ;;  %v11110_v49 = vld [vmem:[#allocation7 + $0x28] sm:$0xff]  ;;  %v11112_v41 = vld [vmem:[#allocation7 + $0x38] sm:$0xff] }
 0xf4e   :  { %4576 = vmatpush1.msra.mxu0 %v7941_v51  ;;  %4609 = vmatprep.mubr.f32.mxu0 %v13502_v32  ;;  %13565 = vst [vmem:[#allocation59_spill] sm:$0xff] %v11110_v49  ;;  %13566 = vst [vmem:[#allocation60_spill] sm:$0xff] %v11112_v41  ;;  %v11116_v51 = vld [vmem:[#allocation7 + $0x20] sm:$0xff] }
 0xf4f   :  { %4647 = vmatpush1.msra.mxu1 %v7942_v17  ;;  %4680 = vmatprep.mubr.f32.mxu1 %v13502_v32  ;;  %13567 = vst [vmem:[#allocation61_spill] sm:$0xff] %v11116_v51  ;;  %v11122_v17 = vld [vmem:[#allocation7 + $0x8] sm:$0xff] }
 0xf50   :  { %4610 = vmatmul.mubr.f32.vlgmr.msra.gmra.mxu0 %v4544_v3  ;;  %4681 = vmatmul.mubr.f32.vlgmr.msra.gmra.mxu1 %v4544_v3  ;;  %v11118_v3 = vld [vmem:[#allocation7 + $0x30] sm:$0xff]  ;;  %13569 = vst [vmem:[#allocation30_spill] sm:$0xff] %v11122_v17 }
 0xf51   :  { %4755 = vmatprep.subr.mxu0 %v10945_v1  ;;  %4826 = vmatprep.subr.mxu1 %v10947_v45  ;;  %13568 = vst [vmem:[#allocation28_spill] sm:$0xff] %v11118_v3 }
 0xf52   :  { %4756 = vmatpush1.msra.mxu0 %v10950_v53  ;;  %4827 = vmatpush1.msra.mxu1 %v10952_v25 }
 0xf53   :  { %4757 = vmatprep.subr.mxu0 %v10954_v47  ;;  %4828 = vmatprep.subr.mxu1 %v10956_v22 }
 0xf54   :  { %4758 = vmatpush1.msra.mxu0 %v10960_v12  ;;  %4829 = vmatpush1.msra.mxu1 %v10962_v13 }
 0xf55   :  { %4759 = vmatprep.subr.mxu0 %v10966_v15  ;;  %4830 = vmatprep.subr.mxu1 %v10968_v18 }
 0xf56   :  { %4760 = vmatpush1.msra.mxu0 %v10972_v19  ;;  %4831 = vmatpush1.msra.mxu1 %v10974_v29 }
 0xf57   :  { %4761 = vmatprep.subr.mxu0 %v10978_v37  ;;  %4832 = vmatprep.subr.mxu1 %v10980_v40 }
 0xf58   :  { %4762 = vmatpush1.msra.mxu0 %v10984_v46  ;;  %4833 = vmatpush1.msra.mxu1 %v10986_v58 }
 0xf59   :  { %4763 = vmatprep.subr.mxu0 %v10990_v63  ;;  %4834 = vmatprep.subr.mxu1 %v10992_v36 }
 0xf5a   :  { %4764 = vmatpush1.msra.mxu0 %v10996_v33  ;;  %4835 = vmatpush1.msra.mxu1 %v10998_v59 }
 0xf5b   :  { %4765 = vmatprep.subr.mxu0 %v11002_v42  ;;  %4836 = vmatprep.subr.mxu1 %v11004_v34 }
 0xf5c   :  { %4766 = vmatpush1.msra.mxu0 %v11008_v61  ;;  %4837 = vmatpush1.msra.mxu1 %v11010_v50 }
 0xf5d   :  { %4767 = vmatprep.subr.mxu0 %v11014_v21  ;;  %4838 = vmatprep.subr.mxu1 %v11016_v44 }
 0xf5e   :  { %4768 = vmatpush1.msra.mxu0 %v11020_v31  ;;  %4839 = vmatpush1.msra.mxu1 %v11022_v55 }
 0xf5f   :  { %4769 = vmatprep.subr.mxu0 %v11026_v20  ;;  %4840 = vmatprep.subr.mxu1 %v11028_v7 }
 0xf60   :  { %4770 = vmatpush1.msra.mxu0 %v11032_v2  ;;  %4841 = vmatpush1.msra.mxu1 %v11034_v57 }
 0xf61   :  { %4771 = vmatprep.subr.mxu0 %v11038_v54  ;;  %4842 = vmatprep.subr.mxu1 %v11040_v27 }
 0xf62   :  { %4772 = vmatpush1.msra.mxu0 %v11044_v60  ;;  %4843 = vmatpush1.msra.mxu1 %v11046_v28 }
 0xf63   :  { %4773 = vmatprep.subr.mxu0 %v11050_v30  ;;  %4844 = vmatprep.subr.mxu1 %v11052_v62 }
 0xf64   :  { %4774 = vmatpush1.msra.mxu0 %v11056_v43  ;;  %4845 = vmatpush1.msra.mxu1 %v11058_v56 }
 0xf65   :  { %4775 = vmatprep.subr.mxu0 %v11062_v11  ;;  %4846 = vmatprep.subr.mxu1 %v11064_v9 }
 0xf66   :  { %4776 = vmatpush1.msra.mxu0 %v11068_v6  ;;  %4847 = vmatpush1.msra.mxu1 %v11070_v39 }
 0xf67   :  { %4777 = vmatprep.subr.mxu0 %v11074_v5  ;;  %4848 = vmatprep.subr.mxu1 %v11076_v23 }
 0xf68   :  { %4778 = vmatpush1.msra.mxu0 %v11080_v24  ;;  %4849 = vmatpush1.msra.mxu1 %v11082_v38 }
 0xf69   :  { %4779 = vmatprep.subr.mxu0 %v11086_v26  ;;  %4850 = vmatprep.subr.mxu1 %v11088_v4 }
 0xf6a   :  { %4780 = vmatpush1.msra.mxu0 %v11092_v8  ;;  %4851 = vmatpush1.msra.mxu1 %v11094_v0  ;;  %v11128_v0 = vld [vmem:[#allocation7] sm:$0xff] }
 0xf6b   :  { %4781 = vmatprep.subr.mxu0 %v11098_v35  ;;  %4852 = vmatprep.subr.mxu1 %v11100_v16  ;;  %13571 = vst [vmem:[#allocation51_spill] sm:$0xff] %v11128_v0  ;;  %v11132_v16 = vld [vmem:[#allocation7 + $0x10] sm:$0xff] }
 0xf6c   :  { %4782 = vmatpush1.msra.mxu0 %v11104_v10  ;;  %4853 = vmatpush1.msra.mxu1 %v11106_v14  ;;  %13572 = vst [vmem:[#allocation31_spill] sm:$0xff] %v11132_v16 }
 0xf6d   :  { %4783 = vmatprep.subr.mxu0 %v11110_v49  ;;  %4854 = vmatprep.subr.mxu1 %v11112_v41 }
 0xf6e   :  { %4784 = vmatpush1.msra.mxu0 %v11116_v51  ;;  %4855 = vmatpush1.msra.mxu1 %v11118_v3 }
 0xf6f   :  { %4785 = vmatprep.subr.mxu0 %v11122_v17  ;;  %4856 = vmatprep.subr.mxu1 %v11124_v52 }
 0xf70   :  { %4786 = vmatpush1.msra.mxu0 %v11128_v0  ;;  %4819 = vmatprep.mubr.f32.mxu0 %v13502_v32 }
 0xf71   :  { %4857 = vmatpush1.msra.mxu1 %v11132_v16  ;;  %4890 = vmatprep.mubr.f32.mxu1 %v13502_v32 }
 0xf72   :  { %4820 = vmatmul.mubr.f32.vlgmr.msra.gmra.mxu0 %v13539_v48  ;;  %4891 = vmatmul.mubr.f32.vlgmr.msra.gmra.mxu1 %v13539_v48  ;;  %v13573_v48 = vld [vmem:[#allocation20_spill] sm:$0xff] }
 0xf73   :  { %4929 = vmatprep.subr.mxu0 %v10945_v1  ;;  %5000 = vmatprep.subr.mxu1 %v10947_v45 }
 0xf74   :  { %4930 = vmatpush1.msra.mxu0 %v10950_v53  ;;  %5001 = vmatpush1.msra.mxu1 %v10952_v25 }
 0xf75   :  { %4931 = vmatprep.subr.mxu0 %v10954_v47  ;;  %5002 = vmatprep.subr.mxu1 %v10956_v22 }
 0xf76   :  { %4932 = vmatpush1.msra.mxu0 %v10960_v12  ;;  %5003 = vmatpush1.msra.mxu1 %v10962_v13 }
 0xf77   :  { %4933 = vmatprep.subr.mxu0 %v10966_v15  ;;  %5004 = vmatprep.subr.mxu1 %v10968_v18 }
 0xf78   :  { %4934 = vmatpush1.msra.mxu0 %v10972_v19  ;;  %5005 = vmatpush1.msra.mxu1 %v10974_v29 }
 0xf79   :  { %4935 = vmatprep.subr.mxu0 %v10978_v37  ;;  %5006 = vmatprep.subr.mxu1 %v10980_v40 }
 0xf7a   :  { %4936 = vmatpush1.msra.mxu0 %v10984_v46  ;;  %5007 = vmatpush1.msra.mxu1 %v10986_v58 }
 0xf7b   :  { %4937 = vmatprep.subr.mxu0 %v10990_v63  ;;  %5008 = vmatprep.subr.mxu1 %v10992_v36 }
 0xf7c   :  { %4938 = vmatpush1.msra.mxu0 %v10996_v33  ;;  %5009 = vmatpush1.msra.mxu1 %v10998_v59 }
 0xf7d   :  { %4939 = vmatprep.subr.mxu0 %v11002_v42  ;;  %5010 = vmatprep.subr.mxu1 %v11004_v34 }
 0xf7e   :  { %4940 = vmatpush1.msra.mxu0 %v11008_v61  ;;  %5011 = vmatpush1.msra.mxu1 %v11010_v50 }
 0xf7f   :  { %4941 = vmatprep.subr.mxu0 %v11014_v21  ;;  %5012 = vmatprep.subr.mxu1 %v11016_v44 }
 0xf80   :  { %4942 = vmatpush1.msra.mxu0 %v11020_v31  ;;  %5013 = vmatpush1.msra.mxu1 %v11022_v55 }
 0xf81   :  { %4943 = vmatprep.subr.mxu0 %v11026_v20  ;;  %5014 = vmatprep.subr.mxu1 %v11028_v7 }
 0xf82   :  { %4944 = vmatpush1.msra.mxu0 %v11032_v2  ;;  %5015 = vmatpush1.msra.mxu1 %v11034_v57 }
 0xf83   :  { %4945 = vmatprep.subr.mxu0 %v11038_v54  ;;  %5016 = vmatprep.subr.mxu1 %v11040_v27 }
 0xf84   :  { %4946 = vmatpush1.msra.mxu0 %v11044_v60  ;;  %5017 = vmatpush1.msra.mxu1 %v11046_v28 }
 0xf85   :  { %4947 = vmatprep.subr.mxu0 %v11050_v30  ;;  %5018 = vmatprep.subr.mxu1 %v11052_v62 }
 0xf86   :  { %4948 = vmatpush1.msra.mxu0 %v11056_v43  ;;  %5019 = vmatpush1.msra.mxu1 %v11058_v56 }
 0xf87   :  { %4949 = vmatprep.subr.mxu0 %v11062_v11  ;;  %5020 = vmatprep.subr.mxu1 %v11064_v9 }
 0xf88   :  { %4950 = vmatpush1.msra.mxu0 %v11068_v6  ;;  %5021 = vmatpush1.msra.mxu1 %v11070_v39  ;;  %v13574_v6 = vld [vmem:[#allocation64_spill] sm:$0xff] }
 0xf89   :  { %4951 = vmatprep.subr.mxu0 %v11074_v5  ;;  %5022 = vmatprep.subr.mxu1 %v11076_v23 }
 0xf8a   :  { %4952 = vmatpush1.msra.mxu0 %v11080_v24  ;;  %5023 = vmatpush1.msra.mxu1 %v11082_v38 }
 0xf8b   :  { %4953 = vmatprep.subr.mxu0 %v11086_v26  ;;  %5024 = vmatprep.subr.mxu1 %v11088_v4  ;;  %v13575_v4 = vld [vmem:[#allocation13_spill] sm:$0xff] }
 0xf8c   :  { %4954 = vmatpush1.msra.mxu0 %v11092_v8  ;;  %5025 = vmatpush1.msra.mxu1 %v13573_v48  ;;  %v11204_v48 = vpop.f32.mrf.mxu0  ;;  %v13576_v26 = vsub.s32 0, %v13575_v4  ;;  %v13577_v24 = vsub.s32 2, %v13575_v4  ;;  %v13578_v5 = vsub.s32 1, %v13575_v4  ;;  %v13579_v9 = vsub.s32 3, %v13575_v4 }
 0xf8d   :  { %4955 = vmatprep.subr.mxu0 %v11098_v35  ;;  %5026 = vmatprep.subr.mxu1 %v13574_v6  ;;  %v11206_v35 = vpop.f32.mrf.mxu1 }
 0xf8e   :  { %4956 = vmatpush1.msra.mxu0 %v11104_v10  ;;  %5027 = vmatpush1.msra.mxu1 %v11106_v14 }
 0xf8f   :  { %4957 = vmatprep.subr.mxu0 %v11110_v49  ;;  %5028 = vmatprep.subr.mxu1 %v11112_v41 }
 0xf90   :  { %4958 = vmatpush1.msra.mxu0 %v11116_v51  ;;  %5029 = vmatpush1.msra.mxu1 %v11118_v3  ;;  %v11214_v3 = vpop.f32.mrf.mxu0 }
 0xf91   :  { %4959 = vmatprep.subr.mxu0 %v11122_v17  ;;  %5030 = vmatprep.subr.mxu1 %v11124_v52  ;;  %v11216_v17 = vpop.f32.mrf.mxu1 }
 0xf92   :  { %4960 = vmatpush1.msra.mxu0 %v11128_v0  ;;  %4993 = vmatprep.mubr.f32.mxu0 %v13502_v32  ;;  %v3753_v52 = vpop.f32.mrf.mxu0 }
 0xf93   :  { %5031 = vmatpush1.msra.mxu1 %v11132_v16  ;;  %5064 = vmatprep.mubr.f32.mxu1 %v13502_v32  ;;  %v3824_v51 = vpop.f32.mrf.mxu1 }
 0xf94   :  { %5103 = vmatprep.subr.mxu0 %v10945_v1  ;;  %5174 = vmatprep.subr.mxu1 %v10947_v45  ;;  %v3755_v41 = vpop.f32.mrf.mxu0  ;;  %v3522_v1 = vld [vmem:[%s12573_s8] sm:$0xf] }
 0xf95   :  { %v3826_v49 = vpop.f32.mrf.mxu1  ;;  %v11223_v38 = vrot.slane %v3522_v1, %v13576_v26  ;;  %v11227_v23 = vrot.slane %v3522_v1, %v13577_v24  ;;  %v11231_v39 = vrot.slane %v3522_v1, %v13578_v5  ;;  %v11235_v11 = vrot.slane %v3522_v1, %v13579_v9 }
 0xf96   :  { %v3896_v14 = vpop.f32.mrf.mxu0 }
 0xf97   :  { %v3967_v0 = vpop.f32.mrf.mxu1 }
 0xf98   :  { %v3898_v10 = vpop.f32.mrf.mxu0  ;;  %v11291_v60 = vadd.f32 %v3967_v0, %v11227_v23 }
 0xf99   :  { %v3969_v6 = vpop.f32.mrf.mxu1 }
 0xf9a   :  { %v4039_v8 = vpop.f32.mrf.mxu0  ;;  %13592 = vst [vmem:[#allocation53_spill] sm:$0xff] %v11291_v60 }
 0xf9b   :  { %v4110_v16 = vpop.f32.mrf.mxu1  ;;  %v4040_v62 = vadd.f32 %v4039_v8, %v11223_v38 }
 0xf9c   :  { %v4041_v32 = vpop.f32.mrf.mxu0  ;;  %v11239_v30 = vadd.f32 %v4110_v16, %v11227_v23  ;;  %v13634_v16 = vld [vmem:[#allocation20_spill] sm:$0xff] }
 0xf9d   :  { %v4112_v45 = vpop.f32.mrf.mxu1  ;;  %v11246_v28 = vadd.f32 %v4041_v32, %v11231_v39 }
 0xf9e   :  { %13580 = vst [vmem:[#allocation56_spill] sm:$0xff] %v11239_v30  ;;  %v11249_v5 = vadd.f32 %v4112_v45, %v11235_v11  ;;  %v11298_v30 = vadd.f32 %v3898_v10, %v11231_v39  ;;  %v3754_v10 = vadd.f32 %v3753_v52, %v11223_v38 }
 0xf9f   :  { %13582 = vst [vmem:[#allocation55_spill] sm:$0xff] %v11246_v28 }
 0xfa0   :  { %13583 = vst [vmem:[#allocation69_spill] sm:$0xff] %v11249_v5  ;;  %13594 = vst [vmem:[#allocation46_spill] sm:$0xff] %v11298_v30  ;;  %v11350_v5 = vadd.f32 %v3755_v41, %v11231_v39  ;;  %v13636_v30 = vld [vmem:[#allocation64_spill] sm:$0xff] }
 0xfa2   :  { %13602 = vst [vmem:[#allocation29_spill] sm:$0xff] %v11350_v5 }
 0xfaa   :  { %v4182_v56 = vpop.f32.mrf.mxu0  ;;  %v4253_v43 = vpop.f32.mrf.mxu1 }
 0xfab   :  { %v4183_v26 = vadd.f32 %v4182_v56, %v11223_v38  ;;  %v11243_v24 = vadd.f32 %v4253_v43, %v11227_v23 }
 0xfac   :  { %v4184_v1 = vpop.f32.mrf.mxu0  ;;  %v4255_v9 = vpop.f32.mrf.mxu1 }
 0xfad   :  { %13581 = vst [vmem:[#allocation57_spill] sm:$0xff] %v11243_v24  ;;  %v11252_v4 = vadd.f32 %v4184_v1, %v11231_v39  ;;  %v11255_v8 = vadd.f32 %v4255_v9, %v11235_v11  ;;  %v11259_v56 = vsel %vm146_vm3, %v4040_v62, %v4183_v26  ;;  %v11267_v45 = vsel %vm146_vm3, %v4183_v26, %v4040_v62 }
 0xfae   :  { %13587 = vst [vmem:[#allocation63_spill] sm:$0xff] %v11259_v56  ;;  %13589 = vst [vmem:[#allocation52_spill] sm:$0xff] %v11267_v45  ;;  %v3897_v45 = vadd.f32 %v3896_v14, %v11223_v38  ;;  %v11301_v62 = vadd.f32 %v3969_v6, %v11235_v11  ;;  %v12403_v56 = vld [vmem:[%s12575_s10] ss:$0 sm:$0xff] }
 0xfaf   :  { %13584 = vst [vmem:[#allocation40_spill] sm:$0xff] %v11252_v4  ;;  %13585 = vst [vmem:[#allocation67_spill] sm:$0xff] %v11255_v8 }
 0xfb0   :  { %13595 = vst [vmem:[#allocation32_spill] sm:$0xff] %v11301_v62 }
 0xfcc   :  { %v4325_v1 = vpop.f32.mrf.mxu0  ;;  %v4396_v32 = vpop.f32.mrf.mxu1 }
 0xfcd   :  { %v4326_v24 = vadd.f32 %v4325_v1, %v11223_v38  ;;  %v11295_v27 = vadd.f32 %v4396_v32, %v11227_v23  ;;  %v11343_v32 = vadd.f32 %v3824_v51, %v11227_v23 }
 0xfce   :  { %v4327_v4 = vpop.f32.mrf.mxu0  ;;  %v4398_v26 = vpop.f32.mrf.mxu1 }
 0xfcf   :  { %13593 = vst [vmem:[#allocation54_spill] sm:$0xff] %v11295_v27  ;;  %v11304_v8 = vadd.f32 %v4327_v4, %v11231_v39  ;;  %v11307_v14 = vadd.f32 %v4398_v26, %v11235_v11  ;;  %v11311_v0 = vsel %vm146_vm3, %v3897_v45, %v4326_v24  ;;  %v11319_v6 = vsel %vm146_vm3, %v4326_v24, %v3897_v45 }
 0xfd0   :  { %13598 = vst [vmem:[#allocation21_spill] sm:$0xff] %v11311_v0  ;;  %13599 = vst [vmem:[#allocation49_spill] sm:$0xff] %v11319_v6  ;;  %v11353_v24 = vadd.f32 %v3826_v49, %v11235_v11  ;;  %v13637_v0 = vld [vmem:[#allocation66_spill] sm:$0xff] }
 0xfd1   :  { %13596 = vst [vmem:[#allocation58_spill] sm:$0xff] %v11304_v8  ;;  %13597 = vst [vmem:[#allocation50_spill] sm:$0xff] %v11307_v14  ;;  %v11405_v14 = vadd.f32 %v11214_v3, %v11231_v39  ;;  %v13635_v8 = vld [vmem:[#allocation39_spill] sm:$0xff] }
 0xfd2   :  { %13600 = vst [vmem:[#allocation38_spill] sm:$0xff] %v11343_v32  ;;  %13603 = vst [vmem:[#allocation12_spill] sm:$0xff] %v11353_v24 }
 0xfd3   :  { %13609 = vst [vmem:[#allocation74_spill] sm:$0xff] %v11405_v14 }
 0xfee   :  { %v4468_v26 = vpop.f32.mrf.mxu0  ;;  %v4539_v4 = vpop.f32.mrf.mxu1 }
 0xfef   :  { %v4469_v6 = vadd.f32 %v4468_v26, %v11223_v38  ;;  %v11347_v1 = vadd.f32 %v4539_v4, %v11227_v23 }
 0xff0   :  { %v4470_v28 = vpop.f32.mrf.mxu0  ;;  %v4541_v45 = vpop.f32.mrf.mxu1 }
 0xff1   :  { %13601 = vst [vmem:[#allocation16_spill] sm:$0xff] %v11347_v1  ;;  %v11356_v27 = vadd.f32 %v4470_v28, %v11231_v39  ;;  %v11359_v52 = vadd.f32 %v4541_v45, %v11235_v11  ;;  %v11363_v51 = vsel %vm146_vm3, %v3754_v10, %v4469_v6  ;;  %v11371_v49 = vsel %vm146_vm3, %v4469_v6, %v3754_v10 }
 0xff2   :  { %13606 = vst [vmem:[#allocation23_spill] sm:$0xff] %v11371_v49  ;;  %v3611_v45 = vadd.f32 %v11204_v48, %v11223_v38  ;;  %v11401_v49 = vadd.f32 %v11206_v35, %v11227_v23  ;;  %v11409_v6 = vadd.f32 %v11216_v17, %v11235_v11 }
 0xff3   :  { %13604 = vst [vmem:[#allocation70_spill] sm:$0xff] %v11356_v27  ;;  %13605 = vst [vmem:[#allocation13_spill] sm:$0xff] %v11359_v52 }
 0xff4   :  { %13608 = vst [vmem:[#allocation73_spill] sm:$0xff] %v11401_v49  ;;  %13610 = vst [vmem:[#allocation75_spill] sm:$0xff] %v11409_v6 }
0x1010   :  { %v4611_v26 = vpop.f32.mrf.mxu0  ;;  %v4682_v28 = vpop.f32.mrf.mxu1 }
0x1011   :  { %v4612_v41 = vadd.f32 %v4611_v26, %v11223_v38  ;;  %v11395_v4 = vadd.f32 %v4682_v28, %v11227_v23 }
0x1012   :  { %v4613_v10 = vpop.f32.mrf.mxu0  ;;  %v4684_v60 = vpop.f32.mrf.mxu1 }
0x1013   :  { %13607 = vst [vmem:[#allocation72_spill] sm:$0xff] %v11395_v4  ;;  %v11412_v28 = vadd.f32 %v4613_v10, %v11231_v39  ;;  %v11415_v26 = vadd.f32 %v4684_v60, %v11235_v11  ;;  %v11419_v23 = vsel %vm146_vm3, %v4612_v41, %v3611_v45  ;;  %v4687_v11 = vsel %vm146_vm3, %v3611_v45, %v4612_v41 }
0x1014   :  { %13613 = vst [vmem:[#allocation78_spill] sm:$0xff] %v11419_v23 }
0x1015   :  { %13611 = vst [vmem:[#allocation76_spill] sm:$0xff] %v11412_v28  ;;  %13612 = vst [vmem:[#allocation77_spill] sm:$0xff] %v11415_v26  ;;  %v4688_v17 = vsel %vm8854_vm5, %v11405_v14, %v11412_v28  ;;  %v4690_v41 = vsel %vm8858_vm6, %v11409_v6, %v11415_v26 }
0x1032   :  { %v4821_v39 = vpop.f32.mrf.mxu0  ;;  %v4892_v35 = vpop.f32.mrf.mxu1 }
0x1033   :  { %v4897_v3 = vadd.f32 %v4821_v39, %v4687_v11  ;;  %v4689_v39 = vsel %vm8841_vm4, %v11401_v49, %v11395_v4  ;;  %v13632_v49 = vld [vmem:[#allocation17_spill] sm:$0xff]  ;;  %v13633_v4 = vld [vmem:[#allocation15_spill] sm:$0xff] }
0x1034   :  { %v4823_v48 = vpop.f32.mrf.mxu0  ;;  %v4894_v62 = vpop.f32.mrf.mxu1 }
0x1035   :  { %v6974_v10 = vmul.f32 -1.442695, %v4897_v3  ;;  %v4898_v38 = vadd.f32 %v4823_v48, %v4688_v17  ;;  %v4900_v45 = vadd.f32 %v4894_v62, %v4690_v41  ;;  %v4899_v3 = vadd.f32 %v4892_v35, %v4689_v39  ;;  %v13619_v39 = vld [vmem:[#allocation37_spill] sm:$0xff] }
0x1037   :  { %7621 = vpow2.f32 %v6974_v10  ;;  %v6975_v23 = vmul.f32 -1.442695, %v4898_v38  ;;  %v6976_v11 = vmul.f32 -1.442695, %v4900_v45  ;;  %v13614_v45 = vld [vmem:[#allocation68_spill] sm:$0xff] }
0x1039   :  { %7623 = vpow2.f32 %v6975_v23 }
0x103a   :  { %7625 = vpow2.f32 %v6976_v11 }
0x1044   :  { %v7622_v60 = vpop.eup %7621 }
0x1045   :  { %v4904_v17 = vadd.f32 1.0, %v7622_v60 }
0x1046   :  { %v7624_v48 = vpop.eup %7623 }
0x1047   :  { %7627 = vrcp.f32 %v4904_v17  ;;  %v4910_v23 = vadd.f32 1.0, %v7624_v48  ;;  %v7626_v38 = vpop.eup %7625  ;;  %v13621_v17 = vld [vmem:[#allocation48_spill] sm:$0xff] }
0x1048   :  { %7629 = vtanh.f32 %v4899_v3  ;;  %v4917_v62 = vadd.f32 1.0, %v7626_v38  ;;  %v13620_v3 = vld [vmem:[#allocation24_spill] sm:$0xff]  ;;  %v13624_v38 = vld [vmem:[#allocation45_spill] sm:$0xff] }
0x1049   :  { %7631 = vrcp.f32 %v4910_v23  ;;  %v13622_v48 = vld [vmem:[#allocation44_spill] sm:$0xff]  ;;  %v13623_v23 = vld [vmem:[#allocation43_spill] sm:$0xff] }
0x104a   :  { %7633 = vrcp.f32 %v4917_v62  ;;  %v13626_v62 = vld [vmem:[#allocation42_spill] sm:$0xff] }
0x1054   :  { %v7628_v10 = vpop.eup %7627 }
0x1055   :  { %v7630_v14 = vpop.eup %7629 }
0x1056   :  { %v7632_v6 = vpop.eup %7631  ;;  %v4921_v41 = vmul.f32 %v7630_v14, %v7628_v10  ;;  %v13616_v14 = vld [vmem:[#allocation33_spill] sm:$0xff]  ;;  %v13625_v10 = vld [vmem:[#allocation47_spill] sm:$0xff] }
0x1057   :  { %v4920_v26 = vmul.f32 %v7632_v6, %v13614_v45  ;;  %v7634_v35 = vpop.eup %7633  ;;  %v13617_v6 = vld [vmem:[#allocation34_spill] sm:$0xff] }
0x1058   :  { %v13628_v45 = vld [vmem:[#allocation22_spill] sm:$0xff] }
0x1059   :  { %v11448_v28 = vadd.f32 %v4921_v41, %v4920_v26  ;;  %v13618_v26 = vld [vmem:[#allocation35_spill] sm:$0xff]  ;;  %v13627_v41 = vld [vmem:[#allocation41_spill] sm:$0xff] }
0x105b   :  { %7635 = vtanh.f32 %v11448_v28 }
0x1068   :  { %v7636_v60 = vpop.eup %7635 }
0x1069   :  { %v11451_v11 = vmul.f32 %v7636_v60, %v7634_v35  ;;  %v13629_v35 = vld [vmem:[#allocation18_spill] sm:$0xff]  ;;  %v13630_v60 = vld [vmem:[#allocation25_spill] sm:$0xff] }
0x106b   :  { %13615 = vst [vmem:[#allocation68_spill] sm:$0xff] %v11451_v11  ;;  %4994 = vmatmul.mubr.f32.vlgmr.msra.gmra.mxu0 %v11451_v11  ;;  %5065 = vmatmul.mubr.f32.vlgmr.msra.gmra.mxu1 %v11451_v11  ;;  %v13631_v11 = vld [vmem:[#allocation27_spill] sm:$0xff] }
0x106c   :  { %5104 = vmatpush1.msra.mxu0 %v10950_v53  ;;  %5175 = vmatpush1.msra.mxu1 %v10952_v25 }
0x106d   :  { %5105 = vmatprep.subr.mxu0 %v10954_v47  ;;  %5176 = vmatprep.subr.mxu1 %v10956_v22 }
0x106e   :  { %5106 = vmatpush1.msra.mxu0 %v10960_v12  ;;  %5177 = vmatpush1.msra.mxu1 %v10962_v13 }
0x106f   :  { %5107 = vmatprep.subr.mxu0 %v10966_v15  ;;  %5178 = vmatprep.subr.mxu1 %v10968_v18 }
0x1070   :  { %5108 = vmatpush1.msra.mxu0 %v10972_v19  ;;  %5179 = vmatpush1.msra.mxu1 %v10974_v29 }
0x1071   :  { %5109 = vmatprep.subr.mxu0 %v10978_v37  ;;  %5180 = vmatprep.subr.mxu1 %v10980_v40 }
0x1072   :  { %5110 = vmatpush1.msra.mxu0 %v10984_v46  ;;  %5181 = vmatpush1.msra.mxu1 %v10986_v58 }
0x1073   :  { %5111 = vmatprep.subr.mxu0 %v10990_v63  ;;  %5182 = vmatprep.subr.mxu1 %v10992_v36 }
0x1074   :  { %5112 = vmatpush1.msra.mxu0 %v10996_v33  ;;  %5183 = vmatpush1.msra.mxu1 %v10998_v59 }
0x1075   :  { %5113 = vmatprep.subr.mxu0 %v11002_v42  ;;  %5184 = vmatprep.subr.mxu1 %v11004_v34 }
0x1076   :  { %5114 = vmatpush1.msra.mxu0 %v11008_v61  ;;  %5185 = vmatpush1.msra.mxu1 %v11010_v50 }
0x1077   :  { %5115 = vmatprep.subr.mxu0 %v11014_v21  ;;  %5186 = vmatprep.subr.mxu1 %v11016_v44 }
0x1078   :  { %5116 = vmatpush1.msra.mxu0 %v11020_v31  ;;  %5187 = vmatpush1.msra.mxu1 %v11022_v55 }
0x1079   :  { %5117 = vmatprep.subr.mxu0 %v11026_v20  ;;  %5188 = vmatprep.subr.mxu1 %v11028_v7 }
0x107a   :  { %5118 = vmatpush1.msra.mxu0 %v11032_v2  ;;  %5189 = vmatpush1.msra.mxu1 %v11034_v57 }
0x107b   :  { %5119 = vmatprep.subr.mxu0 %v11038_v54  ;;  %5190 = vmatprep.subr.mxu1 %v13616_v14 }
0x107c   :  { %5120 = vmatpush1.msra.mxu0 %v13617_v6  ;;  %5191 = vmatpush1.msra.mxu1 %v13618_v26 }
0x107d   :  { %5121 = vmatprep.subr.mxu0 %v13619_v39  ;;  %5192 = vmatprep.subr.mxu1 %v13620_v3 }
0x107e   :  { %5122 = vmatpush1.msra.mxu0 %v13621_v17  ;;  %5193 = vmatpush1.msra.mxu1 %v13622_v48 }
0x107f   :  { %5123 = vmatprep.subr.mxu0 %v13623_v23  ;;  %5194 = vmatprep.subr.mxu1 %v13624_v38 }
0x1080   :  { %5124 = vmatpush1.msra.mxu0 %v13625_v10  ;;  %5195 = vmatpush1.msra.mxu1 %v13626_v62 }
0x1081   :  { %5125 = vmatprep.subr.mxu0 %v13627_v41  ;;  %5196 = vmatprep.subr.mxu1 %v13628_v45  ;;  %v13638_v41 = vld [vmem:[#allocation62_spill] sm:$0xff]  ;;  %v13639_v45 = vld [vmem:[#allocation59_spill] sm:$0xff] }
0x1082   :  { %5126 = vmatpush1.msra.mxu0 %v13629_v35  ;;  %5197 = vmatpush1.msra.mxu1 %v13630_v60  ;;  %v13640_v35 = vld [vmem:[#allocation60_spill] sm:$0xff]  ;;  %v13641_v60 = vld [vmem:[#allocation61_spill] sm:$0xff] }
0x1083   :  { %5127 = vmatprep.subr.mxu0 %v13631_v11  ;;  %5198 = vmatprep.subr.mxu1 %v13632_v49  ;;  %v13642_v11 = vld [vmem:[#allocation28_spill] sm:$0xff]  ;;  %v13643_v49 = vld [vmem:[#allocation30_spill] sm:$0xff] }
0x1084   :  { %5128 = vmatpush1.msra.mxu0 %v13633_v4  ;;  %5199 = vmatpush1.msra.mxu1 %v13634_v16  ;;  %v13644_v4 = vld [vmem:[#allocation65_spill] sm:$0xff]  ;;  %v13645_v16 = vld [vmem:[#allocation51_spill] sm:$0xff] }
0x1085   :  { %5129 = vmatprep.subr.mxu0 %v13635_v8  ;;  %5200 = vmatprep.subr.mxu1 %v13636_v30  ;;  %v13646_v8 = vmov 0.0   ;;  %v13647_v30 = vld [vmem:[#allocation31_spill] sm:$0xff] }
0x1086   :  { %5130 = vmatpush1.msra.mxu0 %v13637_v0  ;;  %5201 = vmatpush1.msra.mxu1 %v13638_v41  ;;  %v13648_v41 = vld [vmem:[#allocation71_spill] sm:$0xff] }
0x1087   :  { %5131 = vmatprep.subr.mxu0 %v13639_v45  ;;  %5202 = vmatprep.subr.mxu1 %v13640_v35  ;;  %v13649_v45 = vld [vmem:[#allocation36_spill] sm:$0xff] }
0x1088   :  { %5132 = vmatpush1.msra.mxu0 %v13641_v60  ;;  %5203 = vmatpush1.msra.mxu1 %v13642_v11 }
0x1089   :  { %5133 = vmatprep.subr.mxu0 %v13643_v49  ;;  %5204 = vmatprep.subr.mxu1 %v13644_v4 }
0x108a   :  { %5134 = vmatpush1.msra.mxu0 %v13645_v16  ;;  %5167 = vmatprep.mubr.f32.mxu0 %v13646_v8  ;;  %v13650_v16 = vsel %vm8854_vm5, %v11350_v5, %v11356_v27 }
0x108b   :  { %5205 = vmatpush1.msra.mxu1 %v13647_v30  ;;  %5238 = vmatprep.mubr.f32.mxu1 %v13646_v8 }
0x108c   :  { %5277 = vmatprep.subr.mxu0 %v13648_v41  ;;  %5348 = vmatprep.subr.mxu1 %v13649_v45  ;;  %v13651_v45 = vsel %vm8858_vm6, %v11353_v24, %v11359_v52 }
0x112b   :  { %v4995_v35 = vpop.f32.mrf.mxu0  ;;  %v5066_v49 = vpop.f32.mrf.mxu1 }
0x112c   :  { %v5071_v60 = vadd.f32 %v4995_v35, %v11363_v51  ;;  %v13652_v51 = vsel %vm8841_vm4, %v11343_v32, %v11347_v1  ;;  %v11692_v32 = vld [vmem:[#allocation7 + $0x158] sm:$0xff]  ;;  %v11695_v1 = vld [vmem:[#allocation7 + $0x140] sm:$0xff] }
0x112d   :  { %v4997_v11 = vpop.f32.mrf.mxu0  ;;  %v5068_v8 = vpop.f32.mrf.mxu1  ;;  %v5073_v35 = vadd.f32 %v5066_v49, %v13652_v51 }
0x112e   :  { %v6977_v0 = vmul.f32 -1.442695, %v5071_v60  ;;  %v5072_v4 = vadd.f32 %v4997_v11, %v13650_v16  ;;  %v5074_v41 = vadd.f32 %v5068_v8, %v13651_v45 }
0x1130   :  { %7637 = vpow2.f32 %v6977_v0  ;;  %v6978_v30 = vmul.f32 -1.442695, %v5072_v4  ;;  %v6979_v60 = vmul.f32 -1.442695, %v5074_v41 }
0x1132   :  { %7639 = vpow2.f32 %v6978_v30 }
0x1133   :  { %7641 = vtanh.f32 %v5073_v35  ;;  %v13681_v35 = vld [vmem:[#allocation32_spill] sm:$0xff] }
0x1134   :  { %7643 = vpow2.f32 %v6979_v60  ;;  %v13682_v60 = vld [vmem:[#allocation50_spill] sm:$0xff] }
0x113d   :  { %v7638_v5 = vpop.eup %7637 }
0x113e   :  { %v5078_v16 = vadd.f32 1.0, %v7638_v5 }
0x113f   :  { %v7640_v0 = vpop.eup %7639 }
0x1140   :  { %7645 = vrcp.f32 %v5078_v16  ;;  %v5084_v30 = vadd.f32 1.0, %v7640_v0  ;;  %v7642_v4 = vpop.eup %7641  ;;  %v13683_v16 = vsel %vm8858_vm6, %v13681_v35, %v13682_v60  ;;  %v11704_v35 = vld [vmem:[#allocation7 + $0x138] sm:$0xff]  ;;  %v11707_v60 = vld [vmem:[#allocation7 + $0x120] sm:$0xff] }
0x1141   :  { %v7644_v11 = vpop.eup %7643  ;;  %13691 = vst [vmem:[#allocation24_spill] sm:$0xff] %v11704_v35 }
0x1142   :  { %7647 = vrcp.f32 %v5084_v30  ;;  %v5091_v45 = vadd.f32 1.0, %v7644_v11  ;;  %v13686_v11 = vld [vmem:[#allocation54_spill] sm:$0xff] }
0x1144   :  { %7649 = vrcp.f32 %v5091_v45 }
0x114d   :  { %v7646_v27 = vpop.eup %7645 }
0x114e   :  { %v5095_v24 = vmul.f32 %v7646_v27, %v7642_v4  ;;  %v13685_v4 = vld [vmem:[#allocation53_spill] sm:$0xff] }
0x114f   :  { %v7648_v8 = vpop.eup %7647 }
0x1150   :  { %v5094_v52 = vmul.f32 %v7648_v8, %v11448_v28  ;;  %v13687_v8 = vsel %vm8841_vm4, %v13685_v4, %v13686_v11  ;;  %v11698_v4 = vld [vmem:[#allocation7 + $0x150] sm:$0xff]  ;;  %v11701_v11 = vld [vmem:[#allocation7 + $0x128] sm:$0xff] }
0x1151   :  { %v7650_v5 = vpop.eup %7649  ;;  %13689 = vst [vmem:[#allocation35_spill] sm:$0xff] %v11698_v4  ;;  %13690 = vst [vmem:[#allocation37_spill] sm:$0xff] %v11701_v11 }
0x1152   :  { %v11538_v43 = vadd.f32 %v5095_v24, %v5094_v52 }
0x1154   :  { %7651 = vtanh.f32 %v11538_v43 }
0x1161   :  { %v7652_v49 = vpop.eup %7651 }
0x1162   :  { %v11541_v41 = vmul.f32 %v7652_v49, %v7650_v5 }
0x1164   :  { %13653 = vst [vmem:[#allocation33_spill] sm:$0xff] %v11541_v41  ;;  %5168 = vmatmul.mubr.f32.vlgmr.msra.gmra.mxu0 %v11541_v41  ;;  %5239 = vmatmul.mubr.f32.vlgmr.msra.gmra.mxu1 %v11541_v41  ;;  %v11689_v41 = vld [vmem:[#allocation7 + $0x148] sm:$0xff] }
0x1165   :  { %5278 = vmatpush1.msra.mxu0 %v10950_v53  ;;  %5349 = vmatpush1.msra.mxu1 %v10952_v25  ;;  %v13654_v53 = vld [vmem:[#allocation41_spill] sm:$0xff]  ;;  %v13655_v25 = vld [vmem:[#allocation22_spill] sm:$0xff] }
0x1166   :  { %5279 = vmatprep.subr.mxu0 %v10954_v47  ;;  %5350 = vmatprep.subr.mxu1 %v10956_v22  ;;  %v13656_v47 = vld [vmem:[#allocation18_spill] sm:$0xff]  ;;  %v13657_v22 = vld [vmem:[#allocation25_spill] sm:$0xff] }
0x1167   :  { %5280 = vmatpush1.msra.mxu0 %v10960_v12  ;;  %5351 = vmatpush1.msra.mxu1 %v10962_v13  ;;  %v13658_v12 = vld [vmem:[#allocation27_spill] sm:$0xff]  ;;  %v13659_v13 = vld [vmem:[#allocation17_spill] sm:$0xff] }
0x1168   :  { %5281 = vmatprep.subr.mxu0 %v10966_v15  ;;  %5352 = vmatprep.subr.mxu1 %v10968_v18  ;;  %v13660_v15 = vld [vmem:[#allocation15_spill] sm:$0xff]  ;;  %v13661_v18 = vld [vmem:[#allocation20_spill] sm:$0xff] }
0x1169   :  { %5282 = vmatpush1.msra.mxu0 %v10972_v19  ;;  %5353 = vmatpush1.msra.mxu1 %v10974_v29  ;;  %v13662_v19 = vld [vmem:[#allocation39_spill] sm:$0xff]  ;;  %v13663_v29 = vld [vmem:[#allocation64_spill] sm:$0xff] }
0x116a   :  { %5283 = vmatprep.subr.mxu0 %v10978_v37  ;;  %5354 = vmatprep.subr.mxu1 %v10980_v40  ;;  %v13664_v37 = vld [vmem:[#allocation66_spill] sm:$0xff] }
0x116b   :  { %5284 = vmatpush1.msra.mxu0 %v10984_v46  ;;  %5355 = vmatpush1.msra.mxu1 %v10986_v58  ;;  %v13665_v40 = vld [vmem:[#allocation62_spill] sm:$0xff]  ;;  %v13666_v46 = vld [vmem:[#allocation59_spill] sm:$0xff]  ;;  %v13667_v58 = vld [vmem:[#allocation60_spill] sm:$0xff] }
0x116c   :  { %5285 = vmatprep.subr.mxu0 %v10990_v63  ;;  %5356 = vmatprep.subr.mxu1 %v10992_v36  ;;  %v13668_v63 = vld [vmem:[#allocation61_spill] sm:$0xff]  ;;  %v13669_v36 = vld [vmem:[#allocation28_spill] sm:$0xff] }
0x116d   :  { %5286 = vmatpush1.msra.mxu0 %v10996_v33  ;;  %5357 = vmatpush1.msra.mxu1 %v10998_v59  ;;  %v13670_v33 = vld [vmem:[#allocation30_spill] sm:$0xff]  ;;  %v13671_v59 = vld [vmem:[#allocation65_spill] sm:$0xff] }
0x116e   :  { %5287 = vmatprep.subr.mxu0 %v11002_v42  ;;  %5358 = vmatprep.subr.mxu1 %v11004_v34  ;;  %v13672_v42 = vld [vmem:[#allocation51_spill] sm:$0xff]  ;;  %v13673_v34 = vmov 0.0  }
0x116f   :  { %5288 = vmatpush1.msra.mxu0 %v11008_v61  ;;  %5359 = vmatpush1.msra.mxu1 %v11010_v50  ;;  %v13674_v61 = vld [vmem:[#allocation31_spill] sm:$0xff] }
0x1170   :  { %5289 = vmatprep.subr.mxu0 %v11014_v21  ;;  %5360 = vmatprep.subr.mxu1 %v11016_v44  ;;  %v13675_v50 = vld [vmem:[#allocation71_spill] sm:$0xff]  ;;  %v13676_v21 = vld [vmem:[#allocation36_spill] sm:$0xff] }
0x1171   :  { %5290 = vmatpush1.msra.mxu0 %v11020_v31  ;;  %5361 = vmatpush1.msra.mxu1 %v11022_v55  ;;  %v13677_v31 = vld [vmem:[#allocation21_spill] sm:$0xff] }
0x1172   :  { %5291 = vmatprep.subr.mxu0 %v11026_v20  ;;  %5362 = vmatprep.subr.mxu1 %v11028_v7 }
0x1173   :  { %5292 = vmatpush1.msra.mxu0 %v11032_v2  ;;  %5363 = vmatpush1.msra.mxu1 %v11034_v57  ;;  %v13678_v2 = vld [vmem:[#allocation46_spill] sm:$0xff] }
0x1174   :  { %5293 = vmatprep.subr.mxu0 %v11038_v54  ;;  %5364 = vmatprep.subr.mxu1 %v13616_v14  ;;  %v13679_v57 = vld [vmem:[#allocation58_spill] sm:$0xff] }
0x1175   :  { %5294 = vmatpush1.msra.mxu0 %v13617_v6  ;;  %5365 = vmatpush1.msra.mxu1 %v13618_v26  ;;  %v13680_v27 = vsel %vm8854_vm5, %v13678_v2, %v13679_v57  ;;  %v11710_v2 = vld [vmem:[#allocation7 + $0x130] sm:$0xff]  ;;  %v11713_v57 = vld [vmem:[#allocation7 + $0x108] sm:$0xff] }
0x1176   :  { %5295 = vmatprep.subr.mxu0 %v13619_v39  ;;  %5366 = vmatprep.subr.mxu1 %v13620_v3 }
0x1177   :  { %5296 = vmatpush1.msra.mxu0 %v13621_v17  ;;  %5367 = vmatpush1.msra.mxu1 %v13622_v48 }
0x1178   :  { %5297 = vmatprep.subr.mxu0 %v13623_v23  ;;  %5368 = vmatprep.subr.mxu1 %v13624_v38 }
0x1179   :  { %5298 = vmatpush1.msra.mxu0 %v13625_v10  ;;  %5369 = vmatpush1.msra.mxu1 %v13626_v62 }
0x117a   :  { %5299 = vmatprep.subr.mxu0 %v13654_v53  ;;  %5370 = vmatprep.subr.mxu1 %v13655_v25 }
0x117b   :  { %5300 = vmatpush1.msra.mxu0 %v13656_v47  ;;  %5371 = vmatpush1.msra.mxu1 %v13657_v22 }
0x117c   :  { %5301 = vmatprep.subr.mxu0 %v13658_v12  ;;  %5372 = vmatprep.subr.mxu1 %v13659_v13 }
0x117d   :  { %5302 = vmatpush1.msra.mxu0 %v13660_v15  ;;  %5373 = vmatpush1.msra.mxu1 %v13661_v18 }
0x117e   :  { %5303 = vmatprep.subr.mxu0 %v13662_v19  ;;  %5374 = vmatprep.subr.mxu1 %v13663_v29 }
0x117f   :  { %5304 = vmatpush1.msra.mxu0 %v13664_v37  ;;  %5375 = vmatpush1.msra.mxu1 %v13665_v40 }
0x1180   :  { %5305 = vmatprep.subr.mxu0 %v13666_v46  ;;  %5376 = vmatprep.subr.mxu1 %v13667_v58 }
0x1181   :  { %5306 = vmatpush1.msra.mxu0 %v13668_v63  ;;  %5377 = vmatpush1.msra.mxu1 %v13669_v36 }
0x1182   :  { %5307 = vmatprep.subr.mxu0 %v13670_v33  ;;  %5378 = vmatprep.subr.mxu1 %v13671_v59 }
0x1183   :  { %5308 = vmatpush1.msra.mxu0 %v13672_v42  ;;  %5341 = vmatprep.mubr.f32.mxu0 %v13673_v34 }
0x1184   :  { %5379 = vmatpush1.msra.mxu1 %v13674_v61  ;;  %5412 = vmatprep.mubr.f32.mxu1 %v13673_v34 }
0x1185   :  { %5451 = vmatprep.subr.mxu0 %v13675_v50  ;;  %5522 = vmatprep.subr.mxu1 %v13676_v21 }
0x1224   :  { %v5169_v44 = vpop.f32.mrf.mxu0  ;;  %v5240_v52 = vpop.f32.mrf.mxu1 }
0x1225   :  { %v5245_v55 = vadd.f32 %v5169_v44, %v13677_v31  ;;  %v5247_v45 = vadd.f32 %v5240_v52, %v13687_v8  ;;  %v11635_v8 = vld [vmem:[#allocation7 + $0x1e0] sm:$0xff] }
0x1226   :  { %v5171_v20 = vpop.f32.mrf.mxu0  ;;  %v5242_v51 = vpop.f32.mrf.mxu1 }
0x1227   :  { %v6980_v7 = vmul.f32 -1.442695, %v5245_v55  ;;  %v5246_v24 = vadd.f32 %v5171_v20, %v13680_v27  ;;  %v5248_v0 = vadd.f32 %v5242_v51, %v13683_v16 }
0x1229   :  { %7653 = vpow2.f32 %v6980_v7  ;;  %v6981_v28 = vmul.f32 -1.442695, %v5246_v24  ;;  %v6982_v5 = vmul.f32 -1.442695, %v5248_v0 }
0x122b   :  { %7655 = vpow2.f32 %v6981_v28 }
0x122c   :  { %7657 = vtanh.f32 %v5247_v45  ;;  %v11638_v45 = vld [vmem:[#allocation7 + $0x1f0] sm:$0xff] }
0x122d   :  { %7659 = vpow2.f32 %v6982_v5  ;;  %v11644_v5 = vld [vmem:[#allocation7 + $0x1d8] sm:$0xff] }
0x1236   :  { %v7654_v49 = vpop.eup %7653 }
0x1237   :  { %v5252_v50 = vadd.f32 1.0, %v7654_v49  ;;  %v11647_v49 = vld [vmem:[#allocation7 + $0x1c0] sm:$0xff] }
0x1238   :  { %v7656_v21 = vpop.eup %7655 }
0x1239   :  { %7661 = vrcp.f32 %v5252_v50  ;;  %v5258_v44 = vadd.f32 1.0, %v7656_v21  ;;  %v7658_v31 = vpop.eup %7657  ;;  %v11650_v50 = vld [vmem:[#allocation7 + $0x1d0] sm:$0xff]  ;;  %v11653_v21 = vld [vmem:[#allocation7 + $0x1a8] sm:$0xff] }
0x123a   :  { %v7660_v55 = vpop.eup %7659 }
0x123b   :  { %7663 = vrcp.f32 %v5258_v44  ;;  %v5265_v24 = vadd.f32 1.0, %v7660_v55  ;;  %v11656_v44 = vld [vmem:[#allocation7 + $0x1b8] sm:$0xff]  ;;  %v11662_v55 = vld [vmem:[#allocation7 + $0x1b0] sm:$0xff] }
0x123d   :  { %7665 = vrcp.f32 %v5265_v24  ;;  %v11674_v24 = vld [vmem:[#allocation7 + $0x190] sm:$0xff] }
0x1246   :  { %v7662_v20 = vpop.eup %7661 }
0x1247   :  { %v5269_v7 = vmul.f32 %v7662_v20, %v7658_v31  ;;  %v11659_v31 = vld [vmem:[#allocation7 + $0x1a0] sm:$0xff]  ;;  %v11665_v20 = vld [vmem:[#allocation7 + $0x188] sm:$0xff] }
0x1248   :  { %v7664_v27 = vpop.eup %7663 }
0x1249   :  { %v5268_v28 = vmul.f32 %v7664_v27, %v11538_v43  ;;  %v11641_v43 = vld [vmem:[#allocation7 + $0x1c8] sm:$0xff]  ;;  %v11671_v27 = vld [vmem:[#allocation7 + $0x180] sm:$0xff] }
0x124a   :  { %v7666_v52 = vpop.eup %7665 }
0x124b   :  { %v11628_v51 = vadd.f32 %v5269_v7, %v5268_v28  ;;  %v11668_v7 = vld [vmem:[#allocation7 + $0x198] sm:$0xff]  ;;  %v11677_v28 = vld [vmem:[#allocation7 + $0x168] sm:$0xff] }
0x124d   :  { %7667 = vtanh.f32 %v11628_v51 }
0x125a   :  { %v7668_v16 = vpop.eup %7667 }
0x125b   :  { %v11631_v0 = vmul.f32 %v7668_v16, %v7666_v52  ;;  %v11680_v52 = vld [vmem:[#allocation7 + $0x178] sm:$0xff]  ;;  %v11683_v16 = vld [vmem:[#allocation7 + $0x160] sm:$0xff] }
0x125d   :  { %13688 = vst [vmem:[#allocation34_spill] sm:$0xff] %v11631_v0  ;;  %5342 = vmatmul.mubr.f32.vlgmr.msra.gmra.mxu0 %v11631_v0  ;;  %5413 = vmatmul.mubr.f32.vlgmr.msra.gmra.mxu1 %v11631_v0  ;;  %v11686_v0 = vld [vmem:[#allocation7 + $0x170] sm:$0xff] }
0x125e   :  { %5452 = vmatpush1.msra.mxu0 %v11635_v8  ;;  %5523 = vmatpush1.msra.mxu1 %v11638_v45 }
0x125f   :  { %5453 = vmatprep.subr.mxu0 %v11641_v43  ;;  %5524 = vmatprep.subr.mxu1 %v11644_v5 }
0x1260   :  { %5454 = vmatpush1.msra.mxu0 %v11647_v49  ;;  %5525 = vmatpush1.msra.mxu1 %v11650_v50 }
0x1261   :  { %5455 = vmatprep.subr.mxu0 %v11653_v21  ;;  %5526 = vmatprep.subr.mxu1 %v11656_v44 }
0x1262   :  { %5456 = vmatpush1.msra.mxu0 %v11659_v31  ;;  %5527 = vmatpush1.msra.mxu1 %v11662_v55 }
0x1263   :  { %5457 = vmatprep.subr.mxu0 %v11665_v20  ;;  %5528 = vmatprep.subr.mxu1 %v11668_v7 }
0x1264   :  { %5458 = vmatpush1.msra.mxu0 %v11671_v27  ;;  %5529 = vmatpush1.msra.mxu1 %v11674_v24 }
0x1265   :  { %5459 = vmatprep.subr.mxu0 %v11677_v28  ;;  %5530 = vmatprep.subr.mxu1 %v11680_v52 }
0x1266   :  { %5460 = vmatpush1.msra.mxu0 %v11683_v16  ;;  %5531 = vmatpush1.msra.mxu1 %v11686_v0 }
0x1267   :  { %5461 = vmatprep.subr.mxu0 %v11689_v41  ;;  %5532 = vmatprep.subr.mxu1 %v11692_v32 }
0x1268   :  { %5462 = vmatpush1.msra.mxu0 %v11695_v1  ;;  %5533 = vmatpush1.msra.mxu1 %v11698_v4  ;;  %v11716_v4 = vld [vmem:[#allocation7 + $0x118] sm:$0xff] }
0x1269   :  { %5463 = vmatprep.subr.mxu0 %v11701_v11  ;;  %5534 = vmatprep.subr.mxu1 %v11704_v35  ;;  %v11719_v11 = vld [vmem:[#allocation7 + $0x100] sm:$0xff]  ;;  %v11722_v35 = vld [vmem:[#allocation7 + $0x110] sm:$0xff] }
0x126a   :  { %5464 = vmatpush1.msra.mxu0 %v11707_v60  ;;  %5535 = vmatpush1.msra.mxu1 %v11710_v2 }
0x126b   :  { %5465 = vmatprep.subr.mxu0 %v11713_v57  ;;  %5536 = vmatprep.subr.mxu1 %v11716_v4 }
0x126c   :  { %5466 = vmatpush1.msra.mxu0 %v11719_v11  ;;  %5537 = vmatpush1.msra.mxu1 %v11722_v35 }
0x126d   :  { %5467 = vmatprep.subr.mxu0 %v11038_v54  ;;  %5538 = vmatprep.subr.mxu1 %v13616_v14  ;;  %v11759_v54 = vld [vmem:[#allocation7 + $0x1e8] sm:$0xff]  ;;  %v11762_v14 = vld [vmem:[#allocation7 + $0x1f8] sm:$0xff] }
0x126e   :  { %5468 = vmatpush1.msra.mxu0 %v13617_v6  ;;  %5539 = vmatpush1.msra.mxu1 %v13618_v26  ;;  %13692 = vst [vmem:[#allocation48_spill] sm:$0xff] %v11759_v54  ;;  %13693 = vst [vmem:[#allocation44_spill] sm:$0xff] %v11762_v14  ;;  %v13694_v26 = vld [vmem:[#allocation63_spill] sm:$0xff] }
0x126f   :  { %5469 = vmatprep.subr.mxu0 %v13619_v39  ;;  %5540 = vmatprep.subr.mxu1 %v13620_v3 }
0x1270   :  { %5470 = vmatpush1.msra.mxu0 %v13621_v17  ;;  %5541 = vmatpush1.msra.mxu1 %v13622_v48  ;;  %v13695_v48 = vld [vmem:[#allocation55_spill] sm:$0xff] }
0x1271   :  { %5471 = vmatprep.subr.mxu0 %v13623_v23  ;;  %5542 = vmatprep.subr.mxu1 %v13624_v38  ;;  %v13696_v23 = vld [vmem:[#allocation40_spill] sm:$0xff] }
0x1272   :  { %5472 = vmatpush1.msra.mxu0 %v13625_v10  ;;  %5543 = vmatpush1.msra.mxu1 %v13626_v62  ;;  %v13697_v38 = vsel %vm8854_vm5, %v13695_v48, %v13696_v23 }
0x1273   :  { %5473 = vmatprep.subr.mxu0 %v13654_v53  ;;  %5544 = vmatprep.subr.mxu1 %v13655_v25 }
0x1274   :  { %5474 = vmatpush1.msra.mxu0 %v13656_v47  ;;  %5545 = vmatpush1.msra.mxu1 %v13657_v22  ;;  %v13698_v47 = vld [vmem:[#allocation69_spill] sm:$0xff]  ;;  %v13699_v22 = vld [vmem:[#allocation67_spill] sm:$0xff] }
0x1275   :  { %5475 = vmatprep.subr.mxu0 %v13658_v12  ;;  %5546 = vmatprep.subr.mxu1 %v13659_v13  ;;  %v13700_v12 = vsel %vm8858_vm6, %v13698_v47, %v13699_v22 }
0x1276   :  { %5476 = vmatpush1.msra.mxu0 %v13660_v15  ;;  %5547 = vmatpush1.msra.mxu1 %v13661_v18  ;;  %v13701_v15 = vld [vmem:[#allocation56_spill] sm:$0xff]  ;;  %v13702_v18 = vld [vmem:[#allocation57_spill] sm:$0xff] }
0x1277   :  { %5477 = vmatprep.subr.mxu0 %v13662_v19  ;;  %5548 = vmatprep.subr.mxu1 %v13663_v29  ;;  %v13703_v19 = vsel %vm8841_vm4, %v13701_v15, %v13702_v18 }
0x1278   :  { %5478 = vmatpush1.msra.mxu0 %v13664_v37  ;;  %5549 = vmatpush1.msra.mxu1 %v13665_v40 }
0x1279   :  { %5479 = vmatprep.subr.mxu0 %v13666_v46  ;;  %5550 = vmatprep.subr.mxu1 %v13667_v58 }
0x127a   :  { %5480 = vmatpush1.msra.mxu0 %v13668_v63  ;;  %5551 = vmatpush1.msra.mxu1 %v13669_v36 }
0x127b   :  { %5481 = vmatprep.subr.mxu0 %v13670_v33  ;;  %5552 = vmatprep.subr.mxu1 %v13671_v59 }
0x127c   :  { %5482 = vmatpush1.msra.mxu0 %v13672_v42  ;;  %5515 = vmatprep.mubr.f32.mxu0 %v13673_v34 }
0x127d   :  { %5553 = vmatpush1.msra.mxu1 %v13674_v61  ;;  %5586 = vmatprep.mubr.f32.mxu1 %v13673_v34 }
0x127e   :  { %5625 = vmatprep.subr.mxu0 %v11759_v54  ;;  %5696 = vmatprep.subr.mxu1 %v11762_v14 }
0x131d   :  { %v5343_v6 = vpop.f32.mrf.mxu0  ;;  %v5414_v62 = vpop.f32.mrf.mxu1 }
0x131e   :  { %v5419_v39 = vadd.f32 %v5343_v6, %v13694_v26  ;;  %v5421_v29 = vadd.f32 %v5414_v62, %v13703_v19  ;;  %v13707_v62 = vld [vmem:[#allocation24_spill] sm:$0xff]  ;;  %v11831_v19 = vld [vmem:[#allocation7 + $0xc8] sm:$0xff] }
0x131f   :  { %v5345_v3 = vpop.f32.mrf.mxu0  ;;  %v5416_v25 = vpop.f32.mrf.mxu1 }
0x1320   :  { %v6983_v17 = vmul.f32 -1.442695, %v5419_v39  ;;  %v5420_v10 = vadd.f32 %v5345_v3, %v13697_v38  ;;  %v5422_v13 = vadd.f32 %v5416_v25, %v13700_v12  ;;  %v11822_v25 = vld [vmem:[#allocation7 + $0xf8] sm:$0xff]  ;;  %v11825_v12 = vld [vmem:[#allocation7 + $0xe0] sm:$0xff] }
0x1322   :  { %7669 = vpow2.f32 %v6983_v17  ;;  %v6984_v53 = vmul.f32 -1.442695, %v5420_v10  ;;  %v6985_v37 = vmul.f32 -1.442695, %v5422_v13  ;;  %v13706_v10 = vld [vmem:[#allocation37_spill] sm:$0xff]  ;;  %v11828_v13 = vld [vmem:[#allocation7 + $0xf0] sm:$0xff] }
0x1324   :  { %7671 = vpow2.f32 %v6984_v53  ;;  %v11819_v53 = vld [vmem:[#allocation7 + $0xe8] sm:$0xff] }
0x1325   :  { %7673 = vtanh.f32 %v5421_v29  ;;  %v11834_v29 = vld [vmem:[#allocation7 + $0xd8] sm:$0xff] }
0x1326   :  { %7675 = vpow2.f32 %v6985_v37  ;;  %v11837_v37 = vld [vmem:[#allocation7 + $0xc0] sm:$0xff] }
0x132f   :  { %v7670_v40 = vpop.eup %7669 }
0x1330   :  { %v5426_v46 = vadd.f32 1.0, %v7670_v40  ;;  %v11840_v40 = vld [vmem:[#allocation7 + $0xd0] sm:$0xff] }
0x1331   :  { %v7672_v58 = vpop.eup %7671 }
0x1332   :  { %7677 = vrcp.f32 %v5426_v46  ;;  %v5432_v63 = vadd.f32 1.0, %v7672_v58  ;;  %v7674_v36 = vpop.eup %7673  ;;  %v11843_v46 = vld [vmem:[#allocation7 + $0xa8] sm:$0xff]  ;;  %v11846_v58 = vld [vmem:[#allocation7 + $0xb8] sm:$0xff] }
0x1333   :  { %v7676_v33 = vpop.eup %7675 }
0x1334   :  { %7679 = vrcp.f32 %v5432_v63  ;;  %v5439_v6 = vadd.f32 1.0, %v7676_v33  ;;  %v11849_v63 = vld [vmem:[#allocation7 + $0xa0] sm:$0xff]  ;;  %v11855_v33 = vld [vmem:[#allocation7 + $0x88] sm:$0xff] }
0x1335   :  { %13708 = vst [vmem:[#allocation45_spill] sm:$0xff] %v11855_v33 }
0x1336   :  { %7681 = vrcp.f32 %v5439_v6  ;;  %v11867_v6 = vld [vmem:[#allocation7 + $0x68] sm:$0xff] }
0x1337   :  { %13712 = vst [vmem:[#allocation22_spill] sm:$0xff] %v11867_v6 }
0x133f   :  { %v7678_v59 = vpop.eup %7677 }
0x1340   :  { %v5443_v42 = vmul.f32 %v7678_v59, %v7674_v36  ;;  %v11852_v36 = vld [vmem:[#allocation7 + $0xb0] sm:$0xff]  ;;  %v11858_v59 = vld [vmem:[#allocation7 + $0x98] sm:$0xff] }
0x1341   :  { %v7680_v61 = vpop.eup %7679  ;;  %13709 = vst [vmem:[#allocation47_spill] sm:$0xff] %v11858_v59 }
0x1342   :  { %v5442_v26 = vmul.f32 %v7680_v61, %v11628_v51  ;;  %v13705_v51 = vld [vmem:[#allocation35_spill] sm:$0xff]  ;;  %v11864_v61 = vld [vmem:[#allocation7 + $0x90] sm:$0xff] }
0x1343   :  { %v7682_v3 = vpop.eup %7681  ;;  %13711 = vst [vmem:[#allocation41_spill] sm:$0xff] %v11864_v61 }
0x1344   :  { %v11782_v39 = vadd.f32 %v5443_v42, %v5442_v26  ;;  %v11861_v42 = vld [vmem:[#allocation7 + $0x80] sm:$0xff]  ;;  %v11870_v26 = vld [vmem:[#allocation7 + $0x78] sm:$0xff] }
0x1345   :  { %13710 = vst [vmem:[#allocation42_spill] sm:$0xff] %v11861_v42  ;;  %13713 = vst [vmem:[#allocation18_spill] sm:$0xff] %v11870_v26 }
0x1346   :  { %7683 = vtanh.f32 %v11782_v39 }
0x1353   :  { %v7684_v17 = vpop.eup %7683 }
0x1354   :  { %v11785_v38 = vmul.f32 %v7684_v17, %v7682_v3  ;;  %v11873_v3 = vld [vmem:[#allocation7 + $0x60] sm:$0xff]  ;;  %v11876_v17 = vld [vmem:[#allocation7 + $0x70] sm:$0xff] }
0x1355   :  { %13714 = vst [vmem:[#allocation25_spill] sm:$0xff] %v11873_v3  ;;  %13715 = vst [vmem:[#allocation27_spill] sm:$0xff] %v11876_v17 }
0x1356   :  { %13704 = vst [vmem:[#allocation43_spill] sm:$0xff] %v11785_v38  ;;  %5516 = vmatmul.mubr.f32.vlgmr.msra.gmra.mxu0 %v11785_v38  ;;  %5587 = vmatmul.mubr.f32.vlgmr.msra.gmra.mxu1 %v11785_v38  ;;  %v11879_v38 = vld [vmem:[#allocation7 + $0x48] sm:$0xff] }
0x1357   :  { %5626 = vmatpush1.msra.mxu0 %v11635_v8  ;;  %5697 = vmatpush1.msra.mxu1 %v11638_v45  ;;  %13716 = vst [vmem:[#allocation17_spill] sm:$0xff] %v11879_v38 }
0x1358   :  { %5627 = vmatprep.subr.mxu0 %v11641_v43  ;;  %5698 = vmatprep.subr.mxu1 %v11644_v5 }
0x1359   :  { %5628 = vmatpush1.msra.mxu0 %v11647_v49  ;;  %5699 = vmatpush1.msra.mxu1 %v11650_v50 }
0x135a   :  { %5629 = vmatprep.subr.mxu0 %v11653_v21  ;;  %5700 = vmatprep.subr.mxu1 %v11656_v44 }
0x135b   :  { %5630 = vmatpush1.msra.mxu0 %v11659_v31  ;;  %5701 = vmatpush1.msra.mxu1 %v11662_v55 }
0x135c   :  { %5631 = vmatprep.subr.mxu0 %v11665_v20  ;;  %5702 = vmatprep.subr.mxu1 %v11668_v7 }
0x135d   :  { %5632 = vmatpush1.msra.mxu0 %v11671_v27  ;;  %5703 = vmatpush1.msra.mxu1 %v11674_v24 }
0x135e   :  { %5633 = vmatprep.subr.mxu0 %v11677_v28  ;;  %5704 = vmatprep.subr.mxu1 %v11680_v52 }
0x135f   :  { %5634 = vmatpush1.msra.mxu0 %v11683_v16  ;;  %5705 = vmatpush1.msra.mxu1 %v11686_v0 }
0x1360   :  { %5635 = vmatprep.subr.mxu0 %v11689_v41  ;;  %5706 = vmatprep.subr.mxu1 %v11692_v32 }
0x1361   :  { %5636 = vmatpush1.msra.mxu0 %v11695_v1  ;;  %5707 = vmatpush1.msra.mxu1 %v13705_v51 }
0x1362   :  { %5637 = vmatprep.subr.mxu0 %v13706_v10  ;;  %5708 = vmatprep.subr.mxu1 %v13707_v62 }
0x1363   :  { %5638 = vmatpush1.msra.mxu0 %v11707_v60  ;;  %5709 = vmatpush1.msra.mxu1 %v11710_v2 }
0x1364   :  { %5639 = vmatprep.subr.mxu0 %v11713_v57  ;;  %5710 = vmatprep.subr.mxu1 %v11716_v4 }
0x1365   :  { %5640 = vmatpush1.msra.mxu0 %v11719_v11  ;;  %5711 = vmatpush1.msra.mxu1 %v11722_v35 }
0x1366   :  { %5641 = vmatprep.subr.mxu0 %v11819_v53  ;;  %5712 = vmatprep.subr.mxu1 %v11822_v25 }
0x1367   :  { %5642 = vmatpush1.msra.mxu0 %v11825_v12  ;;  %5713 = vmatpush1.msra.mxu1 %v11828_v13 }
0x1368   :  { %5643 = vmatprep.subr.mxu0 %v11831_v19  ;;  %5714 = vmatprep.subr.mxu1 %v11834_v29 }
0x1369   :  { %5644 = vmatpush1.msra.mxu0 %v11837_v37  ;;  %5715 = vmatpush1.msra.mxu1 %v11840_v40 }
0x136a   :  { %5645 = vmatprep.subr.mxu0 %v11843_v46  ;;  %5716 = vmatprep.subr.mxu1 %v11846_v58 }
0x136b   :  { %5646 = vmatpush1.msra.mxu0 %v11849_v63  ;;  %5717 = vmatpush1.msra.mxu1 %v11852_v36 }
0x136c   :  { %5647 = vmatprep.subr.mxu0 %v11855_v33  ;;  %5718 = vmatprep.subr.mxu1 %v11858_v59 }
0x136d   :  { %5648 = vmatpush1.msra.mxu0 %v11861_v42  ;;  %5719 = vmatpush1.msra.mxu1 %v11864_v61  ;;  %v11882_v61 = vld [vmem:[#allocation7 + $0x58] sm:$0xff] }
0x136e   :  { %5649 = vmatprep.subr.mxu0 %v11867_v6  ;;  %5720 = vmatprep.subr.mxu1 %v11870_v26  ;;  %13717 = vst [vmem:[#allocation15_spill] sm:$0xff] %v11882_v61  ;;  %v11885_v6 = vld [vmem:[#allocation7 + $0x40] sm:$0xff]  ;;  %v11888_v26 = vld [vmem:[#allocation7 + $0x50] sm:$0xff] }
0x136f   :  { %5650 = vmatpush1.msra.mxu0 %v11873_v3  ;;  %5721 = vmatpush1.msra.mxu1 %v11876_v17  ;;  %13718 = vst [vmem:[#allocation20_spill] sm:$0xff] %v11885_v6  ;;  %13719 = vst [vmem:[#allocation39_spill] sm:$0xff] %v11888_v26  ;;  %v11891_v3 = vld [vmem:[#allocation7 + $0x28] sm:$0xff]  ;;  %v11894_v17 = vld [vmem:[#allocation7 + $0x38] sm:$0xff] }
0x1370   :  { %5651 = vmatprep.subr.mxu0 %v11879_v38  ;;  %5722 = vmatprep.subr.mxu1 %v11882_v61  ;;  %13720 = vst [vmem:[#allocation64_spill] sm:$0xff] %v11891_v3  ;;  %13721 = vst [vmem:[#allocation66_spill] sm:$0xff] %v11894_v17  ;;  %v11897_v38 = vld [vmem:[#allocation7 + $0x20] sm:$0xff]  ;;  %v11900_v61 = vld [vmem:[#allocation7 + $0x30] sm:$0xff] }
0x1371   :  { %5652 = vmatpush1.msra.mxu0 %v11885_v6  ;;  %5723 = vmatpush1.msra.mxu1 %v11888_v26  ;;  %13722 = vst [vmem:[#allocation62_spill] sm:$0xff] %v11897_v38  ;;  %13723 = vst [vmem:[#allocation59_spill] sm:$0xff] %v11900_v61  ;;  %v11903_v6 = vld [vmem:[#allocation7 + $0x8] sm:$0xff]  ;;  %v11906_v26 = vld [vmem:[#allocation7 + $0x18] sm:$0xff] }
0x1372   :  { %5653 = vmatprep.subr.mxu0 %v11891_v3  ;;  %5724 = vmatprep.subr.mxu1 %v11894_v17  ;;  %13724 = vst [vmem:[#allocation60_spill] sm:$0xff] %v11903_v6  ;;  %13725 = vst [vmem:[#allocation61_spill] sm:$0xff] %v11906_v26  ;;  %v11909_v3 = vld [vmem:[#allocation7] sm:$0xff]  ;;  %v11913_v17 = vld [vmem:[#allocation7 + $0x10] sm:$0xff] }
0x1373   :  { %5654 = vmatpush1.msra.mxu0 %v11897_v38  ;;  %5725 = vmatpush1.msra.mxu1 %v11900_v61  ;;  %13726 = vst [vmem:[#allocation28_spill] sm:$0xff] %v11909_v3  ;;  %13727 = vst [vmem:[#allocation30_spill] sm:$0xff] %v11913_v17  ;;  %v13728_v61 = vld [vmem:[#allocation52_spill] sm:$0xff] }
0x1374   :  { %5655 = vmatprep.subr.mxu0 %v11903_v6  ;;  %5726 = vmatprep.subr.mxu1 %v11906_v26 }
0x1375   :  { %5656 = vmatpush1.msra.mxu0 %v11909_v3  ;;  %5689 = vmatprep.mubr.f32.mxu0 %v13673_v34  ;;  %v13729_v3 = vsel %vm8854_vm5, %v13696_v23, %v13695_v48 }
0x1376   :  { %5727 = vmatpush1.msra.mxu1 %v11913_v17  ;;  %5760 = vmatprep.mubr.f32.mxu1 %v13673_v34 }
0x1377   :  { %5799 = vmatprep.subr.mxu0 %v11759_v54  ;;  %5870 = vmatprep.subr.mxu1 %v11762_v14  ;;  %v13730_v54 = vsel %vm8858_vm6, %v13699_v22, %v13698_v47 }
0x1416   :  { %v5517_v6 = vpop.f32.mrf.mxu0  ;;  %v5588_v33 = vpop.f32.mrf.mxu1 }
0x1417   :  { %v5593_v38 = vadd.f32 %v5517_v6, %v13728_v61 }
0x1418   :  { %v5519_v26 = vpop.f32.mrf.mxu0  ;;  %v5590_v34 = vpop.f32.mrf.mxu1 }
0x1419   :  { %v6986_v42 = vmul.f32 -1.442695, %v5593_v38  ;;  %v5594_v59 = vadd.f32 %v5519_v26, %v13729_v3  ;;  %v5596_v14 = vadd.f32 %v5590_v34, %v13730_v54  ;;  %v13731_v38 = vsel %vm8841_vm4, %v13702_v18, %v13701_v15 }
0x141a   :  { %v5595_v61 = vadd.f32 %v5588_v33, %v13731_v38  ;;  %v13734_v33 = vld [vmem:[#allocation47_spill] sm:$0xff]  ;;  %v13735_v38 = vld [vmem:[#allocation42_spill] sm:$0xff] }
0x141b   :  { %7685 = vpow2.f32 %v6986_v42  ;;  %v6987_v17 = vmul.f32 -1.442695, %v5594_v59  ;;  %v6988_v6 = vmul.f32 -1.442695, %v5596_v14 }
0x141d   :  { %7687 = vpow2.f32 %v6987_v17 }
0x141e   :  { %7689 = vtanh.f32 %v5595_v61  ;;  %v13736_v61 = vld [vmem:[#allocation41_spill] sm:$0xff] }
0x141f   :  { %7691 = vpow2.f32 %v6988_v6  ;;  %v13737_v6 = vld [vmem:[#allocation22_spill] sm:$0xff] }
0x1428   :  { %v7686_v48 = vpop.eup %7685 }
0x1429   :  { %v5600_v23 = vadd.f32 1.0, %v7686_v48  ;;  %v13738_v48 = vld [vmem:[#allocation18_spill] sm:$0xff] }
0x142a   :  { %v7688_v42 = vpop.eup %7687 }
0x142b   :  { %7693 = vrcp.f32 %v5600_v23  ;;  %v5606_v59 = vadd.f32 1.0, %v7688_v42  ;;  %v7690_v26 = vpop.eup %7689  ;;  %v13739_v23 = vld [vmem:[#allocation25_spill] sm:$0xff]  ;;  %v13740_v42 = vld [vmem:[#allocation27_spill] sm:$0xff] }
0x142c   :  { %v7692_v3 = vpop.eup %7691 }
0x142d   :  { %7695 = vrcp.f32 %v5606_v59  ;;  %v5613_v54 = vadd.f32 1.0, %v7692_v3  ;;  %v13741_v59 = vld [vmem:[#allocation17_spill] sm:$0xff]  ;;  %v13743_v3 = vld [vmem:[#allocation20_spill] sm:$0xff] }
0x142f   :  { %7697 = vrcp.f32 %v5613_v54  ;;  %v13747_v54 = vld [vmem:[#allocation62_spill] sm:$0xff] }
0x1438   :  { %v7694_v17 = vpop.eup %7693 }
0x1439   :  { %v5617_v47 = vmul.f32 %v7694_v17, %v7690_v26  ;;  %v13742_v26 = vld [vmem:[#allocation15_spill] sm:$0xff] }
0x143a   :  { %v7696_v34 = vpop.eup %7695  ;;  %v13744_v17 = vld [vmem:[#allocation39_spill] sm:$0xff] }
0x143b   :  { %v5616_v22 = vmul.f32 %v7696_v34, %v11782_v39  ;;  %v13733_v39 = vld [vmem:[#allocation45_spill] sm:$0xff]  ;;  %v13746_v34 = vld [vmem:[#allocation66_spill] sm:$0xff] }
0x143c   :  { %v7698_v14 = vpop.eup %7697 }
0x143d   :  { %v11936_v30 = vadd.f32 %v5617_v47, %v5616_v22  ;;  %v13745_v47 = vld [vmem:[#allocation64_spill] sm:$0xff]  ;;  %v13748_v22 = vld [vmem:[#allocation59_spill] sm:$0xff] }
0x143f   :  { %7699 = vtanh.f32 %v11936_v30 }
0x144c   :  { %v7700_v15 = vpop.eup %7699 }
0x144d   :  { %v11939_v18 = vmul.f32 %v7700_v15, %v7698_v14  ;;  %v13749_v14 = vld [vmem:[#allocation60_spill] sm:$0xff]  ;;  %v13750_v15 = vld [vmem:[#allocation61_spill] sm:$0xff] }
0x144f   :  { %13732 = vst [vmem:[#allocation65_spill] sm:$0xff] %v11939_v18  ;;  %5690 = vmatmul.mubr.f32.vlgmr.msra.gmra.mxu0 %v11939_v18  ;;  %5761 = vmatmul.mubr.f32.vlgmr.msra.gmra.mxu1 %v11939_v18  ;;  %v13751_v18 = vld [vmem:[#allocation28_spill] sm:$0xff] }
0x1450   :  { %5800 = vmatpush1.msra.mxu0 %v11635_v8  ;;  %5871 = vmatpush1.msra.mxu1 %v11638_v45 }
0x1451   :  { %5801 = vmatprep.subr.mxu0 %v11641_v43  ;;  %5872 = vmatprep.subr.mxu1 %v11644_v5 }
0x1452   :  { %5802 = vmatpush1.msra.mxu0 %v11647_v49  ;;  %5873 = vmatpush1.msra.mxu1 %v11650_v50 }
0x1453   :  { %5803 = vmatprep.subr.mxu0 %v11653_v21  ;;  %5874 = vmatprep.subr.mxu1 %v11656_v44 }
0x1454   :  { %5804 = vmatpush1.msra.mxu0 %v11659_v31  ;;  %5875 = vmatpush1.msra.mxu1 %v11662_v55 }
0x1455   :  { %5805 = vmatprep.subr.mxu0 %v11665_v20  ;;  %5876 = vmatprep.subr.mxu1 %v11668_v7 }
0x1456   :  { %5806 = vmatpush1.msra.mxu0 %v11671_v27  ;;  %5877 = vmatpush1.msra.mxu1 %v11674_v24 }
0x1457   :  { %5807 = vmatprep.subr.mxu0 %v11677_v28  ;;  %5878 = vmatprep.subr.mxu1 %v11680_v52 }
0x1458   :  { %5808 = vmatpush1.msra.mxu0 %v11683_v16  ;;  %5879 = vmatpush1.msra.mxu1 %v11686_v0 }
0x1459   :  { %5809 = vmatprep.subr.mxu0 %v11689_v41  ;;  %5880 = vmatprep.subr.mxu1 %v11692_v32 }
0x145a   :  { %5810 = vmatpush1.msra.mxu0 %v11695_v1  ;;  %5881 = vmatpush1.msra.mxu1 %v13705_v51 }
0x145b   :  { %5811 = vmatprep.subr.mxu0 %v13706_v10  ;;  %5882 = vmatprep.subr.mxu1 %v13707_v62 }
0x145c   :  { %5812 = vmatpush1.msra.mxu0 %v11707_v60  ;;  %5883 = vmatpush1.msra.mxu1 %v11710_v2 }
0x145d   :  { %5813 = vmatprep.subr.mxu0 %v11713_v57  ;;  %5884 = vmatprep.subr.mxu1 %v11716_v4 }
0x145e   :  { %5814 = vmatpush1.msra.mxu0 %v11719_v11  ;;  %5885 = vmatpush1.msra.mxu1 %v11722_v35 }
0x145f   :  { %5815 = vmatprep.subr.mxu0 %v11819_v53  ;;  %5886 = vmatprep.subr.mxu1 %v11822_v25 }
0x1460   :  { %5816 = vmatpush1.msra.mxu0 %v11825_v12  ;;  %5887 = vmatpush1.msra.mxu1 %v11828_v13 }
0x1461   :  { %5817 = vmatprep.subr.mxu0 %v11831_v19  ;;  %5888 = vmatprep.subr.mxu1 %v11834_v29 }
0x1462   :  { %5818 = vmatpush1.msra.mxu0 %v11837_v37  ;;  %5889 = vmatpush1.msra.mxu1 %v11840_v40 }
0x1463   :  { %5819 = vmatprep.subr.mxu0 %v11843_v46  ;;  %5890 = vmatprep.subr.mxu1 %v11846_v58 }
0x1464   :  { %5820 = vmatpush1.msra.mxu0 %v11849_v63  ;;  %5891 = vmatpush1.msra.mxu1 %v11852_v36 }
0x1465   :  { %5821 = vmatprep.subr.mxu0 %v13733_v39  ;;  %5892 = vmatprep.subr.mxu1 %v13734_v33 }
0x1466   :  { %5822 = vmatpush1.msra.mxu0 %v13735_v38  ;;  %5893 = vmatpush1.msra.mxu1 %v13736_v61 }
0x1467   :  { %5823 = vmatprep.subr.mxu0 %v13737_v6  ;;  %5894 = vmatprep.subr.mxu1 %v13738_v48 }
0x1468   :  { %5824 = vmatpush1.msra.mxu0 %v13739_v23  ;;  %5895 = vmatpush1.msra.mxu1 %v13740_v42 }
0x1469   :  { %5825 = vmatprep.subr.mxu0 %v13741_v59  ;;  %5896 = vmatprep.subr.mxu1 %v13742_v26  ;;  %v13752_v59 = vmov 0.0   ;;  %v13753_v26 = vld [vmem:[#allocation30_spill] sm:$0xff] }
0x146a   :  { %5826 = vmatpush1.msra.mxu0 %v13743_v3  ;;  %5897 = vmatpush1.msra.mxu1 %v13744_v17  ;;  %v13754_v3 = vld [vmem:[#allocation44_spill] sm:$0xff] }
0x146b   :  { %5827 = vmatprep.subr.mxu0 %v13745_v47  ;;  %5898 = vmatprep.subr.mxu1 %v13746_v34  ;;  %v13755_v47 = vld [vmem:[#allocation48_spill] sm:$0xff] }
0x146c   :  { %5828 = vmatpush1.msra.mxu0 %v13747_v54  ;;  %5899 = vmatpush1.msra.mxu1 %v13748_v22  ;;  %v13756_v54 = vld [vmem:[#allocation49_spill] sm:$0xff] }
0x146d   :  { %5829 = vmatprep.subr.mxu0 %v13749_v14  ;;  %5900 = vmatprep.subr.mxu1 %v13750_v15  ;;  %v13757_v14 = vld [vmem:[#allocation58_spill] sm:$0xff] }
0x146e   :  { %5830 = vmatpush1.msra.mxu0 %v13751_v18  ;;  %5863 = vmatprep.mubr.f32.mxu0 %v13752_v59  ;;  %v13758_v15 = vld [vmem:[#allocation46_spill] sm:$0xff] }
0x146f   :  { %5901 = vmatpush1.msra.mxu1 %v13753_v26  ;;  %5934 = vmatprep.mubr.f32.mxu1 %v13752_v59  ;;  %v13759_v18 = vsel %vm8854_vm5, %v13757_v14, %v13758_v15 }
0x1470   :  { %6044 = vmatprep.subr.mxu1 %v13754_v3  ;;  %5973 = vmatprep.subr.mxu0 %v13755_v47  ;;  %v13760_v3 = vld [vmem:[#allocation50_spill] sm:$0xff]  ;;  %v13761_v47 = vld [vmem:[#allocation32_spill] sm:$0xff] }
0x1471   :  { %v13762_v48 = vsel %vm8858_vm6, %v13760_v3, %v13761_v47 }
0x150f   :  { %v5691_v34 = vpop.f32.mrf.mxu0  ;;  %v5762_v6 = vpop.f32.mrf.mxu1 }
0x1510   :  { %v5767_v17 = vadd.f32 %v5691_v34, %v13756_v54  ;;  %v13765_v54 = vld [vmem:[#allocation53_spill] sm:$0xff] }
0x1511   :  { %v5693_v22 = vpop.f32.mrf.mxu0  ;;  %v5764_v59 = vpop.f32.mrf.mxu1 }
0x1512   :  { %v6989_v23 = vmul.f32 -1.442695, %v5767_v17  ;;  %v5768_v42 = vadd.f32 %v5693_v22, %v13759_v18  ;;  %v5770_v38 = vadd.f32 %v5764_v59, %v13762_v48  ;;  %v13764_v17 = vld [vmem:[#allocation54_spill] sm:$0xff] }
0x1513   :  { %v13766_v9 = vsel %vm8841_vm4, %v13764_v17, %v13765_v54 }
0x1514   :  { %7701 = vpow2.f32 %v6989_v23  ;;  %v6990_v26 = vmul.f32 -1.442695, %v5768_v42  ;;  %v5769_v61 = vadd.f32 %v5762_v6, %v13766_v9  ;;  %v6991_v39 = vmul.f32 -1.442695, %v5770_v38 }
0x1516   :  { %7703 = vpow2.f32 %v6990_v26 }
0x1517   :  { %7705 = vtanh.f32 %v5769_v61 }
0x1518   :  { %7707 = vpow2.f32 %v6991_v39 }
0x1521   :  { %v7702_v14 = vpop.eup %7701 }
0x1522   :  { %v5774_v18 = vadd.f32 1.0, %v7702_v14 }
0x1523   :  { %v7704_v23 = vpop.eup %7703 }
0x1524   :  { %7709 = vrcp.f32 %v5774_v18  ;;  %v5780_v42 = vadd.f32 1.0, %v7704_v23  ;;  %v7706_v26 = vpop.eup %7705 }
0x1525   :  { %v7708_v22 = vpop.eup %7707 }
0x1526   :  { %7711 = vrcp.f32 %v5780_v42  ;;  %v5787_v59 = vadd.f32 1.0, %v7708_v22 }
0x1528   :  { %7713 = vrcp.f32 %v5787_v59 }
0x1531   :  { %v7710_v15 = vpop.eup %7709 }
0x1532   :  { %v5791_v3 = vmul.f32 %v7710_v15, %v7706_v26 }
0x1533   :  { %v7712_v48 = vpop.eup %7711 }
0x1534   :  { %v5790_v47 = vmul.f32 %v7712_v48, %v11936_v30  ;;  %v13774_v30 = vld [vmem:[#allocation15_spill] sm:$0xff] }
0x1535   :  { %v7714_v9 = vpop.eup %7713 }
0x1536   :  { %v12026_v34 = vadd.f32 %v5791_v3, %v5790_v47  ;;  %v12124_v47 = vld [vmem:[%s12574_s9 + $0x78] sm:$0xff] }
0x1538   :  { %7715 = vtanh.f32 %v12026_v34 }
0x1545   :  { %v7716_v38 = vpop.eup %7715 }
0x1546   :  { %v12029_v61 = vmul.f32 %v7716_v38, %v7714_v9  ;;  %v12140_v9 = vld [vmem:[%s12574_s9 + $0x68] sm:$0xff]  ;;  %v12149_v38 = vld [vmem:[%s12574_s9 + $0x60] sm:$0xff] }
0x1548   :  { %5864 = vmatmul.mubr.f32.vlgmr.msra.gmra.mxu0 %v12029_v61  ;;  %5935 = vmatmul.mubr.f32.vlgmr.msra.gmra.mxu1 %v12029_v61 }
0x1549   :  { %6045 = vmatpush1.msra.mxu1 %v11638_v45  ;;  %5974 = vmatpush1.msra.mxu0 %v11635_v8  ;;  %v13778_v8 = vld [vmem:[#allocation66_spill] sm:$0xff]  ;;  %v13779_v45 = vld [vmem:[#allocation64_spill] sm:$0xff] }
0x154a   :  { %6046 = vmatprep.subr.mxu1 %v11644_v5  ;;  %5975 = vmatprep.subr.mxu0 %v11641_v43  ;;  %v13780_v43 = vld [vmem:[#allocation59_spill] sm:$0xff]  ;;  %v13781_v5 = vld [vmem:[#allocation62_spill] sm:$0xff] }
0x154b   :  { %6047 = vmatpush1.msra.mxu1 %v11650_v50  ;;  %5976 = vmatpush1.msra.mxu0 %v11647_v49  ;;  %v13782_v49 = vld [vmem:[#allocation61_spill] sm:$0xff]  ;;  %v13783_v50 = vld [vmem:[#allocation60_spill] sm:$0xff] }
0x154c   :  { %6048 = vmatprep.subr.mxu1 %v11656_v44  ;;  %5977 = vmatprep.subr.mxu0 %v11653_v21  ;;  %v13784_v21 = vld [vmem:[#allocation30_spill] sm:$0xff]  ;;  %v13785_v44 = vld [vmem:[#allocation28_spill] sm:$0xff] }
0x154d   :  { %6049 = vmatpush1.msra.mxu1 %v11662_v55  ;;  %5978 = vmatpush1.msra.mxu0 %v11659_v31  ;;  %v13786_v31 = vmov 0.0  }
0x154e   :  { %6050 = vmatprep.subr.mxu1 %v11668_v7  ;;  %5979 = vmatprep.subr.mxu0 %v11665_v20  ;;  %v13787_v20 = vld [vmem:[#allocation23_spill] sm:$0xff] }
0x154f   :  { %6051 = vmatpush1.msra.mxu1 %v11674_v24  ;;  %5980 = vmatpush1.msra.mxu0 %v11671_v27 }
0x1550   :  { %6052 = vmatprep.subr.mxu1 %v11680_v52  ;;  %5981 = vmatprep.subr.mxu0 %v11677_v28  ;;  %v13789_v52 = vld [vmem:[#allocation70_spill] sm:$0xff] }
0x1551   :  { %6053 = vmatpush1.msra.mxu1 %v11686_v0  ;;  %5982 = vmatpush1.msra.mxu0 %v11683_v16  ;;  %v13777_v0 = vld [vmem:[#allocation20_spill] sm:$0xff]  ;;  %v13790_v16 = vld [vmem:[#allocation29_spill] sm:$0xff] }
0x1552   :  { %6054 = vmatprep.subr.mxu1 %v11692_v32  ;;  %5983 = vmatprep.subr.mxu0 %v11689_v41  ;;  %v13767_v32 = vld [vmem:[#allocation45_spill] sm:$0xff]  ;;  %v13769_v41 = vld [vmem:[#allocation42_spill] sm:$0xff] }
0x1553   :  { %6055 = vmatpush1.msra.mxu1 %v13705_v51  ;;  %5984 = vmatpush1.msra.mxu0 %v11695_v1  ;;  %v13768_v1 = vld [vmem:[#allocation41_spill] sm:$0xff]  ;;  %v13791_v51 = vsel %vm8854_vm5, %v13789_v52, %v13790_v16  ;;  %v13804_v52 = vld [vmem:[#allocation78_spill] sm:$0xff] }
0x1554   :  { %6056 = vmatprep.subr.mxu1 %v13707_v62  ;;  %5985 = vmatprep.subr.mxu0 %v13706_v10 }
0x1555   :  { %6057 = vmatpush1.msra.mxu1 %v11710_v2  ;;  %5986 = vmatpush1.msra.mxu0 %v11707_v60  ;;  %v13770_v2 = vld [vmem:[#allocation18_spill] sm:$0xff]  ;;  %v13773_v60 = vld [vmem:[#allocation25_spill] sm:$0xff] }
0x1556   :  { %6058 = vmatprep.subr.mxu1 %v11716_v4  ;;  %5987 = vmatprep.subr.mxu0 %v11713_v57  ;;  %v13771_v57 = vld [vmem:[#allocation22_spill] sm:$0xff]  ;;  %v13775_v4 = vld [vmem:[#allocation17_spill] sm:$0xff] }
0x1557   :  { %6059 = vmatpush1.msra.mxu1 %v11722_v35  ;;  %5988 = vmatpush1.msra.mxu0 %v11719_v11  ;;  %v13772_v35 = vld [vmem:[#allocation27_spill] sm:$0xff] }
0x1558   :  { %6060 = vmatprep.subr.mxu1 %v11822_v25  ;;  %5989 = vmatprep.subr.mxu0 %v11819_v53  ;;  %v13776_v11 = vld [vmem:[#allocation39_spill] sm:$0xff] }
0x1559   :  { %6061 = vmatpush1.msra.mxu1 %v11828_v13  ;;  %5990 = vmatpush1.msra.mxu0 %v11825_v12  ;;  %v13792_v12 = vld [vmem:[#allocation13_spill] sm:$0xff]  ;;  %v13793_v13 = vld [vmem:[#allocation12_spill] sm:$0xff] }
0x155a   :  { %6062 = vmatprep.subr.mxu1 %v11834_v29  ;;  %5991 = vmatprep.subr.mxu0 %v11831_v19  ;;  %v13794_v19 = vsel %vm8858_vm6, %v13792_v12, %v13793_v13 }
0x155b   :  { %6063 = vmatpush1.msra.mxu1 %v11840_v40  ;;  %5992 = vmatpush1.msra.mxu0 %v11837_v37  ;;  %v13796_v40 = vld [vmem:[#allocation16_spill] sm:$0xff] }
0x155c   :  { %6064 = vmatprep.subr.mxu1 %v11846_v58  ;;  %5993 = vmatprep.subr.mxu0 %v11843_v46  ;;  %v13797_v46 = vld [vmem:[#allocation38_spill] sm:$0xff] }
0x155d   :  { %6065 = vmatpush1.msra.mxu1 %v11852_v36  ;;  %5994 = vmatpush1.msra.mxu0 %v11849_v63  ;;  %v13798_v58 = vsel %vm8841_vm4, %v13796_v40, %v13797_v46  ;;  %v13808_v40 = vld [vmem:[#allocation77_spill] sm:$0xff]  ;;  %v13809_v46 = vld [vmem:[#allocation75_spill] sm:$0xff] }
0x155e   :  { %6066 = vmatprep.subr.mxu1 %v13734_v33  ;;  %5995 = vmatprep.subr.mxu0 %v13767_v32  ;;  %v12158_v32 = vld [vmem:[%s12574_s9 + $0x58] sm:$0xff] }
0x155f   :  { %6067 = vmatpush1.msra.mxu1 %v13768_v1  ;;  %5996 = vmatpush1.msra.mxu0 %v13769_v41  ;;  %v12167_v1 = vld [vmem:[%s12574_s9 + $0x50] sm:$0xff]  ;;  %v12176_v41 = vld [vmem:[%s12574_s9 + $0x48] sm:$0xff] }
0x1560   :  { %6068 = vmatprep.subr.mxu1 %v13770_v2  ;;  %5997 = vmatprep.subr.mxu0 %v13771_v57  ;;  %v12185_v2 = vld [vmem:[%s12574_s9 + $0x40] sm:$0xff]  ;;  %v12194_v57 = vld [vmem:[%s12574_s9 + $0x38] sm:$0xff] }
0x1561   :  { %6069 = vmatpush1.msra.mxu1 %v13772_v35  ;;  %5998 = vmatpush1.msra.mxu0 %v13773_v60  ;;  %v12203_v35 = vld [vmem:[%s12574_s9 + $0x30] sm:$0xff]  ;;  %v12212_v60 = vld [vmem:[%s12574_s9 + $0x28] sm:$0xff] }
0x1562   :  { %6070 = vmatprep.subr.mxu1 %v13774_v30  ;;  %5999 = vmatprep.subr.mxu0 %v13775_v4  ;;  %v12221_v30 = vld [vmem:[%s12574_s9 + $0x20] sm:$0xff]  ;;  %v12230_v4 = vld [vmem:[%s12574_s9 + $0x18] sm:$0xff] }
0x1563   :  { %6071 = vmatpush1.msra.mxu1 %v13776_v11  ;;  %6000 = vmatpush1.msra.mxu0 %v13777_v0  ;;  %v12239_v11 = vld [vmem:[%s12574_s9 + $0x10] sm:$0xff]  ;;  %v12248_v0 = vld [vmem:[%s12574_s9 + $0x8] sm:$0xff] }
0x1564   :  { %6072 = vmatprep.subr.mxu1 %v13778_v8  ;;  %6001 = vmatprep.subr.mxu0 %v13779_v45  ;;  %v13799_v8 = vld [vmem:[#allocation33_spill] sm:$0xff] }
0x1565   :  { %6073 = vmatpush1.msra.mxu1 %v13780_v43  ;;  %6002 = vmatpush1.msra.mxu0 %v13781_v5  ;;  %v12261_v5 = vld [vmem:[%s12574_s9] sm:$0xff] }
0x1566   :  { %6074 = vmatprep.subr.mxu1 %v13782_v49  ;;  %6003 = vmatprep.subr.mxu0 %v13783_v50  ;;  %v13801_v50 = vld [vmem:[#allocation65_spill] sm:$0xff] }
0x1567   :  { %6075 = vmatpush1.msra.mxu1 %v13784_v21  ;;  %6004 = vmatpush1.msra.mxu0 %v13785_v44  ;;  %v13802_v21 = vld [vmem:[#allocation43_spill] sm:$0xff] }
0x1568   :  { %6037 = vmatprep.mubr.f32.mxu0 %v13786_v31  ;;  %6108 = vmatprep.mubr.f32.mxu1 %v13786_v31  ;;  %v6146_v44 = vsel %vm146_vm3, %v13802_v21, %v13801_v50 }
0x1569   :  { %7240 = vmatprep.subr.mxu1 %v13786_v31  ;;  %7205 = vmatprep.subr.mxu0 %v13786_v31 }
0x1608   :  { %v5865_v55 = vpop.f32.mrf.mxu0  ;;  %v5936_v62 = vpop.f32.mrf.mxu1 }
0x1609   :  { %v5941_v7 = vadd.f32 %v5865_v55, %v13787_v20  ;;  %v5943_v63 = vadd.f32 %v5936_v62, %v13798_v58  ;;  %v6439_v55 = vmax.f32 %v6146_v44, 0.0  ;;  %v13803_v20 = vld [vmem:[#allocation34_spill] sm:$0xff]  ;;  %v13805_v62 = vld [vmem:[#allocation76_spill] sm:$0xff]  ;;  %v13810_v58 = vsel %vm8858_vm6, %v13808_v40, %v13809_v46 }
0x160a   :  { %v5867_v27 = vpop.f32.mrf.mxu0  ;;  %v5938_v25 = vpop.f32.mrf.mxu1 }
0x160b   :  { %v6992_v24 = vmul.f32 -1.442695, %v5941_v7  ;;  %v5942_v10 = vadd.f32 %v5867_v27, %v13791_v51  ;;  %v5944_v29 = vadd.f32 %v5938_v25, %v13794_v19  ;;  %v6148_v7 = vsel %vm146_vm3, %v12029_v61, %v13803_v20 }
0x160c   :  { %v6631_v27 = vmax.f32 %v6148_v7, 0.0 }
0x160d   :  { %7717 = vpow2.f32 %v6992_v24  ;;  %v6993_v53 = vmul.f32 -1.442695, %v5942_v10  ;;  %v6994_v36 = vmul.f32 -1.442695, %v5944_v29 }
0x160f   :  { %7719 = vpow2.f32 %v6993_v53  ;;  %v13806_v53 = vld [vmem:[#allocation74_spill] sm:$0xff] }
0x1610   :  { %7721 = vtanh.f32 %v5943_v63  ;;  %v13807_v25 = vsel %vm8854_vm5, %v13805_v62, %v13806_v53 }
0x1611   :  { %7723 = vpow2.f32 %v6994_v36  ;;  %v13811_v36 = vld [vmem:[#allocation72_spill] sm:$0xff] }
0x161a   :  { %v7718_v39 = vpop.eup %7717 }
0x161b   :  { %v5948_v33 = vadd.f32 1.0, %v7718_v39  ;;  %v13812_v39 = vld [vmem:[#allocation73_spill] sm:$0xff] }
0x161c   :  { %v7720_v6 = vpop.eup %7719  ;;  %v13813_v28 = vsel %vm8841_vm4, %v13811_v36, %v13812_v39 }
0x161d   :  { %7725 = vrcp.f32 %v5948_v33  ;;  %v5954_v17 = vadd.f32 1.0, %v7720_v6  ;;  %v7722_v54 = vpop.eup %7721 }
0x161e   :  { %v7724_v14 = vpop.eup %7723 }
0x161f   :  { %7727 = vrcp.f32 %v5954_v17  ;;  %v5961_v26 = vadd.f32 1.0, %v7724_v14 }
0x1621   :  { %7729 = vrcp.f32 %v5961_v26 }
0x162a   :  { %v7726_v18 = vpop.eup %7725 }
0x162b   :  { %v5965_v23 = vmul.f32 %v7726_v18, %v7722_v54 }
0x162c   :  { %v7728_v42 = vpop.eup %7727 }
0x162d   :  { %v5964_v22 = vmul.f32 %v7728_v42, %v12026_v34  ;;  %v12131_v34 = vld [vmem:[%s12574_s9 + $0x70] sm:$0xff] }
0x162e   :  { %v7730_v3 = vpop.eup %7729 }
0x162f   :  { %v12116_v15 = vadd.f32 %v5965_v23, %v5964_v22 }
0x1631   :  { %7731 = vtanh.f32 %v12116_v15 }
0x163e   :  { %v7732_v48 = vpop.eup %7731 }
0x163f   :  { %v12119_v59 = vmul.f32 %v7732_v48, %v7730_v3 }
0x1641   :  { %6038 = vmatmul.mubr.f32.vlgmr.msra.gmra.mxu0 %v12119_v59  ;;  %6109 = vmatmul.mubr.f32.vlgmr.msra.gmra.mxu1 %v12119_v59  ;;  %v6144_v43 = vsel %vm146_vm3, %v13799_v8, %v12119_v59 }
0x1642   :  { %7241 = vmatpush3.msra.mxu1 %v12124_v47  ;;  %7272 = vmatprep.mubr.msk.f32.mxu1 %vm8100_vm0, %v13786_v31  ;;  %v6247_v49 = vmax.f32 %v6144_v43, 0.0 }
0x1643   :  { %7242 = vmatprep.subr.mxu1 %v13786_v31  ;;  %7206 = vmatpush3.msra.mxu0 %v12124_v47 }
0x1644   :  { %7243 = vmatpush3.msra.mxu1 %v12131_v34  ;;  %7207 = vmatprep.subr.mxu0 %v13786_v31 }
0x1645   :  { %7244 = vmatprep.subr.mxu1 %v13786_v31  ;;  %7208 = vmatpush3.msra.mxu0 %v12131_v34 }
0x1646   :  { %7245 = vmatpush3.msra.mxu1 %v12140_v9  ;;  %7209 = vmatprep.subr.mxu0 %v13786_v31 }
0x1647   :  { %7246 = vmatprep.subr.mxu1 %v13786_v31  ;;  %7210 = vmatpush3.msra.mxu0 %v12140_v9 }
0x1648   :  { %7247 = vmatpush3.msra.mxu1 %v12149_v38  ;;  %7211 = vmatprep.subr.mxu0 %v13786_v31 }
0x1649   :  { %7248 = vmatprep.subr.mxu1 %v13786_v31  ;;  %7212 = vmatpush3.msra.mxu0 %v12149_v38 }
0x164a   :  { %7249 = vmatpush3.msra.mxu1 %v12158_v32  ;;  %7213 = vmatprep.subr.mxu0 %v13786_v31 }
0x164b   :  { %7250 = vmatprep.subr.mxu1 %v13786_v31  ;;  %7214 = vmatpush3.msra.mxu0 %v12158_v32 }
0x164c   :  { %7251 = vmatpush3.msra.mxu1 %v12167_v1  ;;  %7215 = vmatprep.subr.mxu0 %v13786_v31 }
0x164d   :  { %7252 = vmatprep.subr.mxu1 %v13786_v31  ;;  %7216 = vmatpush3.msra.mxu0 %v12167_v1 }
0x164e   :  { %7253 = vmatpush3.msra.mxu1 %v12176_v41  ;;  %7217 = vmatprep.subr.mxu0 %v13786_v31 }
0x164f   :  { %7254 = vmatprep.subr.mxu1 %v13786_v31  ;;  %7218 = vmatpush3.msra.mxu0 %v12176_v41 }
0x1650   :  { %7255 = vmatpush3.msra.mxu1 %v12185_v2  ;;  %7219 = vmatprep.subr.mxu0 %v13786_v31 }
0x1651   :  { %7256 = vmatprep.subr.mxu1 %v13786_v31  ;;  %7220 = vmatpush3.msra.mxu0 %v12185_v2 }
0x1652   :  { %7257 = vmatpush3.msra.mxu1 %v12194_v57  ;;  %7221 = vmatprep.subr.mxu0 %v13786_v31 }
0x1653   :  { %7258 = vmatprep.subr.mxu1 %v13786_v31  ;;  %7222 = vmatpush3.msra.mxu0 %v12194_v57 }
0x1654   :  { %7259 = vmatpush3.msra.mxu1 %v12203_v35  ;;  %7223 = vmatprep.subr.mxu0 %v13786_v31 }
0x1655   :  { %7260 = vmatprep.subr.mxu1 %v13786_v31  ;;  %7224 = vmatpush3.msra.mxu0 %v12203_v35 }
0x1656   :  { %7261 = vmatpush3.msra.mxu1 %v12212_v60  ;;  %7225 = vmatprep.subr.mxu0 %v13786_v31 }
0x1657   :  { %7262 = vmatprep.subr.mxu1 %v13786_v31  ;;  %7226 = vmatpush3.msra.mxu0 %v12212_v60 }
0x1658   :  { %7263 = vmatpush3.msra.mxu1 %v12221_v30  ;;  %7227 = vmatprep.subr.mxu0 %v13786_v31 }
0x1659   :  { %7264 = vmatprep.subr.mxu1 %v13786_v31  ;;  %7228 = vmatpush3.msra.mxu0 %v12221_v30 }
0x165a   :  { %7265 = vmatpush3.msra.mxu1 %v12230_v4  ;;  %7229 = vmatprep.subr.mxu0 %v13786_v31 }
0x165b   :  { %7266 = vmatprep.subr.mxu1 %v13786_v31  ;;  %7230 = vmatpush3.msra.mxu0 %v12230_v4 }
0x165c   :  { %7267 = vmatpush3.msra.mxu1 %v12239_v11  ;;  %7231 = vmatprep.subr.mxu0 %v13786_v31 }
0x165d   :  { %7268 = vmatprep.subr.mxu1 %v13786_v31  ;;  %7232 = vmatpush3.msra.mxu0 %v12239_v11 }
0x165e   :  { %7269 = vmatpush3.msra.mxu1 %v12248_v0  ;;  %7233 = vmatprep.subr.mxu0 %v13786_v31 }
0x165f   :  { %7270 = vmatprep.subr.mxu1 %v13786_v31  ;;  %7234 = vmatpush3.msra.mxu0 %v12248_v0 }
0x1660   :  { %7271 = vmatpush3.msra.mxu1 %v12261_v5  ;;  %7235 = vmatprep.subr.mxu0 %v13786_v31 }
0x1661   :  { %7273 = vmatmul.mubr.f32.vlgmr.msra.gmra.mxu1 %v6247_v49  ;;  %7310 = vmatprep.subr.mxu1 %v13786_v31 }
0x1662   :  { %7311 = vmatpush3.msra.mxu1 %v12124_v47  ;;  %7342 = vmatprep.mubr.msk.f32.mxu1 %vm8100_vm0, %v13786_v31 }
0x1663   :  { %7312 = vmatprep.subr.mxu1 %v13786_v31  ;;  %7236 = vmatpush3.msra.mxu0 %v12261_v5 }
0x1664   :  { %7313 = vmatpush3.msra.mxu1 %v12131_v34  ;;  %7237 = vmatprep.mubr.msk.f32.mxu0 %vm8100_vm0, %v13786_v31 }
0x1665   :  { %7314 = vmatprep.subr.mxu1 %v13786_v31  ;;  %7275 = vmatprep.subr.mxu0 %v13786_v31 }
0x1666   :  { %7315 = vmatpush3.msra.mxu1 %v12140_v9 }
0x1667   :  { %7316 = vmatprep.subr.mxu1 %v13786_v31 }
0x1668   :  { %7317 = vmatpush3.msra.mxu1 %v12149_v38 }
0x1669   :  { %7318 = vmatprep.subr.mxu1 %v13786_v31 }
0x166a   :  { %7319 = vmatpush3.msra.mxu1 %v12158_v32 }
0x166b   :  { %7320 = vmatprep.subr.mxu1 %v13786_v31 }
0x166c   :  { %7321 = vmatpush3.msra.mxu1 %v12167_v1 }
0x166d   :  { %7322 = vmatprep.subr.mxu1 %v13786_v31 }
0x166e   :  { %7323 = vmatpush3.msra.mxu1 %v12176_v41 }
0x166f   :  { %7324 = vmatprep.subr.mxu1 %v13786_v31 }
0x1670   :  { %7325 = vmatpush3.msra.mxu1 %v12185_v2 }
0x1671   :  { %7326 = vmatprep.subr.mxu1 %v13786_v31 }
0x1672   :  { %7327 = vmatpush3.msra.mxu1 %v12194_v57 }
0x1673   :  { %7328 = vmatprep.subr.mxu1 %v13786_v31 }
0x1674   :  { %7329 = vmatpush3.msra.mxu1 %v12203_v35 }
0x1675   :  { %7330 = vmatprep.subr.mxu1 %v13786_v31 }
0x1676   :  { %7331 = vmatpush3.msra.mxu1 %v12212_v60 }
0x1677   :  { %7332 = vmatprep.subr.mxu1 %v13786_v31 }
0x1678   :  { %7333 = vmatpush3.msra.mxu1 %v12221_v30 }
0x1679   :  { %7334 = vmatprep.subr.mxu1 %v13786_v31 }
0x167a   :  { %7335 = vmatpush3.msra.mxu1 %v12230_v4 }
0x167b   :  { %7336 = vmatprep.subr.mxu1 %v13786_v31 }
0x167c   :  { %7337 = vmatpush3.msra.mxu1 %v12239_v11 }
0x167d   :  { %7338 = vmatprep.subr.mxu1 %v13786_v31 }
0x167e   :  { %7339 = vmatpush3.msra.mxu1 %v12248_v0 }
0x167f   :  { %7340 = vmatprep.subr.mxu1 %v13786_v31 }
0x1680   :  { %7341 = vmatpush3.msra.mxu1 %v12261_v5 }
0x1681   :  { %7343 = vmatmul.mubr.f32.vlgmr.msra.gmra.mxu1 %v6439_v55  ;;  %7380 = vmatprep.subr.mxu1 %v13786_v31 }
0x1682   :  { %7381 = vmatpush3.msra.mxu1 %v12124_v47  ;;  %7412 = vmatprep.mubr.msk.f32.mxu1 %vm8100_vm0, %v13786_v31 }
0x1683   :  { %7382 = vmatprep.subr.mxu1 %v13786_v31 }
0x1684   :  { %7383 = vmatpush3.msra.mxu1 %v12131_v34 }
0x1685   :  { %7384 = vmatprep.subr.mxu1 %v13786_v31 }
0x1686   :  { %7385 = vmatpush3.msra.mxu1 %v12140_v9 }
0x1687   :  { %7386 = vmatprep.subr.mxu1 %v13786_v31 }
0x1688   :  { %7387 = vmatpush3.msra.mxu1 %v12149_v38 }
0x1689   :  { %7388 = vmatprep.subr.mxu1 %v13786_v31 }
0x168a   :  { %7389 = vmatpush3.msra.mxu1 %v12158_v32 }
0x168b   :  { %7390 = vmatprep.subr.mxu1 %v13786_v31 }
0x168c   :  { %7391 = vmatpush3.msra.mxu1 %v12167_v1 }
0x168d   :  { %7392 = vmatprep.subr.mxu1 %v13786_v31 }
0x168e   :  { %7393 = vmatpush3.msra.mxu1 %v12176_v41 }
0x168f   :  { %7394 = vmatprep.subr.mxu1 %v13786_v31 }
0x1690   :  { %7395 = vmatpush3.msra.mxu1 %v12185_v2 }
0x1691   :  { %7396 = vmatprep.subr.mxu1 %v13786_v31 }
0x1692   :  { %7397 = vmatpush3.msra.mxu1 %v12194_v57 }
0x1693   :  { %7398 = vmatprep.subr.mxu1 %v13786_v31 }
0x1694   :  { %7399 = vmatpush3.msra.mxu1 %v12203_v35 }
0x1695   :  { %7400 = vmatprep.subr.mxu1 %v13786_v31 }
0x1696   :  { %7401 = vmatpush3.msra.mxu1 %v12212_v60 }
0x1697   :  { %7402 = vmatprep.subr.mxu1 %v13786_v31 }
0x1698   :  { %7403 = vmatpush3.msra.mxu1 %v12221_v30 }
0x1699   :  { %7404 = vmatprep.subr.mxu1 %v13786_v31 }
0x169a   :  { %7405 = vmatpush3.msra.mxu1 %v12230_v4 }
0x169b   :  { %7406 = vmatprep.subr.mxu1 %v13786_v31 }
0x169c   :  { %7407 = vmatpush3.msra.mxu1 %v12239_v11 }
0x169d   :  { %7408 = vmatprep.subr.mxu1 %v13786_v31 }
0x169e   :  { %7409 = vmatpush3.msra.mxu1 %v12248_v0 }
0x169f   :  { %7410 = vmatprep.subr.mxu1 %v13786_v31 }
0x16a0   :  { %7411 = vmatpush3.msra.mxu1 %v12261_v5 }
0x16a1   :  { %7413 = vmatmul.mubr.f32.vlgmr.msra.gmra.mxu1 %v6631_v27  ;;  %7450 = vmatprep.subr.mxu1 %v13786_v31 }
0x16a2   :  { %7451 = vmatpush3.msra.mxu1 %v12124_v47  ;;  %7482 = vmatprep.mubr.msk.f32.mxu1 %vm8100_vm0, %v13786_v31 }
0x16a3   :  { %7452 = vmatprep.subr.mxu1 %v13786_v31 }
0x16a4   :  { %7453 = vmatpush3.msra.mxu1 %v12131_v34 }
0x16a5   :  { %7454 = vmatprep.subr.mxu1 %v13786_v31 }
0x16a6   :  { %7455 = vmatpush3.msra.mxu1 %v12140_v9 }
0x16a7   :  { %7456 = vmatprep.subr.mxu1 %v13786_v31 }
0x16a8   :  { %7457 = vmatpush3.msra.mxu1 %v12149_v38 }
0x16a9   :  { %7458 = vmatprep.subr.mxu1 %v13786_v31 }
0x16aa   :  { %7459 = vmatpush3.msra.mxu1 %v12158_v32 }
0x16ab   :  { %7460 = vmatprep.subr.mxu1 %v13786_v31 }
0x16ac   :  { %7461 = vmatpush3.msra.mxu1 %v12167_v1 }
0x16ad   :  { %7462 = vmatprep.subr.mxu1 %v13786_v31 }
0x16ae   :  { %7463 = vmatpush3.msra.mxu1 %v12176_v41 }
0x16af   :  { %7464 = vmatprep.subr.mxu1 %v13786_v31 }
0x16b0   :  { %7465 = vmatpush3.msra.mxu1 %v12185_v2 }
0x16b1   :  { %7466 = vmatprep.subr.mxu1 %v13786_v31 }
0x16b2   :  { %7467 = vmatpush3.msra.mxu1 %v12194_v57 }
0x16b3   :  { %7468 = vmatprep.subr.mxu1 %v13786_v31 }
0x16b4   :  { %7469 = vmatpush3.msra.mxu1 %v12203_v35 }
0x16b5   :  { %7470 = vmatprep.subr.mxu1 %v13786_v31 }
0x16b6   :  { %7471 = vmatpush3.msra.mxu1 %v12212_v60 }
0x16b7   :  { %7472 = vmatprep.subr.mxu1 %v13786_v31 }
0x16b8   :  { %7473 = vmatpush3.msra.mxu1 %v12221_v30 }
0x16b9   :  { %7474 = vmatprep.subr.mxu1 %v13786_v31 }
0x16ba   :  { %7475 = vmatpush3.msra.mxu1 %v12230_v4 }
0x16bb   :  { %7476 = vmatprep.subr.mxu1 %v13786_v31 }
0x16bc   :  { %7477 = vmatpush3.msra.mxu1 %v12239_v11 }
0x16bd   :  { %7478 = vmatprep.subr.mxu1 %v13786_v31 }
0x16be   :  { %7479 = vmatpush3.msra.mxu1 %v12248_v0 }
0x16bf   :  { %7480 = vmatprep.subr.mxu1 %v13786_v31 }
0x16c0   :  { %7481 = vmatpush3.msra.mxu1 %v12261_v5 }
0x1701   :  { %v6039_v24 = vpop.f32.mrf.mxu0  ;;  %v6110_v13 = vpop.f32.mrf.mxu1 }
0x1702   :  { %v6115_v16 = vadd.f32 %v6039_v24, %v13804_v52  ;;  %v6117_v33 = vadd.f32 %v6110_v13, %v13813_v28  ;;  %v13814_v52 = vld [vmem:[#allocation68_spill] sm:$0xff] }
0x1703   :  { %v6041_v51 = vpop.f32.mrf.mxu0  ;;  %v6112_v29 = vpop.f32.mrf.mxu1 }
0x1704   :  { %v6995_v10 = vmul.f32 -1.442695, %v6115_v16  ;;  %v6116_v12 = vadd.f32 %v6041_v51, %v13807_v25  ;;  %v6118_v63 = vadd.f32 %v6112_v29, %v13810_v58  ;;  %v6147_v29 = vsel %vm146_vm3, %v13801_v50, %v13802_v21 }
0x1705   :  { %v6535_v40 = vmax.f32 %v6147_v29, 0.0 }
0x1706   :  { %7733 = vpow2.f32 %v6995_v10  ;;  %v6996_v19 = vmul.f32 -1.442695, %v6116_v12  ;;  %v6997_v6 = vmul.f32 -1.442695, %v6118_v63  ;;  %v6145_v12 = vsel %vm146_vm3, %v13803_v20, %v12029_v61 }
0x1707   :  { %v6343_v13 = vmax.f32 %v6145_v12, 0.0 }
0x1708   :  { %7735 = vpow2.f32 %v6996_v19 }
0x1709   :  { %7737 = vtanh.f32 %v6117_v33 }
0x170a   :  { %7739 = vpow2.f32 %v6997_v6 }
0x1713   :  { %v7734_v17 = vpop.eup %7733 }
0x1714   :  { %v6122_v54 = vadd.f32 1.0, %v7734_v17 }
0x1715   :  { %v7736_v14 = vpop.eup %7735 }
0x1716   :  { %7741 = vrcp.f32 %v6122_v54  ;;  %v6128_v18 = vadd.f32 1.0, %v7736_v14  ;;  %v7738_v23 = vpop.eup %7737 }
0x1717   :  { %v7740_v42 = vpop.eup %7739 }
0x1718   :  { %7743 = vrcp.f32 %v6128_v18  ;;  %v6135_v49 = vadd.f32 1.0, %v7740_v42 }
0x171a   :  { %7745 = vrcp.f32 %v6135_v49 }
0x1721   :  { %v6337_v37 = vpop.f32.mrf.mxu1 }
0x1722   :  { %v6338_v26 = vadd.f32 %v12403_v56, %v6337_v37 }
0x1723   :  { %v7742_v22 = vpop.eup %7741  ;;  %v7274_v3 = vpop.f32.mrf.mxu1 }
0x1724   :  { %v6139_v48 = vmul.f32 %v7742_v22, %v7738_v23  ;;  %7000 = vst.msk [vmem:[%s12576_s11 + $0x2] sm:$0x3] %vm6245_vm7, %v6338_v26 }
0x1725   :  { %v7744_v43 = vpop.eup %7743 }
0x1726   :  { %v6138_v44 = vmul.f32 %v7744_v43, %v12116_v15 }
0x1727   :  { %v7746_v7 = vpop.eup %7745 }
0x1728   :  { %v6140_v55 = vadd.f32 %v6139_v48, %v6138_v44 }
0x172a   :  { %7747 = vtanh.f32 %v6140_v55 }
0x1737   :  { %v7748_v27 = vpop.eup %7747 }
0x1738   :  { %v6142_v24 = vmul.f32 %v7748_v27, %v7746_v7 }
0x173a   :  { %v6143_v16 = vsel %vm146_vm3, %v13814_v52, %v6142_v24  ;;  %v6150_v51 = vsel %vm146_vm3, %v6142_v24, %v13814_v52 }
0x173b   :  { %v6151_v10 = vmax.f32 %v6143_v16, 0.0  ;;  %v6823_v62 = vmax.f32 %v6150_v51, 0.0 }
0x173d   :  { %7238 = vmatmul.mubr.f32.vlgmr.msra.gmra.mxu0 %v6151_v10  ;;  %7483 = vmatmul.mubr.f32.vlgmr.msra.gmra.mxu1 %v6823_v62 }
0x173e   :  { %7276 = vmatpush3.msra.mxu0 %v12124_v47  ;;  %7307 = vmatprep.mubr.msk.f32.mxu0 %vm8100_vm0, %v13786_v31 }
0x173f   :  { %7277 = vmatprep.subr.mxu0 %v13786_v31 }
0x1740   :  { %7278 = vmatpush3.msra.mxu0 %v12131_v34 }
0x1741   :  { %7279 = vmatprep.subr.mxu0 %v13786_v31  ;;  %v6529_v15 = vpop.f32.mrf.mxu1 }
0x1742   :  { %v6530_v53 = vadd.f32 %v12403_v56, %v6529_v15  ;;  %7280 = vmatpush3.msra.mxu0 %v12140_v9 }
0x1743   :  { %7281 = vmatprep.subr.mxu0 %v13786_v31  ;;  %v7344_v25 = vpop.f32.mrf.mxu1 }
0x1744   :  { %7004 = vst.msk [vmem:[%s12576_s11 + $0x6] sm:$0x3] %vm6245_vm7, %v6530_v53  ;;  %7282 = vmatpush3.msra.mxu0 %v12149_v38 }
0x1745   :  { %7283 = vmatprep.subr.mxu0 %v13786_v31 }
0x1746   :  { %7284 = vmatpush3.msra.mxu0 %v12158_v32 }
0x1747   :  { %7285 = vmatprep.subr.mxu0 %v13786_v31 }
0x1748   :  { %7286 = vmatpush3.msra.mxu0 %v12167_v1 }
0x1749   :  { %7287 = vmatprep.subr.mxu0 %v13786_v31 }
0x174a   :  { %7288 = vmatpush3.msra.mxu0 %v12176_v41 }
0x174b   :  { %7289 = vmatprep.subr.mxu0 %v13786_v31 }
0x174c   :  { %7290 = vmatpush3.msra.mxu0 %v12185_v2 }
0x174d   :  { %7291 = vmatprep.subr.mxu0 %v13786_v31 }
0x174e   :  { %7292 = vmatpush3.msra.mxu0 %v12194_v57 }
0x174f   :  { %7293 = vmatprep.subr.mxu0 %v13786_v31 }
0x1750   :  { %7294 = vmatpush3.msra.mxu0 %v12203_v35 }
0x1751   :  { %7295 = vmatprep.subr.mxu0 %v13786_v31 }
0x1752   :  { %7296 = vmatpush3.msra.mxu0 %v12212_v60 }
0x1753   :  { %7297 = vmatprep.subr.mxu0 %v13786_v31 }
0x1754   :  { %7298 = vmatpush3.msra.mxu0 %v12221_v30 }
0x1755   :  { %7299 = vmatprep.subr.mxu0 %v13786_v31 }
0x1756   :  { %7300 = vmatpush3.msra.mxu0 %v12230_v4 }
0x1757   :  { %7301 = vmatprep.subr.mxu0 %v13786_v31 }
0x1758   :  { %7302 = vmatpush3.msra.mxu0 %v12239_v11 }
0x1759   :  { %7303 = vmatprep.subr.mxu0 %v13786_v31 }
0x175a   :  { %7304 = vmatpush3.msra.mxu0 %v12248_v0 }
0x175b   :  { %7305 = vmatprep.subr.mxu0 %v13786_v31 }
0x175c   :  { %7306 = vmatpush3.msra.mxu0 %v12261_v5 }
0x175d   :  { %7308 = vmatmul.mubr.f32.vlgmr.msra.gmra.mxu0 %v6343_v13  ;;  %7345 = vmatprep.subr.mxu0 %v13786_v31 }
0x175e   :  { %7346 = vmatpush3.msra.mxu0 %v12124_v47  ;;  %7377 = vmatprep.mubr.msk.f32.mxu0 %vm8100_vm0, %v13786_v31 }
0x175f   :  { %7347 = vmatprep.subr.mxu0 %v13786_v31 }
0x1760   :  { %7348 = vmatpush3.msra.mxu0 %v12131_v34 }
0x1761   :  { %7349 = vmatprep.subr.mxu0 %v13786_v31  ;;  %v6721_v61 = vpop.f32.mrf.mxu1 }
0x1762   :  { %v6722_v20 = vadd.f32 %v12403_v56, %v6721_v61  ;;  %7350 = vmatpush3.msra.mxu0 %v12140_v9 }
0x1763   :  { %7351 = vmatprep.subr.mxu0 %v13786_v31  ;;  %v7414_v19 = vpop.f32.mrf.mxu1 }
0x1764   :  { %7008 = vst.msk [vmem:[%s12576_s11 + $0xa] sm:$0x3] %vm6245_vm7, %v6722_v20  ;;  %7352 = vmatpush3.msra.mxu0 %v12149_v38 }
0x1765   :  { %7353 = vmatprep.subr.mxu0 %v13786_v31 }
0x1766   :  { %7354 = vmatpush3.msra.mxu0 %v12158_v32 }
0x1767   :  { %7355 = vmatprep.subr.mxu0 %v13786_v31 }
0x1768   :  { %7356 = vmatpush3.msra.mxu0 %v12167_v1 }
0x1769   :  { %7357 = vmatprep.subr.mxu0 %v13786_v31 }
0x176a   :  { %7358 = vmatpush3.msra.mxu0 %v12176_v41 }
0x176b   :  { %7359 = vmatprep.subr.mxu0 %v13786_v31 }
0x176c   :  { %7360 = vmatpush3.msra.mxu0 %v12185_v2 }
0x176d   :  { %7361 = vmatprep.subr.mxu0 %v13786_v31 }
0x176e   :  { %7362 = vmatpush3.msra.mxu0 %v12194_v57 }
0x176f   :  { %7363 = vmatprep.subr.mxu0 %v13786_v31 }
0x1770   :  { %7364 = vmatpush3.msra.mxu0 %v12203_v35 }
0x1771   :  { %7365 = vmatprep.subr.mxu0 %v13786_v31 }
0x1772   :  { %7366 = vmatpush3.msra.mxu0 %v12212_v60 }
0x1773   :  { %7367 = vmatprep.subr.mxu0 %v13786_v31 }
0x1774   :  { %7368 = vmatpush3.msra.mxu0 %v12221_v30 }
0x1775   :  { %7369 = vmatprep.subr.mxu0 %v13786_v31 }
0x1776   :  { %7370 = vmatpush3.msra.mxu0 %v12230_v4 }
0x1777   :  { %7371 = vmatprep.subr.mxu0 %v13786_v31 }
0x1778   :  { %7372 = vmatpush3.msra.mxu0 %v12239_v11 }
0x1779   :  { %7373 = vmatprep.subr.mxu0 %v13786_v31 }
0x177a   :  { %7374 = vmatpush3.msra.mxu0 %v12248_v0 }
0x177b   :  { %7375 = vmatprep.subr.mxu0 %v13786_v31 }
0x177c   :  { %7376 = vmatpush3.msra.mxu0 %v12261_v5 }
0x177d   :  { %7378 = vmatmul.mubr.f32.vlgmr.msra.gmra.mxu0 %v6535_v40  ;;  %7415 = vmatprep.subr.mxu0 %v13786_v31 }
0x177e   :  { %7416 = vmatpush3.msra.mxu0 %v12124_v47  ;;  %7447 = vmatprep.mubr.msk.f32.mxu0 %vm8100_vm0, %v13786_v31  ;;  %v6149_v47 = vsel %vm146_vm3, %v12119_v59, %v13799_v8 }
0x177f   :  { %7417 = vmatprep.subr.mxu0 %v13786_v31 }
0x1780   :  { %7418 = vmatpush3.msra.mxu0 %v12131_v34  ;;  %v6727_v34 = vmax.f32 %v6149_v47, 0.0 }
0x1781   :  { %7419 = vmatprep.subr.mxu0 %v13786_v31 }
0x1782   :  { %7420 = vmatpush3.msra.mxu0 %v12140_v9 }
0x1783   :  { %7421 = vmatprep.subr.mxu0 %v13786_v31 }
0x1784   :  { %7422 = vmatpush3.msra.mxu0 %v12149_v38 }
0x1785   :  { %7423 = vmatprep.subr.mxu0 %v13786_v31 }
0x1786   :  { %7424 = vmatpush3.msra.mxu0 %v12158_v32 }
0x1787   :  { %7425 = vmatprep.subr.mxu0 %v13786_v31 }
0x1788   :  { %7426 = vmatpush3.msra.mxu0 %v12167_v1 }
0x1789   :  { %7427 = vmatprep.subr.mxu0 %v13786_v31 }
0x178a   :  { %7428 = vmatpush3.msra.mxu0 %v12176_v41 }
0x178b   :  { %7429 = vmatprep.subr.mxu0 %v13786_v31 }
0x178c   :  { %7430 = vmatpush3.msra.mxu0 %v12185_v2 }
0x178d   :  { %7431 = vmatprep.subr.mxu0 %v13786_v31 }
0x178e   :  { %7432 = vmatpush3.msra.mxu0 %v12194_v57 }
0x178f   :  { %7433 = vmatprep.subr.mxu0 %v13786_v31 }
0x1790   :  { %7434 = vmatpush3.msra.mxu0 %v12203_v35 }
0x1791   :  { %7435 = vmatprep.subr.mxu0 %v13786_v31 }
0x1792   :  { %7436 = vmatpush3.msra.mxu0 %v12212_v60 }
0x1793   :  { %7437 = vmatprep.subr.mxu0 %v13786_v31 }
0x1794   :  { %7438 = vmatpush3.msra.mxu0 %v12221_v30 }
0x1795   :  { %7439 = vmatprep.subr.mxu0 %v13786_v31 }
0x1796   :  { %7440 = vmatpush3.msra.mxu0 %v12230_v4 }
0x1797   :  { %7441 = vmatprep.subr.mxu0 %v13786_v31 }
0x1798   :  { %7442 = vmatpush3.msra.mxu0 %v12239_v11 }
0x1799   :  { %7443 = vmatprep.subr.mxu0 %v13786_v31 }
0x179a   :  { %7444 = vmatpush3.msra.mxu0 %v12248_v0 }
0x179b   :  { %7445 = vmatprep.subr.mxu0 %v13786_v31 }
0x179c   :  { %7446 = vmatpush3.msra.mxu0 %v12261_v5 }
0x179d   :  { %7448 = vmatmul.mubr.f32.vlgmr.msra.gmra.mxu0 %v6727_v34 }
0x17fd   :  { %v6241_v9 = vpop.f32.mrf.mxu0  ;;  %v6913_v38 = vpop.f32.mrf.mxu1 }
0x17fe   :  { %v6242_v32 = vadd.f32 %v12403_v56, %v6241_v9  ;;  %v6914_v1 = vadd.f32 %v12403_v56, %v6913_v38 }
0x17ff   :  { %v7239_v41 = vpop.f32.mrf.mxu0  ;;  %v7484_v2 = vpop.f32.mrf.mxu1 }
0x1800   :  { %6246 = vst.msk [vmem:[%s12576_s11] sm:$0x3] %vm6245_vm7, %v6242_v32  ;;  %7012 = vst.msk [vmem:[%s12576_s11 + $0xe] sm:$0x3] %vm6245_vm7, %v6914_v1 }
0x181d   :  { %v6433_v31 = vpop.f32.mrf.mxu0 }
0x181e   :  { %v6434_v59 = vadd.f32 %v12403_v56, %v6433_v31 }
0x181f   :  { %v7309_v57 = vpop.f32.mrf.mxu0 }
0x1820   :  { %7002 = vst.msk [vmem:[%s12576_s11 + $0x4] sm:$0x3] %vm6245_vm7, %v6434_v59 }
0x183d   :  { %v6625_v35 = vpop.f32.mrf.mxu0 }
0x183e   :  { %v6626_v60 = vadd.f32 %v12403_v56, %v6625_v35 }
0x183f   :  { %v7379_v30 = vpop.f32.mrf.mxu0 }
0x1840   :  { %7006 = vst.msk [vmem:[%s12576_s11 + $0x8] sm:$0x3] %vm6245_vm7, %v6626_v60 }
0x185d   :  { %v6817_v4 = vpop.f32.mrf.mxu0 }
0x185e   :  { %v6818_v11 = vadd.f32 %v12403_v56, %v6817_v4 }
0x185f   :  { %v7449_v0 = vpop.f32.mrf.mxu0 }
0x1860   :  { %7010 = vst.msk [vmem:[%s12576_s11 + $0xc] sm:$0x3] %vm6245_vm7, %v6818_v11 }
0x1861   :  { %6923 = vsyncpa [#allocation3], 1 }
0x1862   :  { %6924 = vsyncpa [#allocation5], 1 }
0x1863   :  { %6925 = vsyncpa [#allocation8], 1 }

</bundles_post_ra>
